<compile_context>
chip_gen: v5e
topology: v5e:2x2
jax: 0.10.0
libtpu: 0.0.40
codegen_flags: <defaults>
</compile_context>

<pallas_src>
import functools
import math

import jax
import jax.numpy as jnp
from jax.experimental import pallas as pl
from jax.experimental.pallas import tpu as pltpu


def _zero_3x3_borders(cols_ref, H, W, C):
    """Write the constant zero-padding strips of an im2col buffer.

    cols[h, w, t*C:(t+1)*C] holds src[h+kh-1, w+kw-1, :]; positions that fall
    outside the image are zero.  These strips depend only on (kh, kw), never on
    the image, and the valid-window scatter never overwrites them, so they are
    written once (first grid step) and reused for every image.
    """
    zrow = jnp.zeros((1, W, C), cols_ref.dtype)
    zcol = jnp.zeros((H, 1, C), cols_ref.dtype)
    for kh in range(3):
        for kw in range(3):
            dh, dw = kh - 1, kw - 1
            t = kh * 3 + kw
            cs = slice(t * C, (t + 1) * C)
            if dh == -1:
                cols_ref[0:1, :, cs] = zrow
            if dh == 1:
                cols_ref[H - 1:H, :, cs] = zrow
            if dw == -1:
                cols_ref[:, 0:1, cs] = zcol
            if dw == 1:
                cols_ref[:, W - 1:W, cs] = zcol


def _scatter_3x3_valid(src, cols_ref, H, W, C):
    """im2col scatter of the in-image (valid) shifted windows.

    cols[h, w, t*C:(t+1)*C] = src[h+kh-1, w+kw-1, :] for in-bounds positions.
    All slice bounds are static Python ints -> plain (masked) vector stores.
    `src` should already be in the scratch dtype (cast once by the caller).
    """
    for kh in range(3):
        for kw in range(3):
            dh, dw = kh - 1, kw - 1
            t = kh * 3 + kw
            cs = slice(t * C, (t + 1) * C)
            h0, h1 = max(0, -dh), H - max(0, dh)
            w0, w1 = max(0, -dw), W - max(0, dw)
            cols_ref[h0:h1, w0:w1, cs] = src[h0 + dh:h1 + dh, w0 + dw:w1 + dw, :]


def _basic_block_kernel(*refs, H, W, Cin, Cout, shortcut_mode, compute_dtype):
    """Fused: out = relu(conv2(relu(conv1(x)))) + shortcut(x), one image/step."""
    if shortcut_mode == "separate":
        x_ref, w1_ref, w2_ref, wsc_ref, o_ref, xcols_ref, hcols_ref = refs
    else:
        x_ref, w1_ref, w2_ref, o_ref, xcols_ref, hcols_ref = refs
        wsc_ref = None

    # One-time write of the constant zero borders (scratch persists over grid).
    @pl.when(pl.program_id(0) == 0)
    def _():
        _zero_3x3_borders(xcols_ref, H, W, Cin)
        _zero_3x3_borders(hcols_ref, H, W, Cout)

    x = x_ref[0]                                       # (H, W, Cin), f32

    # ---- conv1 / shortcut im2col: cast ONCE, scatter into bf16 scratch ----
    _scatter_3x3_valid(x.astype(compute_dtype), xcols_ref, H, W, Cin)
    xcols = xcols_ref[...].reshape(H * W, 9 * Cin)     # (H*W, 9*Cin) bf16

    # ---- conv1 (and, if fused, the shortcut conv); f32 accumulation on MXU ----
    y = jnp.dot(xcols, w1_ref[...], preferred_element_type=jnp.float32)
    if shortcut_mode == "fused":                       # y = [conv1 | shortcut]
        h_pre, sc = y[:, :Cout], y[:, Cout:]
    else:
        h_pre = y
        if shortcut_mode == "separate":
            # Issued right after conv1: shares xcols, ends its live range
            # before the hcols buffer is materialized.
            sc = jnp.dot(xcols, wsc_ref[...], preferred_element_type=jnp.float32)
        else:                                          # identity (Cin == Cout)
            sc = x.reshape(H * W, Cout).astype(jnp.float32)
    h = jnp.maximum(h_pre, 0.0)                        # (H*W, Cout), f32

    # ---- conv2 im2col on the in-VMEM intermediate (never touches HBM) ----
    _scatter_3x3_valid(h.astype(compute_dtype).reshape(H, W, Cout),
                       hcols_ref, H, W, Cout)
    hcols = hcols_ref[...].reshape(H * W, 9 * Cout)

    # ---- conv2 -> relu -> + shortcut (relu BEFORE the residual add) ----
    out = jnp.dot(hcols, w2_ref[...], preferred_element_type=jnp.float32)
    out = jnp.maximum(out, 0.0) + sc

    o_ref[...] = out.reshape(1, H, W, Cout).astype(o_ref.dtype)


def basic_block_nhwc(x_nhwc, w1_hwio, w2_hwio, wsc_hwio=None, *,
                     compute_dtype=jnp.bfloat16):
    """Fused BasicBlock forward in NHWC. Weights are HWIO (3, 3, cin, cout)."""
    N, H, W, Cin = x_nhwc.shape
    Cout = w1_hwio.shape[-1]
    has_sc = wsc_hwio is not None
    if not has_sc and Cin != Cout:
        raise ValueError("identity shortcut requires in_ch == out_ch")
    # NOTE: in-kernel reshapes merge H into the sublane dim; they are layout-
    # free when W is a multiple of the sublane packing (8 for f32, 16 for bf16).
    # Other W still computes correctly but may relayout in VMEM.

    # Fold the 3x3 taps into the contraction dim: (3,3,ci,co) -> (9*ci, co).
    w2 = w2_hwio.reshape(9 * Cout, Cout).astype(compute_dtype)
    if has_sc and Cout < 128:
        # Fuse conv1 + shortcut into one MXU matmul: N = 2*Cout output lanes.
        shortcut_mode = "fused"
        n1 = 2 * Cout
        w1 = jnp.concatenate([w1_hwio, wsc_hwio], axis=-1).reshape(
            9 * Cin, n1).astype(compute_dtype)
        args = [x_nhwc, w1, w2]
    elif has_sc:
        shortcut_mode = "separate"
        n1 = Cout
        w1 = w1_hwio.reshape(9 * Cin, Cout).astype(compute_dtype)
        args = [x_nhwc, w1, w2,
                wsc_hwio.reshape(9 * Cin, Cout).astype(compute_dtype)]
    else:
        shortcut_mode = "identity"
        n1 = Cout
        w1 = w1_hwio.reshape(9 * Cin, Cout).astype(compute_dtype)
        args = [x_nhwc, w1, w2]

    in_specs = [
        pl.BlockSpec((1, H, W, Cin), lambda n: (n, 0, 0, 0)),
        pl.BlockSpec((9 * Cin, n1), lambda n: (0, 0)),
        pl.BlockSpec((9 * Cout, Cout), lambda n: (0, 0)),
    ]
    if shortcut_mode == "separate":
        in_specs.append(pl.BlockSpec((9 * Cin, Cout), lambda n: (0, 0)))

    kernel = functools.partial(
        _basic_block_kernel, H=H, W=W, Cin=Cin, Cout=Cout,
        shortcut_mode=shortcut_mode, compute_dtype=compute_dtype)

    # Per-step VMEM budget: double-buffered in/out blocks (f32) + double-
    # buffered weights (bf16) + the two bf16 im2col scratch buffers (plus their
    # vreg read copies) + f32 temporaries.  2x headroom, capped at 48 MiB so it
    # stays comfortably inside v7x's 64 MiB physical VMEM per TensorCore.
    bc = jnp.dtype(compute_dtype).itemsize
    w_bytes = bc * (9 * Cin * n1 + 9 * Cout * Cout
                    + (9 * Cin * Cout if shortcut_mode == "separate" else 0))
    est = (4 * 2 * H * W * (Cin + Cout)            # in/out blocks, double-buffered
           + 2 * w_bytes                           # weights, double-buffered
           + 2 * bc * 9 * H * W * (Cin + Cout)     # im2col scratch + read copies
           + 4 * 6 * H * W * max(Cin, 2 * Cout))   # f32 temporaries
    vmem_limit = int(min(max(2 * est, 16 * 2**20), 48 * 2**20))

    return pl.pallas_call(
        kernel,
        out_shape=jax.ShapeDtypeStruct((N, H, W, Cout), x_nhwc.dtype),
        grid=(N,),
        in_specs=in_specs,
        out_specs=pl.BlockSpec((1, H, W, Cout), lambda n: (n, 0, 0, 0)),
        scratch_shapes=[
            pltpu.VMEM((H, W, 9 * Cin), compute_dtype),   # conv1/shortcut im2col
            pltpu.VMEM((H, W, 9 * Cout), compute_dtype),  # conv2 im2col
        ],
        compiler_params=pltpu.CompilerParams(
            # "arbitrary": the one-time border zeroing at program_id==0 relies
            # on per-core scratch persistence; a megacore "parallel" split of
            # the batch axis would leave the other core's borders uninitialized.
            dimension_semantics=("arbitrary",),
            vmem_limit_bytes=vmem_limit,
        ),
    )(*args)


class BasicBlockPallas:
    """JAX/Pallas port of the PyTorch BasicBlock (stride=1)."""

    def __init__(self, in_ch, out_ch, stride=1, *, key, compute_dtype=jnp.bfloat16):
        assert stride == 1, "only stride=1 supported (module default)"
        k1, k2, k3 = jax.random.split(key, 3)

        def init_w(k, cin, cout):
            # Kaiming-uniform-like init, stored as HWIO = (3, 3, cin, cout).
            bound = 1.0 / math.sqrt(cin * 9)
            return jax.random.uniform(k, (3, 3, cin, cout), jnp.float32,
                                      -bound, bound)

        self.w1 = init_w(k1, in_ch, out_ch)
        self.w2 = init_w(k2, out_ch, out_ch)
        self.w_sc = init_w(k3, in_ch, out_ch) if in_ch != out_ch else None
        self.compute_dtype = compute_dtype

    def __call__(self, x_nchw):
        # NOTE: if the surrounding model can stay NHWC, drop these transposes
        # and call basic_block_nhwc directly -- each transpose is a full HBM
        # round-trip of the activation (they exist only for NCHW parity with
        # the PyTorch module interface).
        x = jnp.transpose(x_nchw, (0, 2, 3, 1))               # NCHW -> NHWC
        out = basic_block_nhwc(x, self.w1, self.w2, self.w_sc,
                               compute_dtype=self.compute_dtype)
        return jnp.transpose(out, (0, 3, 1, 2))               # NHWC -> NCHW


def _reference_block(x_nchw, w1_hwio, w2_hwio, wsc_hwio):
    """Pure-JAX f32 reference of the PyTorch forward (for validation)."""
    x = jnp.transpose(x_nchw, (0, 2, 3, 1))

    def conv(a, w):
        return jax.lax.conv_general_dilated(
            a, w, window_strides=(1, 1), padding=((1, 1), (1, 1)),
            dimension_numbers=("NHWC", "HWIO", "NHWC"))

    h = jax.nn.relu(conv(x, w1_hwio))
    out = jax.nn.relu(conv(h, w2_hwio))
    out = out + (conv(x, wsc_hwio) if wsc_hwio is not None else x)
    return jnp.transpose(out, (0, 3, 1, 2))


if __name__ == "__main__":
    key = jax.random.PRNGKey(0)
    k_x, k_p, k_p2 = jax.random.split(key, 3)

    N, C_IN, C_OUT, H, W = 2, 4, 8, 16, 16
    x = jax.random.normal(k_x, (N, C_IN, H, W), jnp.float32)

    # Case 1: in_ch != out_ch -> 3x3 conv shortcut (fused [w1 | wsc] matmul).
    block = BasicBlockPallas(C_IN, C_OUT, stride=1, key=k_p)
    y = jax.block_until_ready(block(x))
    assert y.shape == (N, C_OUT, H, W)
    y_ref = _reference_block(x, block.w1, block.w2, block.w_sc)
    assert float(jnp.max(jnp.abs(y - y_ref))) < 1e-1, "mismatch (conv shortcut)"

    # Case 2: in_ch == out_ch -> identity shortcut.
    block2 = BasicBlockPallas(C_IN, C_IN, stride=1, key=k_p2)
    y2 = jax.block_until_ready(block2(x))
    assert y2.shape == (N, C_IN, H, W)
    y2_ref = _reference_block(x, block2.w1, block2.w2, block2.w_sc)
    assert float(jnp.max(jnp.abs(y2 - y2_ref))) < 1e-1, "mismatch (identity shortcut)"

    print("KERNEL_OK")
</pallas_src>

<mosaic_0001>
module attributes {stable_mosaic.version = 11 : i64} {
  func.func @_basic_block_kernel(%arg0: i32, %arg1: memref<1x16x16x4xf32, #tpu.memory_space<vmem>>, %arg2: memref<36x16xbf16, #tpu.memory_space<vmem>>, %arg3: memref<72x8xbf16, #tpu.memory_space<vmem>>, %arg4: memref<1x16x16x8xf32, #tpu.memory_space<vmem>>, %arg5: memref<16x16x36xbf16, #tpu.memory_space<vmem>>, %arg6: memref<16x16x72xbf16, #tpu.memory_space<vmem>>) attributes {dimension_semantics = [#tpu.dimension_semantics<arbitrary>], iteration_bounds = array<i64: 2>, scalar_prefetch = 0 : i64, scratch_operands = 2 : i64, tpu.core_type = #tpu.core_type<tc>, window_params = [{transform_indices = @transform_0, window_bounds = array<i64: 1, 16, 16, 4>}, {pipeline_mode = #tpu.pipeline_mode<synchronous>, transform_indices = @transform_1, window_bounds = array<i64: 36, 16>}, {pipeline_mode = #tpu.pipeline_mode<synchronous>, transform_indices = @transform_2, window_bounds = array<i64: 72, 8>}, {transform_indices = @transform_3, window_bounds = array<i64: 1, 16, 16, 8>}]} {
    %c0_i32 = arith.constant 0 : i32
    %0 = arith.cmpi eq, %arg0, %c0_i32 : i32
    %1 = arith.extui %0 : i1 to i32
    %c0_i32_0 = arith.constant 0 : i32
    %2 = arith.cmpi ne, %1, %c0_i32_0 : i32
    scf.if %2 {
      %cst_62 = arith.constant 0.000000e+00 : bf16
      %59 = vector.broadcast %cst_62 : bf16 to vector<1x16x4xbf16>
      %cst_63 = arith.constant 0.000000e+00 : bf16
      %60 = vector.broadcast %cst_63 : bf16 to vector<16x1x4xbf16>
      %c0_64 = arith.constant 0 : index
      %c0_65 = arith.constant 0 : index
      %c0_66 = arith.constant 0 : index
      %61 = vector.load %arg5[%c0_64, %c0_65, %c0_66] : memref<16x16x36xbf16, #tpu.memory_space<vmem>>, vector<1x16x4xbf16>
      tpu.vector_store %arg5[%c0_64, %c0_65, %c0_66], %59 {strides = array<i32>} : memref<16x16x36xbf16, #tpu.memory_space<vmem>>, vector<1x16x4xbf16>,
      %c0_67 = arith.constant 0 : index
      %c0_68 = arith.constant 0 : index
      %c0_69 = arith.constant 0 : index
      %62 = vector.load %arg5[%c0_67, %c0_68, %c0_69] : memref<16x16x36xbf16, #tpu.memory_space<vmem>>, vector<16x1x4xbf16>
      tpu.vector_store %arg5[%c0_67, %c0_68, %c0_69], %60 {strides = array<i32>} : memref<16x16x36xbf16, #tpu.memory_space<vmem>>, vector<16x1x4xbf16>,
      %c0_70 = arith.constant 0 : index
      %c0_71 = arith.constant 0 : index
      %c4_72 = arith.constant 4 : index
      %63 = vector.load %arg5[%c0_70, %c0_71, %c4_72] : memref<16x16x36xbf16, #tpu.memory_space<vmem>>, vector<1x16x4xbf16>
      tpu.vector_store %arg5[%c0_70, %c0_71, %c4_72], %59 {strides = array<i32>} : memref<16x16x36xbf16, #tpu.memory_space<vmem>>, vector<1x16x4xbf16>,
      %c0_73 = arith.constant 0 : index
      %c0_74 = arith.constant 0 : index
      %c8_75 = arith.constant 8 : index
      %64 = vector.load %arg5[%c0_73, %c0_74, %c8_75] : memref<16x16x36xbf16, #tpu.memory_space<vmem>>, vector<1x16x4xbf16>
      tpu.vector_store %arg5[%c0_73, %c0_74, %c8_75], %59 {strides = array<i32>} : memref<16x16x36xbf16, #tpu.memory_space<vmem>>, vector<1x16x4xbf16>,
      %c0_76 = arith.constant 0 : index
      %c15 = arith.constant 15 : index
      %c8_77 = arith.constant 8 : index
      %65 = vector.load %arg5[%c0_76, %c15, %c8_77] : memref<16x16x36xbf16, #tpu.memory_space<vmem>>, vector<16x1x4xbf16>
      tpu.vector_store %arg5[%c0_76, %c15, %c8_77], %60 {strides = array<i32>} : memref<16x16x36xbf16, #tpu.memory_space<vmem>>, vector<16x1x4xbf16>,
      %c0_78 = arith.constant 0 : index
      %c0_79 = arith.constant 0 : index
      %c12_80 = arith.constant 12 : index
      %66 = vector.load %arg5[%c0_78, %c0_79, %c12_80] : memref<16x16x36xbf16, #tpu.memory_space<vmem>>, vector<16x1x4xbf16>
      tpu.vector_store %arg5[%c0_78, %c0_79, %c12_80], %60 {strides = array<i32>} : memref<16x16x36xbf16, #tpu.memory_space<vmem>>, vector<16x1x4xbf16>,
      %c0_81 = arith.constant 0 : index
      %c15_82 = arith.constant 15 : index
      %c20_83 = arith.constant 20 : index
      %67 = vector.load %arg5[%c0_81, %c15_82, %c20_83] : memref<16x16x36xbf16, #tpu.memory_space<vmem>>, vector<16x1x4xbf16>
      tpu.vector_store %arg5[%c0_81, %c15_82, %c20_83], %60 {strides = array<i32>} : memref<16x16x36xbf16, #tpu.memory_space<vmem>>, vector<16x1x4xbf16>,
      %c15_84 = arith.constant 15 : index
      %c0_85 = arith.constant 0 : index
      %c24_86 = arith.constant 24 : index
      %68 = vector.load %arg5[%c15_84, %c0_85, %c24_86] : memref<16x16x36xbf16, #tpu.memory_space<vmem>>, vector<1x16x4xbf16>
      tpu.vector_store %arg5[%c15_84, %c0_85, %c24_86], %59 {strides = array<i32>} : memref<16x16x36xbf16, #tpu.memory_space<vmem>>, vector<1x16x4xbf16>,
      %c0_87 = arith.constant 0 : index
      %c0_88 = arith.constant 0 : index
      %c24_89 = arith.constant 24 : index
      %69 = vector.load %arg5[%c0_87, %c0_88, %c24_89] : memref<16x16x36xbf16, #tpu.memory_space<vmem>>, vector<16x1x4xbf16>
      tpu.vector_store %arg5[%c0_87, %c0_88, %c24_89], %60 {strides = array<i32>} : memref<16x16x36xbf16, #tpu.memory_space<vmem>>, vector<16x1x4xbf16>,
      %c15_90 = arith.constant 15 : index
      %c0_91 = arith.constant 0 : index
      %c28_92 = arith.constant 28 : index
      %70 = vector.load %arg5[%c15_90, %c0_91, %c28_92] : memref<16x16x36xbf16, #tpu.memory_space<vmem>>, vector<1x16x4xbf16>
      tpu.vector_store %arg5[%c15_90, %c0_91, %c28_92], %59 {strides = array<i32>} : memref<16x16x36xbf16, #tpu.memory_space<vmem>>, vector<1x16x4xbf16>,
      %c15_93 = arith.constant 15 : index
      %c0_94 = arith.constant 0 : index
      %c32_95 = arith.constant 32 : index
      %71 = vector.load %arg5[%c15_93, %c0_94, %c32_95] : memref<16x16x36xbf16, #tpu.memory_space<vmem>>, vector<1x16x4xbf16>
      tpu.vector_store %arg5[%c15_93, %c0_94, %c32_95], %59 {strides = array<i32>} : memref<16x16x36xbf16, #tpu.memory_space<vmem>>, vector<1x16x4xbf16>,
      %c0_96 = arith.constant 0 : index
      %c15_97 = arith.constant 15 : index
      %c32_98 = arith.constant 32 : index
      %72 = vector.load %arg5[%c0_96, %c15_97, %c32_98] : memref<16x16x36xbf16, #tpu.memory_space<vmem>>, vector<16x1x4xbf16>
      tpu.vector_store %arg5[%c0_96, %c15_97, %c32_98], %60 {strides = array<i32>} : memref<16x16x36xbf16, #tpu.memory_space<vmem>>, vector<16x1x4xbf16>,
      %cst_99 = arith.constant 0.000000e+00 : bf16
      %73 = vector.broadcast %cst_99 : bf16 to vector<1x16x8xbf16>
      %cst_100 = arith.constant 0.000000e+00 : bf16
      %74 = vector.broadcast %cst_100 : bf16 to vector<16x1x8xbf16>
      %c0_101 = arith.constant 0 : index
      %c0_102 = arith.constant 0 : index
      %c0_103 = arith.constant 0 : index
      %75 = vector.load %arg6[%c0_101, %c0_102, %c0_103] : memref<16x16x72xbf16, #tpu.memory_space<vmem>>, vector<1x16x8xbf16>
      tpu.vector_store %arg6[%c0_101, %c0_102, %c0_103], %73 {strides = array<i32>} : memref<16x16x72xbf16, #tpu.memory_space<vmem>>, vector<1x16x8xbf16>,
      %c0_104 = arith.constant 0 : index
      %c0_105 = arith.constant 0 : index
      %c0_106 = arith.constant 0 : index
      %76 = vector.load %arg6[%c0_104, %c0_105, %c0_106] : memref<16x16x72xbf16, #tpu.memory_space<vmem>>, vector<16x1x8xbf16>
      tpu.vector_store %arg6[%c0_104, %c0_105, %c0_106], %74 {strides = array<i32>} : memref<16x16x72xbf16, #tpu.memory_space<vmem>>, vector<16x1x8xbf16>,
      %c0_107 = arith.constant 0 : index
      %c0_108 = arith.constant 0 : index
      %c8_109 = arith.constant 8 : index
      %77 = vector.load %arg6[%c0_107, %c0_108, %c8_109] : memref<16x16x72xbf16, #tpu.memory_space<vmem>>, vector<1x16x8xbf16>
      tpu.vector_store %arg6[%c0_107, %c0_108, %c8_109], %73 {strides = array<i32>} : memref<16x16x72xbf16, #tpu.memory_space<vmem>>, vector<1x16x8xbf16>,
      %c0_110 = arith.constant 0 : index
      %c0_111 = arith.constant 0 : index
      %c16_112 = arith.constant 16 : index
      %78 = vector.load %arg6[%c0_110, %c0_111, %c16_112] : memref<16x16x72xbf16, #tpu.memory_space<vmem>>, vector<1x16x8xbf16>
      tpu.vector_store %arg6[%c0_110, %c0_111, %c16_112], %73 {strides = array<i32>} : memref<16x16x72xbf16, #tpu.memory_space<vmem>>, vector<1x16x8xbf16>,
      %c0_113 = arith.constant 0 : index
      %c15_114 = arith.constant 15 : index
      %c16_115 = arith.constant 16 : index
      %79 = vector.load %arg6[%c0_113, %c15_114, %c16_115] : memref<16x16x72xbf16, #tpu.memory_space<vmem>>, vector<16x1x8xbf16>
      tpu.vector_store %arg6[%c0_113, %c15_114, %c16_115], %74 {strides = array<i32>} : memref<16x16x72xbf16, #tpu.memory_space<vmem>>, vector<16x1x8xbf16>,
      %c0_116 = arith.constant 0 : index
      %c0_117 = arith.constant 0 : index
      %c24_118 = arith.constant 24 : index
      %80 = vector.load %arg6[%c0_116, %c0_117, %c24_118] : memref<16x16x72xbf16, #tpu.memory_space<vmem>>, vector<16x1x8xbf16>
      tpu.vector_store %arg6[%c0_116, %c0_117, %c24_118], %74 {strides = array<i32>} : memref<16x16x72xbf16, #tpu.memory_space<vmem>>, vector<16x1x8xbf16>,
      %c0_119 = arith.constant 0 : index
      %c15_120 = arith.constant 15 : index
      %c40_121 = arith.constant 40 : index
      %81 = vector.load %arg6[%c0_119, %c15_120, %c40_121] : memref<16x16x72xbf16, #tpu.memory_space<vmem>>, vector<16x1x8xbf16>
      tpu.vector_store %arg6[%c0_119, %c15_120, %c40_121], %74 {strides = array<i32>} : memref<16x16x72xbf16, #tpu.memory_space<vmem>>, vector<16x1x8xbf16>,
      %c15_122 = arith.constant 15 : index
      %c0_123 = arith.constant 0 : index
      %c48_124 = arith.constant 48 : index
      %82 = vector.load %arg6[%c15_122, %c0_123, %c48_124] : memref<16x16x72xbf16, #tpu.memory_space<vmem>>, vector<1x16x8xbf16>
      tpu.vector_store %arg6[%c15_122, %c0_123, %c48_124], %73 {strides = array<i32>} : memref<16x16x72xbf16, #tpu.memory_space<vmem>>, vector<1x16x8xbf16>,
      %c0_125 = arith.constant 0 : index
      %c0_126 = arith.constant 0 : index
      %c48_127 = arith.constant 48 : index
      %83 = vector.load %arg6[%c0_125, %c0_126, %c48_127] : memref<16x16x72xbf16, #tpu.memory_space<vmem>>, vector<16x1x8xbf16>
      tpu.vector_store %arg6[%c0_125, %c0_126, %c48_127], %74 {strides = array<i32>} : memref<16x16x72xbf16, #tpu.memory_space<vmem>>, vector<16x1x8xbf16>,
      %c15_128 = arith.constant 15 : index
      %c0_129 = arith.constant 0 : index
      %c56_130 = arith.constant 56 : index
      %84 = vector.load %arg6[%c15_128, %c0_129, %c56_130] : memref<16x16x72xbf16, #tpu.memory_space<vmem>>, vector<1x16x8xbf16>
      tpu.vector_store %arg6[%c15_128, %c0_129, %c56_130], %73 {strides = array<i32>} : memref<16x16x72xbf16, #tpu.memory_space<vmem>>, vector<1x16x8xbf16>,
      %c15_131 = arith.constant 15 : index
      %c0_132 = arith.constant 0 : index
      %c64_133 = arith.constant 64 : index
      %85 = vector.load %arg6[%c15_131, %c0_132, %c64_133] : memref<16x16x72xbf16, #tpu.memory_space<vmem>>, vector<1x16x8xbf16>
      tpu.vector_store %arg6[%c15_131, %c0_132, %c64_133], %73 {strides = array<i32>} : memref<16x16x72xbf16, #tpu.memory_space<vmem>>, vector<1x16x8xbf16>,
      %c0_134 = arith.constant 0 : index
      %c15_135 = arith.constant 15 : index
      %c64_136 = arith.constant 64 : index
      %86 = vector.load %arg6[%c0_134, %c15_135, %c64_136] : memref<16x16x72xbf16, #tpu.memory_space<vmem>>, vector<16x1x8xbf16>
      tpu.vector_store %arg6[%c0_134, %c15_135, %c64_136], %74 {strides = array<i32>} : memref<16x16x72xbf16, #tpu.memory_space<vmem>>, vector<16x1x8xbf16>,
    } else {
    }
    %c0 = arith.constant 0 : index
    %c0_1 = arith.constant 0 : index
    %c0_2 = arith.constant 0 : index
    %c0_3 = arith.constant 0 : index
    %3 = vector.load %arg1[%c0, %c0_1, %c0_2, %c0_3] : memref<1x16x16x4xf32, #tpu.memory_space<vmem>>, vector<1x16x16x4xf32>
    %4 = vector.shape_cast %3 : vector<1x16x16x4xf32> to vector<16x16x4xf32>
    %5 = arith.truncf %4 : vector<16x16x4xf32> to vector<16x16x4xbf16>
    %6 = vector.extract_strided_slice %5 {offsets = [0, 0, 0], sizes = [15, 15, 4], strides = [1, 1, 1]} : vector<16x16x4xbf16> to vector<15x15x4xbf16>
    %c1 = arith.constant 1 : index
    %c1_4 = arith.constant 1 : index
    %c0_5 = arith.constant 0 : index
    %7 = vector.load %arg5[%c1, %c1_4, %c0_5] : memref<16x16x36xbf16, #tpu.memory_space<vmem>>, vector<15x15x4xbf16>
    tpu.vector_store %arg5[%c1, %c1_4, %c0_5], %6 {strides = array<i32>} : memref<16x16x36xbf16, #tpu.memory_space<vmem>>, vector<15x15x4xbf16>,
    %8 = vector.extract_strided_slice %5 {offsets = [0, 0, 0], sizes = [15, 16, 4], strides = [1, 1, 1]} : vector<16x16x4xbf16> to vector<15x16x4xbf16>
    %c1_6 = arith.constant 1 : index
    %c0_7 = arith.constant 0 : index
    %c4 = arith.constant 4 : index
    %9 = vector.load %arg5[%c1_6, %c0_7, %c4] : memref<16x16x36xbf16, #tpu.memory_space<vmem>>, vector<15x16x4xbf16>
    tpu.vector_store %arg5[%c1_6, %c0_7, %c4], %8 {strides = array<i32>} : memref<16x16x36xbf16, #tpu.memory_space<vmem>>, vector<15x16x4xbf16>,
    %10 = vector.extract_strided_slice %5 {offsets = [0, 1, 0], sizes = [15, 15, 4], strides = [1, 1, 1]} : vector<16x16x4xbf16> to vector<15x15x4xbf16>
    %c1_8 = arith.constant 1 : index
    %c0_9 = arith.constant 0 : index
    %c8 = arith.constant 8 : index
    %11 = vector.load %arg5[%c1_8, %c0_9, %c8] : memref<16x16x36xbf16, #tpu.memory_space<vmem>>, vector<15x15x4xbf16>
    tpu.vector_store %arg5[%c1_8, %c0_9, %c8], %10 {strides = array<i32>} : memref<16x16x36xbf16, #tpu.memory_space<vmem>>, vector<15x15x4xbf16>,
    %12 = vector.extract_strided_slice %5 {offsets = [0, 0, 0], sizes = [16, 15, 4], strides = [1, 1, 1]} : vector<16x16x4xbf16> to vector<16x15x4xbf16>
    %c0_10 = arith.constant 0 : index
    %c1_11 = arith.constant 1 : index
    %c12 = arith.constant 12 : index
    %13 = vector.load %arg5[%c0_10, %c1_11, %c12] : memref<16x16x36xbf16, #tpu.memory_space<vmem>>, vector<16x15x4xbf16>
    tpu.vector_store %arg5[%c0_10, %c1_11, %c12], %12 {strides = array<i32>} : memref<16x16x36xbf16, #tpu.memory_space<vmem>>, vector<16x15x4xbf16>,
    %c0_12 = arith.constant 0 : index
    %c0_13 = arith.constant 0 : index
    %c16 = arith.constant 16 : index
    %14 = vector.load %arg5[%c0_12, %c0_13, %c16] : memref<16x16x36xbf16, #tpu.memory_space<vmem>>, vector<16x16x4xbf16>
    tpu.vector_store %arg5[%c0_12, %c0_13, %c16], %5 {strides = array<i32>} : memref<16x16x36xbf16, #tpu.memory_space<vmem>>, vector<16x16x4xbf16>,
    %15 = vector.extract_strided_slice %5 {offsets = [0, 1, 0], sizes = [16, 15, 4], strides = [1, 1, 1]} : vector<16x16x4xbf16> to vector<16x15x4xbf16>
    %c0_14 = arith.constant 0 : index
    %c0_15 = arith.constant 0 : index
    %c20 = arith.constant 20 : index
    %16 = vector.load %arg5[%c0_14, %c0_15, %c20] : memref<16x16x36xbf16, #tpu.memory_space<vmem>>, vector<16x15x4xbf16>
    tpu.vector_store %arg5[%c0_14, %c0_15, %c20], %15 {strides = array<i32>} : memref<16x16x36xbf16, #tpu.memory_space<vmem>>, vector<16x15x4xbf16>,
    %17 = vector.extract_strided_slice %5 {offsets = [1, 0, 0], sizes = [15, 15, 4], strides = [1, 1, 1]} : vector<16x16x4xbf16> to vector<15x15x4xbf16>
    %c0_16 = arith.constant 0 : index
    %c1_17 = arith.constant 1 : index
    %c24 = arith.constant 24 : index
    %18 = vector.load %arg5[%c0_16, %c1_17, %c24] : memref<16x16x36xbf16, #tpu.memory_space<vmem>>, vector<15x15x4xbf16>
    tpu.vector_store %arg5[%c0_16, %c1_17, %c24], %17 {strides = array<i32>} : memref<16x16x36xbf16, #tpu.memory_space<vmem>>, vector<15x15x4xbf16>,
    %19 = vector.extract_strided_slice %5 {offsets = [1, 0, 0], sizes = [15, 16, 4], strides = [1, 1, 1]} : vector<16x16x4xbf16> to vector<15x16x4xbf16>
    %c0_18 = arith.constant 0 : index
    %c0_19 = arith.constant 0 : index
    %c28 = arith.constant 28 : index
    %20 = vector.load %arg5[%c0_18, %c0_19, %c28] : memref<16x16x36xbf16, #tpu.memory_space<vmem>>, vector<15x16x4xbf16>
    tpu.vector_store %arg5[%c0_18, %c0_19, %c28], %19 {strides = array<i32>} : memref<16x16x36xbf16, #tpu.memory_space<vmem>>, vector<15x16x4xbf16>,
    %21 = vector.extract_strided_slice %5 {offsets = [1, 1, 0], sizes = [15, 15, 4], strides = [1, 1, 1]} : vector<16x16x4xbf16> to vector<15x15x4xbf16>
    %c0_20 = arith.constant 0 : index
    %c0_21 = arith.constant 0 : index
    %c32 = arith.constant 32 : index
    %22 = vector.load %arg5[%c0_20, %c0_21, %c32] : memref<16x16x36xbf16, #tpu.memory_space<vmem>>, vector<15x15x4xbf16>
    tpu.vector_store %arg5[%c0_20, %c0_21, %c32], %21 {strides = array<i32>} : memref<16x16x36xbf16, #tpu.memory_space<vmem>>, vector<15x15x4xbf16>,
    %c0_22 = arith.constant 0 : index
    %c0_23 = arith.constant 0 : index
    %c0_24 = arith.constant 0 : index
    %23 = vector.load %arg5[%c0_22, %c0_23, %c0_24] : memref<16x16x36xbf16, #tpu.memory_space<vmem>>, vector<16x16x36xbf16>
    %24 = vector.shape_cast %23 : vector<16x16x36xbf16> to vector<256x36xbf16>
    %c0_25 = arith.constant 0 : index
    %c0_26 = arith.constant 0 : index
    %25 = vector.load %arg2[%c0_25, %c0_26] : memref<36x16xbf16, #tpu.memory_space<vmem>>, vector<36x16xbf16>
    %cst = arith.constant dense<0.000000e+00> : vector<256x16xf32>
    %26 = tpu.matmul %24, %25, %cst {dimension_numbers = #tpu.dot_dimension_numbers<[1], [0], [0], [1], [0, 0, 1, 1], [], []>} : vector<256x36xbf16>, vector<36x16xbf16>, vector<256x16xf32> -> vector<256x16xf32>
    %27 = vector.extract_strided_slice %26 {offsets = [0, 0], sizes = [256, 8], strides = [1, 1]} : vector<256x16xf32> to vector<256x8xf32>
    %28 = vector.extract_strided_slice %26 {offsets = [0, 8], sizes = [256, 8], strides = [1, 1]} : vector<256x16xf32> to vector<256x8xf32>
    %cst_27 = arith.constant 0.000000e+00 : f32
    %29 = vector.broadcast %cst_27 : f32 to vector<256x8xf32>
    %30 = arith.maximumf %27, %29 : vector<256x8xf32>
    %31 = arith.truncf %30 : vector<256x8xf32> to vector<256x8xbf16>
    %32 = vector.shape_cast %31 : vector<256x8xbf16> to vector<16x16x8xbf16>
    %33 = vector.extract_strided_slice %32 {offsets = [0, 0, 0], sizes = [15, 15, 8], strides = [1, 1, 1]} : vector<16x16x8xbf16> to vector<15x15x8xbf16>
    %c1_28 = arith.constant 1 : index
    %c1_29 = arith.constant 1 : index
    %c0_30 = arith.constant 0 : index
    %34 = vector.load %arg6[%c1_28, %c1_29, %c0_30] : memref<16x16x72xbf16, #tpu.memory_space<vmem>>, vector<15x15x8xbf16>
    tpu.vector_store %arg6[%c1_28, %c1_29, %c0_30], %33 {strides = array<i32>} : memref<16x16x72xbf16, #tpu.memory_space<vmem>>, vector<15x15x8xbf16>,
    %35 = vector.extract_strided_slice %32 {offsets = [0, 0, 0], sizes = [15, 16, 8], strides = [1, 1, 1]} : vector<16x16x8xbf16> to vector<15x16x8xbf16>
    %c1_31 = arith.constant 1 : index
    %c0_32 = arith.constant 0 : index
    %c8_33 = arith.constant 8 : index
    %36 = vector.load %arg6[%c1_31, %c0_32, %c8_33] : memref<16x16x72xbf16, #tpu.memory_space<vmem>>, vector<15x16x8xbf16>
    tpu.vector_store %arg6[%c1_31, %c0_32, %c8_33], %35 {strides = array<i32>} : memref<16x16x72xbf16, #tpu.memory_space<vmem>>, vector<15x16x8xbf16>,
    %37 = vector.extract_strided_slice %32 {offsets = [0, 1, 0], sizes = [15, 15, 8], strides = [1, 1, 1]} : vector<16x16x8xbf16> to vector<15x15x8xbf16>
    %c1_34 = arith.constant 1 : index
    %c0_35 = arith.constant 0 : index
    %c16_36 = arith.constant 16 : index
    %38 = vector.load %arg6[%c1_34, %c0_35, %c16_36] : memref<16x16x72xbf16, #tpu.memory_space<vmem>>, vector<15x15x8xbf16>
    tpu.vector_store %arg6[%c1_34, %c0_35, %c16_36], %37 {strides = array<i32>} : memref<16x16x72xbf16, #tpu.memory_space<vmem>>, vector<15x15x8xbf16>,
    %39 = vector.extract_strided_slice %32 {offsets = [0, 0, 0], sizes = [16, 15, 8], strides = [1, 1, 1]} : vector<16x16x8xbf16> to vector<16x15x8xbf16>
    %c0_37 = arith.constant 0 : index
    %c1_38 = arith.constant 1 : index
    %c24_39 = arith.constant 24 : index
    %40 = vector.load %arg6[%c0_37, %c1_38, %c24_39] : memref<16x16x72xbf16, #tpu.memory_space<vmem>>, vector<16x15x8xbf16>
    tpu.vector_store %arg6[%c0_37, %c1_38, %c24_39], %39 {strides = array<i32>} : memref<16x16x72xbf16, #tpu.memory_space<vmem>>, vector<16x15x8xbf16>,
    %c0_40 = arith.constant 0 : index
    %c0_41 = arith.constant 0 : index
    %c32_42 = arith.constant 32 : index
    %41 = vector.load %arg6[%c0_40, %c0_41, %c32_42] : memref<16x16x72xbf16, #tpu.memory_space<vmem>>, vector<16x16x8xbf16>
    tpu.vector_store %arg6[%c0_40, %c0_41, %c32_42], %32 {strides = array<i32>} : memref<16x16x72xbf16, #tpu.memory_space<vmem>>, vector<16x16x8xbf16>,
    %42 = vector.extract_strided_slice %32 {offsets = [0, 1, 0], sizes = [16, 15, 8], strides = [1, 1, 1]} : vector<16x16x8xbf16> to vector<16x15x8xbf16>
    %c0_43 = arith.constant 0 : index
    %c0_44 = arith.constant 0 : index
    %c40 = arith.constant 40 : index
    %43 = vector.load %arg6[%c0_43, %c0_44, %c40] : memref<16x16x72xbf16, #tpu.memory_space<vmem>>, vector<16x15x8xbf16>
    tpu.vector_store %arg6[%c0_43, %c0_44, %c40], %42 {strides = array<i32>} : memref<16x16x72xbf16, #tpu.memory_space<vmem>>, vector<16x15x8xbf16>,
    %44 = vector.extract_strided_slice %32 {offsets = [1, 0, 0], sizes = [15, 15, 8], strides = [1, 1, 1]} : vector<16x16x8xbf16> to vector<15x15x8xbf16>
    %c0_45 = arith.constant 0 : index
    %c1_46 = arith.constant 1 : index
    %c48 = arith.constant 48 : index
    %45 = vector.load %arg6[%c0_45, %c1_46, %c48] : memref<16x16x72xbf16, #tpu.memory_space<vmem>>, vector<15x15x8xbf16>
    tpu.vector_store %arg6[%c0_45, %c1_46, %c48], %44 {strides = array<i32>} : memref<16x16x72xbf16, #tpu.memory_space<vmem>>, vector<15x15x8xbf16>,
    %46 = vector.extract_strided_slice %32 {offsets = [1, 0, 0], sizes = [15, 16, 8], strides = [1, 1, 1]} : vector<16x16x8xbf16> to vector<15x16x8xbf16>
    %c0_47 = arith.constant 0 : index
    %c0_48 = arith.constant 0 : index
    %c56 = arith.constant 56 : index
    %47 = vector.load %arg6[%c0_47, %c0_48, %c56] : memref<16x16x72xbf16, #tpu.memory_space<vmem>>, vector<15x16x8xbf16>
    tpu.vector_store %arg6[%c0_47, %c0_48, %c56], %46 {strides = array<i32>} : memref<16x16x72xbf16, #tpu.memory_space<vmem>>, vector<15x16x8xbf16>,
    %48 = vector.extract_strided_slice %32 {offsets = [1, 1, 0], sizes = [15, 15, 8], strides = [1, 1, 1]} : vector<16x16x8xbf16> to vector<15x15x8xbf16>
    %c0_49 = arith.constant 0 : index
    %c0_50 = arith.constant 0 : index
    %c64 = arith.constant 64 : index
    %49 = vector.load %arg6[%c0_49, %c0_50, %c64] : memref<16x16x72xbf16, #tpu.memory_space<vmem>>, vector<15x15x8xbf16>
    tpu.vector_store %arg6[%c0_49, %c0_50, %c64], %48 {strides = array<i32>} : memref<16x16x72xbf16, #tpu.memory_space<vmem>>, vector<15x15x8xbf16>,
    %c0_51 = arith.constant 0 : index
    %c0_52 = arith.constant 0 : index
    %c0_53 = arith.constant 0 : index
    %50 = vector.load %arg6[%c0_51, %c0_52, %c0_53] : memref<16x16x72xbf16, #tpu.memory_space<vmem>>, vector<16x16x72xbf16>
    %51 = vector.shape_cast %50 : vector<16x16x72xbf16> to vector<256x72xbf16>
    %c0_54 = arith.constant 0 : index
    %c0_55 = arith.constant 0 : index
    %52 = vector.load %arg3[%c0_54, %c0_55] : memref<72x8xbf16, #tpu.memory_space<vmem>>, vector<72x8xbf16>
    %cst_56 = arith.constant dense<0.000000e+00> : vector<256x8xf32>
    %53 = tpu.matmul %51, %52, %cst_56 {dimension_numbers = #tpu.dot_dimension_numbers<[1], [0], [0], [1], [0, 0, 1, 1], [], []>} : vector<256x72xbf16>, vector<72x8xbf16>, vector<256x8xf32> -> vector<256x8xf32>
    %cst_57 = arith.constant 0.000000e+00 : f32
    %54 = vector.broadcast %cst_57 : f32 to vector<256x8xf32>
    %55 = arith.maximumf %53, %54 : vector<256x8xf32>
    %56 = arith.addf %55, %28 : vector<256x8xf32>
    %57 = vector.shape_cast %56 : vector<256x8xf32> to vector<1x16x16x8xf32>
    %c0_58 = arith.constant 0 : index
    %c0_59 = arith.constant 0 : index
    %c0_60 = arith.constant 0 : index
    %c0_61 = arith.constant 0 : index
    %58 = vector.load %arg4[%c0_58, %c0_59, %c0_60, %c0_61] : memref<1x16x16x8xf32, #tpu.memory_space<vmem>>, vector<1x16x16x8xf32>
    tpu.vector_store %arg4[%c0_58, %c0_59, %c0_60, %c0_61], %57 {strides = array<i32>} : memref<1x16x16x8xf32, #tpu.memory_space<vmem>>, vector<1x16x16x8xf32>,
    return
  }
  func.func @transform_0(%arg0: i32) -> (i32, i32, i32, i32) {
    %c0_i32 = arith.constant 0 : i32
    %c0_i32_0 = arith.constant 0 : i32
    %c0_i32_1 = arith.constant 0 : i32
    %c0_i32_2 = arith.constant 0 : i32
    return %arg0, %c0_i32, %c0_i32_0, %c0_i32_1 : i32, i32, i32, i32
  }
  func.func @transform_1(%arg0: i32) -> (i32, i32) {
    %c0_i32 = arith.constant 0 : i32
    %c0_i32_0 = arith.constant 0 : i32
    %c0_i32_1 = arith.constant 0 : i32
    return %c0_i32, %c0_i32_0 : i32, i32
  }
  func.func @transform_2(%arg0: i32) -> (i32, i32) {
    %c0_i32 = arith.constant 0 : i32
    %c0_i32_0 = arith.constant 0 : i32
    %c0_i32_1 = arith.constant 0 : i32
    return %c0_i32, %c0_i32_0 : i32, i32
  }
  func.func @transform_3(%arg0: i32) -> (i32, i32, i32, i32) {
    %c0_i32 = arith.constant 0 : i32
    %c0_i32_0 = arith.constant 0 : i32
    %c0_i32_1 = arith.constant 0 : i32
    %c0_i32_2 = arith.constant 0 : i32
    return %arg0, %c0_i32, %c0_i32_0, %c0_i32_1 : i32, i32, i32, i32
  }
}

</mosaic_0001>

<bundles_post_ra>
// kernel: tpu_custom_call.1
= control target key start
LH: loop header
LB: loop body
LE: loop exit
PB: predicated region body
PF: predicated region fallthrough
CT: control target
= control target key end

     0   :  { %s5467_s12 = smov 0   ;;  %s9219_s0 = inlined_call_operand.vmem [shape: f32[2,16,16,4], index: 0, kind: input, shape index: {}]   ;;  %s9220_s1 = inlined_call_operand.vmem [shape: bf16[36,16], index: 1, kind: input, shape index: {}]   ;;  %s9221_s2 = inlined_call_operand.vmem [shape: bf16[72,8], index: 2, kind: input, shape index: {}]   ;;  %s9222_s3 = inlined_call_operand.vmem [shape: f32[2,16,16,8], index: 3, kind: output, shape index: {}]  }
   0x1 LB: > { %s5159_s13 = sadd.s32 4294967295, %s5431_s12   ;;  %p5163_p0 = scmp.ge.s32.totalorder %s5431_s12, 1  ;;  %s5431_s12 = sphi %s5467_s12, %s13_s12  }
   0x2   : > { %p137_p1 = scmp.lt.s32.totalorder %s5431_s12, 3 }
   0x4   : > { %p138_p2 = pnand %p5163_p0, %p137_p1 }
   0x6   : > { %141 = sbr.rel (%p138_p2) target bundleno = 2077 (0x81d), region = 32 }
   0xb   : > { %p161_p3 = scmp.lt.s32.totalorder %s5159_s13, 1  ;;  %p5168_p4 = scmp.ne.s32.totalorder %s5159_s13, 0 }
   0xd   : > { %s162_s14 = scalar_select %p161_p3, %s5159_s13, 1 }
   0xe   : > { %175 = sbr.rel (%p5168_p4) target bundleno = 236 (0xec), region = 36 }
   0xf   : > { %s5355_s15 = sshll.u32 %s162_s14, 8 }
  0x10   : > { %s5478_s18 = scalar_lea.vmem %s9219_s0, %s5355_s15  ;;  %s5483_s21 = scalar_lea.vmem %s9222_s3, %s5355_s15 }
  0x13   : > { %vm176_vm0 = vcmask 27648   ;;  %vm497_vm1 = vcmask 60416   ;;  %v5433_v0 = vmov 0   ;;  %vm230_vm2 = vcmask 60448   ;;  %v227_v1 = vld [vmem:[#allocation2 + $0x78] sm:$0x1] }
  0x14   : > { %177 = vst.msk [vmem:[#allocation2] sm:$0xf] %vm176_vm0, %v5433_v0  ;;  %vm179_vm3 = vcmask 24576   ;;  %vm180_vm4 = vsmask.f32 256  ;;  %vm236_vm5 = vcmask 93251  }
  0x15   : > { %178 = vst.msk [vmem:[#allocation2 + $0x4] sm:$0xf] %vm176_vm0, %v5433_v0  ;;  %vm500_vm6 = vcmask 57344   ;;  %vm550_vm7 = vcmask 126016   ;;  %vm5489_vm8 = vmand %vm179_vm3, %vm180_vm4  ;;  %vm237_vm9 = vsmask.f32 7950 }
  0x16   : > { %498 = vst.msk [vmem:[#allocation3] sm:$0xf] %vm497_vm1, %v5433_v0  ;;  %vm233_vm10 = vcmask 93248   ;;  %vm5495_vm11 = vmand %vm236_vm5, %vm237_vm9  ;;  %v284_v4 = vld [vmem:[#allocation2 + $0x7c] sm:$0x8]  ;;  %vm556_vm12 = vcmask 191619  }
  0x17   : > { %499 = vst.msk [vmem:[#allocation3 + $0x4] sm:$0xf] %vm497_vm1, %v5433_v0  ;;  %vm553_vm13 = vcmask 191616   ;;  %vm5502_vm14 = vmand %vm500_vm6, %vm180_vm4  ;;  %v547_v6 = vld [vmem:[#allocation3 + $0x78] sm:$0x1]  ;;  %v228_v7 = vsel %vm5489_vm8, 0, %v227_v1 }
  0x18   : > { %232 = vst.msk [vmem:[#allocation2 + $0x4] sm:$0xf] %vm230_vm2, %v5433_v0  ;;  %vm5511_vm15 = vmand %vm556_vm12, %vm237_vm9  ;;  %v603_v9 = vld [vmem:[#allocation3 + $0x7c] sm:$0x8]  ;;  %v285_v10 = vsel %vm5495_vm11, 0, %v284_v4  ;;  %v548_v11 = vsel %vm5502_vm14, 0, %v547_v6 }
  0x19   : > { %552 = vst.msk [vmem:[#allocation3 + $0x4] sm:$0xf] %vm550_vm7, %v5433_v0  ;;  %v604_v13 = vsel %vm5511_vm15, 0, %v603_v9  ;;  %v185_v17 = vld [vmem:[#allocation2 + $0x8] sm:$0x1]  ;;  %vm287_vm0 = vcmask 122976  }
  0x1a   : > { %235 = vst.msk [vmem:[#allocation2 + $0x4] sm:$0xf] %vm233_vm10, %v5433_v0  ;;  %v188_v18 = vld [vmem:[#allocation2 + $0x10] sm:$0x1]  ;;  %v191_v19 = vld [vmem:[#allocation2 + $0x18] sm:$0x1]  ;;  %vm5650_vm3 = vmand %vm287_vm0, %vm180_vm4 }
  0x1b   : > { %555 = vst.msk [vmem:[#allocation3 + $0x4] sm:$0xf] %vm553_vm13, %v5433_v0  ;;  %v182_v12 = vld [vmem:[#allocation2] sm:$0x1]  ;;  %v186_v20 = vsel %vm5489_vm8, 0, %v185_v17  ;;  %v189_v22 = vsel %vm5489_vm8, 0, %v188_v18 }
  0x1c   : > { %229 = vst [vmem:[#allocation2 + $0x78] sm:$0x1] %v228_v7  ;;  %v183_v14 = vsel %vm5489_vm8, 0, %v182_v12  ;;  %v194_v21 = vld [vmem:[#allocation2 + $0x20] sm:$0x1]  ;;  %v192_v24 = vsel %vm5489_vm8, 0, %v191_v19 }
  0x1d   : > { %286 = vst [vmem:[#allocation2 + $0x7c] sm:$0x8] %v285_v10  ;;  %v502_v15 = vld [vmem:[#allocation3] sm:$0x1]  ;;  %v197_v23 = vld [vmem:[#allocation2 + $0x28] sm:$0x1] }
  0x1e   : > { %549 = vst [vmem:[#allocation3 + $0x78] sm:$0x1] %v548_v11  ;;  %v503_v16 = vsel %vm5502_vm14, 0, %v502_v15  ;;  %v200_v25 = vld [vmem:[#allocation2 + $0x30] sm:$0x1]  ;;  %v195_v26 = vsel %vm5489_vm8, 0, %v194_v21 }
  0x1f   : > { %605 = vst [vmem:[#allocation3 + $0x7c] sm:$0x8] %v604_v13  ;;  %v203_v27 = vld [vmem:[#allocation2 + $0x38] sm:$0x1]  ;;  %v198_v28 = vsel %vm5489_vm8, 0, %v197_v23  ;;  %v201_v30 = vsel %vm5489_vm8, 0, %v200_v25 }
  0x20   : > { %184 = vst [vmem:[#allocation2] sm:$0x1] %v183_v14  ;;  %v206_v29 = vld [vmem:[#allocation2 + $0x40] sm:$0x1]  ;;  %v209_v31 = vld [vmem:[#allocation2 + $0x48] sm:$0x1] }
  0x21   : > { %231 = vst.msk [vmem:[#allocation2] sm:$0xf] %vm230_vm2, %v5433_v0  ;;  %v204_v32 = vsel %vm5489_vm8, 0, %v203_v27  ;;  %v212_v33 = vld [vmem:[#allocation2 + $0x50] sm:$0x1]  ;;  %v207_v34 = vsel %vm5489_vm8, 0, %v206_v29 }
  0x22   : > { %504 = vst [vmem:[#allocation3] sm:$0x1] %v503_v16  ;;  %v215_v35 = vld [vmem:[#allocation2 + $0x58] sm:$0x1]  ;;  %v210_v36 = vsel %vm5489_vm8, 0, %v209_v31  ;;  %v213_v38 = vsel %vm5489_vm8, 0, %v212_v33 }
  0x23   : > { %234 = vst.msk [vmem:[#allocation2] sm:$0xf] %vm233_vm10, %v5433_v0  ;;  %v218_v37 = vld [vmem:[#allocation2 + $0x60] sm:$0x1]  ;;  %v221_v39 = vld [vmem:[#allocation2 + $0x68] sm:$0x1] }
  0x24   : > { %551 = vst.msk [vmem:[#allocation3] sm:$0xf] %vm550_vm7, %v5433_v0  ;;  %v216_v40 = vsel %vm5489_vm8, 0, %v215_v35  ;;  %v224_v41 = vld [vmem:[#allocation2 + $0x70] sm:$0x1]  ;;  %v219_v42 = vsel %vm5489_vm8, 0, %v218_v37 }
  0x25   : > { %554 = vst.msk [vmem:[#allocation3] sm:$0xf] %vm553_vm13, %v5433_v0  ;;  %v239_v43 = vld [vmem:[#allocation2 + $0x4] sm:$0x8]  ;;  %v222_v44 = vsel %vm5489_vm8, 0, %v221_v39  ;;  %v225_v46 = vsel %vm5489_vm8, 0, %v224_v41 }
  0x26   : > { %187 = vst [vmem:[#allocation2 + $0x8] sm:$0x1] %v186_v20  ;;  %v242_v45 = vld [vmem:[#allocation2 + $0xc] sm:$0x8]  ;;  %v245_v47 = vld [vmem:[#allocation2 + $0x14] sm:$0x8] }
  0x27   : > { %190 = vst [vmem:[#allocation2 + $0x10] sm:$0x1] %v189_v22  ;;  %v240_v48 = vsel %vm5495_vm11, 0, %v239_v43  ;;  %v248_v49 = vld [vmem:[#allocation2 + $0x1c] sm:$0x8]  ;;  %v243_v50 = vsel %vm5495_vm11, 0, %v242_v45 }
  0x28   : > { %193 = vst [vmem:[#allocation2 + $0x18] sm:$0x1] %v192_v24  ;;  %v251_v51 = vld [vmem:[#allocation2 + $0x24] sm:$0x8]  ;;  %v246_v52 = vsel %vm5495_vm11, 0, %v245_v47  ;;  %v249_v54 = vsel %vm5495_vm11, 0, %v248_v49 }
  0x29   : > { %196 = vst [vmem:[#allocation2 + $0x20] sm:$0x1] %v195_v26  ;;  %v254_v53 = vld [vmem:[#allocation2 + $0x2c] sm:$0x8]  ;;  %v257_v55 = vld [vmem:[#allocation2 + $0x34] sm:$0x8] }
  0x2a   : > { %199 = vst [vmem:[#allocation2 + $0x28] sm:$0x1] %v198_v28  ;;  %v252_v56 = vsel %vm5495_vm11, 0, %v251_v51  ;;  %v260_v57 = vld [vmem:[#allocation2 + $0x3c] sm:$0x8]  ;;  %v255_v58 = vsel %vm5495_vm11, 0, %v254_v53 }
  0x2b   : > { %202 = vst [vmem:[#allocation2 + $0x30] sm:$0x1] %v201_v30  ;;  %v263_v59 = vld [vmem:[#allocation2 + $0x44] sm:$0x8]  ;;  %v258_v60 = vsel %vm5495_vm11, 0, %v257_v55  ;;  %v261_v62 = vsel %vm5495_vm11, 0, %v260_v57 }
  0x2c   : > { %205 = vst [vmem:[#allocation2 + $0x38] sm:$0x1] %v204_v32  ;;  %v266_v61 = vld [vmem:[#allocation2 + $0x4c] sm:$0x8]  ;;  %v269_v63 = vld [vmem:[#allocation2 + $0x54] sm:$0x8] }
  0x2d   : > { %208 = vst [vmem:[#allocation2 + $0x40] sm:$0x1] %v207_v34  ;;  %v264_v1 = vsel %vm5495_vm11, 0, %v263_v59  ;;  %v272_v2 = vld [vmem:[#allocation2 + $0x5c] sm:$0x8]  ;;  %v267_v4 = vsel %vm5495_vm11, 0, %v266_v61 }
  0x2e   : > { %211 = vst [vmem:[#allocation2 + $0x48] sm:$0x1] %v210_v36  ;;  %v275_v6 = vld [vmem:[#allocation2 + $0x64] sm:$0x8]  ;;  %v270_v7 = vsel %vm5495_vm11, 0, %v269_v63  ;;  %v273_v10 = vsel %vm5495_vm11, 0, %v272_v2 }
  0x2f   : > { %214 = vst [vmem:[#allocation2 + $0x50] sm:$0x1] %v213_v38  ;;  %v278_v9 = vld [vmem:[#allocation2 + $0x6c] sm:$0x8]  ;;  %v281_v11 = vld [vmem:[#allocation2 + $0x74] sm:$0x8] }
  0x30   : > { %217 = vst [vmem:[#allocation2 + $0x58] sm:$0x1] %v216_v40  ;;  %v276_v12 = vsel %vm5495_vm11, 0, %v275_v6  ;;  %v505_v13 = vld [vmem:[#allocation3 + $0x8] sm:$0x1]  ;;  %v279_v14 = vsel %vm5495_vm11, 0, %v278_v9 }
  0x31   : > { %220 = vst [vmem:[#allocation2 + $0x60] sm:$0x1] %v219_v42  ;;  %v508_v15 = vld [vmem:[#allocation3 + $0x10] sm:$0x1]  ;;  %v282_v16 = vsel %vm5495_vm11, 0, %v281_v11  ;;  %v506_v18 = vsel %vm5502_vm14, 0, %v505_v13 }
  0x32   : > { %223 = vst [vmem:[#allocation2 + $0x68] sm:$0x1] %v222_v44  ;;  %v511_v17 = vld [vmem:[#allocation3 + $0x18] sm:$0x1]  ;;  %v514_v19 = vld [vmem:[#allocation3 + $0x20] sm:$0x1] }
  0x33   : > { %226 = vst [vmem:[#allocation2 + $0x70] sm:$0x1] %v225_v46  ;;  %v509_v20 = vsel %vm5502_vm14, 0, %v508_v15  ;;  %v517_v21 = vld [vmem:[#allocation3 + $0x28] sm:$0x1]  ;;  %v512_v22 = vsel %vm5502_vm14, 0, %v511_v17 }
  0x34   : > { %241 = vst [vmem:[#allocation2 + $0x4] sm:$0x8] %v240_v48  ;;  %v520_v23 = vld [vmem:[#allocation3 + $0x30] sm:$0x1]  ;;  %v515_v3 = vsel %vm5502_vm14, 0, %v514_v19  ;;  %v518_v25 = vsel %vm5502_vm14, 0, %v517_v21 }
  0x35   : > { %244 = vst [vmem:[#allocation2 + $0xc] sm:$0x8] %v243_v50  ;;  %v523_v24 = vld [vmem:[#allocation3 + $0x38] sm:$0x1]  ;;  %v526_v26 = vld [vmem:[#allocation3 + $0x40] sm:$0x1] }
  0x36   : > { %247 = vst [vmem:[#allocation2 + $0x14] sm:$0x8] %v246_v52  ;;  %v521_v27 = vsel %vm5502_vm14, 0, %v520_v23  ;;  %v529_v28 = vld [vmem:[#allocation3 + $0x48] sm:$0x1]  ;;  %v524_v29 = vsel %vm5502_vm14, 0, %v523_v24 }
  0x37   : > { %250 = vst [vmem:[#allocation2 + $0x1c] sm:$0x8] %v249_v54  ;;  %v532_v30 = vld [vmem:[#allocation3 + $0x50] sm:$0x1]  ;;  %v527_v31 = vsel %vm5502_vm14, 0, %v526_v26  ;;  %v530_v33 = vsel %vm5502_vm14, 0, %v529_v28 }
  0x38   : > { %253 = vst [vmem:[#allocation2 + $0x24] sm:$0x8] %v252_v56  ;;  %v535_v32 = vld [vmem:[#allocation3 + $0x58] sm:$0x1]  ;;  %v538_v34 = vld [vmem:[#allocation3 + $0x60] sm:$0x1] }
  0x39   : > { %256 = vst [vmem:[#allocation2 + $0x2c] sm:$0x8] %v255_v58  ;;  %v533_v35 = vsel %vm5502_vm14, 0, %v532_v30  ;;  %v541_v36 = vld [vmem:[#allocation3 + $0x68] sm:$0x1]  ;;  %v536_v37 = vsel %vm5502_vm14, 0, %v535_v32 }
  0x3a   : > { %259 = vst [vmem:[#allocation2 + $0x34] sm:$0x8] %v258_v60  ;;  %v544_v38 = vld [vmem:[#allocation3 + $0x70] sm:$0x1]  ;;  %v539_v39 = vsel %vm5502_vm14, 0, %v538_v34  ;;  %v542_v41 = vsel %vm5502_vm14, 0, %v541_v36 }
  0x3b   : > { %262 = vst [vmem:[#allocation2 + $0x3c] sm:$0x8] %v261_v62  ;;  %v558_v40 = vld [vmem:[#allocation3 + $0x4] sm:$0x8]  ;;  %v561_v42 = vld [vmem:[#allocation3 + $0xc] sm:$0x8] }
  0x3c   : > { %265 = vst [vmem:[#allocation2 + $0x44] sm:$0x8] %v264_v1  ;;  %v545_v43 = vsel %vm5502_vm14, 0, %v544_v38  ;;  %v564_v44 = vld [vmem:[#allocation3 + $0x14] sm:$0x8]  ;;  %v559_v45 = vsel %vm5511_vm15, 0, %v558_v40 }
  0x3d   : > { %268 = vst [vmem:[#allocation2 + $0x4c] sm:$0x8] %v267_v4  ;;  %v567_v46 = vld [vmem:[#allocation3 + $0x1c] sm:$0x8]  ;;  %v562_v47 = vsel %vm5511_vm15, 0, %v561_v42  ;;  %v565_v49 = vsel %vm5511_vm15, 0, %v564_v44 }
  0x3e   : > { %271 = vst [vmem:[#allocation2 + $0x54] sm:$0x8] %v270_v7  ;;  %v570_v48 = vld [vmem:[#allocation3 + $0x24] sm:$0x8]  ;;  %v573_v50 = vld [vmem:[#allocation3 + $0x2c] sm:$0x8] }
  0x3f   : > { %274 = vst [vmem:[#allocation2 + $0x5c] sm:$0x8] %v273_v10  ;;  %v568_v5 = vsel %vm5511_vm15, 0, %v567_v46  ;;  %v576_v51 = vld [vmem:[#allocation3 + $0x34] sm:$0x8]  ;;  %v571_v52 = vsel %vm5511_vm15, 0, %v570_v48 }
  0x40   : > { %277 = vst [vmem:[#allocation2 + $0x64] sm:$0x8] %v276_v12  ;;  %v579_v53 = vld [vmem:[#allocation3 + $0x3c] sm:$0x8]  ;;  %v574_v54 = vsel %vm5511_vm15, 0, %v573_v50  ;;  %v577_v56 = vsel %vm5511_vm15, 0, %v576_v51 }
  0x41   : > { %280 = vst [vmem:[#allocation2 + $0x6c] sm:$0x8] %v279_v14  ;;  %v582_v55 = vld [vmem:[#allocation3 + $0x44] sm:$0x8]  ;;  %v585_v57 = vld [vmem:[#allocation3 + $0x4c] sm:$0x8] }
  0x42   : > { %283 = vst [vmem:[#allocation2 + $0x74] sm:$0x8] %v282_v16  ;;  %v580_v58 = vsel %vm5511_vm15, 0, %v579_v53  ;;  %v588_v59 = vld [vmem:[#allocation3 + $0x54] sm:$0x8]  ;;  %v583_v60 = vsel %vm5511_vm15, 0, %v582_v55 }
  0x43   : > { %507 = vst [vmem:[#allocation3 + $0x8] sm:$0x1] %v506_v18  ;;  %v591_v61 = vld [vmem:[#allocation3 + $0x5c] sm:$0x8]  ;;  %v586_v62 = vsel %vm5511_vm15, 0, %v585_v57  ;;  %v589_v1 = vsel %vm5511_vm15, 0, %v588_v59 }
  0x44   : > { %510 = vst [vmem:[#allocation3 + $0x10] sm:$0x1] %v509_v20  ;;  %v594_v63 = vld [vmem:[#allocation3 + $0x64] sm:$0x8]  ;;  %v597_v2 = vld [vmem:[#allocation3 + $0x6c] sm:$0x8] }
  0x45   : > { %513 = vst [vmem:[#allocation3 + $0x18] sm:$0x1] %v512_v22  ;;  %vm337_vm1 = vcmask 191651   ;;  %v592_v4 = vsel %vm5511_vm15, 0, %v591_v61  ;;  %v600_v6 = vld [vmem:[#allocation3 + $0x74] sm:$0x8] }
  0x46   : > { %516 = vst [vmem:[#allocation3 + $0x20] sm:$0x1] %v515_v3  ;;  %vm606_vm2 = vcmask 254144   ;;  %v595_v7 = vsel %vm5511_vm15, 0, %v594_v63  ;;  %v334_v10 = vld [vmem:[#allocation2 + $0x78] sm:$0x1]  ;;  %vm5657_vm6 = vmand %vm337_vm1, %vm237_vm9 }
  0x47   : > { %519 = vst [vmem:[#allocation3 + $0x28] sm:$0x1] %v518_v25  ;;  %vm656_vm5 = vcmask 388419   ;;  %v598_v11 = vsel %vm5511_vm15, 0, %v597_v2  ;;  %v384_v13 = vld [vmem:[#allocation2 + $0x7c] sm:$0x8]  ;;  %vm5664_vm7 = vmand %vm606_vm2, %vm180_vm4 }
  0x48   : > { %522 = vst [vmem:[#allocation3 + $0x30] sm:$0x1] %v521_v27  ;;  %v601_v14 = vsel %vm5511_vm15, 0, %v600_v6  ;;  %v653_v16 = vld [vmem:[#allocation3 + $0x78] sm:$0x1]  ;;  %v335_v17 = vsel %vm5650_vm3, 0, %v334_v10  ;;  %vm5671_vm8 = vmand %vm656_vm5, %vm237_vm9 }
  0x49   : > { %525 = vst [vmem:[#allocation3 + $0x38] sm:$0x1] %v524_v29  ;;  %v703_v19 = vld [vmem:[#allocation3 + $0x7c] sm:$0x8]  ;;  %v385_v8 = vsel %vm5657_vm6, 0, %v384_v13  ;;  %v654_v20 = vsel %vm5664_vm7, 0, %v653_v16 }
  0x4a   : > { %528 = vst [vmem:[#allocation3 + $0x40] sm:$0x1] %v527_v31  ;;  %v704_v21 = vsel %vm5671_vm8, 0, %v703_v19  ;;  %vm388_vm10 = vcmask 224448   ;;  %vm707_vm11 = vcmask 454016   ;;  %vm441_vm12 = vcmask 257248  }
  0x4b   : > { %531 = vst [vmem:[#allocation3 + $0x48] sm:$0x1] %v530_v33  ;;  %v289_v22 = vld [vmem:[#allocation2] sm:$0x1]  ;;  %v292_v23 = vld [vmem:[#allocation2 + $0x8] sm:$0x1] }
  0x4c   : > { %534 = vst [vmem:[#allocation3 + $0x50] sm:$0x1] %v533_v35  ;;  %vm760_vm13 = vcmask 519616   ;;  %v295_v3 = vld [vmem:[#allocation2 + $0x10] sm:$0x1]  ;;  %v290_v24 = vsel %vm5650_vm3, 0, %v289_v22 }
  0x4d   : > { %537 = vst [vmem:[#allocation3 + $0x58] sm:$0x1] %v536_v37  ;;  %v298_v25 = vld [vmem:[#allocation2 + $0x18] sm:$0x1]  ;;  %v293_v26 = vsel %vm5650_vm3, 0, %v292_v23  ;;  %v296_v28 = vsel %vm5650_vm3, 0, %v295_v3 }
  0x4e   : > { %540 = vst [vmem:[#allocation3 + $0x60] sm:$0x1] %v539_v39  ;;  %v301_v27 = vld [vmem:[#allocation2 + $0x20] sm:$0x1]  ;;  %v304_v29 = vld [vmem:[#allocation2 + $0x28] sm:$0x1] }
  0x4f   : > { %543 = vst [vmem:[#allocation3 + $0x68] sm:$0x1] %v542_v41  ;;  %v299_v30 = vsel %vm5650_vm3, 0, %v298_v25  ;;  %v307_v31 = vld [vmem:[#allocation2 + $0x30] sm:$0x1]  ;;  %v302_v32 = vsel %vm5650_vm3, 0, %v301_v27 }
  0x50   : > { %546 = vst [vmem:[#allocation3 + $0x70] sm:$0x1] %v545_v43  ;;  %v310_v33 = vld [vmem:[#allocation2 + $0x38] sm:$0x1]  ;;  %v305_v34 = vsel %vm5650_vm3, 0, %v304_v29  ;;  %v308_v36 = vsel %vm5650_vm3, 0, %v307_v31 }
  0x51   : > { %560 = vst [vmem:[#allocation3 + $0x4] sm:$0x8] %v559_v45  ;;  %v313_v35 = vld [vmem:[#allocation2 + $0x40] sm:$0x1]  ;;  %v316_v37 = vld [vmem:[#allocation2 + $0x48] sm:$0x1] }
  0x52   : > { %563 = vst [vmem:[#allocation3 + $0xc] sm:$0x8] %v562_v47  ;;  %v311_v38 = vsel %vm5650_vm3, 0, %v310_v33  ;;  %v319_v39 = vld [vmem:[#allocation2 + $0x50] sm:$0x1]  ;;  %v314_v40 = vsel %vm5650_vm3, 0, %v313_v35 }
  0x53   : > { %566 = vst [vmem:[#allocation3 + $0x14] sm:$0x8] %v565_v49  ;;  %v322_v41 = vld [vmem:[#allocation2 + $0x58] sm:$0x1]  ;;  %v317_v42 = vsel %vm5650_vm3, 0, %v316_v37  ;;  %v320_v44 = vsel %vm5650_vm3, 0, %v319_v39 }
  0x54   : > { %569 = vst [vmem:[#allocation3 + $0x1c] sm:$0x8] %v568_v5  ;;  %v325_v43 = vld [vmem:[#allocation2 + $0x60] sm:$0x1]  ;;  %v328_v45 = vld [vmem:[#allocation2 + $0x68] sm:$0x1] }
  0x55   : > { %572 = vst [vmem:[#allocation3 + $0x24] sm:$0x8] %v571_v52  ;;  %v323_v46 = vsel %vm5650_vm3, 0, %v322_v41  ;;  %v331_v47 = vld [vmem:[#allocation2 + $0x70] sm:$0x1]  ;;  %v326_v48 = vsel %vm5650_vm3, 0, %v325_v43 }
  0x56   : > { %575 = vst [vmem:[#allocation3 + $0x2c] sm:$0x8] %v574_v54  ;;  %v339_v49 = vld [vmem:[#allocation2 + $0x4] sm:$0x8]  ;;  %v329_v50 = vsel %vm5650_vm3, 0, %v328_v45  ;;  %v332_v51 = vsel %vm5650_vm3, 0, %v331_v47 }
  0x57   : > { %578 = vst [vmem:[#allocation3 + $0x34] sm:$0x8] %v577_v56  ;;  %v342_v5 = vld [vmem:[#allocation2 + $0xc] sm:$0x8]  ;;  %v345_v52 = vld [vmem:[#allocation2 + $0x14] sm:$0x8] }
  0x58   : > { %581 = vst [vmem:[#allocation3 + $0x3c] sm:$0x8] %v580_v58  ;;  %v340_v53 = vsel %vm5657_vm6, 0, %v339_v49  ;;  %v348_v54 = vld [vmem:[#allocation2 + $0x1c] sm:$0x8]  ;;  %v343_v55 = vsel %vm5657_vm6, 0, %v342_v5 }
  0x59   : > { %584 = vst [vmem:[#allocation3 + $0x44] sm:$0x8] %v583_v60  ;;  %v351_v56 = vld [vmem:[#allocation2 + $0x24] sm:$0x8]  ;;  %v346_v57 = vsel %vm5657_vm6, 0, %v345_v52  ;;  %v349_v59 = vsel %vm5657_vm6, 0, %v348_v54 }
  0x5a   : > { %587 = vst [vmem:[#allocation3 + $0x4c] sm:$0x8] %v586_v62  ;;  %v354_v58 = vld [vmem:[#allocation2 + $0x2c] sm:$0x8]  ;;  %v357_v60 = vld [vmem:[#allocation2 + $0x34] sm:$0x8] }
  0x5b   : > { %590 = vst [vmem:[#allocation3 + $0x54] sm:$0x8] %v589_v1  ;;  %v352_v61 = vsel %vm5657_vm6, 0, %v351_v56  ;;  %v360_v62 = vld [vmem:[#allocation2 + $0x3c] sm:$0x8]  ;;  %v355_v63 = vsel %vm5657_vm6, 0, %v354_v58 }
  0x5c   : > { %593 = vst [vmem:[#allocation3 + $0x5c] sm:$0x8] %v592_v4  ;;  %v363_v1 = vld [vmem:[#allocation2 + $0x44] sm:$0x8]  ;;  %v358_v2 = vsel %vm5657_vm6, 0, %v357_v60  ;;  %v361_v6 = vsel %vm5657_vm6, 0, %v360_v62 }
  0x5d   : > { %596 = vst [vmem:[#allocation3 + $0x64] sm:$0x8] %v595_v7  ;;  %v366_v4 = vld [vmem:[#allocation2 + $0x4c] sm:$0x8]  ;;  %v369_v7 = vld [vmem:[#allocation2 + $0x54] sm:$0x8] }
  0x5e   : > { %599 = vst [vmem:[#allocation3 + $0x6c] sm:$0x8] %v598_v11  ;;  %v364_v9 = vsel %vm5657_vm6, 0, %v363_v1  ;;  %v372_v10 = vld [vmem:[#allocation2 + $0x5c] sm:$0x8]  ;;  %v367_v11 = vsel %vm5657_vm6, 0, %v366_v4 }
  0x5f   : > { %602 = vst [vmem:[#allocation3 + $0x74] sm:$0x8] %v601_v14  ;;  %v375_v13 = vld [vmem:[#allocation2 + $0x64] sm:$0x8]  ;;  %v370_v14 = vsel %vm5657_vm6, 0, %v369_v7  ;;  %vm444_vm14 = vcmask 290048  }
  0x60   : > { %336 = vst [vmem:[#allocation2 + $0x78] sm:$0x1] %v335_v17  ;;  %v378_v16 = vld [vmem:[#allocation2 + $0x6c] sm:$0x8]  ;;  %v373_v17 = vsel %vm5657_vm6, 0, %v372_v10  ;;  %vm391_vm15 = vcmask 221376  }
  0x61   : > { %386 = vst [vmem:[#allocation2 + $0x7c] sm:$0x8] %v385_v8  ;;  %v381_v19 = vld [vmem:[#allocation2 + $0x74] sm:$0x8]  ;;  %v376_v8 = vsel %vm5657_vm6, 0, %v375_v13  ;;  %vm710_vm0 = vcmask 450944   ;;  %vm5810_vm1 = vmand %vm391_vm15, %vm180_vm4 }
  0x62   : > { %655 = vst [vmem:[#allocation3 + $0x78] sm:$0x1] %v654_v20  ;;  %v379_v20 = vsel %vm5657_vm6, 0, %v378_v16  ;;  %v382_v22 = vsel %vm5657_vm6, 0, %v381_v19  ;;  %v611_v23 = vld [vmem:[#allocation3 + $0x8] sm:$0x1]  ;;  %vm5817_vm3 = vmand %vm710_vm0, %vm180_vm4 }
  0x63   : > { %705 = vst [vmem:[#allocation3 + $0x7c] sm:$0x8] %v704_v21  ;;  %v608_v21 = vld [vmem:[#allocation3] sm:$0x1]  ;;  %v614_v3 = vld [vmem:[#allocation3 + $0x10] sm:$0x1] }
  0x64   : > { %389 = vst.msk [vmem:[#allocation2 + $0x78] sm:$0xf] %vm388_vm10, %v5433_v0  ;;  %v617_v25 = vld [vmem:[#allocation3 + $0x18] sm:$0x1]  ;;  %v620_v27 = vld [vmem:[#allocation3 + $0x20] sm:$0x1] }
  0x65   : > { %390 = vst.msk [vmem:[#allocation2 + $0x7c] sm:$0xf] %vm388_vm10, %v5433_v0  ;;  %v615_v12 = vsel %vm5664_vm7, 0, %v614_v3  ;;  %v618_v29 = vsel %vm5664_vm7, 0, %v617_v25  ;;  %v621_v31 = vsel %vm5664_vm7, 0, %v620_v27  ;;  %vm763_vm2 = vcmask 585216  }
  0x66   : > { %708 = vst.msk [vmem:[#allocation3 + $0x78] sm:$0xf] %vm707_vm11, %v5433_v0  ;;  %v676_v58 = vld [vmem:[#allocation3 + $0x34] sm:$0x8]  ;;  %v679_v60 = vld [vmem:[#allocation3 + $0x3c] sm:$0x8] }
  0x67   : > { %709 = vst.msk [vmem:[#allocation3 + $0x7c] sm:$0xf] %vm707_vm11, %v5433_v0  ;;  %v682_v62 = vld [vmem:[#allocation3 + $0x44] sm:$0x8]  ;;  %v685_v1 = vld [vmem:[#allocation3 + $0x4c] sm:$0x8] }
  0x68   : > { %443 = vst.msk [vmem:[#allocation2 + $0x7c] sm:$0xf] %vm441_vm12, %v5433_v0  ;;  %v688_v4 = vld [vmem:[#allocation3 + $0x54] sm:$0x8]  ;;  %v691_v7 = vld [vmem:[#allocation3 + $0x5c] sm:$0x8] }
  0x69   : > { %762 = vst.msk [vmem:[#allocation3 + $0x7c] sm:$0xf] %vm760_vm13, %v5433_v0  ;;  %v694_v10 = vld [vmem:[#allocation3 + $0x64] sm:$0x8]  ;;  %v697_v13 = vld [vmem:[#allocation3 + $0x6c] sm:$0x8] }
  0x6a   : > { %291 = vst [vmem:[#allocation2] sm:$0x1] %v290_v24  ;;  %v609_v24 = vsel %vm5664_vm7, 0, %v608_v21  ;;  %v700_v16 = vld [vmem:[#allocation3 + $0x74] sm:$0x8]  ;;  %v698_v19 = vsel %vm5671_vm8, 0, %v697_v13 }
  0x6b   : > { %294 = vst [vmem:[#allocation2 + $0x8] sm:$0x1] %v293_v26  ;;  %v612_v26 = vsel %vm5664_vm7, 0, %v611_v23  ;;  %v701_v21 = vsel %vm5671_vm8, 0, %v700_v16  ;;  %vm447_vm4 = vcmask 290051   ;;  %vm766_vm6 = vcmask 585219  }
  0x6c   : > { %297 = vst [vmem:[#allocation2 + $0x10] sm:$0x1] %v296_v28  ;;  %v623_v28 = vld [vmem:[#allocation3 + $0x28] sm:$0x1]  ;;  %vm5862_vm5 = vmand %vm447_vm4, %vm237_vm9 }
  0x6d   : > { %300 = vst [vmem:[#allocation2 + $0x18] sm:$0x1] %v299_v30  ;;  %v626_v30 = vld [vmem:[#allocation3 + $0x30] sm:$0x1]  ;;  %v624_v33 = vsel %vm5664_vm7, 0, %v623_v28 }
  0x6e   : > { %303 = vst [vmem:[#allocation2 + $0x20] sm:$0x1] %v302_v32  ;;  %v629_v32 = vld [vmem:[#allocation3 + $0x38] sm:$0x1]  ;;  %v627_v35 = vsel %vm5664_vm7, 0, %v626_v30 }
  0x6f   : > { %306 = vst [vmem:[#allocation2 + $0x28] sm:$0x1] %v305_v34  ;;  %v632_v34 = vld [vmem:[#allocation3 + $0x40] sm:$0x1]  ;;  %v630_v37 = vsel %vm5664_vm7, 0, %v629_v32 }
  0x70   : > { %309 = vst [vmem:[#allocation2 + $0x30] sm:$0x1] %v308_v36  ;;  %v635_v36 = vld [vmem:[#allocation3 + $0x48] sm:$0x1]  ;;  %v633_v39 = vsel %vm5664_vm7, 0, %v632_v34 }
  0x71   : > { %312 = vst [vmem:[#allocation2 + $0x38] sm:$0x1] %v311_v38  ;;  %v638_v38 = vld [vmem:[#allocation3 + $0x50] sm:$0x1]  ;;  %v636_v41 = vsel %vm5664_vm7, 0, %v635_v36 }
  0x72   : > { %315 = vst [vmem:[#allocation2 + $0x40] sm:$0x1] %v314_v40  ;;  %v641_v40 = vld [vmem:[#allocation3 + $0x58] sm:$0x1]  ;;  %v639_v43 = vsel %vm5664_vm7, 0, %v638_v38 }
  0x73   : > { %318 = vst [vmem:[#allocation2 + $0x48] sm:$0x1] %v317_v42  ;;  %v644_v42 = vld [vmem:[#allocation3 + $0x60] sm:$0x1]  ;;  %v642_v45 = vsel %vm5664_vm7, 0, %v641_v40 }
  0x74   : > { %321 = vst [vmem:[#allocation2 + $0x50] sm:$0x1] %v320_v44  ;;  %v647_v44 = vld [vmem:[#allocation3 + $0x68] sm:$0x1]  ;;  %v645_v47 = vsel %vm5664_vm7, 0, %v644_v42 }
  0x75   : > { %324 = vst [vmem:[#allocation2 + $0x58] sm:$0x1] %v323_v46  ;;  %v650_v46 = vld [vmem:[#allocation3 + $0x70] sm:$0x1]  ;;  %v648_v49 = vsel %vm5664_vm7, 0, %v647_v44 }
  0x76   : > { %327 = vst [vmem:[#allocation2 + $0x60] sm:$0x1] %v326_v48  ;;  %v658_v48 = vld [vmem:[#allocation3 + $0x4] sm:$0x8]  ;;  %v651_v5 = vsel %vm5664_vm7, 0, %v650_v46  ;;  %vm5929_vm7 = vmand %vm766_vm6, %vm237_vm9 }
  0x77   : > { %330 = vst [vmem:[#allocation2 + $0x68] sm:$0x1] %v329_v50  ;;  %v661_v50 = vld [vmem:[#allocation3 + $0xc] sm:$0x8]  ;;  %v659_v52 = vsel %vm5671_vm8, 0, %v658_v48 }
  0x78   : > { %333 = vst [vmem:[#allocation2 + $0x70] sm:$0x1] %v332_v51  ;;  %v664_v51 = vld [vmem:[#allocation3 + $0x14] sm:$0x8]  ;;  %v662_v54 = vsel %vm5671_vm8, 0, %v661_v50 }
  0x79   : > { %341 = vst [vmem:[#allocation2 + $0x4] sm:$0x8] %v340_v53  ;;  %v667_v53 = vld [vmem:[#allocation3 + $0x1c] sm:$0x8]  ;;  %v665_v56 = vsel %vm5671_vm8, 0, %v664_v51 }
  0x7a   : > { %344 = vst [vmem:[#allocation2 + $0xc] sm:$0x8] %v343_v55  ;;  %v670_v55 = vld [vmem:[#allocation3 + $0x24] sm:$0x8]  ;;  %v668_v15 = vsel %vm5671_vm8, 0, %v667_v53 }
  0x7b   : > { %347 = vst [vmem:[#allocation2 + $0x14] sm:$0x8] %v346_v57  ;;  %v673_v57 = vld [vmem:[#allocation3 + $0x2c] sm:$0x8]  ;;  %v757_v23 = vld [vmem:[#allocation3 + $0x78] sm:$0x1] }
  0x7c   : > { %350 = vst [vmem:[#allocation2 + $0x1c] sm:$0x8] %v349_v59  ;;  %v671_v59 = vsel %vm5671_vm8, 0, %v670_v55  ;;  %v758_v18 = vsel %vm5817_vm3, 0, %v757_v23  ;;  %v396_v25 = vld [vmem:[#allocation2 + $0x8] sm:$0x1] }
  0x7d   : > { %353 = vst [vmem:[#allocation2 + $0x24] sm:$0x8] %v352_v61  ;;  %v674_v61 = vsel %vm5671_vm8, 0, %v673_v57  ;;  %v397_v28 = vsel %vm5810_vm1, 0, %v396_v25  ;;  %v420_v38 = vld [vmem:[#allocation2 + $0x48] sm:$0x1] }
  0x7e   : > { %356 = vst [vmem:[#allocation2 + $0x2c] sm:$0x8] %v355_v63  ;;  %v677_v63 = vsel %vm5671_vm8, 0, %v676_v58  ;;  %v423_v40 = vld [vmem:[#allocation2 + $0x50] sm:$0x1] }
  0x7f   : > { %359 = vst [vmem:[#allocation2 + $0x34] sm:$0x8] %v358_v2  ;;  %v680_v2 = vsel %vm5671_vm8, 0, %v679_v60  ;;  %v426_v42 = vld [vmem:[#allocation2 + $0x58] sm:$0x1] }
  0x80   : > { %362 = vst [vmem:[#allocation2 + $0x3c] sm:$0x8] %v361_v6  ;;  %v683_v6 = vsel %vm5671_vm8, 0, %v682_v62  ;;  %v429_v44 = vld [vmem:[#allocation2 + $0x60] sm:$0x1] }
  0x81   : > { %365 = vst [vmem:[#allocation2 + $0x44] sm:$0x8] %v364_v9  ;;  %v686_v9 = vsel %vm5671_vm8, 0, %v685_v1  ;;  %v432_v46 = vld [vmem:[#allocation2 + $0x68] sm:$0x1] }
  0x82   : > { %368 = vst [vmem:[#allocation2 + $0x4c] sm:$0x8] %v367_v11  ;;  %v689_v11 = vsel %vm5671_vm8, 0, %v688_v4  ;;  %v435_v48 = vld [vmem:[#allocation2 + $0x70] sm:$0x1]  ;;  %v433_v51 = vsel %vm5810_vm1, 0, %v432_v46 }
  0x83   : > { %371 = vst [vmem:[#allocation2 + $0x54] sm:$0x8] %v370_v14  ;;  %v692_v14 = vsel %vm5671_vm8, 0, %v691_v7  ;;  %v436_v53 = vsel %vm5810_vm1, 0, %v435_v48 }
  0x84   : > { %374 = vst [vmem:[#allocation2 + $0x5c] sm:$0x8] %v373_v17  ;;  %v695_v17 = vsel %vm5671_vm8, 0, %v694_v10 }
  0x85   : > { %377 = vst [vmem:[#allocation2 + $0x64] sm:$0x8] %v376_v8 }
  0x86   : > { %380 = vst [vmem:[#allocation2 + $0x6c] sm:$0x8] %v379_v20  ;;  %v438_v20 = vld [vmem:[#allocation2 + $0x78] sm:$0x1] }
  0x87   : > { %383 = vst [vmem:[#allocation2 + $0x74] sm:$0x8] %v382_v22  ;;  %v439_v3 = vsel %vm5810_vm1, 0, %v438_v20 }
  0x88   : > { %446 = vst.msk [vmem:[#allocation2 + $0x7c] sm:$0xf] %vm444_vm14, %v5433_v0 }
  0x89   : > { %610 = vst [vmem:[#allocation3] sm:$0x1] %v609_v24  ;;  %v393_v24 = vld [vmem:[#allocation2] sm:$0x1] }
  0x8a   : > { %613 = vst [vmem:[#allocation3 + $0x8] sm:$0x1] %v612_v26  ;;  %v399_v26 = vld [vmem:[#allocation2 + $0x10] sm:$0x1]  ;;  %v394_v27 = vsel %vm5810_vm1, 0, %v393_v24 }
  0x8b   : > { %616 = vst [vmem:[#allocation3 + $0x10] sm:$0x1] %v615_v12  ;;  %v402_v12 = vld [vmem:[#allocation2 + $0x18] sm:$0x1]  ;;  %v400_v30 = vsel %vm5810_vm1, 0, %v399_v26 }
  0x8c   : > { %619 = vst [vmem:[#allocation3 + $0x18] sm:$0x1] %v618_v29  ;;  %v405_v29 = vld [vmem:[#allocation2 + $0x20] sm:$0x1]  ;;  %v403_v32 = vsel %vm5810_vm1, 0, %v402_v12 }
  0x8d   : > { %622 = vst [vmem:[#allocation3 + $0x20] sm:$0x1] %v621_v31  ;;  %v408_v31 = vld [vmem:[#allocation2 + $0x28] sm:$0x1]  ;;  %v406_v34 = vsel %vm5810_vm1, 0, %v405_v29 }
  0x8e   : > { %625 = vst [vmem:[#allocation3 + $0x28] sm:$0x1] %v624_v33  ;;  %v411_v33 = vld [vmem:[#allocation2 + $0x30] sm:$0x1]  ;;  %v409_v36 = vsel %vm5810_vm1, 0, %v408_v31 }
  0x8f   : > { %628 = vst [vmem:[#allocation3 + $0x30] sm:$0x1] %v627_v35  ;;  %v414_v35 = vld [vmem:[#allocation2 + $0x38] sm:$0x1]  ;;  %v491_v8 = vld [vmem:[#allocation2 + $0x74] sm:$0x8] }
  0x90   : > { %631 = vst [vmem:[#allocation3 + $0x38] sm:$0x1] %v630_v37  ;;  %v417_v37 = vld [vmem:[#allocation2 + $0x40] sm:$0x1] }
  0x91   : > { %634 = vst [vmem:[#allocation3 + $0x40] sm:$0x1] %v633_v39  ;;  %v415_v39 = vsel %vm5810_vm1, 0, %v414_v35  ;;  %v715_v24 = vld [vmem:[#allocation3 + $0x8] sm:$0x1] }
  0x92   : > { %637 = vst [vmem:[#allocation3 + $0x48] sm:$0x1] %v636_v41  ;;  %v418_v41 = vsel %vm5810_vm1, 0, %v417_v37  ;;  %v718_v26 = vld [vmem:[#allocation3 + $0x10] sm:$0x1] }
  0x93   : > { %640 = vst [vmem:[#allocation3 + $0x50] sm:$0x1] %v639_v43  ;;  %v421_v43 = vsel %vm5810_vm1, 0, %v420_v38  ;;  %v721_v12 = vld [vmem:[#allocation3 + $0x18] sm:$0x1] }
  0x94   : > { %643 = vst [vmem:[#allocation3 + $0x58] sm:$0x1] %v642_v45  ;;  %v424_v45 = vsel %vm5810_vm1, 0, %v423_v40  ;;  %v724_v29 = vld [vmem:[#allocation3 + $0x20] sm:$0x1] }
  0x95   : > { %646 = vst [vmem:[#allocation3 + $0x60] sm:$0x1] %v645_v47  ;;  %v427_v47 = vsel %vm5810_vm1, 0, %v426_v42  ;;  %v727_v31 = vld [vmem:[#allocation3 + $0x28] sm:$0x1] }
  0x96   : > { %649 = vst [vmem:[#allocation3 + $0x68] sm:$0x1] %v648_v49  ;;  %v430_v49 = vsel %vm5810_vm1, 0, %v429_v44 }
  0x97   : > { %652 = vst [vmem:[#allocation3 + $0x70] sm:$0x1] %v651_v5  ;;  %v449_v5 = vld [vmem:[#allocation2 + $0x4] sm:$0x8]  ;;  %v733_v35 = vld [vmem:[#allocation3 + $0x38] sm:$0x1] }
  0x98   : > { %660 = vst [vmem:[#allocation3 + $0x4] sm:$0x8] %v659_v52  ;;  %v452_v52 = vld [vmem:[#allocation2 + $0xc] sm:$0x8]  ;;  %v450_v55 = vsel %vm5862_vm5, 0, %v449_v5 }
  0x99   : > { %663 = vst [vmem:[#allocation3 + $0xc] sm:$0x8] %v662_v54  ;;  %v455_v54 = vld [vmem:[#allocation2 + $0x14] sm:$0x8]  ;;  %v453_v57 = vsel %vm5862_vm5, 0, %v452_v52 }
  0x9a   : > { %666 = vst [vmem:[#allocation3 + $0x14] sm:$0x8] %v665_v56  ;;  %v458_v56 = vld [vmem:[#allocation2 + $0x1c] sm:$0x8]  ;;  %v456_v58 = vsel %vm5862_vm5, 0, %v455_v54 }
  0x9b   : > { %669 = vst [vmem:[#allocation3 + $0x1c] sm:$0x8] %v668_v15  ;;  %v461_v15 = vld [vmem:[#allocation2 + $0x24] sm:$0x8]  ;;  %v459_v60 = vsel %vm5862_vm5, 0, %v458_v56 }
  0x9c   : > { %672 = vst [vmem:[#allocation3 + $0x24] sm:$0x8] %v671_v59  ;;  %v464_v59 = vld [vmem:[#allocation2 + $0x2c] sm:$0x8]  ;;  %v462_v62 = vsel %vm5862_vm5, 0, %v461_v15 }
  0x9d   : > { %675 = vst [vmem:[#allocation3 + $0x2c] sm:$0x8] %v674_v61  ;;  %v467_v61 = vld [vmem:[#allocation2 + $0x34] sm:$0x8]  ;;  %v465_v1 = vsel %vm5862_vm5, 0, %v464_v59 }
  0x9e   : > { %678 = vst [vmem:[#allocation3 + $0x34] sm:$0x8] %v677_v63  ;;  %v470_v63 = vld [vmem:[#allocation2 + $0x3c] sm:$0x8]  ;;  %v468_v4 = vsel %vm5862_vm5, 0, %v467_v61 }
  0x9f   : > { %681 = vst [vmem:[#allocation3 + $0x3c] sm:$0x8] %v680_v2  ;;  %v473_v2 = vld [vmem:[#allocation2 + $0x44] sm:$0x8]  ;;  %v471_v7 = vsel %vm5862_vm5, 0, %v470_v63 }
  0xa0   : > { %684 = vst [vmem:[#allocation3 + $0x44] sm:$0x8] %v683_v6  ;;  %v476_v6 = vld [vmem:[#allocation2 + $0x4c] sm:$0x8]  ;;  %v474_v10 = vsel %vm5862_vm5, 0, %v473_v2 }
  0xa1   : > { %687 = vst [vmem:[#allocation3 + $0x4c] sm:$0x8] %v686_v9  ;;  %v479_v9 = vld [vmem:[#allocation2 + $0x54] sm:$0x8]  ;;  %v477_v13 = vsel %vm5862_vm5, 0, %v476_v6 }
  0xa2   : > { %690 = vst [vmem:[#allocation3 + $0x54] sm:$0x8] %v689_v11  ;;  %v482_v11 = vld [vmem:[#allocation2 + $0x5c] sm:$0x8]  ;;  %v480_v16 = vsel %vm5862_vm5, 0, %v479_v9 }
  0xa3   : > { %693 = vst [vmem:[#allocation3 + $0x5c] sm:$0x8] %v692_v14  ;;  %v485_v14 = vld [vmem:[#allocation2 + $0x64] sm:$0x8]  ;;  %v736_v37 = vld [vmem:[#allocation3 + $0x40] sm:$0x1] }
  0xa4   : > { %696 = vst [vmem:[#allocation3 + $0x64] sm:$0x8] %v695_v17  ;;  %v488_v17 = vld [vmem:[#allocation2 + $0x6c] sm:$0x8]  ;;  %v486_v20 = vsel %vm5862_vm5, 0, %v485_v14 }
  0xa5   : > { %699 = vst [vmem:[#allocation3 + $0x6c] sm:$0x8] %v698_v19  ;;  %v483_v19 = vsel %vm5862_vm5, 0, %v482_v11  ;;  %v489_v23 = vsel %vm5862_vm5, 0, %v488_v17  ;;  %v739_v38 = vld [vmem:[#allocation3 + $0x48] sm:$0x1] }
  0xa6   : > { %702 = vst [vmem:[#allocation3 + $0x74] sm:$0x8] %v701_v21  ;;  %v494_v21 = vld [vmem:[#allocation2 + $0x7c] sm:$0x8]  ;;  %v742_v40 = vld [vmem:[#allocation3 + $0x50] sm:$0x1] }
  0xa7   : > { %765 = vst.msk [vmem:[#allocation3 + $0x7c] sm:$0xf] %vm763_vm2, %v5433_v0  ;;  %v495_v25 = vsel %vm5862_vm5, 0, %v494_v21  ;;  %v745_v42 = vld [vmem:[#allocation3 + $0x58] sm:$0x1] }
  0xa8   : > { %440 = vst [vmem:[#allocation2 + $0x78] sm:$0x1] %v439_v3  ;;  %v712_v3 = vld [vmem:[#allocation3] sm:$0x1]  ;;  %v751_v46 = vld [vmem:[#allocation3 + $0x68] sm:$0x1] }
  0xa9   : > { %442 = vst.msk [vmem:[#allocation2 + $0x78] sm:$0xf] %vm441_vm12, %v5433_v0  ;;  %v748_v44 = vld [vmem:[#allocation3 + $0x60] sm:$0x1]  ;;  %v754_v48 = vld [vmem:[#allocation3 + $0x70] sm:$0x1] }
  0xaa   : > { %759 = vst [vmem:[#allocation3 + $0x78] sm:$0x1] %v758_v18  ;;  %v492_v18 = vsel %vm5862_vm5, 0, %v491_v8  ;;  %v768_v5 = vld [vmem:[#allocation3 + $0x4] sm:$0x8] }
  0xab   : > { %445 = vst.msk [vmem:[#allocation2 + $0x78] sm:$0xf] %vm444_vm14, %v5433_v0  ;;  %v771_v52 = vld [vmem:[#allocation3 + $0xc] sm:$0x8]  ;;  %v774_v54 = vld [vmem:[#allocation3 + $0x14] sm:$0x8] }
  0xac   : > { %761 = vst.msk [vmem:[#allocation3 + $0x78] sm:$0xf] %vm760_vm13, %v5433_v0  ;;  %v777_v56 = vld [vmem:[#allocation3 + $0x1c] sm:$0x8]  ;;  %v780_v15 = vld [vmem:[#allocation3 + $0x24] sm:$0x8] }
  0xad   : > { %764 = vst.msk [vmem:[#allocation3 + $0x78] sm:$0xf] %vm763_vm2, %v5433_v0  ;;  %v412_v0 = vsel %vm5810_vm1, 0, %v411_v33  ;;  %v730_v33 = vld [vmem:[#allocation3 + $0x30] sm:$0x1]  ;;  %v778_v22 = vsel %vm5929_vm7, 0, %v777_v56 }
  0xae   : > { %395 = vst [vmem:[#allocation2] sm:$0x1] %v394_v27  ;;  %v713_v27 = vsel %vm5817_vm3, 0, %v712_v3  ;;  %v783_v59 = vld [vmem:[#allocation3 + $0x2c] sm:$0x8]  ;;  %v781_v61 = vsel %vm5929_vm7, 0, %v780_v15 }
  0xaf   : > { %398 = vst [vmem:[#allocation2 + $0x8] sm:$0x1] %v397_v28  ;;  %v716_v28 = vsel %vm5817_vm3, 0, %v715_v24  ;;  %v784_v63 = vsel %vm5929_vm7, 0, %v783_v59 }
  0xb0   : > { %401 = vst [vmem:[#allocation2 + $0x10] sm:$0x1] %v400_v30  ;;  %v719_v30 = vsel %vm5817_vm3, 0, %v718_v26 }
  0xb1   : > { %404 = vst [vmem:[#allocation2 + $0x18] sm:$0x1] %v403_v32  ;;  %v722_v32 = vsel %vm5817_vm3, 0, %v721_v12 }
  0xb2   : > { %407 = vst [vmem:[#allocation2 + $0x20] sm:$0x1] %v406_v34  ;;  %v725_v34 = vsel %vm5817_vm3, 0, %v724_v29 }
  0xb3   : > { %410 = vst [vmem:[#allocation2 + $0x28] sm:$0x1] %v409_v36  ;;  %v728_v36 = vsel %vm5817_vm3, 0, %v727_v31 }
  0xb4   : > { %413 = vst [vmem:[#allocation2 + $0x30] sm:$0x1] %v412_v0  ;;  %v731_v0 = vsel %vm5817_vm3, 0, %v730_v33 }
  0xb5   : > { %416 = vst [vmem:[#allocation2 + $0x38] sm:$0x1] %v415_v39  ;;  %v734_v39 = vsel %vm5817_vm3, 0, %v733_v35 }
  0xb6   : > { %419 = vst [vmem:[#allocation2 + $0x40] sm:$0x1] %v418_v41  ;;  %v737_v41 = vsel %vm5817_vm3, 0, %v736_v37 }
  0xb7   : > { %422 = vst [vmem:[#allocation2 + $0x48] sm:$0x1] %v421_v43  ;;  %v740_v43 = vsel %vm5817_vm3, 0, %v739_v38 }
  0xb8   : > { %425 = vst [vmem:[#allocation2 + $0x50] sm:$0x1] %v424_v45  ;;  %v743_v45 = vsel %vm5817_vm3, 0, %v742_v40 }
  0xb9   : > { %428 = vst [vmem:[#allocation2 + $0x58] sm:$0x1] %v427_v47  ;;  %v746_v47 = vsel %vm5817_vm3, 0, %v745_v42 }
  0xba   : > { %431 = vst [vmem:[#allocation2 + $0x60] sm:$0x1] %v430_v49  ;;  %v749_v49 = vsel %vm5817_vm3, 0, %v748_v44 }
  0xbb   : > { %434 = vst [vmem:[#allocation2 + $0x68] sm:$0x1] %v433_v51  ;;  %v752_v51 = vsel %vm5817_vm3, 0, %v751_v46 }
  0xbc   : > { %437 = vst [vmem:[#allocation2 + $0x70] sm:$0x1] %v436_v53  ;;  %v755_v53 = vsel %vm5817_vm3, 0, %v754_v48 }
  0xbd   : > { %451 = vst [vmem:[#allocation2 + $0x4] sm:$0x8] %v450_v55  ;;  %v769_v55 = vsel %vm5929_vm7, 0, %v768_v5 }
  0xbe   : > { %454 = vst [vmem:[#allocation2 + $0xc] sm:$0x8] %v453_v57  ;;  %v772_v57 = vsel %vm5929_vm7, 0, %v771_v52 }
  0xbf   : > { %457 = vst [vmem:[#allocation2 + $0x14] sm:$0x8] %v456_v58  ;;  %v775_v58 = vsel %vm5929_vm7, 0, %v774_v54 }
  0xc0   : > { %460 = vst [vmem:[#allocation2 + $0x1c] sm:$0x8] %v459_v60  ;;  %v786_v60 = vld [vmem:[#allocation3 + $0x34] sm:$0x8] }
  0xc1   : > { %463 = vst [vmem:[#allocation2 + $0x24] sm:$0x8] %v462_v62  ;;  %v789_v62 = vld [vmem:[#allocation3 + $0x3c] sm:$0x8]  ;;  %v787_v2 = vsel %vm5929_vm7, 0, %v786_v60 }
  0xc2   : > { %466 = vst [vmem:[#allocation2 + $0x2c] sm:$0x8] %v465_v1  ;;  %v792_v1 = vld [vmem:[#allocation3 + $0x44] sm:$0x8]  ;;  %v790_v6 = vsel %vm5929_vm7, 0, %v789_v62 }
  0xc3   : > { %469 = vst [vmem:[#allocation2 + $0x34] sm:$0x8] %v468_v4  ;;  %v795_v4 = vld [vmem:[#allocation3 + $0x4c] sm:$0x8]  ;;  %v793_v9 = vsel %vm5929_vm7, 0, %v792_v1 }
  0xc4   : > { %472 = vst [vmem:[#allocation2 + $0x3c] sm:$0x8] %v471_v7  ;;  %v798_v7 = vld [vmem:[#allocation3 + $0x54] sm:$0x8]  ;;  %v796_v11 = vsel %vm5929_vm7, 0, %v795_v4 }
  0xc5   : > { %475 = vst [vmem:[#allocation2 + $0x44] sm:$0x8] %v474_v10  ;;  %v801_v10 = vld [vmem:[#allocation3 + $0x5c] sm:$0x8]  ;;  %v799_v14 = vsel %vm5929_vm7, 0, %v798_v7 }
  0xc6   : > { %478 = vst [vmem:[#allocation2 + $0x4c] sm:$0x8] %v477_v13  ;;  %v804_v13 = vld [vmem:[#allocation3 + $0x64] sm:$0x8]  ;;  %v802_v17 = vsel %vm5929_vm7, 0, %v801_v10 }
  0xc7   : > { %481 = vst [vmem:[#allocation2 + $0x54] sm:$0x8] %v480_v16  ;;  %v807_v16 = vld [vmem:[#allocation3 + $0x6c] sm:$0x8]  ;;  %v805_v8 = vsel %vm5929_vm7, 0, %v804_v13 }
  0xc8   : > { %484 = vst [vmem:[#allocation2 + $0x5c] sm:$0x8] %v483_v19  ;;  %v810_v19 = vld [vmem:[#allocation3 + $0x74] sm:$0x8]  ;;  %v808_v21 = vsel %vm5929_vm7, 0, %v807_v16 }
  0xc9   : > { %487 = vst [vmem:[#allocation2 + $0x64] sm:$0x8] %v486_v20  ;;  %v813_v20 = vld [vmem:[#allocation3 + $0x7c] sm:$0x8] }
  0xca   : > { %490 = vst [vmem:[#allocation2 + $0x6c] sm:$0x8] %v489_v23  ;;  %v811_v23 = vsel %vm5929_vm7, 0, %v810_v19  ;;  %v814_v3 = vsel %vm5929_vm7, 0, %v813_v20 }
  0xcb   : > { %493 = vst [vmem:[#allocation2 + $0x74] sm:$0x8] %v492_v18 }
  0xcc   : > { %496 = vst [vmem:[#allocation2 + $0x7c] sm:$0x8] %v495_v25 }
  0xcd   : > { %714 = vst [vmem:[#allocation3] sm:$0x1] %v713_v27 }
  0xce   : > { %717 = vst [vmem:[#allocation3 + $0x8] sm:$0x1] %v716_v28 }
  0xcf   : > { %720 = vst [vmem:[#allocation3 + $0x10] sm:$0x1] %v719_v30 }
  0xd0   : > { %723 = vst [vmem:[#allocation3 + $0x18] sm:$0x1] %v722_v32 }
  0xd1   : > { %726 = vst [vmem:[#allocation3 + $0x20] sm:$0x1] %v725_v34 }
  0xd2   : > { %729 = vst [vmem:[#allocation3 + $0x28] sm:$0x1] %v728_v36 }
  0xd3   : > { %732 = vst [vmem:[#allocation3 + $0x30] sm:$0x1] %v731_v0 }
  0xd4   : > { %735 = vst [vmem:[#allocation3 + $0x38] sm:$0x1] %v734_v39 }
  0xd5   : > { %738 = vst [vmem:[#allocation3 + $0x40] sm:$0x1] %v737_v41 }
  0xd6   : > { %741 = vst [vmem:[#allocation3 + $0x48] sm:$0x1] %v740_v43 }
  0xd7   : > { %744 = vst [vmem:[#allocation3 + $0x50] sm:$0x1] %v743_v45 }
  0xd8   : > { %747 = vst [vmem:[#allocation3 + $0x58] sm:$0x1] %v746_v47 }
  0xd9   : > { %750 = vst [vmem:[#allocation3 + $0x60] sm:$0x1] %v749_v49 }
  0xda   : > { %753 = vst [vmem:[#allocation3 + $0x68] sm:$0x1] %v752_v51 }
  0xdb   : > { %756 = vst [vmem:[#allocation3 + $0x70] sm:$0x1] %v755_v53 }
  0xdc   : > { %770 = vst [vmem:[#allocation3 + $0x4] sm:$0x8] %v769_v55 }
  0xdd   : > { %773 = vst [vmem:[#allocation3 + $0xc] sm:$0x8] %v772_v57 }
  0xde   : > { %776 = vst [vmem:[#allocation3 + $0x14] sm:$0x8] %v775_v58 }
  0xdf   : > { %779 = vst [vmem:[#allocation3 + $0x1c] sm:$0x8] %v778_v22 }
  0xe0   : > { %782 = vst [vmem:[#allocation3 + $0x24] sm:$0x8] %v781_v61 }
  0xe1   : > { %785 = vst [vmem:[#allocation3 + $0x2c] sm:$0x8] %v784_v63 }
  0xe2   : > { %788 = vst [vmem:[#allocation3 + $0x34] sm:$0x8] %v787_v2 }
  0xe3   : > { %791 = vst [vmem:[#allocation3 + $0x3c] sm:$0x8] %v790_v6 }
  0xe4   : > { %794 = vst [vmem:[#allocation3 + $0x44] sm:$0x8] %v793_v9 }
  0xe5   : > { %797 = vst [vmem:[#allocation3 + $0x4c] sm:$0x8] %v796_v11 }
  0xe6   : > { %800 = vst [vmem:[#allocation3 + $0x54] sm:$0x8] %v799_v14 }
  0xe7   : > { %803 = vst [vmem:[#allocation3 + $0x5c] sm:$0x8] %v802_v17 }
  0xe8   : > { %806 = vst [vmem:[#allocation3 + $0x64] sm:$0x8] %v805_v8 }
  0xe9   : > { %809 = vst [vmem:[#allocation3 + $0x6c] sm:$0x8] %v808_v21 }
  0xea   : > { %812 = vst [vmem:[#allocation3 + $0x74] sm:$0x8] %v811_v23 }
  0xeb   : > { %815 = vst [vmem:[#allocation3 + $0x7c] sm:$0x8] %v814_v3 }
  0xec PF: > { %v820_v18 = vld [vmem:[%s5478_s18 + $0x20] sm:$0xff]  ;;  %v818_v24 = vld [vmem:[%s5478_s18 + $0x10] sm:$0xff]  ;;  %s5434_s22 = smov 4   ;;  %v821_v28 = vld [vmem:[%s5478_s18 + $0x28] sm:$0xff]  ;;  %vm1154_vm9 = vcmask 27648   ;;  %s5435_s23 = smov 8  }
  0xed   : > { %v816_v25 = vld [vmem:[%s5478_s18] sm:$0xff]  ;;  %v5972_v26 = vpack.c.bf16 %v820_v18, %v820_v18  ;;  %v5974_v27 = vpack.c.bf16 %v818_v24, %v818_v24  ;;  %v819_v29 = vld [vmem:[%s5478_s18 + $0x18] sm:$0xff]  ;;  %v817_v30 = vld [vmem:[%s5478_s18 + $0x8] sm:$0xff]  ;;  %v5987_v31 = vpack.c.bf16 %v821_v28, %v821_v28  ;;  %vm1155_vm8 = vsmask.f32 7938  ;;  %s5436_s24 = smov 12  }
  0xee   : > { %v5976_v12 = vpack.c.bf16 %v816_v25, %v816_v25  ;;  %v5989_v32 = vpack.c.bf16 %v819_v29, %v819_v29  ;;  %v5991_v33 = vpack.c.bf16 %v817_v30, %v817_v30  ;;  %v824_v34 = vld [vmem:[%s5478_s18 + $0x40] sm:$0xff]  ;;  %v823_v35 = vld [vmem:[%s5478_s18 + $0x38] sm:$0xff]  ;;  %v822_v36 = vld [vmem:[%s5478_s18 + $0x30] sm:$0xff]  ;;  %vm880_vm11 = vsmask.f32 256  ;;  %s5437_s25 = smov 16  }
  0xef   : > { %9502 = vst [vmem:[#allocation4_spill] sm:$0xff] %v5972_v26  ;;  %1256 = vrot.lane.b32.xlu2 %v5972_v26, %s5434_s22  ;;  %1252 = vrot.lane.b32.xlu1 %v5974_v27, %s5434_s22  ;;  %v6002_v37 = vpack.c.bf16 %v824_v34, %v824_v34  ;;  %v6004_v0 = vpack.c.bf16 %v823_v35, %v823_v35  ;;  %v827_v39 = vld [vmem:[%s5478_s18 + $0x58] sm:$0xff]  ;;  %v826_v40 = vld [vmem:[%s5478_s18 + $0x50] sm:$0xff]  ;;  %v916_v6 = vshrl.u32 %v5972_v26, 16  ;;  %v919_v10 = vshll.u32 %v5972_v26, 16  ;;  %vm6108_vm10 = vmand %vm1154_vm9, %vm1155_vm8  ;;  %s5438_s26 = smov 20  }
  0xf0   : > { %9503 = vst [vmem:[#allocation5_spill] sm:$0xff] %v5974_v27  ;;  %1248 = vrot.lane.b32.xlu0 %v5976_v12, %s5434_s22  ;;  %v6006_v38 = vpack.c.bf16 %v822_v36, %v822_v36  ;;  %v825_v41 = vld [vmem:[%s5478_s18 + $0x48] sm:$0xff]  ;;  %v6017_v42 = vpack.c.bf16 %v827_v39, %v827_v39  ;;  %v6019_v43 = vpack.c.bf16 %v826_v40, %v826_v40  ;;  %v830_v45 = vld [vmem:[%s5478_s18 + $0x70] sm:$0xff]  ;;  %v828_v47 = vld [vmem:[%s5478_s18 + $0x60] sm:$0xff]  ;;  %v900_v14 = vshrl.u32 %v5974_v27, 16  ;;  %s5439_s27 = smov 24  }
  0xf1   : > { %9504 = vst [vmem:[#allocation6_spill] sm:$0xff] %v5976_v12  ;;  %v6021_v44 = vpack.c.bf16 %v825_v41, %v825_v41  ;;  %v829_v46 = vld [vmem:[%s5478_s18 + $0x68] sm:$0xff]  ;;  %v6032_v48 = vpack.c.bf16 %v830_v45, %v830_v45  ;;  %v6036_v50 = vpack.c.bf16 %v828_v47, %v828_v47  ;;  %v832_v51 = vld [vmem:[%s5478_s18 + $0x80] sm:$0xff]  ;;  %v831_v52 = vld [vmem:[%s5478_s18 + $0x78] sm:$0xff]  ;;  %v918_v11 = vrot.slane %v916_v6, 7  ;;  %s5440_s28 = smov 28  }
  0xf2   : > { %9505 = vst [vmem:[#allocation7_spill] sm:$0xff] %v5987_v31  ;;  %v6034_v49 = vpack.c.bf16 %v829_v46, %v829_v46  ;;  %v833_v5 = vld [vmem:[%s5478_s18 + $0x88] sm:$0xff]  ;;  %v6049_v54 = vpack.c.bf16 %v832_v51, %v832_v51  ;;  %v6051_v55 = vpack.c.bf16 %v831_v52, %v831_v52  ;;  %v836_v56 = vld [vmem:[%s5478_s18 + $0xa0] sm:$0xff]  ;;  %v835_v57 = vld [vmem:[%s5478_s18 + $0x98] sm:$0xff]  ;;  %v903_v16 = vshll.u32 %v5974_v27, 16  ;;  %s5441_s29 = smov 32  }
  0xf3   : > { %9506 = vst [vmem:[#allocation8_spill] sm:$0xff] %v5989_v32  ;;  %v6047_v53 = vpack.c.bf16 %v833_v5, %v833_v5  ;;  %v834_v15 = vld [vmem:[%s5478_s18 + $0x90] sm:$0xff]  ;;  %v6062_v58 = vpack.c.bf16 %v836_v56, %v836_v56  ;;  %v6064_v59 = vpack.c.bf16 %v835_v57, %v835_v57  ;;  %v839_v60 = vld [vmem:[%s5478_s18 + $0xb8] sm:$0xff]  ;;  %v837_v62 = vld [vmem:[%s5478_s18 + $0xa8] sm:$0xff]  ;;  %v884_v8 = vshrl.u32 %v5976_v12, 16  ;;  %s5442_s9 = smov 40  }
  0xf4   : > { %9507 = vst [vmem:[#allocation9_spill] sm:$0xff] %v5991_v33  ;;  %v6066_v22 = vpack.c.bf16 %v834_v15, %v834_v15  ;;  %v838_v61 = vld [vmem:[%s5478_s18 + $0xb0] sm:$0xff]  ;;  %v6077_v63 = vpack.c.bf16 %v839_v60, %v839_v60  ;;  %v6081_v2 = vpack.c.bf16 %v837_v62, %v837_v62  ;;  %v841_v7 = vld [vmem:[%s5478_s18 + $0xc8] sm:$0xff]  ;;  %v840_v9 = vld [vmem:[%s5478_s18 + $0xc0] sm:$0xff]  ;;  %v9227_v20 = vshll.u32 %v5976_v12, 16  ;;  %s5443_s10 = smov 48  }
  0xf5   : > { %9508 = vst [vmem:[#allocation10_spill] sm:$0xff] %v6002_v37  ;;  %v6079_v1 = vpack.c.bf16 %v838_v61, %v838_v61  ;;  %v842_v4 = vld [vmem:[%s5478_s18 + $0xd0] sm:$0xff]  ;;  %v1166_v17 = vld [vmem:[#allocation2 + $0x18] sm:$0xf]  ;;  %v6098_v19 = vpack.c.bf16 %v841_v7, %v841_v7  ;;  %v6102_v21 = vor.u32 %v919_v10, %v918_v11  ;;  %v6104_v23 = vpack.c.bf16 %v840_v9, %v840_v9  ;;  %v845_v29 = vld [vmem:[%s5478_s18 + $0xe8] sm:$0xff]  ;;  %s5444_s11 = smov 56  }
  0xf6   : > { %9509 = vst [vmem:[#allocation11_spill] sm:$0xff] %v6004_v0  ;;  %v6094_v13 = vpack.c.bf16 %v842_v4, %v842_v4  ;;  %v1381_v24 = vrot.slane %v900_v14, 4  ;;  %v1382_v25 = vrot.slane %v903_v16, 5  ;;  %v9225_v28 = vshrl.u32 %v5991_v33, 16  ;;  %v844_v30 = vld [vmem:[%s5478_s18 + $0xe0] sm:$0xff]  ;;  %v843_v40 = vld [vmem:[%s5478_s18 + $0xd8] sm:$0xff] }
  0xf7   : > { %1258 = vrot.lane.b32.xlu2 %v5987_v31, %s5434_s22  ;;  %1254 = vrot.lane.b32.xlu1 %v5989_v32, %s5434_s22  ;;  %9510 = vst [vmem:[#allocation12_spill] sm:$0xff] %v6006_v38  ;;  %v1167_v18 = vsel %vm6108_vm10, %v6102_v21, %v1166_v17  ;;  %v9223_v34 = vshll.u32 %v5991_v33, 16  ;;  %v1372_v35 = vrot.slane %v884_v8, 4  ;;  %v1373_v36 = vrot.slane %v9227_v20, 5  ;;  %s5445_s13 = smov 64  }
  0xf8   : > { %1250 = vrot.lane.b32.xlu0 %v5991_v33, %s5434_s22  ;;  %9511 = vst [vmem:[#allocation13_spill] sm:$0xff] %v6017_v42  ;;  %v924_v39 = vshrl.u32 %v5987_v31, 16  ;;  %v9224_v41 = vshll.u32 %v5989_v32, 16  ;;  %v927_v45 = vshll.u32 %v5987_v31, 16  ;;  %vm881_vm12 = vsmask.f32 4368 }
  0xf9   : > { %9512 = vst [vmem:[#allocation14_spill] sm:$0xff] %v6019_v43  ;;  %v922_v47 = vrot.slane %v918_v11, 4  ;;  %v6137_v5 = vpack.c.bf16 %v845_v29, %v845_v29  ;;  %v6139_v51 = vpack.c.bf16 %v844_v30, %v844_v30  ;;  %v1383_v52 = vor.u32 %v1382_v25, %v1381_v24  ;;  %vm6149_vm15 = vmor %vm880_vm11, %vm881_vm12 }
  0xfa   : > { %9513 = vst [vmem:[#allocation15_spill] sm:$0xff] %v6021_v44  ;;  %v926_v46 = vrot.slane %v924_v39, 7  ;;  %v1376_v56 = vrot.slane %v9223_v34, 5  ;;  %v1378_v57 = vrot.slane %v9225_v28, 4  ;;  %v1374_v15 = vor.u32 %v1373_v36, %v1372_v35 }
  0xfb   : > { %9514 = vst [vmem:[#allocation16_spill] sm:$0xff] %v6032_v48  ;;  %v6145_v61 = vpack.c.bf16 %v843_v40, %v843_v40  ;;  %vm1369_vm13 = vsmask.f32 3328  ;;  %vm1370_vm14 = vsmask.f32 7440  ;;  %v9226_v62 = vshrl.u32 %v5989_v32, 16 }
  0xfc   : > { %9515 = vst [vmem:[#allocation17_spill] sm:$0xff] %v6047_v53  ;;  %v929_v60 = vor.u32 %v927_v45, %v926_v46  ;;  %v9527_v4 = vmov 0  ;;  %v6155_v7 = vrot.slane %v9224_v41, 5  ;;  %v1384_v11 = vrot.slane %v1383_v52, 4  ;;  %vm6169_vm0 = vmor %vm1369_vm13, %vm1370_vm14  ;;  %v1174_v52 = vld [vmem:[#allocation2 + $0x28] sm:$0xf] }
  0xfd   : > { %9516 = vst [vmem:[#allocation18_spill] sm:$0xff] %v6049_v54  ;;  %v9528_v4 = vsel %vm6149_vm15, 4294967295, %v9527_v4  ;;  %v1390_v17 = vrot.slane %v916_v6, 4  ;;  %v948_v24 = vshrl.u32 %v6002_v37, 16  ;;  %v1379_v29 = vor.u32 %v1378_v57, %v1376_v56 }
  0xfe   : > { %9517 = vst [vmem:[#allocation19_spill] sm:$0xff] %v6051_v55  ;;  %v6159_v9 = vsel %vm6149_vm15, %v922_v47, %v929_v60  ;;  %v1375_v30 = vrot.slane %v1374_v15, 4  ;;  %v951_v6 = vshll.u32 %v6002_v37, 16  ;;  %v1396_v35 = vrot.slane %v924_v39, 4 }
  0xff   : > { %1264 = vrot.lane.b32.xlu2 %v6002_v37, %s5434_s22  ;;  %1262 = vrot.lane.b32.xlu1 %v6004_v0, %s5434_s22  ;;  %9518 = vst [vmem:[#allocation20_spill] sm:$0xff] %v6062_v58  ;;  %v1387_v36 = vrot.slane %v9226_v62, 4  ;;  %v6178_v40 = vrot.slane %v948_v24, 7  ;;  %v9229_v46 = vshrl.u32 %v6006_v38, 16  ;;  %v9228_v47 = vshll.u32 %v6006_v38, 16 }
 0x100   : > { %1260 = vrot.lane.b32.xlu0 %v6006_v38, %s5434_s22  ;;  %9519 = vst [vmem:[#allocation21_spill] sm:$0xff] %v6064_v59  ;;  %v6185_v57 = vsel %vm6169_vm0, %v1384_v11, %v6155_v7  ;;  %v6190_v39 = vrot.slane %v1379_v29, 4  ;;  %v1408_v34 = vrot.slane %v948_v24, 4  ;;  %v1409_v41 = vrot.slane %v951_v6, 5 }
 0x101   : > { %9520 = vst [vmem:[#allocation22_spill] sm:$0xff] %v6077_v63  ;;  %v6188_v60 = vor.u32 %v951_v6, %v6178_v40  ;;  %v1388_v62 = vor.u32 %v1387_v36, %v6155_v7  ;;  %v9239_v20 = vshrl.u32 %v6004_v0, 16  ;;  %v6208_v24 = vrot.slane %v900_v14, 7 }
 0x102   : > { %9521 = vst [vmem:[#allocation23_spill] sm:$0xff] %v6081_v2  ;;  %v972_v29 = vshrl.u32 %v6017_v42, 16  ;;  %v886_v6 = vrot.slane %v884_v8, 7  ;;  %v1410_v36 = vor.u32 %v1409_v41, %v1408_v34  ;;  %v975_v8 = vshll.u32 %v6017_v42, 16 }
 0x103   : > { %9522 = vst [vmem:[#allocation24_spill] sm:$0xff] %v6094_v13  ;;  %v1175_v11 = vsel %vm6108_vm10, %v6188_v60, %v1174_v52  ;;  %v6223_v52 = vor.u32 %v903_v16, %v6208_v24  ;;  %v1405_v16 = vrot.slane %v9239_v20, 4  ;;  %v9537_v37 = vshll.u32 %v6019_v43, 16 }
 0x104   : > { %1168 = vst [vmem:[#allocation2 + $0x18] sm:$0xf] %v1167_v18  ;;  %v1391_v18 = vrot.slane %v919_v10, 5  ;;  %v1394_v10 = vrot.slane %v927_v45, 5  ;;  %v6194_v45 = vsel %vm6169_vm0, %v1375_v30, %v1376_v56  ;;  %v1400_v56 = vrot.slane %v9228_v47, 5 }
 0x105   : > { %9525 = vst [vmem:[#allocation25_spill] sm:$0xff] %v6137_v5  ;;  %v964_v30 = vshrl.u32 %v6019_v43, 16  ;;  %v1162_v47 = vld [vmem:[#allocation2 + $0x10] sm:$0xf]  ;;  %v1418_v20 = vrot.slane %v9537_v37, 5  ;;  %vm1338_vm1 = vcmask 60448  }
 0x106   : > { %9526 = vst [vmem:[#allocation26_spill] sm:$0xff] %v6145_v61  ;;  %v1392_v15 = vor.u32 %v1391_v18, %v1390_v17  ;;  %v1397_v28 = vor.u32 %v1396_v35, %v1394_v10  ;;  %v9236_v17 = vshll.u32 %v6004_v0, 16  ;;  %v1399_v18 = vrot.slane %v9229_v46, 4 }
 0x107   : > { %1270 = vrot.lane.b32.xlu2 %v6017_v42, %s5434_s22  ;;  %1268 = vrot.lane.b32.xlu1 %v6019_v43, %s5434_s22  ;;  %9529 = vst [vmem:[#allocation27_spill] sm:$0xff] %v9528_v4  ;;  %v9535_v46 = vshll.u32 %v5976_v12, 16  ;;  %v1163_v14 = vsel %vm6108_vm10, %v6223_v52, %v1162_v47  ;;  %v9554_v31 = vshrl.u32 %v6034_v49, 16  ;;  %v9297_v12 = vshll.u32 %v6079_v1, 16  ;;  %v9620_v4 = vld [vmem:[#allocation12_spill] sm:$0xff] }
 0x108   : > { %1266 = vrot.lane.b32.xlu0 %v6021_v44, %s5434_s22  ;;  %1169 = vst.msk [vmem:[#allocation2 + $0x1c] sm:$0xf] %vm1154_vm9, %v6159_v9  ;;  %v1393_v7 = vrot.slane %v1392_v15, 4  ;;  %v6228_v15 = vrot.slane %v964_v30, 7  ;;  %v1403_v34 = vrot.slane %v9236_v17, 5  ;;  %v1401_v41 = vor.u32 %v1400_v56, %v1399_v18 }
 0x109   : > { %9532 = vst [vmem:[#allocation28_spill] sm:$0xff] %v6185_v57  ;;  %v6232_v35 = vor.u32 %v9535_v46, %v886_v6  ;;  %v6245_v42 = vrot.slane %v1397_v28, 4  ;;  %v1417_v17 = vrot.slane %v964_v30, 4  ;;  %v6254_v56 = vrot.slane %v1388_v62, 4 }
 0x10a   : > { %9533 = vst [vmem:[#allocation29_spill] sm:$0xff] %v6190_v39  ;;  %v6252_v47 = vsel %vm6169_vm0, %v1393_v7, %v1394_v10  ;;  %v1406_v30 = vor.u32 %v1405_v16, %v1403_v34  ;;  %v1402_v37 = vrot.slane %v1401_v41, 4  ;;  %v6268_v7 = vrot.slane %v975_v8, 5 }
 0x10b   : > { %9534 = vst [vmem:[#allocation30_spill] sm:$0xff] %v6194_v45  ;;  %v6270_v62 = vrot.slane %v972_v29, 4  ;;  %v9542_v18 = vshrl.u32 %v5991_v33, 16  ;;  %vm1597_vm2 = vcmask 93248   ;;  %vm1772_vm4 = vcmask 126048  }
 0x10c   : > { %1176 = vst [vmem:[#allocation2 + $0x28] sm:$0xf] %v1175_v11  ;;  %v974_v11 = vrot.slane %v972_v29, 7  ;;  %v9544_v29 = vshll.u32 %v5989_v32, 16  ;;  %vm6769_vm3 = vmand %vm1597_vm2, %vm1369_vm13  ;;  %vm1937_vm6 = vcmask 158848   ;;  %vm2075_vm7 = vcmask 191648  }
 0x10d   : > { %1164 = vst [vmem:[#allocation2 + $0x10] sm:$0xf] %v1163_v14  ;;  %v9540_v14 = vshll.u32 %v6021_v44, 16  ;;  %v894_v26 = vrot.slane %v9542_v18, 7  ;;  %v906_v18 = vrot.slane %v6208_v24, 4  ;;  %vm6892_vm5 = vmand %vm1772_vm4, %vm1155_vm8  ;;  %vm2385_vm12 = vcmask 257248  }
 0x10e   : > { %9536 = vst [vmem:[#allocation31_spill] sm:$0xff] %v6245_v42  ;;  %vm2750_vm14 = vcmask 1041408  }
 0x10f   : > { %1276 = vrot.lane.b32.xlu2 %v6032_v48, %s5434_s22  ;;  %1274 = vrot.lane.b32.xlu1 %v6034_v49, %s5434_s22  ;;  %9538 = vst [vmem:[#allocation32_spill] sm:$0xff] %v6252_v47 }
 0x110   : > { %1272 = vrot.lane.b32.xlu0 %v6036_v50, %s5434_s22  ;;  %9539 = vst [vmem:[#allocation33_spill] sm:$0xff] %v6254_v56 }
 0x117   : > { %1282 = vrot.lane.b32.xlu2 %v6047_v53, %s5434_s22  ;;  %1280 = vrot.lane.b32.xlu1 %v6049_v54, %s5434_s22 }
 0x118   : > { %1278 = vrot.lane.b32.xlu0 %v6051_v55, %s5434_s22 }
 0x11f   : > { %1288 = vrot.lane.b32.xlu2 %v6062_v58, %s5434_s22  ;;  %1286 = vrot.lane.b32.xlu1 %v6064_v59, %s5434_s22 }
 0x120   : > { %1284 = vrot.lane.b32.xlu0 %v6066_v22, %s5434_s22 }
 0x127   : > { %1294 = vrot.lane.b32.xlu2 %v6077_v63, %s5434_s22  ;;  %1292 = vrot.lane.b32.xlu1 %v6079_v1, %s5434_s22 }
 0x128   : > { %1290 = vrot.lane.b32.xlu0 %v6081_v2, %s5434_s22 }
 0x12f   : > { %1300 = vrot.lane.b32.xlu2 %v6094_v13, %s5434_s22  ;;  %1298 = vrot.lane.b32.xlu1 %v6098_v19, %s5434_s22 }
 0x130   : > { %1296 = vrot.lane.b32.xlu0 %v6104_v23, %s5434_s22 }
 0x137   : > { %1306 = vrot.lane.b32.xlu2 %v6137_v5, %s5434_s22  ;;  %1304 = vrot.lane.b32.xlu1 %v6139_v51, %s5434_s22 }
 0x138   : > { %1302 = vrot.lane.b32.xlu0 %v6145_v61, %s5434_s22 }
 0x13f   : > { %1511 = vrot.lane.b32.xlu2 %v6185_v57, %s5435_s23  ;;  %1509 = vrot.lane.b32.xlu1 %v6190_v39, %s5435_s23  ;;  %v1157_v57 = vld [vmem:[#allocation2 + $0x8] sm:$0xf]  ;;  %v977_v39 = vor.u32 %v975_v8, %v974_v11  ;;  %v6258_v11 = vrot.slane %v9540_v14, 5  ;;  %v996_v14 = vshrl.u32 %v6032_v48, 16  ;;  %v999_v8 = vshll.u32 %v6032_v48, 16 }
 0x140   : > { %1507 = vrot.lane.b32.xlu0 %v6194_v45, %s5435_s23  ;;  %v970_v45 = vrot.slane %v6228_v15, 4  ;;  %v1158_v46 = vsel %vm6108_vm10, %v6232_v35, %v1157_v57  ;;  %v1411_v57 = vrot.slane %v1410_v36, 4 }
 0x141   : > { %1159 = vst [vmem:[#allocation2 + $0x8] sm:$0xf] %v1158_v46  ;;  %v9541_v46 = vshrl.u32 %v5989_v32, 16  ;;  %v6288_v41 = vrot.slane %v996_v14, 7 }
 0x142   : > { %v6262_v28 = vsel %vm6149_vm15, %v970_v45, %v977_v39  ;;  %v1419_v39 = vor.u32 %v1418_v20, %v1417_v17  ;;  %v9543_v45 = vshrl.u32 %v6021_v44, 16  ;;  %v890_v20 = vrot.slane %v886_v6, 4 }
 0x143   : > { %1181 = vst.msk [vmem:[#allocation2 + $0x34] sm:$0xf] %vm1154_vm9, %v6262_v28  ;;  %v910_v10 = vrot.slane %v9541_v46, 7  ;;  %v9545_v46 = vshll.u32 %v5991_v33, 16  ;;  %v6310_v6 = vrot.slane %v1406_v30, 4  ;;  %v9267_v33 = vshll.u32 %v6049_v54, 16 }
 0x144   : > { %v6281_v36 = vrot.slane %v9543_v45, 4  ;;  %v1186_v45 = vld [vmem:[#allocation2 + $0x40] sm:$0xf] }
 0x145   : > { %v913_v16 = vor.u32 %v9544_v29, %v910_v10  ;;  %v6297_v10 = vsel %vm6169_vm0, %v1411_v57, %v6258_v11  ;;  %v6300_v29 = vor.u32 %v999_v8, %v6288_v41  ;;  %9547 = vst [vmem:[#allocation35_spill] sm:$0xff] %v6310_v6 }
 0x146   : > { %9546 = vst [vmem:[#allocation34_spill] sm:$0xff] %v6297_v10 }
 0x147   : > { %1517 = vrot.lane.b32.xlu2 %v6245_v42, %s5435_s23  ;;  %1515 = vrot.lane.b32.xlu1 %v6252_v47, %s5435_s23  ;;  %v897_v42 = vor.u32 %v9545_v46, %v894_v26  ;;  %v6304_v24 = vsel %vm6149_vm15, %v906_v18, %v913_v16  ;;  %v6314_v46 = vsel %vm6169_vm0, %v1402_v37, %v1403_v34  ;;  %v1420_v18 = vrot.slane %v1419_v39, 4 }
 0x148   : > { %1513 = vrot.lane.b32.xlu0 %v6254_v56, %s5435_s23  ;;  %9548 = vst [vmem:[#allocation36_spill] sm:$0xff] %v6314_v46  ;;  %v1424_v16 = vor.u32 %v6270_v62, %v6268_v7  ;;  %v1187_v30 = vsel %vm6108_vm10, %v6300_v29, %v1186_v45  ;;  %v1435_v34 = vrot.slane %v996_v14, 4  ;;  %v1436_v37 = vrot.slane %v999_v8, 5 }
 0x149   : > { %v1257_v17 = vpop.permute.xlu2 %1256  ;;  %v6308_v26 = vsel %vm6149_vm15, %v890_v20, %v897_v42  ;;  %1165 = vst.msk [vmem:[#allocation2 + $0x14] sm:$0xf] %vm1154_vm9, %v6304_v24  ;;  %v1415_v42 = vor.u32 %v6281_v36, %v6258_v11  ;;  %v1020_v39 = vshrl.u32 %v6047_v53, 16  ;;  %v1012_v11 = vshrl.u32 %v6049_v54, 16 }
 0x14a   : > { %1343 = vst.msk [vmem:[#allocation2 + $0x18] sm:$0xf] %vm1338_vm1, %v1257_v17  ;;  %v9549_v17 = vshrl.u32 %v6006_v38, 16  ;;  %v9550_v36 = vshrl.u32 %v6004_v0, 16  ;;  %v9551_v8 = vshrl.u32 %v6036_v50, 16  ;;  %v9553_v47 = vshll.u32 %v6004_v0, 16 }
 0x14b   : > { %1161 = vst.msk [vmem:[#allocation2 + $0xc] sm:$0xf] %vm1154_vm9, %v6308_v26  ;;  %v6349_v56 = vrot.slane %v1012_v11, 7  ;;  %v1437_v14 = vor.u32 %v1436_v37, %v1435_v34 }
 0x14c   : > { %1188 = vst [vmem:[#allocation2 + $0x40] sm:$0xf] %v1187_v30  ;;  %v934_v57 = vrot.slane %v9549_v17, 7  ;;  %v942_v45 = vrot.slane %v9550_v36, 7  ;;  %v1426_v17 = vrot.slane %v9551_v8, 4  ;;  %v9552_v30 = vshll.u32 %v6036_v50, 16 }
 0x14d   : > { %v1023_v36 = vshll.u32 %v6047_v53, 16  ;;  %v1432_v8 = vrot.slane %v9554_v31, 4  ;;  %v9556_v53 = vshll.u32 %v6034_v49, 16  ;;  %v1018_v0 = vrot.slane %v6349_v56, 4 }
 0x14e   : > { %v1427_v62 = vrot.slane %v9552_v30, 5  ;;  %v938_v20 = vrot.slane %v934_v57, 4  ;;  %v9555_v30 = vshll.u32 %v6006_v38, 16  ;;  %v6368_v31 = vrot.slane %v1424_v16, 4 }
 0x14f   : > { %1523 = vrot.lane.b32.xlu2 %v6297_v10, %s5435_s23  ;;  %1521 = vrot.lane.b32.xlu1 %v6310_v6, %s5435_s23  ;;  %v1022_v10 = vrot.slane %v1020_v39, 7  ;;  %v945_v6 = vor.u32 %v9553_v47, %v942_v45  ;;  %v1430_v32 = vrot.slane %v9556_v53, 5  ;;  %v6378_v53 = vsel %vm6169_vm0, %v1420_v18, %v6268_v7 }
 0x150   : > { %1519 = vrot.lane.b32.xlu0 %v6314_v46, %s5435_s23  ;;  %v6358_v27 = vor.u32 %v9555_v30, %v934_v57  ;;  %v1170_v46 = vld [vmem:[#allocation2 + $0x20] sm:$0xf]  ;;  %9557 = vst [vmem:[#allocation37_spill] sm:$0xff] %v6368_v31  ;;  %v1428_v37 = vor.u32 %v1427_v62, %v1426_v17  ;;  %v9561_v16 = vshll.u32 %v6051_v55, 16  ;;  %v1444_v62 = vrot.slane %v1012_v11, 4 }
 0x151   : > { %v1259_v48 = vpop.permute.xlu2 %1258  ;;  %v1025_v47 = vor.u32 %v1023_v36, %v1022_v10  ;;  %v6366_v34 = vsel %vm6149_vm15, %v938_v20, %v945_v6  ;;  %9558 = vst [vmem:[#allocation38_spill] sm:$0xff] %v6378_v53  ;;  %v6380_v10 = vrot.slane %v1415_v42, 4  ;;  %v9270_v6 = vshrl.u32 %v6051_v55, 16 }
 0x152   : > { %1344 = vst.msk [vmem:[#allocation2 + $0x1c] sm:$0xf] %vm1338_vm1, %v1259_v48  ;;  %v1171_v48 = vsel %vm6108_vm10, %v6358_v27, %v1170_v46  ;;  %v6389_v20 = vrot.slane %v9561_v16, 5  ;;  %v1445_v46 = vrot.slane %v9267_v33, 5  ;;  %v1438_v7 = vrot.slane %v1437_v14, 4 }
 0x153   : > { %1173 = vst.msk [vmem:[#allocation2 + $0x24] sm:$0xf] %vm1154_vm9, %v6366_v34  ;;  %v6385_v57 = vsel %vm6149_vm15, %v1018_v0, %v1025_v47  ;;  %v1433_v18 = vor.u32 %v1432_v8, %v1430_v32  ;;  %v1044_v42 = vshrl.u32 %v6062_v58, 16  ;;  %v9562_v45 = vshrl.u32 %v6021_v44, 16  ;;  %v1198_v33 = vld [vmem:[#allocation2 + $0x58] sm:$0xf] }
 0x154   : > { %9559 = vst [vmem:[#allocation39_spill] sm:$0xff] %v6380_v10  ;;  %v1429_v11 = vrot.slane %v1428_v37, 4  ;;  %v6402_v17 = vrot.slane %v1023_v36, 5  ;;  %v1450_v30 = vrot.slane %v1020_v39, 4  ;;  %v9563_v47 = vshll.u32 %v6019_v43, 16 }
 0x155   : > { %9560 = vst [vmem:[#allocation40_spill] sm:$0xff] %v6385_v57  ;;  %v958_v0 = vrot.slane %v9562_v45, 7  ;;  %v1441_v8 = vrot.slane %v9270_v6, 4  ;;  %v6414_v16 = vrot.slane %v1044_v42, 7  ;;  %v1178_v45 = vld [vmem:[#allocation2 + $0x30] sm:$0xf]  ;;  %v1446_v39 = vor.u32 %v1445_v46, %v1444_v62 }
 0x156   : > { %1172 = vst [vmem:[#allocation2 + $0x20] sm:$0xf] %v1171_v48  ;;  %v6407_v14 = vor.u32 %v9563_v47, %v6228_v15  ;;  %v1047_v48 = vshll.u32 %v6062_v58, 16  ;;  %v954_v36 = vrot.slane %v6178_v40, 4  ;;  %v9564_v47 = vshll.u32 %v6021_v44, 16 }
 0x157   : > { %1193 = vst.msk [vmem:[#allocation2 + $0x4c] sm:$0xf] %vm1154_vm9, %v6385_v57  ;;  %1529 = vrot.lane.b32.xlu2 %v6368_v31, %s5435_s23  ;;  %1527 = vrot.lane.b32.xlu1 %v6378_v53, %s5435_s23  ;;  %v6426_v6 = vsel %vm6169_vm0, %v1438_v7, %v6389_v20  ;;  %v9281_v62 = vshrl.u32 %v6064_v59, 16  ;;  %v6442_v7 = vsel %vm6169_vm0, %v1429_v11, %v1430_v32  ;;  %v1068_v32 = vshrl.u32 %v6077_v63, 16 }
 0x158   : > { %1525 = vrot.lane.b32.xlu0 %v6380_v10, %s5435_s23  ;;  %v1179_v15 = vsel %vm6108_vm10, %v6407_v14, %v1178_v45  ;;  %v961_v31 = vor.u32 %v9564_v47, %v958_v0  ;;  %9565 = vst [vmem:[#allocation41_spill] sm:$0xff] %v6426_v6  ;;  %v6428_v10 = vrot.slane %v1433_v18, 4  ;;  %v6431_v40 = vor.u32 %v1047_v48, %v6414_v16 }
 0x159   : > { %v1265_v37 = vpop.permute.xlu2 %1264  ;;  %1180 = vst [vmem:[#allocation2 + $0x30] sm:$0xf] %v1179_v15  ;;  %v1451_v18 = vor.u32 %v1450_v30, %v6402_v17  ;;  %v1447_v15 = vrot.slane %v1446_v39, 4  ;;  %v1462_v45 = vrot.slane %v1044_v42, 4  ;;  %v1463_v46 = vrot.slane %v1047_v48, 5 }
 0x15a   : > { %1347 = vst.msk [vmem:[#allocation2 + $0x28] sm:$0xf] %vm1338_vm1, %v1265_v37  ;;  %v6438_v0 = vsel %vm6149_vm15, %v954_v36, %v961_v31  ;;  %v1442_v37 = vor.u32 %v1441_v8, %v6389_v20  ;;  %v1199_v47 = vsel %vm6108_vm10, %v6431_v40, %v1198_v33  ;;  %v1060_v11 = vshrl.u32 %v6079_v1, 16 }
 0x15b   : > { %9566 = vst [vmem:[#allocation42_spill] sm:$0xff] %v6428_v10  ;;  %v9569_v30 = vshrl.u32 %v6036_v50, 16  ;;  %v9570_v8 = vshrl.u32 %v6034_v49, 16  ;;  %v1459_v42 = vrot.slane %v9281_v62, 4  ;;  %v9571_v48 = vshrl.u32 %v6066_v22, 16 }
 0x15c   : > { %9567 = vst [vmem:[#allocation43_spill] sm:$0xff] %v6431_v40  ;;  %v6472_v31 = vrot.slane %v1060_v11, 7  ;;  %v1464_v58 = vor.u32 %v1463_v46, %v1462_v45  ;;  %v9573_v62 = vshll.u32 %v6064_v59, 16  ;;  %v6486_v46 = vrot.slane %v1451_v18, 4 }
 0x15d   : > { %9568 = vst [vmem:[#allocation44_spill] sm:$0xff] %v6442_v7  ;;  %v982_v20 = vrot.slane %v9569_v30, 7  ;;  %v990_v36 = vrot.slane %v9570_v8, 7  ;;  %v1453_v39 = vrot.slane %v9571_v48, 4  ;;  %v1071_v8 = vshll.u32 %v6077_v63, 16 }
 0x15e   : > { %1177 = vst.msk [vmem:[#allocation2 + $0x2c] sm:$0xf] %vm1154_vm9, %v6438_v0  ;;  %v1457_v43 = vrot.slane %v9573_v62, 5  ;;  %v9574_v48 = vshll.u32 %v6034_v49, 16  ;;  %v1066_v40 = vrot.slane %v6472_v31, 4  ;;  %v6488_v62 = vrot.slane %v1442_v37, 4 }
 0x15f   : > { %1200 = vst [vmem:[#allocation2 + $0x58] sm:$0xf] %v1199_v47  ;;  %1535 = vrot.lane.b32.xlu2 %v6426_v6, %s5435_s23  ;;  %1533 = vrot.lane.b32.xlu1 %v6428_v10, %s5435_s23  ;;  %v9572_v47 = vshll.u32 %v6066_v22, 16  ;;  %v1070_v6 = vrot.slane %v1068_v32, 7  ;;  %v986_v10 = vrot.slane %v982_v20, 4 }
 0x160   : > { %1531 = vrot.lane.b32.xlu0 %v6442_v7, %s5435_s23  ;;  %v993_v44 = vor.u32 %v9574_v48, %v990_v36  ;;  %v1182_v7 = vld [vmem:[#allocation2 + $0x38] sm:$0xf]  ;;  %9576 = vst [vmem:[#allocation45_spill] sm:$0xff] %v6486_v46  ;;  %v1465_v36 = vrot.slane %v1464_v58, 4  ;;  %v1095_v48 = vshll.u32 %v6094_v13, 16 }
 0x161   : > { %v1454_v30 = vrot.slane %v9572_v47, 5  ;;  %v1271_v53 = vpop.permute.xlu2 %1270  ;;  %v1253_v33 = vpop.permute.xlu1 %1252  ;;  %v9575_v47 = vshll.u32 %v6036_v50, 16  ;;  %v1073_v57 = vor.u32 %v1071_v8, %v1070_v6  ;;  %9577 = vst [vmem:[#allocation46_spill] sm:$0xff] %v6488_v62  ;;  %v9298_v6 = vshrl.u32 %v6081_v2, 16 }
 0x162   : > { %1350 = vst.msk [vmem:[#allocation2 + $0x34] sm:$0xf] %vm1338_vm1, %v1271_v53  ;;  %v1249_v63 = vpop.permute.xlu0 %1248  ;;  %v6498_v53 = vsel %vm6169_vm0, %v1447_v15, %v6402_v17  ;;  %v1471_v17 = vrot.slane %v1060_v11, 4  ;;  %v1472_v15 = vrot.slane %v9297_v12, 5  ;;  %v1477_v11 = vrot.slane %v1068_v32, 4 }
 0x163   : > { %v6480_v38 = vor.u32 %v9575_v47, %v982_v20  ;;  %1341 = vst.msk [vmem:[#allocation2 + $0x10] sm:$0xf] %vm1338_vm1, %v1253_v33  ;;  %v1455_v45 = vor.u32 %v1454_v30, %v1453_v39  ;;  %v6492_v20 = vsel %vm6149_vm15, %v986_v10, %v993_v44  ;;  %v6503_v18 = vsel %vm6149_vm15, %v1066_v40, %v1073_v57 }
 0x164   : > { %1339 = vst.msk [vmem:[#allocation2 + $0x8] sm:$0xf] %vm1338_vm1, %v1249_v63  ;;  %v9579_v44 = vshll.u32 %v6081_v2, 16  ;;  %v1460_v63 = vor.u32 %v1459_v42, %v1457_v43  ;;  %v1092_v57 = vshrl.u32 %v6094_v13, 16  ;;  %v9580_v40 = vshrl.u32 %v6051_v55, 16 }
 0x165   : > { %9578 = vst [vmem:[#allocation47_spill] sm:$0xff] %v6498_v53  ;;  %v1183_v37 = vsel %vm6108_vm10, %v6480_v38, %v1182_v7  ;;  %v1456_v7 = vrot.slane %v1455_v45, 4  ;;  %v6525_v33 = vrot.slane %v1071_v8, 5  ;;  %v9581_v42 = vshll.u32 %v6049_v54, 16 }
 0x166   : > { %v6510_v10 = vrot.slane %v9579_v44, 5  ;;  %1205 = vst.msk [vmem:[#allocation2 + $0x64] sm:$0xf] %vm1154_vm9, %v6503_v18  ;;  %v1006_v58 = vrot.slane %v9580_v40, 7  ;;  %v1468_v30 = vrot.slane %v9298_v6, 4  ;;  %v6537_v47 = vrot.slane %v1092_v57, 7 }
 0x167   : > { %1185 = vst.msk [vmem:[#allocation2 + $0x3c] sm:$0xf] %vm1154_vm9, %v6492_v20  ;;  %1541 = vrot.lane.b32.xlu2 %v6486_v46, %s5435_s23  ;;  %1539 = vrot.lane.b32.xlu1 %v6498_v53, %s5435_s23  ;;  %v6530_v39 = vor.u32 %v9581_v42, %v6349_v56  ;;  %v1002_v8 = vrot.slane %v6288_v41, 4  ;;  %v1190_v44 = vld [vmem:[#allocation2 + $0x48] sm:$0xf]  ;;  %v9582_v40 = vshll.u32 %v6051_v55, 16  ;;  %v1473_v6 = vor.u32 %v1472_v15, %v1471_v17 }
 0x168   : > { %1184 = vst [vmem:[#allocation2 + $0x38] sm:$0xf] %v1183_v37  ;;  %1537 = vrot.lane.b32.xlu0 %v6488_v62, %s5435_s23  ;;  %v1210_v37 = vld [vmem:[#allocation2 + $0x70] sm:$0xf]  ;;  %v6546_v12 = vsel %vm6169_vm0, %v1465_v36, %v6510_v10  ;;  %v6549_v46 = vor.u32 %v1095_v48, %v6537_v47  ;;  %v6552_v41 = vrot.slane %v1460_v63, 4  ;;  %v6556_v62 = vsel %vm6169_vm0, %v1456_v7, %v1457_v43 }
 0x169   : > { %v1277_v45 = vpop.permute.xlu2 %1276  ;;  %v1255_v32 = vpop.permute.xlu1 %1254  ;;  %v1009_v56 = vor.u32 %v9582_v40, %v1006_v58  ;;  %9583 = vst [vmem:[#allocation48_spill] sm:$0xff] %v6546_v12  ;;  %v1478_v58 = vor.u32 %v1477_v11, %v6525_v33  ;;  %v1469_v36 = vor.u32 %v1468_v30, %v6510_v10  ;;  %v1489_v17 = vrot.slane %v1092_v57, 4 }
 0x16a   : > { %1353 = vst.msk [vmem:[#allocation2 + $0x40] sm:$0xf] %vm1338_vm1, %v1277_v45  ;;  %v1251_v42 = vpop.permute.xlu0 %1250  ;;  %v1191_v45 = vsel %vm6108_vm10, %v6530_v39, %v1190_v44  ;;  %v1211_v63 = vsel %vm6108_vm10, %v6549_v46, %v1210_v37  ;;  %v9586_v11 = vshrl.u32 %v6066_v22, 16  ;;  %v9587_v44 = vshrl.u32 %v6064_v59, 16 }
 0x16b   : > { %1342 = vst.msk [vmem:[#allocation2 + $0x14] sm:$0xf] %vm1338_vm1, %v1255_v32  ;;  %v6569_v15 = vsel %vm6149_vm15, %v1002_v8, %v1009_v56  ;;  %v1474_v57 = vrot.slane %v1473_v6, 4  ;;  %v1490_v30 = vrot.slane %v1095_v48, 5  ;;  %v9313_v40 = vshrl.u32 %v6137_v5, 16 }
 0x16c   : > { %9584 = vst [vmem:[#allocation49_spill] sm:$0xff] %v6552_v41  ;;  %v1030_v32 = vrot.slane %v9586_v11, 7  ;;  %v1038_v10 = vrot.slane %v9587_v44, 7  ;;  %v1108_v37 = vshrl.u32 %v6139_v51, 16  ;;  %v9588_v48 = vshll.u32 %v6064_v59, 16 }
 0x16d   : > { %9585 = vst [vmem:[#allocation50_spill] sm:$0xff] %v6556_v62  ;;  %v1118_v11 = vrot.slane %v9313_v40, 7  ;;  %v9589_v44 = vshll.u32 %v6066_v22, 16  ;;  %v6600_v43 = vrot.slane %v1478_v58, 4  ;;  %v6607_v13 = vrot.slane %v1469_v36, 4 }
 0x16e   : > { %1340 = vst.msk [vmem:[#allocation2 + $0xc] sm:$0xf] %vm1338_vm1, %v1251_v42  ;;  %v1034_v6 = vrot.slane %v1030_v32, 4  ;;  %v1041_v42 = vor.u32 %v9588_v48, %v1038_v10  ;;  %v9591_v10 = vshrl.u32 %v6104_v23, 16  ;;  %v9318_v40 = vshll.u32 %v6145_v61, 16 }
 0x16f   : > { %1212 = vst [vmem:[#allocation2 + $0x70] sm:$0xf] %v1211_v63  ;;  %1547 = vrot.lane.b32.xlu2 %v6546_v12, %s5435_s23  ;;  %1545 = vrot.lane.b32.xlu1 %v6552_v41, %s5435_s23  ;;  %v6592_v63 = vrot.slane %v1108_v37, 7  ;;  %v6598_v8 = vor.u32 %v9589_v44, %v1030_v32  ;;  %v9592_v12 = vshll.u32 %v6104_v23, 16  ;;  %v1194_v41 = vld [vmem:[#allocation2 + $0x50] sm:$0xf]  ;;  %v1491_v58 = vor.u32 %v1490_v30, %v1489_v17 }
 0x170   : > { %1192 = vst [vmem:[#allocation2 + $0x48] sm:$0xf] %v1191_v45  ;;  %1543 = vrot.lane.b32.xlu0 %v6556_v62, %s5435_s23  ;;  %v1119_v45 = vshll.u32 %v6137_v5, 16  ;;  %v1480_v48 = vrot.slane %v9591_v10, 4  ;;  %v9594_v59 = vshll.u32 %v6098_v19, 16  ;;  %v9595_v54 = vshrl.u32 %v6098_v19, 16 }
 0x171   : > { %1189 = vst.msk [vmem:[#allocation2 + $0x44] sm:$0xf] %vm1154_vm9, %v6569_v15  ;;  %v1283_v56 = vpop.permute.xlu2 %1282  ;;  %v1263_v7 = vpop.permute.xlu1 %1262  ;;  %v1481_v62 = vrot.slane %v9592_v12, 5  ;;  %v1114_v32 = vrot.slane %v6592_v63, 4  ;;  %v6624_v36 = vsel %vm6169_vm0, %v1474_v57, %v6525_v33  ;;  %v9597_v33 = vshrl.u32 %v6081_v2, 16 }
 0x172   : > { %9590 = vst [vmem:[#allocation51_spill] sm:$0xff] %v6600_v43  ;;  %v1261_v53 = vpop.permute.xlu0 %1260  ;;  %v1121_v44 = vor.u32 %v1119_v45, %v1118_v11  ;;  %v1484_v10 = vrot.slane %v9594_v59, 5  ;;  %v1486_v12 = vrot.slane %v9595_v54, 4  ;;  %v1195_v54 = vsel %vm6108_vm10, %v6598_v8, %v1194_v41 }
 0x173   : > { %1356 = vst.msk [vmem:[#allocation2 + $0x4c] sm:$0xf] %vm1338_vm1, %v1283_v56  ;;  %v6618_v56 = vsel %vm6149_vm15, %v1034_v6, %v1041_v42  ;;  %v1482_v59 = vor.u32 %v1481_v62, %v1480_v48  ;;  %v1054_v57 = vrot.slane %v9597_v33, 7  ;;  %v1492_v41 = vrot.slane %v1491_v58, 4 }
 0x174   : > { %9593 = vst [vmem:[#allocation52_spill] sm:$0xff] %v6607_v13  ;;  %v6629_v17 = vsel %vm6149_vm15, %v1114_v32, %v1121_v44  ;;  %v1487_v62 = vor.u32 %v1486_v12, %v1484_v10  ;;  %v1498_v30 = vrot.slane %v1108_v37, 4  ;;  %v9598_v6 = vshll.u32 %v6079_v1, 16  ;;  %v1202_v32 = vld [vmem:[#allocation2 + $0x60] sm:$0xf] }
 0x175   : > { %1346 = vst.msk [vmem:[#allocation2 + $0x24] sm:$0xf] %vm1338_vm1, %v1263_v7  ;;  %v9319_v7 = vshll.u32 %v6139_v51, 16  ;;  %v1100_v48 = vshrl.u32 %v6145_v61, 16  ;;  %v1050_v44 = vrot.slane %v6414_v16, 4  ;;  %v9599_v58 = vshll.u32 %v6081_v2, 16 }
 0x176   : > { %1345 = vst.msk [vmem:[#allocation2 + $0x20] sm:$0xf] %vm1338_vm1, %v1261_v53  ;;  %v1493_v53 = vrot.slane %v9318_v40, 5  ;;  %v6649_v42 = vor.u32 %v9598_v6, %v6472_v31  ;;  %v1483_v33 = vrot.slane %v1482_v59, 4  ;;  %v6664_v40 = vrot.slane %v1487_v62, 4 }
 0x177   : > { %9596 = vst [vmem:[#allocation53_spill] sm:$0xff] %v6624_v36  ;;  %1553 = vrot.lane.b32.xlu2 %v6600_v43, %s5435_s23  ;;  %1551 = vrot.lane.b32.xlu1 %v6624_v36, %s5435_s23  ;;  %v1499_v11 = vrot.slane %v9319_v7, 5  ;;  %v1057_v37 = vor.u32 %v9599_v58, %v1054_v57  ;;  %v1502_v7 = vrot.slane %v1119_v45, 5  ;;  %v9601_v16 = vshrl.u32 %v6137_v5, 16 }
 0x178   : > { %1217 = vst.msk [vmem:[#allocation2 + $0x7c] sm:$0xf] %vm1154_vm9, %v6629_v17  ;;  %1549 = vrot.lane.b32.xlu0 %v6607_v13, %s5435_s23  ;;  %v1203_v6 = vsel %vm6108_vm10, %v6649_v42, %v1202_v32  ;;  %v6675_v59 = vsel %vm6169_vm0, %v1492_v41, %v1493_v53  ;;  %v1495_v32 = vrot.slane %v1100_v48, 4  ;;  %v6679_v62 = vsel %vm6169_vm0, %v1483_v33, %v1484_v10 }
 0x179   : > { %1197 = vst.msk [vmem:[#allocation2 + $0x54] sm:$0xf] %vm1154_vm9, %v6618_v56  ;;  %v1289_v12 = vpop.permute.xlu2 %1288  ;;  %v1504_v43 = vrot.slane %v9601_v16, 4  ;;  %v6670_v57 = vsel %vm6149_vm15, %v1050_v44, %v1057_v37  ;;  %v1500_v58 = vor.u32 %v1499_v11, %v1498_v30  ;;  %v9604_v45 = vshrl.u32 %v6104_v23, 16 }
 0x17a   : > { %1196 = vst [vmem:[#allocation2 + $0x50] sm:$0xf] %v1195_v54  ;;  %v1269_v54 = vpop.permute.xlu1 %1268  ;;  %v1267_v31 = vpop.permute.xlu0 %1266  ;;  %v9606_v10 = vshll.u32 %v6098_v19, 16  ;;  %v1496_v33 = vor.u32 %v1495_v32, %v1493_v53 }
 0x17b   : > { %1359 = vst.msk [vmem:[#allocation2 + $0x58] sm:$0xf] %vm1338_vm1, %v1289_v12  ;;  %v1078_v12 = vrot.slane %v9604_v45, 7  ;;  %v1505_v41 = vor.u32 %v1504_v43, %v1502_v7  ;;  %v1501_v37 = vrot.slane %v1500_v58, 4 }
 0x17c   : > { %1349 = vst.msk [vmem:[#allocation2 + $0x30] sm:$0xf] %vm1338_vm1, %v1269_v54  ;;  %v9605_v54 = vshrl.u32 %v6098_v19, 16  ;;  %v6715_v32 = vrot.slane %v1496_v33, 4 }
 0x17d   : > { %9600 = vst [vmem:[#allocation54_spill] sm:$0xff] %v6664_v40  ;;  %v1082_v30 = vrot.slane %v1078_v12, 4  ;;  %v6713_v58 = vsel %vm6169_vm0, %v1501_v37, %v1502_v7  ;;  %v1214_v7 = vld [vmem:[#allocation2 + $0x78] sm:$0xf] }
 0x17e   : > { %1348 = vst.msk [vmem:[#allocation2 + $0x2c] sm:$0xf] %vm1338_vm1, %v1267_v31  ;;  %v1086_v44 = vrot.slane %v9605_v54, 7  ;;  %v9607_v31 = vshll.u32 %v6104_v23, 16  ;;  %v1206_v54 = vld [vmem:[#allocation2 + $0x68] sm:$0xf] }
 0x17f   : > { %9602 = vst [vmem:[#allocation55_spill] sm:$0xff] %v6675_v59  ;;  %1559 = vrot.lane.b32.xlu2 %v6675_v59, %s5435_s23  ;;  %1557 = vrot.lane.b32.xlu1 %v6664_v40, %s5435_s23 }
 0x180   : > { %9603 = vst [vmem:[#allocation56_spill] sm:$0xff] %v6679_v62  ;;  %v1089_v11 = vor.u32 %v9606_v10, %v1086_v44  ;;  %1555 = vrot.lane.b32.xlu0 %v6679_v62, %s5435_s23  ;;  %v6705_v44 = vrot.slane %v1505_v41, 4  ;;  %v9609_v10 = vshll.u32 %v6145_v61, 16 }
 0x181   : > { %1204 = vst [vmem:[#allocation2 + $0x60] sm:$0xf] %v1203_v6  ;;  %v6697_v6 = vor.u32 %v9607_v31, %v1078_v12  ;;  %v1295_v16 = vpop.permute.xlu2 %1294  ;;  %v1102_v12 = vrot.slane %v1100_v48, 7 }
 0x182   : > { %1201 = vst.msk [vmem:[#allocation2 + $0x5c] sm:$0xf] %vm1154_vm9, %v6670_v57  ;;  %v1275_v45 = vpop.permute.xlu1 %1274  ;;  %v1273_v59 = vpop.permute.xlu0 %1272  ;;  %v6702_v43 = vsel %vm6149_vm15, %v1082_v30, %v1089_v11  ;;  %v1098_v30 = vrot.slane %v6537_v47, 4 }
 0x183   : > { %1362 = vst.msk [vmem:[#allocation2 + $0x64] sm:$0xf] %vm1338_vm1, %v1295_v16  ;;  %v1207_v53 = vsel %vm6108_vm10, %v6697_v6, %v1206_v54  ;;  %v1105_v48 = vor.u32 %v9609_v10, %v1102_v12  ;;  %v1609_v12 = vld [vmem:[#allocation2 + $0x1c] sm:$0xf] }
 0x184   : > { %1352 = vst.msk [vmem:[#allocation2 + $0x3c] sm:$0xf] %vm1338_vm1, %v1275_v45 }
 0x185   : > { %1351 = vst.msk [vmem:[#allocation2 + $0x38] sm:$0xf] %vm1338_vm1, %v1273_v59  ;;  %v9608_v59 = vshll.u32 %v6139_v51, 16 }
 0x186   : > { %1209 = vst.msk [vmem:[#allocation2 + $0x6c] sm:$0xf] %vm1154_vm9, %v6702_v43 }
 0x187   : > { %1208 = vst [vmem:[#allocation2 + $0x68] sm:$0xf] %v1207_v53  ;;  %1565 = vrot.lane.b32.xlu2 %v6705_v44, %s5435_s23  ;;  %1563 = vrot.lane.b32.xlu1 %v6713_v58, %s5435_s23  ;;  %v6726_v41 = vor.u32 %v9608_v59, %v6592_v63  ;;  %v6740_v63 = vsel %vm6149_vm15, %v1098_v30, %v1105_v48 }
 0x188   : > { %1561 = vrot.lane.b32.xlu0 %v6715_v32, %s5435_s23  ;;  %1213 = vst.msk [vmem:[#allocation2 + $0x74] sm:$0xf] %vm1154_vm9, %v6740_v63  ;;  %vm7120_vm9 = vmand %vm2075_vm7, %vm1369_vm13 }
 0x189   : > { %v1301_v11 = vpop.permute.xlu2 %1300  ;;  %v1215_v31 = vsel %vm6108_vm10, %v6726_v41, %v1214_v7  ;;  %vm2232_vm10 = vcmask 224448  }
 0x18a   : > { %v1281_v37 = vpop.permute.xlu1 %1280  ;;  %1365 = vst.msk [vmem:[#allocation2 + $0x70] sm:$0xf] %vm1338_vm1, %v1301_v11  ;;  %v1279_v33 = vpop.permute.xlu0 %1278  ;;  %vm7238_vm11 = vmand %vm2232_vm10, %vm1155_vm8 }
 0x18b   : > { %1355 = vst.msk [vmem:[#allocation2 + $0x48] sm:$0xf] %vm1338_vm1, %v1281_v37  ;;  %v1621_v37 = vld [vmem:[#allocation2 + $0x34] sm:$0xf] }
 0x18c   : > { %1354 = vst.msk [vmem:[#allocation2 + $0x44] sm:$0xf] %vm1338_vm1, %v1279_v33 }
 0x18d   : > { %1216 = vst [vmem:[#allocation2 + $0x78] sm:$0xf] %v1215_v31 }
 0x18f   : > { %1680 = vrot.lane.b32.xlu2 %v6223_v52, %s5436_s24  ;;  %1678 = vrot.lane.b32.xlu1 %v6308_v26, %s5436_s24 }
 0x190   : > { %1676 = vrot.lane.b32.xlu0 %v6232_v35, %s5436_s24 }
 0x191   : > { %v1307_v3 = vpop.permute.xlu2 %1306 }
 0x192   : > { %v1287_v47 = vpop.permute.xlu1 %1286  ;;  %1368 = vst.msk [vmem:[#allocation2 + $0x7c] sm:$0xf] %vm1338_vm1, %v1307_v3  ;;  %v1285_v16 = vpop.permute.xlu0 %1284  ;;  %v1601_v3 = vld [vmem:[#allocation2 + $0xc] sm:$0xf] }
 0x193   : > { %1358 = vst.msk [vmem:[#allocation2 + $0x54] sm:$0xf] %vm1338_vm1, %v1287_v47 }
 0x194   : > { %1357 = vst.msk [vmem:[#allocation2 + $0x50] sm:$0xf] %vm1338_vm1, %v1285_v16 }
 0x197   : > { %1686 = vrot.lane.b32.xlu2 %v6159_v9, %s5436_s24  ;;  %1684 = vrot.lane.b32.xlu1 %v6102_v21, %s5436_s24 }
 0x198   : > { %1682 = vrot.lane.b32.xlu0 %v6304_v24, %s5436_s24 }
 0x199   : > { %v1512_v35 = vpop.permute.xlu2 %1511 }
 0x19a   : > { %v1293_v26 = vpop.permute.xlu1 %1292  ;;  %v1291_v45 = vpop.permute.xlu0 %1290  ;;  %1604 = vst.msk [vmem:[#allocation2 + $0x10] sm:$0xf] %vm1597_vm2, %v1512_v35  ;;  %v9612_v35 = vld [vmem:[#allocation40_spill] sm:$0xff] }
 0x19b   : > { %1361 = vst.msk [vmem:[#allocation2 + $0x60] sm:$0xf] %vm1338_vm1, %v1293_v26 }
 0x19c   : > { %1360 = vst.msk [vmem:[#allocation2 + $0x5c] sm:$0xf] %vm1338_vm1, %v1291_v45 }
 0x19f   : > { %1692 = vrot.lane.b32.xlu2 %v6188_v60, %s5436_s24  ;;  %1690 = vrot.lane.b32.xlu1 %v6366_v34, %s5436_s24 }
 0x1a0   : > { %1688 = vrot.lane.b32.xlu0 %v6358_v27, %s5436_s24 }
 0x1a1   : > { %v1518_v59 = vpop.permute.xlu2 %1517 }
 0x1a2   : > { %v1299_v53 = vpop.permute.xlu1 %1298  ;;  %v1610_v7 = vsel %vm6769_vm3, %v1518_v59, %v1609_v12  ;;  %v1297_v30 = vpop.permute.xlu0 %1296  ;;  %v1605_v12 = vld [vmem:[#allocation2 + $0x14] sm:$0xf] }
 0x1a3   : > { %1364 = vst.msk [vmem:[#allocation2 + $0x6c] sm:$0xf] %vm1338_vm1, %v1299_v53 }
 0x1a4   : > { %1611 = vst [vmem:[#allocation2 + $0x1c] sm:$0xf] %v1610_v7 }
 0x1a5   : > { %1363 = vst.msk [vmem:[#allocation2 + $0x68] sm:$0xf] %vm1338_vm1, %v1297_v30  ;;  %v9613_v30 = vld [vmem:[#allocation43_spill] sm:$0xff] }
 0x1a7   : > { %1698 = vrot.lane.b32.xlu2 %v6262_v28, %s5436_s24  ;;  %1696 = vrot.lane.b32.xlu1 %v6407_v14, %s5436_s24 }
 0x1a8   : > { %1694 = vrot.lane.b32.xlu0 %v6438_v0, %s5436_s24 }
 0x1a9   : > { %v1524_v48 = vpop.permute.xlu2 %1523 }
 0x1aa   : > { %v1305_v10 = vpop.permute.xlu1 %1304  ;;  %v1303_v11 = vpop.permute.xlu0 %1302  ;;  %1616 = vst.msk [vmem:[#allocation2 + $0x28] sm:$0xf] %vm1597_vm2, %v1524_v48 }
 0x1ab   : > { %1367 = vst.msk [vmem:[#allocation2 + $0x78] sm:$0xf] %vm1338_vm1, %v1305_v10  ;;  %v1633_v10 = vld [vmem:[#allocation2 + $0x4c] sm:$0xf] }
 0x1ac   : > { %1366 = vst.msk [vmem:[#allocation2 + $0x74] sm:$0xf] %vm1338_vm1, %v1303_v11  ;;  %v1613_v11 = vld [vmem:[#allocation2 + $0x24] sm:$0xf]  ;;  %vm2506_vm1 = vcmask 290048  }
 0x1af   : > { %1704 = vrot.lane.b32.xlu2 %v6300_v29, %s5436_s24  ;;  %1702 = vrot.lane.b32.xlu1 %v6492_v20, %s5436_s24 }
 0x1b0   : > { %1700 = vrot.lane.b32.xlu0 %v6480_v38, %s5436_s24 }
 0x1b1   : > { %v1530_v33 = vpop.permute.xlu2 %1529 }
 0x1b2   : > { %v1510_v31 = vpop.permute.xlu1 %1509  ;;  %v1622_v47 = vsel %vm6769_vm3, %v1530_v33, %v1621_v37  ;;  %v1508_v26 = vpop.permute.xlu0 %1507 }
 0x1b3   : > { %v1602_v16 = vsel %vm6769_vm3, %v1510_v31, %v1601_v3  ;;  %1623 = vst [vmem:[#allocation2 + $0x34] sm:$0xf] %v1622_v47 }
 0x1b4   : > { %1603 = vst [vmem:[#allocation2 + $0xc] sm:$0xf] %v1602_v16 }
 0x1b5   : > { %1598 = vst.msk [vmem:[#allocation2 + $0x8] sm:$0xf] %vm1597_vm2, %v1508_v26  ;;  %v846_v26 = vld [vmem:[%s5478_s18 + $0xf0] sm:$0xff] }
 0x1b7   : > { %1710 = vrot.lane.b32.xlu2 %v9612_v35, %s5436_s24  ;;  %1708 = vrot.lane.b32.xlu1 %v6530_v39, %s5436_s24 }
 0x1b8   : > { %1706 = vrot.lane.b32.xlu0 %v6569_v15, %s5436_s24 }
 0x1b9   : > { %v1536_v45 = vpop.permute.xlu2 %1535 }
 0x1ba   : > { %v1516_v53 = vpop.permute.xlu1 %1515  ;;  %1628 = vst.msk [vmem:[#allocation2 + $0x40] sm:$0xf] %vm1597_vm2, %v1536_v45  ;;  %v1514_v59 = vpop.permute.xlu0 %1513  ;;  %v847_v45 = vld [vmem:[%s5478_s18 + $0xf8] sm:$0xff] }
 0x1bb   : > { %1608 = vst.msk [vmem:[#allocation2 + $0x18] sm:$0xf] %vm1597_vm2, %v1516_v53  ;;  %v1606_v7 = vsel %vm6769_vm3, %v1514_v59, %v1605_v12  ;;  %v1617_v53 = vld [vmem:[#allocation2 + $0x2c] sm:$0xf] }
 0x1bc   : > { %1607 = vst [vmem:[#allocation2 + $0x14] sm:$0xf] %v1606_v7  ;;  %v6832_v7 = vpack.c.bf16 %v846_v26, %v846_v26 }
 0x1bf   : > { %1716 = vrot.lane.b32.xlu2 %v9613_v30, %s5436_s24  ;;  %1714 = vrot.lane.b32.xlu1 %v6618_v56, %s5436_s24 }
 0x1c0   : > { %1712 = vrot.lane.b32.xlu0 %v6598_v8, %s5436_s24 }
 0x1c1   : > { %v1542_v48 = vpop.permute.xlu2 %1541 }
 0x1c2   : > { %v1522_v37 = vpop.permute.xlu1 %1521  ;;  %v1634_v33 = vsel %vm6769_vm3, %v1542_v48, %v1633_v10  ;;  %v1520_v3 = vpop.permute.xlu0 %1519  ;;  %v6834_v10 = vpack.c.bf16 %v847_v45, %v847_v45  ;;  %v9326_v48 = vshrl.u32 %v6832_v7, 16 }
 0x1c3   : > { %v1614_v31 = vsel %vm6769_vm3, %v1522_v37, %v1613_v11  ;;  %1635 = vst [vmem:[#allocation2 + $0x4c] sm:$0xf] %v1634_v33  ;;  %v1645_v37 = vld [vmem:[#allocation2 + $0x64] sm:$0xf] }
 0x1c4   : > { %1615 = vst [vmem:[#allocation2 + $0x24] sm:$0xf] %v1614_v31  ;;  %v9324_v11 = vshrl.u32 %v6834_v10, 16  ;;  %v1625_v31 = vld [vmem:[#allocation2 + $0x3c] sm:$0xf]  ;;  %v1663_v45 = vrot.slane %v9326_v48, 7 }
 0x1c5   : > { %1612 = vst.msk [vmem:[#allocation2 + $0x20] sm:$0xf] %vm1597_vm2, %v1520_v3  ;;  %v9649_v48 = vld [vmem:[#allocation47_spill] sm:$0xff] }
 0x1c7   : > { %1722 = vrot.lane.b32.xlu2 %v6503_v18, %s5436_s24  ;;  %1720 = vrot.lane.b32.xlu1 %v6649_v42, %s5436_s24 }
 0x1c8   : > { %1718 = vrot.lane.b32.xlu0 %v6670_v57, %s5436_s24 }
 0x1c9   : > { %v1548_v47 = vpop.permute.xlu2 %1547 }
 0x1ca   : > { %v1528_v16 = vpop.permute.xlu1 %1527  ;;  %1640 = vst.msk [vmem:[#allocation2 + $0x58] sm:$0xf] %vm1597_vm2, %v1548_v47  ;;  %v1526_v12 = vpop.permute.xlu0 %1525 }
 0x1cb   : > { %1620 = vst.msk [vmem:[#allocation2 + $0x30] sm:$0xf] %vm1597_vm2, %v1528_v16  ;;  %v1618_v59 = vsel %vm6769_vm3, %v1526_v12, %v1617_v53  ;;  %v1671_v53 = vrot.slane %v9324_v11, 7  ;;  %v9325_v12 = vshll.u32 %v6834_v10, 16 }
 0x1cc   : > { %1619 = vst [vmem:[#allocation2 + $0x2c] sm:$0xf] %v1618_v59  ;;  %v1667_v59 = vrot.slane %v1663_v45, 4 }
 0x1cf   : > { %1728 = vrot.lane.b32.xlu2 %v6549_v46, %s5436_s24  ;;  %1726 = vrot.lane.b32.xlu1 %v6702_v43, %s5436_s24 }
 0x1d0   : > { %1724 = vrot.lane.b32.xlu0 %v6697_v6, %s5436_s24 }
 0x1d1   : > { %v1554_v33 = vpop.permute.xlu2 %1553 }
 0x1d2   : > { %v1534_v3 = vpop.permute.xlu1 %1533  ;;  %v1646_v47 = vsel %vm6769_vm3, %v1554_v33, %v1645_v37  ;;  %v1532_v26 = vpop.permute.xlu0 %1531  ;;  %v1674_v37 = vor.u32 %v9325_v12, %v1671_v53  ;;  %v9327_v33 = vshll.u32 %v6832_v7, 16  ;;  %v9614_v12 = vld [vmem:[#allocation6_spill] sm:$0xff] }
 0x1d3   : > { %v1626_v16 = vsel %vm6769_vm3, %v1534_v3, %v1625_v31  ;;  %1647 = vst [vmem:[#allocation2 + $0x64] sm:$0xf] %v1646_v47  ;;  %v1629_v47 = vld [vmem:[#allocation2 + $0x44] sm:$0xf] }
 0x1d4   : > { %1627 = vst [vmem:[#allocation2 + $0x3c] sm:$0xf] %v1626_v16  ;;  %v6869_v11 = vsel %vm6149_vm15, %v1667_v59, %v1674_v37  ;;  %v6873_v53 = vor.u32 %v9327_v33, %v1663_v45 }
 0x1d5   : > { %1624 = vst.msk [vmem:[#allocation2 + $0x38] sm:$0xf] %vm1597_vm2, %v1532_v26 }
 0x1d7   : > { %1734 = vrot.lane.b32.xlu2 %v6629_v17, %s5436_s24  ;;  %1732 = vrot.lane.b32.xlu1 %v6726_v41, %s5436_s24 }
 0x1d8   : > { %1730 = vrot.lane.b32.xlu0 %v6740_v63, %s5436_s24 }
 0x1d9   : > { %v1560_v31 = vpop.permute.xlu2 %1559 }
 0x1da   : > { %v1540_v3 = vpop.permute.xlu1 %1539  ;;  %1652 = vst.msk [vmem:[#allocation2 + $0x70] sm:$0xf] %vm1597_vm2, %v1560_v31  ;;  %v1538_v16 = vpop.permute.xlu0 %1537  ;;  %v1657_v31 = vld [vmem:[#allocation2 + $0x7c] sm:$0xf] }
 0x1db   : > { %1632 = vst.msk [vmem:[#allocation2 + $0x48] sm:$0xf] %vm1597_vm2, %v1540_v3  ;;  %v1630_v26 = vsel %vm6769_vm3, %v1538_v16, %v1629_v47  ;;  %v1637_v47 = vld [vmem:[#allocation2 + $0x54] sm:$0xf] }
 0x1dc   : > { %1631 = vst [vmem:[#allocation2 + $0x44] sm:$0xf] %v1630_v26  ;;  %v9616_v26 = vld [vmem:[#allocation5_spill] sm:$0xff] }
 0x1df   : > { %1841 = vrot.lane.b32.xlu2 %v9614_v12, %s5437_s25  ;;  %1738 = vrot.lane.b32.xlu1 %v6869_v11, %s5436_s24  ;;  %v9615_v12 = vld [vmem:[#allocation8_spill] sm:$0xff] }
 0x1e0   : > { %1736 = vrot.lane.b32.xlu0 %v6873_v53, %s5436_s24 }
 0x1e1   : > { %v1566_v3 = vpop.permute.xlu2 %1565 }
 0x1e2   : > { %v1546_v16 = vpop.permute.xlu1 %1545  ;;  %v1658_v59 = vsel %vm6769_vm3, %v1566_v3, %v1657_v31  ;;  %v1544_v37 = vpop.permute.xlu0 %1543  ;;  %v9619_v31 = vld [vmem:[#allocation9_spill] sm:$0xff] }
 0x1e3   : > { %v1638_v45 = vsel %vm6769_vm3, %v1546_v16, %v1637_v47  ;;  %1659 = vst [vmem:[#allocation2 + $0x7c] sm:$0xf] %v1658_v59  ;;  %v1779_v47 = vld [vmem:[#allocation2 + $0x8] sm:$0xf] }
 0x1e4   : > { %1639 = vst [vmem:[#allocation2 + $0x54] sm:$0xf] %v1638_v45  ;;  %v1641_v45 = vld [vmem:[#allocation2 + $0x5c] sm:$0xf] }
 0x1e5   : > { %1636 = vst.msk [vmem:[#allocation2 + $0x50] sm:$0xf] %vm1597_vm2, %v1544_v37 }
 0x1e7   : > { %1847 = vrot.lane.b32.xlu2 %v9615_v12, %s5437_s25  ;;  %1845 = vrot.lane.b32.xlu1 %v9616_v26, %s5437_s25  ;;  %v9622_v26 = vld [vmem:[#allocation4_spill] sm:$0xff] }
 0x1e8   : > { %1843 = vrot.lane.b32.xlu0 %v9619_v31, %s5437_s25  ;;  %v9621_v31 = vld [vmem:[#allocation7_spill] sm:$0xff] }
 0x1e9   : > { %v1681_v3 = vpop.permute.xlu2 %1680 }
 0x1ea   : > { %v1552_v16 = vpop.permute.xlu1 %1551  ;;  %v1780_v59 = vsel %vm6892_vm5, %v1681_v3, %v1779_v47  ;;  %v1550_v37 = vpop.permute.xlu0 %1549  ;;  %v1649_v3 = vld [vmem:[#allocation2 + $0x6c] sm:$0xf] }
 0x1eb   : > { %1644 = vst.msk [vmem:[#allocation2 + $0x60] sm:$0xf] %vm1597_vm2, %v1552_v16  ;;  %v1642_v33 = vsel %vm6769_vm3, %v1550_v37, %v1641_v45  ;;  %v9624_v45 = vld [vmem:[#allocation10_spill] sm:$0xff]  ;;  %v9625_v37 = vld [vmem:[#allocation11_spill] sm:$0xff] }
 0x1ec   : > { %1781 = vst [vmem:[#allocation2 + $0x8] sm:$0xf] %v1780_v59 }
 0x1ed   : > { %1643 = vst [vmem:[#allocation2 + $0x5c] sm:$0xf] %v1642_v33  ;;  %v9623_v33 = vld [vmem:[#allocation15_spill] sm:$0xff] }
 0x1ef   : > { %1853 = vrot.lane.b32.xlu2 %v9620_v4, %s5437_s25  ;;  %1851 = vrot.lane.b32.xlu1 %v9621_v31, %s5437_s25  ;;  %v1791_v4 = vld [vmem:[#allocation2 + $0x20] sm:$0xf] }
 0x1f0   : > { %1849 = vrot.lane.b32.xlu0 %v9622_v26, %s5437_s25 }
 0x1f1   : > { %v1687_v12 = vpop.permute.xlu2 %1686 }
 0x1f2   : > { %v1558_v47 = vpop.permute.xlu1 %1557  ;;  %1786 = vst.msk [vmem:[#allocation2 + $0x14] sm:$0xf] %vm1772_vm4, %v1687_v12  ;;  %v1556_v59 = vpop.permute.xlu0 %1555 }
 0x1f3   : > { %v1650_v16 = vsel %vm6769_vm3, %v1558_v47, %v1649_v3  ;;  %1648 = vst.msk [vmem:[#allocation2 + $0x68] sm:$0xf] %vm1597_vm2, %v1556_v59  ;;  %v1653_v3 = vld [vmem:[#allocation2 + $0x74] sm:$0xf]  ;;  %v9626_v59 = vld [vmem:[#allocation13_spill] sm:$0xff] }
 0x1f4   : > { %1651 = vst [vmem:[#allocation2 + $0x6c] sm:$0xf] %v1650_v16 }
 0x1f7   : > { %1859 = vrot.lane.b32.xlu2 %v9623_v33, %s5437_s25  ;;  %1857 = vrot.lane.b32.xlu1 %v9624_v45, %s5437_s25  ;;  %v9627_v45 = vld [vmem:[#allocation14_spill] sm:$0xff]  ;;  %v1774_v33 = vld [vmem:[#allocation2] sm:$0xf] }
 0x1f8   : > { %1855 = vrot.lane.b32.xlu0 %v9625_v37, %s5437_s25 }
 0x1f9   : > { %v1693_v31 = vpop.permute.xlu2 %1692 }
 0x1fa   : > { %v1564_v26 = vpop.permute.xlu1 %1563  ;;  %v1792_v12 = vsel %vm6892_vm5, %v1693_v31, %v1791_v4  ;;  %v1562_v47 = vpop.permute.xlu0 %1561 }
 0x1fb   : > { %1656 = vst.msk [vmem:[#allocation2 + $0x78] sm:$0xf] %vm1597_vm2, %v1564_v26  ;;  %v1654_v16 = vsel %vm6769_vm3, %v1562_v47, %v1653_v3  ;;  %v1803_v47 = vld [vmem:[#allocation2 + $0x38] sm:$0xf]  ;;  %vm7444_vm2 = vmand %vm2506_vm1, %vm1369_vm13  ;;  %vm2701_vm3 = vcmask 293888  }
 0x1fc   : > { %1793 = vst [vmem:[#allocation2 + $0x20] sm:$0xf] %v1792_v12  ;;  %v9628_v12 = vld [vmem:[#allocation16_spill] sm:$0xff] }
 0x1fd   : > { %1655 = vst [vmem:[#allocation2 + $0x74] sm:$0xf] %v1654_v16  ;;  %v1783_v16 = vld [vmem:[#allocation2 + $0x10] sm:$0xf] }
 0x1ff   : > { %1865 = vrot.lane.b32.xlu2 %v6036_v50, %s5437_s25  ;;  %1863 = vrot.lane.b32.xlu1 %v9626_v59, %s5437_s25 }
 0x200   : > { %1861 = vrot.lane.b32.xlu0 %v9627_v45, %s5437_s25 }
 0x201   : > { %v1699_v4 = vpop.permute.xlu2 %1698 }
 0x202   : > { %v1679_v31 = vpop.permute.xlu1 %1678  ;;  %1798 = vst.msk [vmem:[#allocation2 + $0x2c] sm:$0xf] %vm1772_vm4, %v1699_v4  ;;  %v1677_v26 = vpop.permute.xlu0 %1676 }
 0x203   : > { %1778 = vst.msk [vmem:[#allocation2 + $0x4] sm:$0xf] %vm1772_vm4, %v1679_v31  ;;  %v1775_v54 = vsel %vm6892_vm5, %v1677_v26, %v1774_v33 }
 0x204   : > { %1776 = vst [vmem:[#allocation2] sm:$0xf] %v1775_v54  ;;  %v9629_v54 = vld [vmem:[#allocation17_spill] sm:$0xff] }
 0x207   : > { %1871 = vrot.lane.b32.xlu2 %v6051_v55, %s5437_s25  ;;  %1869 = vrot.lane.b32.xlu1 %v9628_v12, %s5437_s25  ;;  %v9630_v12 = vld [vmem:[#allocation18_spill] sm:$0xff] }
 0x208   : > { %1867 = vrot.lane.b32.xlu0 %v6034_v49, %s5437_s25 }
 0x209   : > { %v1705_v3 = vpop.permute.xlu2 %1704 }
 0x20a   : > { %v1685_v4 = vpop.permute.xlu1 %1684  ;;  %v1804_v31 = vsel %vm6892_vm5, %v1705_v3, %v1803_v47  ;;  %v1683_v26 = vpop.permute.xlu0 %1682  ;;  %v1787_v3 = vld [vmem:[#allocation2 + $0x18] sm:$0xf] }
 0x20b   : > { %v1784_v33 = vsel %vm6892_vm5, %v1685_v4, %v1783_v16  ;;  %1805 = vst [vmem:[#allocation2 + $0x38] sm:$0xf] %v1804_v31  ;;  %v9631_v4 = vld [vmem:[#allocation20_spill] sm:$0xff]  ;;  %v9632_v31 = vld [vmem:[#allocation21_spill] sm:$0xff] }
 0x20c   : > { %1785 = vst [vmem:[#allocation2 + $0x10] sm:$0xf] %v1784_v33 }
 0x20d   : > { %1782 = vst.msk [vmem:[#allocation2 + $0xc] sm:$0xf] %vm1772_vm4, %v1683_v26  ;;  %v1815_v26 = vld [vmem:[#allocation2 + $0x50] sm:$0xf] }
 0x20f   : > { %1877 = vrot.lane.b32.xlu2 %v6066_v22, %s5437_s25  ;;  %1875 = vrot.lane.b32.xlu1 %v9629_v54, %s5437_s25 }
 0x210   : > { %1873 = vrot.lane.b32.xlu0 %v9630_v12, %s5437_s25 }
 0x211   : > { %v1711_v55 = vpop.permute.xlu2 %1710 }
 0x212   : > { %v1691_v59 = vpop.permute.xlu1 %1690  ;;  %1810 = vst.msk [vmem:[#allocation2 + $0x44] sm:$0xf] %vm1772_vm4, %v1711_v55  ;;  %v1689_v47 = vpop.permute.xlu0 %1688  ;;  %v1795_v55 = vld [vmem:[#allocation2 + $0x28] sm:$0xf] }
 0x213   : > { %1790 = vst.msk [vmem:[#allocation2 + $0x1c] sm:$0xf] %vm1772_vm4, %v1691_v59  ;;  %v1788_v16 = vsel %vm6892_vm5, %v1689_v47, %v1787_v3 }
 0x214   : > { %1789 = vst [vmem:[#allocation2 + $0x18] sm:$0xf] %v1788_v16  ;;  %v9633_v16 = vld [vmem:[#allocation22_spill] sm:$0xff] }
 0x217   : > { %1883 = vrot.lane.b32.xlu2 %v6081_v2, %s5437_s25  ;;  %1881 = vrot.lane.b32.xlu1 %v9631_v4, %s5437_s25 }
 0x218   : > { %1879 = vrot.lane.b32.xlu0 %v9632_v31, %s5437_s25 }
 0x219   : > { %v1717_v33 = vpop.permute.xlu2 %1716 }
 0x21a   : > { %v1697_v54 = vpop.permute.xlu1 %1696  ;;  %v1816_v59 = vsel %vm6892_vm5, %v1717_v33, %v1815_v26  ;;  %v1695_v47 = vpop.permute.xlu0 %1694  ;;  %v1799_v33 = vld [vmem:[#allocation2 + $0x30] sm:$0xf] }
 0x21b   : > { %v1796_v3 = vsel %vm6892_vm5, %v1697_v54, %v1795_v55  ;;  %1817 = vst [vmem:[#allocation2 + $0x50] sm:$0xf] %v1816_v59  ;;  %v9634_v55 = vld [vmem:[#allocation24_spill] sm:$0xff] }
 0x21c   : > { %1797 = vst [vmem:[#allocation2 + $0x28] sm:$0xf] %v1796_v3  ;;  %v1827_v3 = vld [vmem:[#allocation2 + $0x68] sm:$0xf] }
 0x21d   : > { %1794 = vst.msk [vmem:[#allocation2 + $0x24] sm:$0xf] %vm1772_vm4, %v1695_v47 }
 0x21f   : > { %1889 = vrot.lane.b32.xlu2 %v6104_v23, %s5437_s25  ;;  %1887 = vrot.lane.b32.xlu1 %v9633_v16, %s5437_s25 }
 0x220   : > { %1885 = vrot.lane.b32.xlu0 %v6079_v1, %s5437_s25 }
 0x221   : > { %v1723_v4 = vpop.permute.xlu2 %1722 }
 0x222   : > { %v1703_v2 = vpop.permute.xlu1 %1702  ;;  %1822 = vst.msk [vmem:[#allocation2 + $0x5c] sm:$0xf] %vm1772_vm4, %v1723_v4  ;;  %v1701_v54 = vpop.permute.xlu0 %1700  ;;  %v1807_v4 = vld [vmem:[#allocation2 + $0x40] sm:$0xf] }
 0x223   : > { %1802 = vst.msk [vmem:[#allocation2 + $0x34] sm:$0xf] %vm1772_vm4, %v1703_v2  ;;  %v1800_v26 = vsel %vm6892_vm5, %v1701_v54, %v1799_v33 }
 0x224   : > { %1801 = vst [vmem:[#allocation2 + $0x30] sm:$0xf] %v1800_v26 }
 0x227   : > { %1895 = vrot.lane.b32.xlu2 %v6145_v61, %s5437_s25  ;;  %1893 = vrot.lane.b32.xlu1 %v9634_v55, %s5437_s25 }
 0x228   : > { %1891 = vrot.lane.b32.xlu0 %v6098_v19, %s5437_s25 }
 0x229   : > { %v1729_v59 = vpop.permute.xlu2 %1728 }
 0x22a   : > { %v1709_v47 = vpop.permute.xlu1 %1708  ;;  %v1828_v2 = vsel %vm6892_vm5, %v1729_v59, %v1827_v3  ;;  %v1707_v54 = vpop.permute.xlu0 %1706  ;;  %v1811_v59 = vld [vmem:[#allocation2 + $0x48] sm:$0xf] }
 0x22b   : > { %v1808_v33 = vsel %vm6892_vm5, %v1709_v47, %v1807_v4  ;;  %1829 = vst [vmem:[#allocation2 + $0x68] sm:$0xf] %v1828_v2  ;;  %v9635_v47 = vld [vmem:[#allocation29_spill] sm:$0xff]  ;;  %v9636_v2 = vld [vmem:[#allocation30_spill] sm:$0xff] }
 0x22c   : > { %1809 = vst [vmem:[#allocation2 + $0x40] sm:$0xf] %v1808_v33 }
 0x22d   : > { %1806 = vst.msk [vmem:[#allocation2 + $0x3c] sm:$0xf] %vm1772_vm4, %v1707_v54  ;;  %v1819_v54 = vld [vmem:[#allocation2 + $0x58] sm:$0xf] }
 0x22f   : > { %1901 = vrot.lane.b32.xlu2 %v6832_v7, %s5437_s25  ;;  %1899 = vrot.lane.b32.xlu1 %v6137_v5, %s5437_s25 }
 0x230   : > { %1897 = vrot.lane.b32.xlu0 %v6139_v51, %s5437_s25 }
 0x231   : > { %v1735_v26 = vpop.permute.xlu2 %1734 }
 0x232   : > { %v1715_v55 = vpop.permute.xlu1 %1714  ;;  %1834 = vst.msk [vmem:[#allocation2 + $0x74] sm:$0xf] %vm1772_vm4, %v1735_v26  ;;  %v1713_v3 = vpop.permute.xlu0 %1712 }
 0x233   : > { %1814 = vst.msk [vmem:[#allocation2 + $0x4c] sm:$0xf] %vm1772_vm4, %v1715_v55  ;;  %v1812_v4 = vsel %vm6892_vm5, %v1713_v3, %v1811_v59  ;;  %v9637_v3 = vld [vmem:[#allocation32_spill] sm:$0xff] }
 0x234   : > { %1813 = vst [vmem:[#allocation2 + $0x48] sm:$0xf] %v1812_v4  ;;  %v9638_v4 = vld [vmem:[#allocation33_spill] sm:$0xff] }
 0x237   : > { %1981 = vrot.lane.b32.xlu2 %v9635_v47, %s5438_s26  ;;  %1979 = vrot.lane.b32.xlu1 %v9636_v2, %s5438_s26  ;;  %v9639_v47 = vld [vmem:[#allocation28_spill] sm:$0xff] }
 0x238   : > { %1903 = vrot.lane.b32.xlu0 %v6834_v10, %s5437_s25 }
 0x239   : > { %v1842_v33 = vpop.permute.xlu2 %1841 }
 0x23a   : > { %v1721_v26 = vpop.permute.xlu1 %1720  ;;  %1938 = vst.msk [vmem:[#allocation2] sm:$0xf] %vm1937_vm6, %v1842_v33  ;;  %v1719_v59 = vpop.permute.xlu0 %1718  ;;  %v1823_v33 = vld [vmem:[#allocation2 + $0x60] sm:$0xf] }
 0x23b   : > { %v1820_v55 = vsel %vm6892_vm5, %v1721_v26, %v1819_v54  ;;  %1818 = vst.msk [vmem:[#allocation2 + $0x54] sm:$0xf] %vm1772_vm4, %v1719_v59  ;;  %v9640_v26 = vld [vmem:[#allocation35_spill] sm:$0xff] }
 0x23c   : > { %1821 = vst [vmem:[#allocation2 + $0x58] sm:$0xf] %v1820_v55  ;;  %v9641_v55 = vld [vmem:[#allocation36_spill] sm:$0xff]  ;;  %v9642_v59 = vld [vmem:[#allocation31_spill] sm:$0xff] }
 0x23f   : > { %1987 = vrot.lane.b32.xlu2 %v9637_v3, %s5438_s26  ;;  %1985 = vrot.lane.b32.xlu1 %v9638_v4, %s5438_s26  ;;  %v1831_v4 = vld [vmem:[#allocation2 + $0x70] sm:$0xf] }
 0x240   : > { %1983 = vrot.lane.b32.xlu0 %v9639_v47, %s5438_s26 }
 0x241   : > { %v1848_v2 = vpop.permute.xlu2 %1847 }
 0x242   : > { %v1727_v5 = vpop.permute.xlu1 %1726  ;;  %1941 = vst.msk [vmem:[#allocation2 + $0xc] sm:$0xf] %vm1937_vm6, %v1848_v2  ;;  %v1725_v61 = vpop.permute.xlu0 %1724 }
 0x243   : > { %1826 = vst.msk [vmem:[#allocation2 + $0x64] sm:$0xf] %vm1772_vm4, %v1727_v5  ;;  %v1824_v54 = vsel %vm6892_vm5, %v1725_v61, %v1823_v33  ;;  %v9643_v61 = vld [vmem:[#allocation38_spill] sm:$0xff]  ;;  %v9644_v33 = vld [vmem:[#allocation39_spill] sm:$0xff] }
 0x244   : > { %1825 = vst [vmem:[#allocation2 + $0x60] sm:$0xf] %v1824_v54  ;;  %v9645_v54 = vld [vmem:[#allocation34_spill] sm:$0xff] }
 0x247   : > { %1993 = vrot.lane.b32.xlu2 %v9640_v26, %s5438_s26  ;;  %1991 = vrot.lane.b32.xlu1 %v9641_v55, %s5438_s26 }
 0x248   : > { %1989 = vrot.lane.b32.xlu0 %v9642_v59, %s5438_s26 }
 0x249   : > { %v1854_v47 = vpop.permute.xlu2 %1853 }
 0x24a   : > { %v1733_v2 = vpop.permute.xlu1 %1732  ;;  %1944 = vst.msk [vmem:[#allocation2 + $0x18] sm:$0xf] %vm1937_vm6, %v1854_v47  ;;  %v1731_v3 = vpop.permute.xlu0 %1730  ;;  %v1835_v47 = vld [vmem:[#allocation2 + $0x78] sm:$0xf] }
 0x24b   : > { %v1832_v5 = vsel %vm6892_vm5, %v1733_v2, %v1831_v4  ;;  %1830 = vst.msk [vmem:[#allocation2 + $0x6c] sm:$0xf] %vm1772_vm4, %v1731_v3  ;;  %v9646_v4 = vld [vmem:[#allocation42_spill] sm:$0xff]  ;;  %v9647_v2 = vld [vmem:[#allocation44_spill] sm:$0xff] }
 0x24c   : > { %1833 = vst [vmem:[#allocation2 + $0x70] sm:$0xf] %v1832_v5  ;;  %v9648_v5 = vld [vmem:[#allocation37_spill] sm:$0xff] }
 0x24f   : > { %1999 = vrot.lane.b32.xlu2 %v9643_v61, %s5438_s26  ;;  %1997 = vrot.lane.b32.xlu1 %v9644_v33, %s5438_s26 }
 0x250   : > { %1995 = vrot.lane.b32.xlu0 %v9645_v54, %s5438_s26 }
 0x251   : > { %v1860_v59 = vpop.permute.xlu2 %1859 }
 0x252   : > { %v1739_v55 = vpop.permute.xlu1 %1738  ;;  %1947 = vst.msk [vmem:[#allocation2 + $0x24] sm:$0xf] %vm1937_vm6, %v1860_v59  ;;  %v1737_v26 = vpop.permute.xlu0 %1736 }
 0x253   : > { %1838 = vst.msk [vmem:[#allocation2 + $0x7c] sm:$0xf] %vm1772_vm4, %v1739_v55  ;;  %v1836_v3 = vsel %vm6892_vm5, %v1737_v26, %v1835_v47  ;;  %v9650_v26 = vld [vmem:[#allocation46_spill] sm:$0xff]  ;;  %v9651_v55 = vld [vmem:[#allocation41_spill] sm:$0xff]  ;;  %vm3178_vm4 = vcmask 60416  }
 0x254   : > { %1837 = vst [vmem:[#allocation2 + $0x78] sm:$0xf] %v1836_v3  ;;  %vm7524_vm5 = vmand %vm3178_vm4, %vm1155_vm8 }
 0x257   : > { %2005 = vrot.lane.b32.xlu2 %v9646_v4, %s5438_s26  ;;  %2003 = vrot.lane.b32.xlu1 %v9647_v2, %s5438_s26 }
 0x258   : > { %2001 = vrot.lane.b32.xlu0 %v9648_v5, %s5438_s26 }
 0x259   : > { %v1866_v54 = vpop.permute.xlu2 %1865 }
 0x25a   : > { %v1846_v33 = vpop.permute.xlu1 %1845  ;;  %1950 = vst.msk [vmem:[#allocation2 + $0x30] sm:$0xf] %vm1937_vm6, %v1866_v54  ;;  %v1844_v59 = vpop.permute.xlu0 %1843  ;;  %v9653_v54 = vld [vmem:[#allocation50_spill] sm:$0xff] }
 0x25b   : > { %1940 = vst.msk [vmem:[#allocation2 + $0x8] sm:$0xf] %vm1937_vm6, %v1846_v33  ;;  %v9652_v33 = vld [vmem:[#allocation49_spill] sm:$0xff] }
 0x25c   : > { %1939 = vst.msk [vmem:[#allocation2 + $0x4] sm:$0xf] %vm1937_vm6, %v1844_v59  ;;  %v9654_v59 = vld [vmem:[#allocation45_spill] sm:$0xff] }
 0x25f   : > { %2011 = vrot.lane.b32.xlu2 %v9649_v48, %s5438_s26  ;;  %2009 = vrot.lane.b32.xlu1 %v9650_v26, %s5438_s26 }
 0x260   : > { %2007 = vrot.lane.b32.xlu0 %v9651_v55, %s5438_s26 }
 0x261   : > { %v1872_v47 = vpop.permute.xlu2 %1871 }
 0x262   : > { %v1852_v3 = vpop.permute.xlu1 %1851  ;;  %1953 = vst.msk [vmem:[#allocation2 + $0x3c] sm:$0xf] %vm1937_vm6, %v1872_v47  ;;  %v1850_v5 = vpop.permute.xlu0 %1849 }
 0x263   : > { %1943 = vst.msk [vmem:[#allocation2 + $0x14] sm:$0xf] %vm1937_vm6, %v1852_v3 }
 0x264   : > { %1942 = vst.msk [vmem:[#allocation2 + $0x10] sm:$0xf] %vm1937_vm6, %v1850_v5  ;;  %v9655_v5 = vld [vmem:[#allocation48_spill] sm:$0xff] }
 0x267   : > { %2017 = vrot.lane.b32.xlu2 %v9652_v33, %s5438_s26  ;;  %2015 = vrot.lane.b32.xlu1 %v9653_v54, %s5438_s26 }
 0x268   : > { %2013 = vrot.lane.b32.xlu0 %v9654_v59, %s5438_s26 }
 0x269   : > { %v1878_v26 = vpop.permute.xlu2 %1877 }
 0x26a   : > { %v1858_v55 = vpop.permute.xlu1 %1857  ;;  %1956 = vst.msk [vmem:[#allocation2 + $0x48] sm:$0xf] %vm1937_vm6, %v1878_v26  ;;  %v1856_v48 = vpop.permute.xlu0 %1855 }
 0x26b   : > { %1946 = vst.msk [vmem:[#allocation2 + $0x20] sm:$0xf] %vm1937_vm6, %v1858_v55  ;;  %v9657_v55 = vld [vmem:[#allocation51_spill] sm:$0xff] }
 0x26c   : > { %1945 = vst.msk [vmem:[#allocation2 + $0x1c] sm:$0xf] %vm1937_vm6, %v1856_v48  ;;  %v9656_v48 = vshll.u32 %v6832_v7, 16 }
 0x26e   : > { %v1971_v26 = vrot.slane %v9656_v48, 5 }
 0x26f   : > { %2023 = vrot.lane.b32.xlu2 %v6624_v36, %s5438_s26  ;;  %2021 = vrot.lane.b32.xlu1 %v6607_v13, %s5438_s26 }
 0x270   : > { %2019 = vrot.lane.b32.xlu0 %v9655_v5, %s5438_s26  ;;  %v9658_v5 = vshrl.u32 %v6832_v7, 16 }
 0x271   : > { %v1884_v47 = vpop.permute.xlu2 %1883 }
 0x272   : > { %v1864_v3 = vpop.permute.xlu1 %1863  ;;  %1959 = vst.msk [vmem:[#allocation2 + $0x54] sm:$0xf] %vm1937_vm6, %v1884_v47  ;;  %v1862_v59 = vpop.permute.xlu0 %1861  ;;  %v1970_v47 = vrot.slane %v9658_v5, 4 }
 0x273   : > { %1949 = vst.msk [vmem:[#allocation2 + $0x2c] sm:$0xf] %vm1937_vm6, %v1864_v3  ;;  %v9659_v3 = vshll.u32 %v6834_v10, 16 }
 0x274   : > { %1948 = vst.msk [vmem:[#allocation2 + $0x28] sm:$0xf] %vm1937_vm6, %v1862_v59  ;;  %v1972_v48 = vor.u32 %v1971_v26, %v1970_v47 }
 0x277   : > { %2029 = vrot.lane.b32.xlu2 %v6664_v40, %s5438_s26  ;;  %2027 = vrot.lane.b32.xlu1 %v6679_v62, %s5438_s26  ;;  %v1974_v40 = vrot.slane %v9659_v3, 5  ;;  %v9660_v62 = vshrl.u32 %v6834_v10, 16 }
 0x278   : > { %2025 = vrot.lane.b32.xlu0 %v9657_v55, %s5438_s26 }
 0x279   : > { %v1890_v13 = vpop.permute.xlu2 %1889  ;;  %v1976_v54 = vrot.slane %v9660_v62, 4 }
 0x27a   : > { %v1870_v36 = vpop.permute.xlu1 %1869  ;;  %1962 = vst.msk [vmem:[#allocation2 + $0x60] sm:$0xf] %vm1937_vm6, %v1890_v13  ;;  %v1868_v59 = vpop.permute.xlu0 %1867  ;;  %v9661_v13 = vld [vmem:[#allocation55_spill] sm:$0xff] }
 0x27b   : > { %1952 = vst.msk [vmem:[#allocation2 + $0x38] sm:$0xf] %vm1937_vm6, %v1870_v36  ;;  %v1977_v5 = vor.u32 %v1976_v54, %v1974_v40  ;;  %v1973_v36 = vrot.slane %v1972_v48, 4 }
 0x27c   : > { %1951 = vst.msk [vmem:[#allocation2 + $0x34] sm:$0xf] %vm1937_vm6, %v1868_v59  ;;  %v2079_v59 = vld [vmem:[#allocation2 + $0x4] sm:$0xf] }
 0x27d   : > { %v7098_v62 = vrot.slane %v1977_v5, 4  ;;  %v7103_v26 = vsel %vm6169_vm0, %v1973_v36, %v1974_v40 }
 0x27f   : > { %2035 = vrot.lane.b32.xlu2 %v6713_v58, %s5438_s26  ;;  %2033 = vrot.lane.b32.xlu1 %v6715_v32, %s5438_s26 }
 0x280   : > { %2031 = vrot.lane.b32.xlu0 %v9661_v13, %s5438_s26 }
 0x281   : > { %v1896_v55 = vpop.permute.xlu2 %1895 }
 0x282   : > { %v1876_v33 = vpop.permute.xlu1 %1875  ;;  %1965 = vst.msk [vmem:[#allocation2 + $0x6c] sm:$0xf] %vm1937_vm6, %v1896_v55  ;;  %v1874_v3 = vpop.permute.xlu0 %1873 }
 0x283   : > { %1955 = vst.msk [vmem:[#allocation2 + $0x44] sm:$0xf] %vm1937_vm6, %v1876_v33 }
 0x284   : > { %1954 = vst.msk [vmem:[#allocation2 + $0x40] sm:$0xf] %vm1937_vm6, %v1874_v3 }
 0x287   : > { %2041 = vrot.lane.b32.xlu2 %v7098_v62, %s5438_s26  ;;  %2039 = vrot.lane.b32.xlu1 %v7103_v26, %s5438_s26 }
 0x288   : > { %2037 = vrot.lane.b32.xlu0 %v6705_v44, %s5438_s26 }
 0x289   : > { %v1902_v54 = vpop.permute.xlu2 %1901 }
 0x28a   : > { %v1882_v55 = vpop.permute.xlu1 %1881  ;;  %1968 = vst.msk [vmem:[#allocation2 + $0x78] sm:$0xf] %vm1937_vm6, %v1902_v54  ;;  %v1880_v33 = vpop.permute.xlu0 %1879 }
 0x28b   : > { %1958 = vst.msk [vmem:[#allocation2 + $0x50] sm:$0xf] %vm1937_vm6, %v1882_v55  ;;  %v2083_v55 = vld [vmem:[#allocation2 + $0xc] sm:$0xf] }
 0x28c   : > { %1957 = vst.msk [vmem:[#allocation2 + $0x4c] sm:$0xf] %vm1937_vm6, %v1880_v33 }
 0x28f   : > { %2146 = vrot.lane.b32.xlu2 %v6102_v21, %s5439_s27  ;;  %2144 = vrot.lane.b32.xlu1 %v6304_v24, %s5439_s27 }
 0x290   : > { %2142 = vrot.lane.b32.xlu0 %v6223_v52, %s5439_s27 }
 0x291   : > { %v1982_v47 = vpop.permute.xlu2 %1981 }
 0x292   : > { %v1888_v48 = vpop.permute.xlu1 %1887  ;;  %v2080_v5 = vsel %vm7120_vm9, %v1982_v47, %v2079_v59  ;;  %v1886_v21 = vpop.permute.xlu0 %1885 }
 0x293   : > { %1961 = vst.msk [vmem:[#allocation2 + $0x5c] sm:$0xf] %vm1937_vm6, %v1888_v48 }
 0x294   : > { %2081 = vst [vmem:[#allocation2 + $0x4] sm:$0xf] %v2080_v5 }
 0x295   : > { %1960 = vst.msk [vmem:[#allocation2 + $0x58] sm:$0xf] %vm1937_vm6, %v1886_v21  ;;  %v2095_v21 = vld [vmem:[#allocation2 + $0x24] sm:$0xf] }
 0x297   : > { %2152 = vrot.lane.b32.xlu2 %v6366_v34, %s5439_s27  ;;  %2150 = vrot.lane.b32.xlu1 %v6358_v27, %s5439_s27 }
 0x298   : > { %2148 = vrot.lane.b32.xlu0 %v6159_v9, %s5439_s27  ;;  %v2091_v9 = vld [vmem:[#allocation2 + $0x1c] sm:$0xf] }
 0x299   : > { %v1988_v52 = vpop.permute.xlu2 %1987 }
 0x29a   : > { %v1894_v24 = vpop.permute.xlu1 %1893  ;;  %2086 = vst.msk [vmem:[#allocation2 + $0x10] sm:$0xf] %vm2075_vm7, %v1988_v52  ;;  %v1892_v36 = vpop.permute.xlu0 %1891 }
 0x29b   : > { %1964 = vst.msk [vmem:[#allocation2 + $0x68] sm:$0xf] %vm1937_vm6, %v1894_v24 }
 0x29c   : > { %1963 = vst.msk [vmem:[#allocation2 + $0x64] sm:$0xf] %vm1937_vm6, %v1892_v36 }
 0x29f   : > { %2158 = vrot.lane.b32.xlu2 %v6407_v14, %s5439_s27  ;;  %2156 = vrot.lane.b32.xlu1 %v6438_v0, %s5439_s27 }
 0x2a0   : > { %2154 = vrot.lane.b32.xlu0 %v6188_v60, %s5439_s27 }
 0x2a1   : > { %v1994_v27 = vpop.permute.xlu2 %1993 }
 0x2a2   : > { %v1900_v34 = vpop.permute.xlu1 %1899  ;;  %v2092_v3 = vsel %vm7120_vm9, %v1994_v27, %v2091_v9  ;;  %v1898_v54 = vpop.permute.xlu0 %1897 }
 0x2a3   : > { %1967 = vst.msk [vmem:[#allocation2 + $0x74] sm:$0xf] %vm1937_vm6, %v1900_v34  ;;  %v2107_v34 = vld [vmem:[#allocation2 + $0x3c] sm:$0xf] }
 0x2a4   : > { %2093 = vst [vmem:[#allocation2 + $0x1c] sm:$0xf] %v2092_v3 }
 0x2a5   : > { %1966 = vst.msk [vmem:[#allocation2 + $0x70] sm:$0xf] %vm1937_vm6, %v1898_v54 }
 0x2a7   : > { %2164 = vrot.lane.b32.xlu2 %v6492_v20, %s5439_s27  ;;  %2162 = vrot.lane.b32.xlu1 %v6480_v38, %s5439_s27 }
 0x2a8   : > { %2160 = vrot.lane.b32.xlu0 %v6262_v28, %s5439_s27  ;;  %v2103_v28 = vld [vmem:[#allocation2 + $0x34] sm:$0xf] }
 0x2a9   : > { %v2000_v60 = vpop.permute.xlu2 %1999 }
 0x2aa   : > { %v1980_v14 = vpop.permute.xlu1 %1979  ;;  %2098 = vst.msk [vmem:[#allocation2 + $0x28] sm:$0xf] %vm2075_vm7, %v2000_v60  ;;  %v1904_v0 = vpop.permute.xlu0 %1903 }
 0x2ab   : > { %2076 = vst.msk [vmem:[#allocation2] sm:$0xf] %vm2075_vm7, %v1980_v14 }
 0x2ac   : > { %1969 = vst.msk [vmem:[#allocation2 + $0x7c] sm:$0xf] %vm1937_vm6, %v1904_v0  ;;  %vm3361_vm6 = vcmask 126016  }
 0x2af   : > { %2170 = vrot.lane.b32.xlu2 %v6530_v39, %s5439_s27  ;;  %2168 = vrot.lane.b32.xlu1 %v6569_v15, %s5439_s27  ;;  %v2087_v15 = vld [vmem:[#allocation2 + $0x14] sm:$0xf] }
 0x2b0   : > { %2166 = vrot.lane.b32.xlu0 %v6300_v29, %s5439_s27 }
 0x2b1   : > { %v2006_v38 = vpop.permute.xlu2 %2005 }
 0x2b2   : > { %v1986_v20 = vpop.permute.xlu1 %1985  ;;  %v2104_v33 = vsel %vm7120_vm9, %v2006_v38, %v2103_v28  ;;  %v1984_v59 = vpop.permute.xlu0 %1983 }
 0x2b3   : > { %v2084_v47 = vsel %vm7120_vm9, %v1986_v20, %v2083_v55  ;;  %2105 = vst [vmem:[#allocation2 + $0x34] sm:$0xf] %v2104_v33  ;;  %v2139_v28 = vld [vmem:[#allocation2 + $0x7c] sm:$0xf]  ;;  %v2119_v55 = vld [vmem:[#allocation2 + $0x54] sm:$0xf] }
 0x2b4   : > { %2085 = vst [vmem:[#allocation2 + $0xc] sm:$0xf] %v2084_v47 }
 0x2b5   : > { %2082 = vst.msk [vmem:[#allocation2 + $0x8] sm:$0xf] %vm2075_vm7, %v1984_v59 }
 0x2b7   : > { %2176 = vrot.lane.b32.xlu2 %v6618_v56, %s5439_s27  ;;  %2174 = vrot.lane.b32.xlu1 %v6598_v8, %s5439_s27  ;;  %v2115_v56 = vld [vmem:[#allocation2 + $0x4c] sm:$0xf] }
 0x2b8   : > { %2172 = vrot.lane.b32.xlu0 %v9612_v35, %s5439_s27 }
 0x2b9   : > { %v2012_v29 = vpop.permute.xlu2 %2011 }
 0x2ba   : > { %v1992_v39 = vpop.permute.xlu1 %1991  ;;  %2110 = vst.msk [vmem:[#allocation2 + $0x40] sm:$0xf] %vm2075_vm7, %v2012_v29  ;;  %v1990_v48 = vpop.permute.xlu0 %1989  ;;  %v9667_v29 = vld [vmem:[#allocation12_spill] sm:$0xff] }
 0x2bb   : > { %2090 = vst.msk [vmem:[#allocation2 + $0x18] sm:$0xf] %vm2075_vm7, %v1992_v39  ;;  %v2088_v5 = vsel %vm7120_vm9, %v1990_v48, %v2087_v15  ;;  %v9670_v15 = vld [vmem:[#allocation7_spill] sm:$0xff]  ;;  %v9694_v39 = vld [vmem:[#allocation49_spill] sm:$0xff] }
 0x2bc   : > { %2089 = vst [vmem:[#allocation2 + $0x14] sm:$0xf] %v2088_v5  ;;  %v2239_v5 = vld [vmem:[#allocation2 + $0x8] sm:$0xf] }
 0x2bf   : > { %2182 = vrot.lane.b32.xlu2 %v6649_v42, %s5439_s27  ;;  %2180 = vrot.lane.b32.xlu1 %v6670_v57, %s5439_s27 }
 0x2c0   : > { %2178 = vrot.lane.b32.xlu0 %v9613_v30, %s5439_s27  ;;  %v2099_v30 = vld [vmem:[#allocation2 + $0x2c] sm:$0xf] }
 0x2c1   : > { %v2018_v8 = vpop.permute.xlu2 %2017 }
 0x2c2   : > { %v1998_v35 = vpop.permute.xlu1 %1997  ;;  %v2116_v52 = vsel %vm7120_vm9, %v2018_v8, %v2115_v56  ;;  %v1996_v36 = vpop.permute.xlu0 %1995 }
 0x2c3   : > { %v2096_v24 = vsel %vm7120_vm9, %v1998_v35, %v2095_v21  ;;  %2117 = vst [vmem:[#allocation2 + $0x4c] sm:$0xf] %v2116_v52  ;;  %v9671_v52 = vld [vmem:[#allocation15_spill] sm:$0xff] }
 0x2c4   : > { %2097 = vst [vmem:[#allocation2 + $0x24] sm:$0xf] %v2096_v24  ;;  %v9672_v24 = vld [vmem:[#allocation10_spill] sm:$0xff] }
 0x2c5   : > { %2094 = vst.msk [vmem:[#allocation2 + $0x20] sm:$0xf] %vm2075_vm7, %v1996_v36 }
 0x2c7   : > { %2188 = vrot.lane.b32.xlu2 %v6702_v43, %s5439_s27  ;;  %2186 = vrot.lane.b32.xlu1 %v6697_v6, %s5439_s27  ;;  %v2127_v6 = vld [vmem:[#allocation2 + $0x64] sm:$0xf] }
 0x2c8   : > { %2184 = vrot.lane.b32.xlu0 %v6503_v18, %s5439_s27 }
 0x2c9   : > { %v2024_v42 = vpop.permute.xlu2 %2023 }
 0x2ca   : > { %v2004_v57 = vpop.permute.xlu1 %2003  ;;  %2122 = vst.msk [vmem:[#allocation2 + $0x58] sm:$0xf] %vm2075_vm7, %v2024_v42  ;;  %v2002_v27 = vpop.permute.xlu0 %2001 }
 0x2cb   : > { %2102 = vst.msk [vmem:[#allocation2 + $0x30] sm:$0xf] %vm2075_vm7, %v2004_v57  ;;  %v2100_v9 = vsel %vm7120_vm9, %v2002_v27, %v2099_v30  ;;  %v2131_v57 = vld [vmem:[#allocation2 + $0x6c] sm:$0xf] }
 0x2cc   : > { %2101 = vst [vmem:[#allocation2 + $0x2c] sm:$0xf] %v2100_v9 }
 0x2cf   : > { %2194 = vrot.lane.b32.xlu2 %v6726_v41, %s5439_s27  ;;  %2192 = vrot.lane.b32.xlu1 %v6740_v63, %s5439_s27  ;;  %v2111_v63 = vld [vmem:[#allocation2 + $0x44] sm:$0xf] }
 0x2d0   : > { %2190 = vrot.lane.b32.xlu0 %v6549_v46, %s5439_s27 }
 0x2d1   : > { %v2030_v18 = vpop.permute.xlu2 %2029 }
 0x2d2   : > { %v2010_v43 = vpop.permute.xlu1 %2009  ;;  %v2128_v3 = vsel %vm7120_vm9, %v2030_v18, %v2127_v6  ;;  %v2008_v60 = vpop.permute.xlu0 %2007  ;;  %v2251_v18 = vld [vmem:[#allocation2 + $0x20] sm:$0xf] }
 0x2d3   : > { %v2108_v54 = vsel %vm7120_vm9, %v2010_v43, %v2107_v34  ;;  %2129 = vst [vmem:[#allocation2 + $0x64] sm:$0xf] %v2128_v3  ;;  %v2135_v34 = vld [vmem:[#allocation2 + $0x74] sm:$0xf] }
 0x2d4   : > { %2109 = vst [vmem:[#allocation2 + $0x3c] sm:$0xf] %v2108_v54  ;;  %v9675_v54 = vld [vmem:[#allocation16_spill] sm:$0xff] }
 0x2d5   : > { %2106 = vst.msk [vmem:[#allocation2 + $0x38] sm:$0xf] %vm2075_vm7, %v2008_v60 }
 0x2d7   : > { %2200 = vrot.lane.b32.xlu2 %v6869_v11, %s5439_s27  ;;  %2198 = vrot.lane.b32.xlu1 %v6873_v53, %s5439_s27  ;;  %v9664_v11 = vld [vmem:[#allocation4_spill] sm:$0xff] }
 0x2d8   : > { %2196 = vrot.lane.b32.xlu0 %v6629_v17, %s5439_s27  ;;  %v9665_v53 = vld [vmem:[#allocation8_spill] sm:$0xff]  ;;  %v9666_v17 = vld [vmem:[#allocation5_spill] sm:$0xff] }
 0x2d9   : > { %v2036_v46 = vpop.permute.xlu2 %2035 }
 0x2da   : > { %v2016_v41 = vpop.permute.xlu1 %2015  ;;  %2134 = vst.msk [vmem:[#allocation2 + $0x70] sm:$0xf] %vm2075_vm7, %v2036_v46  ;;  %v2014_v14 = vpop.permute.xlu0 %2013 }
 0x2db   : > { %2114 = vst.msk [vmem:[#allocation2 + $0x48] sm:$0xf] %vm2075_vm7, %v2016_v41  ;;  %v2112_v0 = vsel %vm7120_vm9, %v2014_v14, %v2111_v63  ;;  %v2234_v41 = vld [vmem:[#allocation2] sm:$0xf] }
 0x2dc   : > { %2113 = vst [vmem:[#allocation2 + $0x44] sm:$0xf] %v2112_v0  ;;  %v2263_v0 = vld [vmem:[#allocation2 + $0x38] sm:$0xf] }
 0x2df   : > { %2299 = vrot.lane.b32.xlu2 %v9664_v11, %s5440_s28  ;;  %2297 = vrot.lane.b32.xlu1 %v9665_v53, %s5440_s28  ;;  %v2243_v53 = vld [vmem:[#allocation2 + $0x10] sm:$0xf] }
 0x2e0   : > { %2295 = vrot.lane.b32.xlu0 %v9666_v17, %s5440_s28 }
 0x2e1   : > { %v2042_v38 = vpop.permute.xlu2 %2041 }
 0x2e2   : > { %v2022_v20 = vpop.permute.xlu1 %2021  ;;  %v2140_v33 = vsel %vm7120_vm9, %v2042_v38, %v2139_v28  ;;  %v2020_v59 = vpop.permute.xlu0 %2019 }
 0x2e3   : > { %v2120_v47 = vsel %vm7120_vm9, %v2022_v20, %v2119_v55  ;;  %2141 = vst [vmem:[#allocation2 + $0x7c] sm:$0xf] %v2140_v33  ;;  %v2247_v33 = vld [vmem:[#allocation2 + $0x18] sm:$0xf] }
 0x2e4   : > { %2121 = vst [vmem:[#allocation2 + $0x54] sm:$0xf] %v2120_v47 }
 0x2e5   : > { %2118 = vst.msk [vmem:[#allocation2 + $0x50] sm:$0xf] %vm2075_vm7, %v2020_v59 }
 0x2e7   : > { %2305 = vrot.lane.b32.xlu2 %v9625_v37, %s5440_s28  ;;  %2303 = vrot.lane.b32.xlu1 %v9667_v29, %s5440_s28  ;;  %v2123_v37 = vld [vmem:[#allocation2 + $0x5c] sm:$0xf] }
 0x2e8   : > { %2301 = vrot.lane.b32.xlu0 %v9670_v15, %s5440_s28 }
 0x2e9   : > { %v2147_v48 = vpop.permute.xlu2 %2146 }
 0x2ea   : > { %v2028_v8 = vpop.permute.xlu1 %2027  ;;  %v2240_v56 = vsel %vm7238_vm11, %v2147_v48, %v2239_v5  ;;  %v2026_v35 = vpop.permute.xlu0 %2025  ;;  %v2255_v48 = vld [vmem:[#allocation2 + $0x28] sm:$0xf] }
 0x2eb   : > { %2126 = vst.msk [vmem:[#allocation2 + $0x60] sm:$0xf] %vm2075_vm7, %v2028_v8  ;;  %v2124_v21 = vsel %vm7120_vm9, %v2026_v35, %v2123_v37  ;;  %v2259_v35 = vld [vmem:[#allocation2 + $0x30] sm:$0xf] }
 0x2ec   : > { %2241 = vst [vmem:[#allocation2 + $0x8] sm:$0xf] %v2240_v56  ;;  %v2275_v29 = vld [vmem:[#allocation2 + $0x50] sm:$0xf] }
 0x2ed   : > { %2125 = vst [vmem:[#allocation2 + $0x5c] sm:$0xf] %v2124_v21 }
 0x2ef   : > { %2311 = vrot.lane.b32.xlu2 %v9627_v45, %s5440_s28  ;;  %2309 = vrot.lane.b32.xlu1 %v9671_v52, %s5440_s28  ;;  %v9673_v45 = vld [vmem:[#allocation13_spill] sm:$0xff] }
 0x2f0   : > { %2307 = vrot.lane.b32.xlu0 %v9672_v24, %s5440_s28 }
 0x2f1   : > { %v2153_v36 = vpop.permute.xlu2 %2152 }
 0x2f2   : > { %v2034_v42 = vpop.permute.xlu1 %2033  ;;  %2246 = vst.msk [vmem:[#allocation2 + $0x14] sm:$0xf] %vm2232_vm10, %v2153_v36  ;;  %v2032_v27 = vpop.permute.xlu0 %2031 }
 0x2f3   : > { %v2132_v30 = vsel %vm7120_vm9, %v2034_v42, %v2131_v57  ;;  %2130 = vst.msk [vmem:[#allocation2 + $0x68] sm:$0xf] %vm2075_vm7, %v2032_v27  ;;  %v2267_v57 = vld [vmem:[#allocation2 + $0x40] sm:$0xf] }
 0x2f4   : > { %2133 = vst [vmem:[#allocation2 + $0x6c] sm:$0xf] %v2132_v30 }
 0x2f7   : > { %2317 = vrot.lane.b32.xlu2 %v6034_v49, %s5440_s28  ;;  %2315 = vrot.lane.b32.xlu1 %v6036_v50, %s5440_s28  ;;  %v9674_v50 = vld [vmem:[#allocation19_spill] sm:$0xff] }
 0x2f8   : > { %2313 = vrot.lane.b32.xlu0 %v9673_v45, %s5440_s28 }
 0x2f9   : > { %v2159_v9 = vpop.permute.xlu2 %2158 }
 0x2fa   : > { %v2040_v6 = vpop.permute.xlu1 %2039  ;;  %v2252_v43 = vsel %vm7238_vm11, %v2159_v9, %v2251_v18  ;;  %v2038_v3 = vpop.permute.xlu0 %2037  ;;  %v2287_v36 = vld [vmem:[#allocation2 + $0x68] sm:$0xf]  ;;  %v9684_v9 = vld [vmem:[#allocation28_spill] sm:$0xff] }
 0x2fb   : > { %2138 = vst.msk [vmem:[#allocation2 + $0x78] sm:$0xf] %vm2075_vm7, %v2040_v6  ;;  %v2136_v49 = vsel %vm7120_vm9, %v2038_v3, %v2135_v34 }
 0x2fc   : > { %2253 = vst [vmem:[#allocation2 + $0x20] sm:$0xf] %v2252_v43  ;;  %v2271_v43 = vld [vmem:[#allocation2 + $0x48] sm:$0xf] }
 0x2fd   : > { %2137 = vst [vmem:[#allocation2 + $0x74] sm:$0xf] %v2136_v49  ;;  %v9685_v49 = vld [vmem:[#allocation35_spill] sm:$0xff] }
 0x2ff   : > { %2323 = vrot.lane.b32.xlu2 %v9630_v12, %s5440_s28  ;;  %2321 = vrot.lane.b32.xlu1 %v9674_v50, %s5440_s28  ;;  %v9676_v12 = vld [vmem:[#allocation17_spill] sm:$0xff]  ;;  %v9686_v50 = vld [vmem:[#allocation36_spill] sm:$0xff] }
 0x300   : > { %2319 = vrot.lane.b32.xlu0 %v9675_v54, %s5440_s28  ;;  %v9687_v54 = vld [vmem:[#allocation31_spill] sm:$0xff] }
 0x301   : > { %v2165_v60 = vpop.permute.xlu2 %2164 }
 0x302   : > { %v2145_v46 = vpop.permute.xlu1 %2144  ;;  %2258 = vst.msk [vmem:[#allocation2 + $0x2c] sm:$0xf] %vm2232_vm10, %v2165_v60  ;;  %v2143_v63 = vpop.permute.xlu0 %2142 }
 0x303   : > { %2238 = vst.msk [vmem:[#allocation2 + $0x4] sm:$0xf] %vm2232_vm10, %v2145_v46  ;;  %v2235_v40 = vsel %vm7238_vm11, %v2143_v63, %v2234_v41  ;;  %v2279_v41 = vld [vmem:[#allocation2 + $0x58] sm:$0xf] }
 0x304   : > { %2236 = vst [vmem:[#allocation2] sm:$0xf] %v2235_v40 }
 0x307   : > { %2329 = vrot.lane.b32.xlu2 %v9632_v31, %s5440_s28  ;;  %2327 = vrot.lane.b32.xlu1 %v6066_v22, %s5440_s28  ;;  %v9677_v22 = vld [vmem:[#allocation23_spill] sm:$0xff]  ;;  %v9678_v31 = vld [vmem:[#allocation20_spill] sm:$0xff] }
 0x308   : > { %2325 = vrot.lane.b32.xlu0 %v9676_v12, %s5440_s28  ;;  %v9688_v12 = vld [vmem:[#allocation39_spill] sm:$0xff] }
 0x309   : > { %v2171_v14 = vpop.permute.xlu2 %2170 }
 0x30a   : > { %v2151_v11 = vpop.permute.xlu1 %2150  ;;  %v2264_v17 = vsel %vm7238_vm11, %v2171_v14, %v2263_v0  ;;  %v2149_v28 = vpop.permute.xlu0 %2148  ;;  %v9689_v14 = vld [vmem:[#allocation34_spill] sm:$0xff] }
 0x30b   : > { %v2244_v38 = vsel %vm7238_vm11, %v2151_v11, %v2243_v53  ;;  %2265 = vst [vmem:[#allocation2 + $0x38] sm:$0xf] %v2264_v17  ;;  %v2283_v53 = vld [vmem:[#allocation2 + $0x60] sm:$0xf] }
 0x30c   : > { %2245 = vst [vmem:[#allocation2 + $0x10] sm:$0xf] %v2244_v38 }
 0x30d   : > { %2242 = vst.msk [vmem:[#allocation2 + $0xc] sm:$0xf] %vm2232_vm10, %v2149_v28 }
 0x30f   : > { %2335 = vrot.lane.b32.xlu2 %v6079_v1, %s5440_s28  ;;  %2333 = vrot.lane.b32.xlu1 %v9677_v22, %s5440_s28 }
 0x310   : > { %2331 = vrot.lane.b32.xlu0 %v9678_v31, %s5440_s28  ;;  %v2291_v31 = vld [vmem:[#allocation2 + $0x70] sm:$0xf] }
 0x311   : > { %v2177_v20 = vpop.permute.xlu2 %2176 }
 0x312   : > { %v2157_v55 = vpop.permute.xlu1 %2156  ;;  %2270 = vst.msk [vmem:[#allocation2 + $0x44] sm:$0xf] %vm2232_vm10, %v2177_v20  ;;  %v2155_v47 = vpop.permute.xlu0 %2154 }
 0x313   : > { %2250 = vst.msk [vmem:[#allocation2 + $0x1c] sm:$0xf] %vm2232_vm10, %v2157_v55  ;;  %v2248_v59 = vsel %vm7238_vm11, %v2155_v47, %v2247_v33  ;;  %v9693_v33 = vld [vmem:[#allocation41_spill] sm:$0xff] }
 0x314   : > { %2249 = vst [vmem:[#allocation2 + $0x18] sm:$0xf] %v2248_v59 }
 0x317   : > { %2341 = vrot.lane.b32.xlu2 %v6098_v19, %s5440_s28  ;;  %2339 = vrot.lane.b32.xlu1 %v6104_v23, %s5440_s28  ;;  %v9679_v19 = vld [vmem:[#allocation26_spill] sm:$0xff]  ;;  %v9680_v23 = vld [vmem:[#allocation24_spill] sm:$0xff] }
 0x318   : > { %2337 = vrot.lane.b32.xlu0 %v9633_v16, %s5440_s28 }
 0x319   : > { %v2183_v1 = vpop.permute.xlu2 %2182 }
 0x31a   : > { %v2163_v15 = vpop.permute.xlu1 %2162  ;;  %v2276_v5 = vsel %vm7238_vm11, %v2183_v1, %v2275_v29  ;;  %v2161_v56 = vpop.permute.xlu0 %2160  ;;  %v9695_v29 = vld [vmem:[#allocation50_spill] sm:$0xff] }
 0x31b   : > { %v2256_v8 = vsel %vm7238_vm11, %v2163_v15, %v2255_v48  ;;  %2277 = vst [vmem:[#allocation2 + $0x50] sm:$0xf] %v2276_v5  ;;  %v9696_v15 = vld [vmem:[#allocation45_spill] sm:$0xff] }
 0x31c   : > { %2257 = vst [vmem:[#allocation2 + $0x28] sm:$0xf] %v2256_v8 }
 0x31d   : > { %2254 = vst.msk [vmem:[#allocation2 + $0x24] sm:$0xf] %vm2232_vm10, %v2161_v56  ;;  %v9697_v56 = vld [vmem:[#allocation53_spill] sm:$0xff] }
 0x31f   : > { %2347 = vrot.lane.b32.xlu2 %v6139_v51, %s5440_s28  ;;  %2345 = vrot.lane.b32.xlu1 %v9679_v19, %s5440_s28  ;;  %v9681_v51 = vld [vmem:[#allocation25_spill] sm:$0xff]  ;;  %v9698_v19 = vld [vmem:[#allocation52_spill] sm:$0xff] }
 0x320   : > { %2343 = vrot.lane.b32.xlu0 %v9680_v23, %s5440_s28  ;;  %v9699_v23 = vld [vmem:[#allocation48_spill] sm:$0xff] }
 0x321   : > { %v2189_v16 = vpop.permute.xlu2 %2188 }
 0x322   : > { %v2169_v37 = vpop.permute.xlu1 %2168  ;;  %2282 = vst.msk [vmem:[#allocation2 + $0x5c] sm:$0xf] %vm2232_vm10, %v2189_v16  ;;  %v2167_v21 = vpop.permute.xlu0 %2166 }
 0x323   : > { %2262 = vst.msk [vmem:[#allocation2 + $0x34] sm:$0xf] %vm2232_vm10, %v2169_v37  ;;  %v2260_v52 = vsel %vm7238_vm11, %v2167_v21, %v2259_v35  ;;  %v9700_v21 = vld [vmem:[#allocation54_spill] sm:$0xff] }
 0x324   : > { %2261 = vst [vmem:[#allocation2 + $0x30] sm:$0xf] %v2260_v52  ;;  %v9701_v52 = vld [vmem:[#allocation56_spill] sm:$0xff] }
 0x327   : > { %2353 = vrot.lane.b32.xlu2 %v6834_v10, %s5440_s28  ;;  %2351 = vrot.lane.b32.xlu1 %v6832_v7, %s5440_s28  ;;  %v9682_v7 = vld [vmem:[#allocation32_spill] sm:$0xff]  ;;  %v9683_v10 = vld [vmem:[#allocation33_spill] sm:$0xff] }
 0x328   : > { %2349 = vrot.lane.b32.xlu0 %v9681_v51, %s5440_s28  ;;  %v9702_v51 = vld [vmem:[#allocation51_spill] sm:$0xff] }
 0x329   : > { %v2195_v24 = vpop.permute.xlu2 %2194 }
 0x32a   : > { %v2175_v42 = vpop.permute.xlu1 %2174  ;;  %v2288_v30 = vsel %vm7238_vm11, %v2195_v24, %v2287_v36  ;;  %v2173_v45 = vpop.permute.xlu0 %2172 }
 0x32b   : > { %v2268_v27 = vsel %vm7238_vm11, %v2175_v42, %v2267_v57  ;;  %2289 = vst [vmem:[#allocation2 + $0x68] sm:$0xf] %v2288_v30 }
 0x32c   : > { %2269 = vst [vmem:[#allocation2 + $0x40] sm:$0xf] %v2268_v27 }
 0x32d   : > { %2266 = vst.msk [vmem:[#allocation2 + $0x3c] sm:$0xf] %vm2232_vm10, %v2173_v45  ;;  %v2605_v45 = vld [vmem:[%s9220_s1 + $0x10] sm:$0x3] }
 0x32f   : > { %2420 = vrot.lane.b32.xlu2 %v9682_v7, %s5441_s29  ;;  %2418 = vrot.lane.b32.xlu1 %v9683_v10, %s5441_s29 }
 0x330   : > { %2416 = vrot.lane.b32.xlu0 %v9684_v9, %s5441_s29 }
 0x331   : > { %v2201_v18 = vpop.permute.xlu2 %2200 }
 0x332   : > { %v2181_v6 = vpop.permute.xlu1 %2180  ;;  %2294 = vst.msk [vmem:[#allocation2 + $0x74] sm:$0xf] %vm2232_vm10, %v2201_v18  ;;  %v2179_v34 = vpop.permute.xlu0 %2178  ;;  %v5374_v18 = vld [vmem:[%s9220_s1 + $0x8] sm:$0xff] }
 0x333   : > { %2274 = vst.msk [vmem:[#allocation2 + $0x4c] sm:$0xf] %vm2232_vm10, %v2181_v6  ;;  %v2272_v3 = vsel %vm7238_vm11, %v2179_v34, %v2271_v43 }
 0x334   : > { %2273 = vst [vmem:[#allocation2 + $0x48] sm:$0xf] %v2272_v3  ;;  %v5373_v3 = vld [vmem:[%s9220_s1] sm:$0xff] }
 0x337   : > { %2426 = vrot.lane.b32.xlu2 %v9685_v49, %s5441_s29  ;;  %2424 = vrot.lane.b32.xlu1 %v9686_v50, %s5441_s29 }
 0x338   : > { %2422 = vrot.lane.b32.xlu0 %v9687_v54, %s5441_s29 }
 0x339   : > { %v2300_v60 = vpop.permute.xlu2 %2299 }
 0x33a   : > { %v2187_v46 = vpop.permute.xlu1 %2186  ;;  %2388 = vst.msk [vmem:[#allocation2 + $0x8] sm:$0xf] %vm2385_vm12, %v2300_v60  ;;  %v2185_v40 = vpop.permute.xlu0 %2184 }
 0x33b   : > { %v2280_v63 = vsel %vm7238_vm11, %v2187_v46, %v2279_v41  ;;  %2278 = vst.msk [vmem:[#allocation2 + $0x54] sm:$0xf] %vm2232_vm10, %v2185_v40 }
 0x33c   : > { %2281 = vst [vmem:[#allocation2 + $0x58] sm:$0xf] %v2280_v63 }
 0x33f   : > { %2432 = vrot.lane.b32.xlu2 %v9643_v61, %s5441_s29  ;;  %2430 = vrot.lane.b32.xlu1 %v9688_v12, %s5441_s29  ;;  %v9690_v61 = vld [vmem:[#allocation37_spill] sm:$0xff] }
 0x340   : > { %2428 = vrot.lane.b32.xlu0 %v9689_v14, %s5441_s29 }
 0x341   : > { %v2306_v0 = vpop.permute.xlu2 %2305 }
 0x342   : > { %v2193_v11 = vpop.permute.xlu1 %2192  ;;  %2391 = vst.msk [vmem:[#allocation2 + $0x14] sm:$0xf] %vm2385_vm12, %v2306_v0  ;;  %v2191_v17 = vpop.permute.xlu0 %2190 }
 0x343   : > { %2286 = vst.msk [vmem:[#allocation2 + $0x64] sm:$0xf] %vm2232_vm10, %v2193_v11  ;;  %v2284_v38 = vsel %vm7238_vm11, %v2191_v17, %v2283_v53 }
 0x344   : > { %2285 = vst [vmem:[#allocation2 + $0x60] sm:$0xf] %v2284_v38 }
 0x347   : > { %2438 = vrot.lane.b32.xlu2 %v9646_v4, %s5441_s29  ;;  %2436 = vrot.lane.b32.xlu1 %v9647_v2, %s5441_s29  ;;  %v9691_v4 = vld [vmem:[#allocation47_spill] sm:$0xff]  ;;  %v9692_v2 = vld [vmem:[#allocation46_spill] sm:$0xff] }
 0x348   : > { %2434 = vrot.lane.b32.xlu0 %v9690_v61, %s5441_s29 }
 0x349   : > { %v2312_v28 = vpop.permute.xlu2 %2311  ;;  %v2518_v54 = vld [vmem:[#allocation2 + $0x14] sm:$0xf] }
 0x34a   : > { %v2199_v22 = vpop.permute.xlu1 %2198  ;;  %2394 = vst.msk [vmem:[#allocation2 + $0x20] sm:$0xf] %vm2385_vm12, %v2312_v28  ;;  %v2197_v55 = vpop.permute.xlu0 %2196 }
 0x34b   : > { %v2292_v20 = vsel %vm7238_vm11, %v2199_v22, %v2291_v31  ;;  %2290 = vst.msk [vmem:[#allocation2 + $0x6c] sm:$0xf] %vm2232_vm10, %v2197_v55  ;;  %vm3957_vm10 = vcmask 322816   ;;  %vm4095_vm11 = vcmask 388416  }
 0x34c   : > { %2293 = vst [vmem:[#allocation2 + $0x70] sm:$0xf] %v2292_v20 }
 0x34f   : > { %2444 = vrot.lane.b32.xlu2 %v9691_v4, %s5441_s29  ;;  %2442 = vrot.lane.b32.xlu1 %v9692_v2, %s5441_s29 }
 0x350   : > { %2440 = vrot.lane.b32.xlu0 %v9693_v33, %s5441_s29 }
 0x351   : > { %v2318_v47 = vpop.permute.xlu2 %2317 }
 0x352   : > { %v2298_v59 = vpop.permute.xlu1 %2297  ;;  %2397 = vst.msk [vmem:[#allocation2 + $0x2c] sm:$0xf] %vm2385_vm12, %v2318_v47  ;;  %v2296_v1 = vpop.permute.xlu0 %2295 }
 0x353   : > { %2387 = vst.msk [vmem:[#allocation2 + $0x4] sm:$0xf] %vm2385_vm12, %v2298_v59 }
 0x354   : > { %2386 = vst.msk [vmem:[#allocation2] sm:$0xf] %vm2385_vm12, %v2296_v1 }
 0x357   : > { %2450 = vrot.lane.b32.xlu2 %v9694_v39, %s5441_s29  ;;  %2448 = vrot.lane.b32.xlu1 %v9695_v29, %s5441_s29 }
 0x358   : > { %2446 = vrot.lane.b32.xlu0 %v9696_v15, %s5441_s29 }
 0x359   : > { %v2324_v48 = vpop.permute.xlu2 %2323  ;;  %v2530_v0 = vld [vmem:[#allocation2 + $0x2c] sm:$0xf] }
 0x35a   : > { %v2304_v5 = vpop.permute.xlu1 %2303  ;;  %2400 = vst.msk [vmem:[#allocation2 + $0x38] sm:$0xf] %vm2385_vm12, %v2324_v48  ;;  %v2302_v8 = vpop.permute.xlu0 %2301  ;;  %v2510_v53 = vld [vmem:[#allocation2 + $0x4] sm:$0xf] }
 0x35b   : > { %2390 = vst.msk [vmem:[#allocation2 + $0x10] sm:$0xf] %vm2385_vm12, %v2304_v5 }
 0x35c   : > { %2389 = vst.msk [vmem:[#allocation2 + $0xc] sm:$0xf] %vm2385_vm12, %v2302_v8 }
 0x35f   : > { %2456 = vrot.lane.b32.xlu2 %v9697_v56, %s5441_s29  ;;  %2454 = vrot.lane.b32.xlu1 %v9698_v19, %s5441_s29 }
 0x360   : > { %2452 = vrot.lane.b32.xlu0 %v9699_v23, %s5441_s29 }
 0x361   : > { %v2330_v16 = vpop.permute.xlu2 %2329 }
 0x362   : > { %v2310_v37 = vpop.permute.xlu1 %2309  ;;  %2403 = vst.msk [vmem:[#allocation2 + $0x44] sm:$0xf] %vm2385_vm12, %v2330_v16  ;;  %v2308_v35 = vpop.permute.xlu0 %2307 }
 0x363   : > { %2393 = vst.msk [vmem:[#allocation2 + $0x1c] sm:$0xf] %vm2385_vm12, %v2310_v37  ;;  %v2514_v31 = vld [vmem:[#allocation2 + $0xc] sm:$0xf] }
 0x364   : > { %2392 = vst.msk [vmem:[#allocation2 + $0x18] sm:$0xf] %vm2385_vm12, %v2308_v35 }
 0x367   : > { %2462 = vrot.lane.b32.xlu2 %v9700_v21, %s5441_s29  ;;  %2460 = vrot.lane.b32.xlu1 %v9701_v52, %s5441_s29 }
 0x368   : > { %2458 = vrot.lane.b32.xlu0 %v9702_v51, %s5441_s29 }
 0x369   : > { %v2336_v24 = vpop.permute.xlu2 %2335  ;;  %v2542_v33 = vld [vmem:[#allocation2 + $0x44] sm:$0xf] }
 0x36a   : > { %v2316_v36 = vpop.permute.xlu1 %2315  ;;  %2406 = vst.msk [vmem:[#allocation2 + $0x50] sm:$0xf] %vm2385_vm12, %v2336_v24  ;;  %v2314_v42 = vpop.permute.xlu0 %2313  ;;  %v2522_v59 = vld [vmem:[#allocation2 + $0x1c] sm:$0xf] }
 0x36b   : > { %2396 = vst.msk [vmem:[#allocation2 + $0x28] sm:$0xf] %vm2385_vm12, %v2316_v36 }
 0x36c   : > { %2395 = vst.msk [vmem:[#allocation2 + $0x24] sm:$0xf] %vm2385_vm12, %v2314_v42 }
 0x36f   : > { %2468 = vrot.lane.b32.xlu2 %v6713_v58, %s5441_s29  ;;  %2466 = vrot.lane.b32.xlu1 %v6715_v32, %s5441_s29 }
 0x370   : > { %2464 = vrot.lane.b32.xlu0 %v9661_v13, %s5441_s29 }
 0x371   : > { %v2342_v57 = vpop.permute.xlu2 %2341 }
 0x372   : > { %v2322_v30 = vpop.permute.xlu1 %2321  ;;  %2409 = vst.msk [vmem:[#allocation2 + $0x5c] sm:$0xf] %vm2385_vm12, %v2342_v57  ;;  %v2320_v27 = vpop.permute.xlu0 %2319 }
 0x373   : > { %2399 = vst.msk [vmem:[#allocation2 + $0x34] sm:$0xf] %vm2385_vm12, %v2322_v30  ;;  %v2526_v5 = vld [vmem:[#allocation2 + $0x24] sm:$0xf] }
 0x374   : > { %2398 = vst.msk [vmem:[#allocation2 + $0x30] sm:$0xf] %vm2385_vm12, %v2320_v27 }
 0x377   : > { %2474 = vrot.lane.b32.xlu2 %v7098_v62, %s5441_s29  ;;  %2472 = vrot.lane.b32.xlu1 %v7103_v26, %s5441_s29  ;;  %v2695_v62 = vunpack.c.l.b16 %v2605_v45 }
 0x378   : > { %2470 = vrot.lane.b32.xlu0 %v6705_v44, %s5441_s29 }
 0x379   : > { %v2348_v58 = vpop.permute.xlu2 %2347  ;;  %v2698_v26 = vpack.c.b16 %v2695_v62, %v2695_v62  ;;  %v2554_v16 = vld [vmem:[#allocation2 + $0x5c] sm:$0xf] }
 0x37a   : > { %v2328_v32 = vpop.permute.xlu1 %2327  ;;  %2412 = vst.msk [vmem:[#allocation2 + $0x68] sm:$0xf] %vm2385_vm12, %v2348_v58  ;;  %v2326_v13 = vpop.permute.xlu0 %2325  ;;  %v2534_v35 = vld [vmem:[#allocation2 + $0x34] sm:$0xf] }
 0x37b   : > { %2402 = vst.msk [vmem:[#allocation2 + $0x40] sm:$0xf] %vm2385_vm12, %v2328_v32  ;;  %v2752_v9 = vsel %vm2750_vm14, %v2698_v26, 0  ;;  %vm4252_vm14 = vcmask 454016  }
 0x37c   : > { %2401 = vst.msk [vmem:[#allocation2 + $0x3c] sm:$0xf] %vm2385_vm12, %v2326_v13  ;;  %2759 = vmatpush.bf16.msra.mxu0 %v2752_v9  ;;  %5395 = vmatpush.bf16.msra.mxu3 %v2752_v9 }
 0x380   : > { %2760 = vmatpush.bf16.msra.mxu0 %v5374_v18  ;;  %5396 = vmatpush.bf16.msra.mxu3 %v5374_v18 }
 0x381   : > { %v2354_v7 = vpop.permute.xlu2 %2353 }
 0x382   : > { %v2334_v10 = vpop.permute.xlu1 %2333  ;;  %2415 = vst.msk [vmem:[#allocation2 + $0x74] sm:$0xf] %vm2385_vm12, %v2354_v7  ;;  %v2332_v44 = vpop.permute.xlu0 %2331 }
 0x383   : > { %2405 = vst.msk [vmem:[#allocation2 + $0x4c] sm:$0xf] %vm2385_vm12, %v2334_v10  ;;  %v2538_v42 = vld [vmem:[#allocation2 + $0x3c] sm:$0xf] }
 0x384   : > { %2404 = vst.msk [vmem:[#allocation2 + $0x48] sm:$0xf] %vm2385_vm12, %v2332_v44  ;;  %2761 = vmatpush.bf16.msra.mxu0 %v5373_v3  ;;  %5397 = vmatpush.bf16.msra.mxu3 %v5373_v3 }
 0x389   : > { %v2421_v6 = vpop.permute.xlu2 %2420  ;;  %v2566_v32 = vld [vmem:[#allocation2 + $0x74] sm:$0xf] }
 0x38a   : > { %v2340_v43 = vpop.permute.xlu1 %2339  ;;  %2513 = vst.msk [vmem:[#allocation2 + $0x8] sm:$0xf] %vm2506_vm1, %v2421_v6  ;;  %v2338_v34 = vpop.permute.xlu0 %2337  ;;  %v2546_v45 = vld [vmem:[#allocation2 + $0x4c] sm:$0xf] }
 0x38b   : > { %2408 = vst.msk [vmem:[#allocation2 + $0x58] sm:$0xf] %vm2385_vm12, %v2340_v43 }
 0x38c   : > { %2407 = vst.msk [vmem:[#allocation2 + $0x54] sm:$0xf] %vm2385_vm12, %v2338_v34 }
 0x391   : > { %v2427_v50 = vpop.permute.xlu2 %2426 }
 0x392   : > { %v2346_v60 = vpop.permute.xlu1 %2345  ;;  %v2519_v46 = vsel %vm7444_vm2, %v2427_v50, %v2518_v54  ;;  %v2344_v41 = vpop.permute.xlu0 %2343 }
 0x393   : > { %2411 = vst.msk [vmem:[#allocation2 + $0x64] sm:$0xf] %vm2385_vm12, %v2346_v60  ;;  %v2550_v44 = vld [vmem:[#allocation2 + $0x54] sm:$0xf] }
 0x394   : > { %2520 = vst [vmem:[#allocation2 + $0x14] sm:$0xf] %v2519_v46 }
 0x395   : > { %2410 = vst.msk [vmem:[#allocation2 + $0x60] sm:$0xf] %vm2385_vm12, %v2344_v41 }
 0x399   : > { %v2433_v63 = vpop.permute.xlu2 %2432 }
 0x39a   : > { %v2352_v40 = vpop.permute.xlu1 %2351  ;;  %2525 = vst.msk [vmem:[#allocation2 + $0x20] sm:$0xf] %vm2506_vm1, %v2433_v63  ;;  %v2350_v12 = vpop.permute.xlu0 %2349  ;;  %v2558_v3 = vld [vmem:[#allocation2 + $0x64] sm:$0xf] }
 0x39b   : > { %2414 = vst.msk [vmem:[#allocation2 + $0x70] sm:$0xf] %vm2385_vm12, %v2352_v40 }
 0x39c   : > { %2413 = vst.msk [vmem:[#allocation2 + $0x6c] sm:$0xf] %vm2385_vm12, %v2350_v12  ;;  %vm8674_vm12 = vmand %vm4095_vm11, %vm1369_vm13 }
 0x3a1   : > { %v2439_v14 = vpop.permute.xlu2 %2438 }
 0x3a2   : > { %v2419_v11 = vpop.permute.xlu1 %2418  ;;  %v2531_v17 = vsel %vm7444_vm2, %v2439_v14, %v2530_v0  ;;  %v2417_v61 = vpop.permute.xlu0 %2416 }
 0x3a3   : > { %v2511_v38 = vsel %vm7444_vm2, %v2419_v11, %v2510_v53  ;;  %2532 = vst [vmem:[#allocation2 + $0x2c] sm:$0xf] %v2531_v17  ;;  %v2562_v46 = vld [vmem:[#allocation2 + $0x6c] sm:$0xf] }
 0x3a4   : > { %2512 = vst [vmem:[#allocation2 + $0x4] sm:$0xf] %v2511_v38 }
 0x3a5   : > { %2507 = vst.msk [vmem:[#allocation2] sm:$0xf] %vm2506_vm1, %v2417_v61 }
 0x3a9   : > { %v2445_v28 = vpop.permute.xlu2 %2444 }
 0x3aa   : > { %v2425_v22 = vpop.permute.xlu1 %2424  ;;  %2537 = vst.msk [vmem:[#allocation2 + $0x38] sm:$0xf] %vm2506_vm1, %v2445_v28  ;;  %v2423_v20 = vpop.permute.xlu0 %2422 }
 0x3ab   : > { %2517 = vst.msk [vmem:[#allocation2 + $0x10] sm:$0xf] %vm2506_vm1, %v2425_v22  ;;  %v2515_v55 = vsel %vm7444_vm2, %v2423_v20, %v2514_v31 }
 0x3ac   : > { %2516 = vst [vmem:[#allocation2 + $0xc] sm:$0xf] %v2515_v55  ;;  %v5357_v4 = vld [vmem:[#allocation2] sm:$0xff] }
 0x3ad   : > { %5241 = vmatmul.msk.bf16.vlgmr.msra.gmra.mxu0 %vm2701_vm3, %v5357_v4 }
 0x3b1   : > { %v2451_v2 = vpop.permute.xlu2 %2450 }
 0x3b2   : > { %v2431_v47 = vpop.permute.xlu1 %2430  ;;  %v2543_v1 = vsel %vm7444_vm2, %v2451_v2, %v2542_v33  ;;  %v2429_v29 = vpop.permute.xlu0 %2428  ;;  %v5359_v27 = vld [vmem:[#allocation2 + $0x10] sm:$0xff] }
 0x3b3   : > { %v2523_v39 = vsel %vm7444_vm2, %v2431_v47, %v2522_v59  ;;  %2544 = vst [vmem:[#allocation2 + $0x44] sm:$0xf] %v2543_v1  ;;  %v5358_v19 = vld [vmem:[#allocation2 + $0x8] sm:$0xff] }
 0x3b4   : > { %2524 = vst [vmem:[#allocation2 + $0x1c] sm:$0xf] %v2523_v39  ;;  %v3180_v1 = vld [vmem:[#allocation3 + $0x8] sm:$0xf] }
 0x3b5   : > { %2521 = vst.msk [vmem:[#allocation2 + $0x18] sm:$0xf] %vm2506_vm1, %v2429_v29 }
 0x3b9   : > { %v2457_v15 = vpop.permute.xlu2 %2456 }
 0x3ba   : > { %v2437_v48 = vpop.permute.xlu1 %2436  ;;  %2549 = vst.msk [vmem:[#allocation2 + $0x50] sm:$0xf] %vm2506_vm1, %v2457_v15  ;;  %v2435_v8 = vpop.permute.xlu0 %2434 }
 0x3bb   : > { %2529 = vst.msk [vmem:[#allocation2 + $0x28] sm:$0xf] %vm2506_vm1, %v2437_v48  ;;  %v2527_v56 = vsel %vm7444_vm2, %v2435_v8, %v2526_v5 }
 0x3bc   : > { %2528 = vst [vmem:[#allocation2 + $0x24] sm:$0xf] %v2527_v56  ;;  %v5360_v6 = vld [vmem:[#allocation2 + $0x18] sm:$0xff] }
 0x3bd   : > { %5242 = vmatmul.msk.bf16.gmra.mxu0 %vm2701_vm3, %v5358_v19 }
 0x3c1   : > { %v2463_v23 = vpop.permute.xlu2 %2462 }
 0x3c2   : > { %v2443_v37 = vpop.permute.xlu1 %2442  ;;  %v2555_v21 = vsel %vm7444_vm2, %v2463_v23, %v2554_v16  ;;  %v2441_v51 = vpop.permute.xlu0 %2440  ;;  %v5362_v14 = vld [vmem:[#allocation2 + $0x28] sm:$0xff] }
 0x3c3   : > { %v2535_v52 = vsel %vm7444_vm2, %v2443_v37, %v2534_v35  ;;  %2556 = vst [vmem:[#allocation2 + $0x5c] sm:$0xf] %v2555_v21  ;;  %v5361_v40 = vld [vmem:[#allocation2 + $0x20] sm:$0xff] }
 0x3c4   : > { %2536 = vst [vmem:[#allocation2 + $0x34] sm:$0xf] %v2535_v52 }
 0x3c5   : > { %2533 = vst.msk [vmem:[#allocation2 + $0x30] sm:$0xf] %vm2506_vm1, %v2441_v51  ;;  %v5372_v51 = vld [vmem:[#allocation2 + $0x78] sm:$0xff] }
 0x3c9   : > { %v2469_v24 = vpop.permute.xlu2 %2468 }
 0x3ca   : > { %v2449_v36 = vpop.permute.xlu1 %2448  ;;  %2561 = vst.msk [vmem:[#allocation2 + $0x68] sm:$0xf] %vm2506_vm1, %v2469_v24  ;;  %v2447_v57 = vpop.permute.xlu0 %2446 }
 0x3cb   : > { %2541 = vst.msk [vmem:[#allocation2 + $0x40] sm:$0xf] %vm2506_vm1, %v2449_v36  ;;  %v2539_v30 = vsel %vm7444_vm2, %v2447_v57, %v2538_v42  ;;  %v3197_v42 = vld [vmem:[#allocation3 + $0x28] sm:$0xf] }
 0x3cc   : > { %2540 = vst [vmem:[#allocation2 + $0x3c] sm:$0xf] %v2539_v30  ;;  %v5363_v11 = vld [vmem:[#allocation2 + $0x30] sm:$0xff] }
 0x3cd   : > { %5243 = vmatmul.msk.bf16.gmra.mxu0 %vm2701_vm3, %v5359_v27 }
 0x3d1   : > { %v2475_v58 = vpop.permute.xlu2 %2474 }
 0x3d2   : > { %v2455_v13 = vpop.permute.xlu1 %2454  ;;  %v2567_v62 = vsel %vm7444_vm2, %v2475_v58, %v2566_v32  ;;  %v2453_v10 = vpop.permute.xlu0 %2452  ;;  %v5365_v28 = vld [vmem:[#allocation2 + $0x40] sm:$0xff] }
 0x3d3   : > { %v2547_v7 = vsel %vm7444_vm2, %v2455_v13, %v2546_v45  ;;  %2568 = vst [vmem:[#allocation2 + $0x74] sm:$0xf] %v2567_v62  ;;  %v5364_v49 = vld [vmem:[#allocation2 + $0x38] sm:$0xff] }
 0x3d4   : > { %2548 = vst [vmem:[#allocation2 + $0x4c] sm:$0xf] %v2547_v7 }
 0x3d5   : > { %2545 = vst.msk [vmem:[#allocation2 + $0x48] sm:$0xf] %vm2506_vm1, %v2453_v10  ;;  %v3185_v10 = vld [vmem:[#allocation3 + $0x10] sm:$0xf] }
 0x3da   : > { %v2461_v26 = vpop.permute.xlu1 %2460  ;;  %v2459_v9 = vpop.permute.xlu0 %2458 }
 0x3db   : > { %2553 = vst.msk [vmem:[#allocation2 + $0x58] sm:$0xf] %vm2506_vm1, %v2461_v26  ;;  %v2551_v18 = vsel %vm7444_vm2, %v2459_v9, %v2550_v44 }
 0x3dc   : > { %2552 = vst [vmem:[#allocation2 + $0x54] sm:$0xf] %v2551_v18  ;;  %v5366_v43 = vld [vmem:[#allocation2 + $0x48] sm:$0xff] }
 0x3dd   : > { %5244 = vmatmul.msk.bf16.gmra.mxu0 %vm2701_vm3, %v5360_v6  ;;  %5250 = vmatmul.msk.bf16.vlgmr.msra.gmra.mxu3 %vm2701_vm3, %v5366_v43 }
 0x3e2   : > { %v2467_v34 = vpop.permute.xlu1 %2466  ;;  %v2465_v54 = vpop.permute.xlu0 %2464  ;;  %v5368_v0 = vld [vmem:[#allocation2 + $0x58] sm:$0xff] }
 0x3e3   : > { %v2559_v50 = vsel %vm7444_vm2, %v2467_v34, %v2558_v3  ;;  %2557 = vst.msk [vmem:[#allocation2 + $0x60] sm:$0xf] %vm2506_vm1, %v2465_v54  ;;  %v5367_v12 = vld [vmem:[#allocation2 + $0x50] sm:$0xff] }
 0x3e4   : > { %2560 = vst [vmem:[#allocation2 + $0x64] sm:$0xf] %v2559_v50 }
 0x3ea   : > { %v2473_v60 = vpop.permute.xlu1 %2472  ;;  %v2471_v41 = vpop.permute.xlu0 %2470 }
 0x3eb   : > { %2565 = vst.msk [vmem:[#allocation2 + $0x70] sm:$0xf] %vm2506_vm1, %v2473_v60  ;;  %v2563_v63 = vsel %vm7444_vm2, %v2471_v41, %v2562_v46  ;;  %v5369_v53 = vld [vmem:[#allocation2 + $0x60] sm:$0xff]  ;;  %vm8793_vm1 = vmand %vm4252_vm14, %vm1155_vm8  ;;  %vm4405_vm2 = vcmask 519616  }
 0x3ec   : > { %2564 = vst [vmem:[#allocation2 + $0x6c] sm:$0xf] %v2563_v63 }
 0x3ed   : > { %5245 = vmatmul.msk.bf16.gmra.mxu0 %vm2701_vm3, %v5361_v40  ;;  %5251 = vmatmul.msk.bf16.gmra.mxu3 %vm2701_vm3, %v5367_v12 }
 0x3f2   : > { %v5371_v22 = vld [vmem:[#allocation2 + $0x70] sm:$0xff] }
 0x3f3   : > { %v5370_v17 = vld [vmem:[#allocation2 + $0x68] sm:$0xff] }
 0x3fd   : > { %5246 = vmatmul.msk.bf16.gmra.mxu0 %vm2701_vm3, %v5362_v14  ;;  %5252 = vmatmul.msk.bf16.gmra.mxu3 %vm2701_vm3, %v5368_v0 }
 0x40d   : > { %5247 = vmatmul.msk.bf16.gmra.mxu0 %vm2701_vm3, %v5363_v11  ;;  %5253 = vmatmul.msk.bf16.gmra.mxu3 %vm2701_vm3, %v5369_v53 }
 0x41d   : > { %5248 = vmatmul.msk.bf16.gmra.mxu0 %vm2701_vm3, %v5364_v49  ;;  %5254 = vmatmul.msk.bf16.gmra.mxu3 %vm2701_vm3, %v5370_v17 }
 0x42a   : > { %v7509_v38 = vpop.f32.mrf.mxu0 }
 0x42b   : > { %9705 = vst [vmem:[#allocation40_spill] sm:$0xff] %v7509_v38  ;;  %v2843_v61 = vmax.f32 %v7509_v38, 0.0 }
 0x42d   : > { %v7512_v31 = vpack.c.bf16 %v2843_v61, %v2843_v61  ;;  %5249 = vmatmul.msk.bf16.gmra.mxu0 %vm2701_vm3, %v5365_v28  ;;  %5255 = vmatmul.msk.bf16.gmra.mxu3 %vm2701_vm3, %v5371_v22 }
 0x42f   : > { %9706 = vst [vmem:[#allocation43_spill] sm:$0xff] %v7512_v31  ;;  %v2908_v20 = vshrl.u32 %v7512_v31, 16  ;;  %v2911_v55 = vshll.u32 %v7512_v31, 16  ;;  %3271 = vrot.lane.b32.xlu0 %v7512_v31, %s5435_s23 }
 0x431   : > { %v2910_v4 = vrot.slane %v2908_v20, 7  ;;  %v3392_v2 = vrot.slane %v2908_v20, 4  ;;  %v3393_v33 = vrot.slane %v2911_v55, 5  ;;  %v3189_v20 = vld [vmem:[#allocation3 + $0x18] sm:$0xf] }
 0x432   : > { %v7520_v47 = vpop.f32.mrf.mxu0 }
 0x433   : > { %9707 = vst [vmem:[#allocation6_spill] sm:$0xff] %v7520_v47  ;;  %v7528_v39 = vor.u32 %v2911_v55, %v2910_v4  ;;  %v2844_v29 = vmax.f32 %v7520_v47, 0.0  ;;  %v3394_v15 = vor.u32 %v3393_v33, %v3392_v2  ;;  %v2914_v21 = vrot.slane %v2910_v4, 4 }
 0x435   : > { %9710 = vst [vmem:[#allocation9_spill] sm:$0xff] %v7528_v39  ;;  %v7531_v48 = vpack.c.bf16 %v2844_v29, %v2844_v29  ;;  %v3181_v5 = vsel %vm7524_vm5, %v7528_v39, %v3180_v1  ;;  %v3395_v23 = vrot.slane %v3394_v15, 4 }
 0x436   : > { %3182 = vst [vmem:[#allocation3 + $0x8] sm:$0xf] %v3181_v5 }
 0x437   : > { %9711 = vst [vmem:[#allocation11_spill] sm:$0xff] %v7531_v48  ;;  %v2916_v8 = vshrl.u32 %v7531_v48, 16  ;;  %v2919_v56 = vshll.u32 %v7531_v48, 16  ;;  %3273 = vrot.lane.b32.xlu1 %v7531_v48, %s5435_s23 }
 0x439   : > { %v2918_v19 = vrot.slane %v2916_v8, 7  ;;  %v7540_v16 = vrot.slane %v2919_v56, 5  ;;  %v7542_v37 = vrot.slane %v2916_v8, 4 }
 0x43a   : > { %v7544_v35 = vpop.f32.mrf.mxu0 }
 0x43b   : > { %9712 = vst [vmem:[#allocation14_spill] sm:$0xff] %v7544_v35  ;;  %v2845_v52 = vmax.f32 %v7544_v35, 0.0  ;;  %v2921_v24 = vor.u32 %v2919_v56, %v2918_v19  ;;  %v7550_v36 = vsel %vm6169_vm0, %v3395_v23, %v7540_v16 }
 0x43d   : > { %v7554_v57 = vpack.c.bf16 %v2845_v52, %v2845_v52  ;;  %5256 = vmatmul.msk.bf16.gmra.mxu3 %vm2701_vm3, %v5372_v51  ;;  %v7559_v27 = vsel %vm6149_vm15, %v2914_v21, %v2921_v24  ;;  %vm4526_vm3 = vcmask 585216  }
 0x43e   : > { %9715 = vst [vmem:[#allocation21_spill] sm:$0xff] %v7559_v27 }
 0x43f   : > { %9713 = vst [vmem:[#allocation18_spill] sm:$0xff] %v7554_v57  ;;  %v2924_v58 = vshrl.u32 %v7554_v57, 16  ;;  %v2927_v32 = vshll.u32 %v7554_v57, 16  ;;  %3275 = vrot.lane.b32.xlu2 %v7554_v57, %s5435_s23  ;;  %v3225_v57 = vld [vmem:[#allocation3 + $0x60] sm:$0xf] }
 0x440   : > { %3184 = vst.msk [vmem:[#allocation3 + $0xc] sm:$0xf] %vm3178_vm4, %v7559_v27 }
 0x441   : > { %v2926_v13 = vrot.slane %v2924_v58, 7  ;;  %v3401_v45 = vrot.slane %v2924_v58, 4  ;;  %v3402_v62 = vrot.slane %v2927_v32, 5 }
 0x442   : > { %v7567_v7 = vpop.f32.mrf.mxu0 }
 0x443   : > { %9716 = vst [vmem:[#allocation22_spill] sm:$0xff] %v7567_v7  ;;  %v2846_v26 = vmax.f32 %v7567_v7, 0.0  ;;  %v7570_v44 = vor.u32 %v2927_v32, %v2926_v13  ;;  %v3403_v9 = vor.u32 %v3402_v62, %v3401_v45  ;;  %v2930_v41 = vrot.slane %v2926_v13, 4 }
 0x445   : > { %9717 = vst [vmem:[#allocation29_spill] sm:$0xff] %v7570_v44  ;;  %v7572_v18 = vpack.c.bf16 %v2846_v26, %v2846_v26  ;;  %v3186_v6 = vsel %vm7524_vm5, %v7570_v44, %v3185_v10  ;;  %v3404_v60 = vrot.slane %v3403_v9, 4 }
 0x446   : > { %3187 = vst [vmem:[#allocation3 + $0x10] sm:$0xf] %v3186_v6 }
 0x447   : > { %9718 = vst [vmem:[#allocation30_spill] sm:$0xff] %v7572_v18  ;;  %3277 = vrot.lane.b32.xlu0 %v7572_v18, %s5435_s23  ;;  %v2932_v43 = vshrl.u32 %v7572_v18, 16  ;;  %v2935_v34 = vshll.u32 %v7572_v18, 16 }
 0x449   : > { %v2934_v3 = vrot.slane %v2932_v43, 7  ;;  %v7581_v50 = vrot.slane %v2935_v34, 5  ;;  %v7583_v54 = vrot.slane %v2932_v43, 4 }
 0x44a   : > { %v7585_v46 = vpop.f32.mrf.mxu0 }
 0x44b   : > { %9719 = vst [vmem:[#allocation38_spill] sm:$0xff] %v7585_v46  ;;  %v2847_v63 = vmax.f32 %v7585_v46, 0.0  ;;  %v2937_v40 = vor.u32 %v2935_v34, %v2934_v3  ;;  %v7593_v14 = vsel %vm6169_vm0, %v3404_v60, %v7581_v50  ;;  %v3193_v3 = vld [vmem:[#allocation3 + $0x20] sm:$0xf] }
 0x44d   : > { %v7595_v0 = vpack.c.bf16 %v2847_v63, %v2847_v63  ;;  %v7599_v11 = vsel %vm6149_vm15, %v2930_v41, %v2937_v40 }
 0x44e   : > { %9721 = vst [vmem:[#allocation44_spill] sm:$0xff] %v7599_v11 }
 0x44f   : > { %9720 = vst [vmem:[#allocation42_spill] sm:$0xff] %v7595_v0  ;;  %v2943_v53 = vshll.u32 %v7595_v0, 16  ;;  %3279 = vrot.lane.b32.xlu1 %v7595_v0, %s5435_s23  ;;  %v2940_v49 = vshrl.u32 %v7595_v0, 16 }
 0x450   : > { %3188 = vst.msk [vmem:[#allocation3 + $0x14] sm:$0xf] %vm3178_vm4, %v7599_v11 }
 0x451   : > { %v2942_v17 = vrot.slane %v2940_v49, 7  ;;  %v3410_v61 = vrot.slane %v2940_v49, 4  ;;  %v3411_v28 = vrot.slane %v2943_v53, 5 }
 0x452   : > { %v7607_v22 = vpop.f32.mrf.mxu0 }
 0x453   : > { %9722 = vst [vmem:[#allocation55_spill] sm:$0xff] %v7607_v22  ;;  %v2848_v55 = vmax.f32 %v7607_v22, 0.0  ;;  %v7610_v4 = vor.u32 %v2943_v53, %v2942_v17  ;;  %v3412_v2 = vor.u32 %v3411_v28, %v3410_v61  ;;  %v2946_v21 = vrot.slane %v2942_v17, 4 }
 0x455   : > { %9723 = vst [vmem:[#allocation4_spill] sm:$0xff] %v7610_v4  ;;  %v7612_v33 = vpack.c.bf16 %v2848_v55, %v2848_v55  ;;  %v3190_v1 = vsel %vm7524_vm5, %v7610_v4, %v3189_v20  ;;  %v3413_v8 = vrot.slane %v3412_v2, 4  ;;  %v3209_v4 = vld [vmem:[#allocation3 + $0x40] sm:$0xf] }
 0x456   : > { %3191 = vst [vmem:[#allocation3 + $0x18] sm:$0xf] %v3190_v1 }
 0x457   : > { %9724 = vst [vmem:[#allocation8_spill] sm:$0xff] %v7612_v33  ;;  %3281 = vrot.lane.b32.xlu2 %v7612_v33, %s5435_s23  ;;  %v2948_v29 = vshrl.u32 %v7612_v33, 16  ;;  %v2951_v15 = vshll.u32 %v7612_v33, 16  ;;  %v3201_v33 = vld [vmem:[#allocation3 + $0x30] sm:$0xf] }
 0x459   : > { %v2950_v5 = vrot.slane %v2948_v29, 7  ;;  %v7621_v56 = vrot.slane %v2951_v15, 5  ;;  %v7623_v19 = vrot.slane %v2948_v29, 4 }
 0x45a   : > { %v7625_v23 = vpop.f32.mrf.mxu0 }
 0x45b   : > { %9725 = vst [vmem:[#allocation5_spill] sm:$0xff] %v7625_v23  ;;  %v2849_v52 = vmax.f32 %v7625_v23, 0.0  ;;  %v2953_v51 = vor.u32 %v2951_v15, %v2950_v5  ;;  %v7631_v24 = vsel %vm6169_vm0, %v3413_v8, %v7621_v56 }
 0x45d   : > { %v7635_v32 = vpack.c.bf16 %v2849_v52, %v2849_v52  ;;  %v7639_v13 = vsel %vm6149_vm15, %v2946_v21, %v2953_v51  ;;  %v3217_v51 = vld [vmem:[#allocation3 + $0x50] sm:$0xf] }
 0x45e   : > { %9727 = vst [vmem:[#allocation7_spill] sm:$0xff] %v7639_v13 }
 0x45f   : > { %9726 = vst [vmem:[#allocation12_spill] sm:$0xff] %v7635_v32  ;;  %v2956_v45 = vshrl.u32 %v7635_v32, 16  ;;  %v2959_v62 = vshll.u32 %v7635_v32, 16  ;;  %3283 = vrot.lane.b32.xlu0 %v7635_v32, %s5435_s23 }
 0x460   : > { %3192 = vst.msk [vmem:[#allocation3 + $0x1c] sm:$0xf] %vm3178_vm4, %v7639_v13  ;;  %v7647_v10 = vpop.f32.mrf.mxu3 }
 0x461   : > { %9728 = vst [vmem:[#allocation15_spill] sm:$0xff] %v7647_v10  ;;  %v2861_v26 = vmax.f32 %v7647_v10, 0.0  ;;  %v2958_v9 = vrot.slane %v2956_v45, 7  ;;  %v3419_v6 = vrot.slane %v2956_v45, 4  ;;  %v3420_v43 = vrot.slane %v2959_v62, 5 }
 0x462   : > { %v7650_v34 = vpop.f32.mrf.mxu0 }
 0x463   : > { %9729 = vst [vmem:[#allocation10_spill] sm:$0xff] %v7650_v34  ;;  %v7652_v60 = vpack.c.bf16 %v2861_v26, %v2861_v26  ;;  %v2850_v41 = vmax.f32 %v7650_v34, 0.0  ;;  %v7655_v63 = vor.u32 %v2959_v62, %v2958_v9  ;;  %v3421_v40 = vor.u32 %v3420_v43, %v3419_v6 }
 0x464   : > { %v2962_v62 = vrot.slane %v2958_v9, 4 }
 0x465   : > { %9730 = vst [vmem:[#allocation13_spill] sm:$0xff] %v7652_v60  ;;  %v7657_v53 = vpack.c.bf16 %v2850_v41, %v2850_v41  ;;  %v3194_v49 = vsel %vm7524_vm5, %v7655_v63, %v3193_v3  ;;  %v3052_v17 = vshrl.u32 %v7652_v60, 16  ;;  %v3055_v61 = vshll.u32 %v7652_v60, 16 }
 0x466   : > { %9731 = vst [vmem:[#allocation19_spill] sm:$0xff] %v7655_v63  ;;  %v3422_v29 = vrot.slane %v3421_v40, 4 }
 0x467   : > { %9732 = vst [vmem:[#allocation16_spill] sm:$0xff] %v7657_v53  ;;  %3285 = vrot.lane.b32.xlu1 %v7657_v53, %s5435_s23  ;;  %v2964_v28 = vshrl.u32 %v7657_v53, 16  ;;  %v2967_v20 = vshll.u32 %v7657_v53, 16  ;;  %v3473_v55 = vrot.slane %v3052_v17, 4  ;;  %v3474_v2 = vrot.slane %v3055_v61, 5 }
 0x468   : > { %3195 = vst [vmem:[#allocation3 + $0x20] sm:$0xf] %v3194_v49  ;;  %v7668_v1 = vpop.f32.mrf.mxu3  ;;  %v3054_v15 = vrot.slane %v3052_v17, 7 }
 0x469   : > { %9733 = vst [vmem:[#allocation17_spill] sm:$0xff] %v7668_v1  ;;  %v2862_v5 = vmax.f32 %v7668_v1, 0.0  ;;  %v2966_v8 = vrot.slane %v2964_v28, 7  ;;  %v7671_v21 = vrot.slane %v2967_v20, 5  ;;  %v7673_v52 = vrot.slane %v2964_v28, 4 }
 0x46a   : > { %v7675_v45 = vpop.f32.mrf.mxu0  ;;  %v3475_v26 = vor.u32 %v3474_v2, %v3473_v55  ;;  %v7677_v6 = vor.u32 %v3055_v61, %v3054_v15  ;;  %v3058_v10 = vrot.slane %v3054_v15, 4 }
 0x46b   : > { %9734 = vst [vmem:[#allocation23_spill] sm:$0xff] %v7675_v45  ;;  %v7679_v43 = vpack.c.bf16 %v2862_v5, %v2862_v5  ;;  %v2851_v3 = vmax.f32 %v7675_v45, 0.0  ;;  %v2969_v41 = vor.u32 %v2967_v20, %v2966_v8  ;;  %v7685_v40 = vsel %vm6169_vm0, %v3422_v29, %v7671_v21 }
 0x46c   : > { %9735 = vst [vmem:[#allocation20_spill] sm:$0xff] %v7677_v6  ;;  %v3218_v9 = vsel %vm7524_vm5, %v7677_v6, %v3217_v51  ;;  %v3476_v51 = vrot.slane %v3475_v26, 4 }
 0x46d   : > { %9736 = vst [vmem:[#allocation26_spill] sm:$0xff] %v7679_v43  ;;  %v7692_v17 = vpack.c.bf16 %v2851_v3, %v2851_v3  ;;  %v7696_v61 = vsel %vm6149_vm15, %v2962_v62, %v2969_v41  ;;  %v3063_v28 = vshll.u32 %v7679_v43, 16  ;;  %v3060_v20 = vshrl.u32 %v7679_v43, 16 }
 0x46e   : > { %9738 = vst [vmem:[#allocation25_spill] sm:$0xff] %v7696_v61 }
 0x46f   : > { %9737 = vst [vmem:[#allocation24_spill] sm:$0xff] %v7692_v17  ;;  %v2972_v55 = vshrl.u32 %v7692_v17, 16  ;;  %v2975_v2 = vshll.u32 %v7692_v17, 16  ;;  %3287 = vrot.lane.b32.xlu2 %v7692_v17, %s5435_s23  ;;  %v7706_v29 = vrot.slane %v3063_v28, 5  ;;  %v7708_v5 = vrot.slane %v3060_v20, 4 }
 0x470   : > { %3219 = vst [vmem:[#allocation3 + $0x50] sm:$0xf] %v3218_v9  ;;  %v7710_v8 = vpop.f32.mrf.mxu3  ;;  %v3062_v62 = vrot.slane %v3060_v20, 7 }
 0x471   : > { %3196 = vst.msk [vmem:[#allocation3 + $0x24] sm:$0xf] %vm3178_vm4, %v7696_v61  ;;  %v2863_v3 = vmax.f32 %v7710_v8, 0.0  ;;  %v2974_v41 = vrot.slane %v2972_v55, 7  ;;  %v3428_v9 = vrot.slane %v2972_v55, 4  ;;  %v3429_v58 = vrot.slane %v2975_v2, 5 }
 0x472   : > { %9739 = vst [vmem:[#allocation32_spill] sm:$0xff] %v7710_v8  ;;  %v7713_v49 = vpop.f32.mrf.mxu0  ;;  %v7718_v12 = vsel %vm6169_vm0, %v3476_v51, %v7706_v29  ;;  %v3065_v45 = vor.u32 %v3063_v28, %v3062_v62 }
 0x473   : > { %9740 = vst [vmem:[#allocation33_spill] sm:$0xff] %v7713_v49  ;;  %v7722_v26 = vpack.c.bf16 %v2863_v3, %v2863_v3  ;;  %v2852_v20 = vmax.f32 %v7713_v49, 0.0  ;;  %v7725_v8 = vor.u32 %v2975_v2, %v2974_v41  ;;  %v3430_v55 = vor.u32 %v3429_v58, %v3428_v9 }
 0x474   : > { %v7729_v22 = vsel %vm6149_vm15, %v3058_v10, %v3065_v45  ;;  %v2978_v35 = vrot.slane %v2974_v41, 4 }
 0x475   : > { %9741 = vst [vmem:[#allocation28_spill] sm:$0xff] %v7725_v8  ;;  %v7731_v34 = vpack.c.bf16 %v2852_v20, %v2852_v20  ;;  %v3198_v51 = vsel %vm7524_vm5, %v7725_v8, %v3197_v42  ;;  %v3068_v15 = vshrl.u32 %v7722_v26, 16  ;;  %v3071_v28 = vshll.u32 %v7722_v26, 16 }
 0x476   : > { %9742 = vst [vmem:[#allocation35_spill] sm:$0xff] %v7729_v22  ;;  %v3431_v23 = vrot.slane %v3430_v55, 4 }
 0x477   : > { %9743 = vst [vmem:[#allocation36_spill] sm:$0xff] %v7731_v34  ;;  %3289 = vrot.lane.b32.xlu0 %v7731_v34, %s5435_s23  ;;  %v2980_v58 = vshrl.u32 %v7731_v34, 16  ;;  %v2983_v10 = vshll.u32 %v7731_v34, 16  ;;  %v3482_v45 = vrot.slane %v3068_v15, 4  ;;  %v3483_v2 = vrot.slane %v3071_v28, 5 }
 0x478   : > { %3220 = vst.msk [vmem:[#allocation3 + $0x54] sm:$0xf] %vm3178_vm4, %v7729_v22  ;;  %v7744_v62 = vpop.f32.mrf.mxu3  ;;  %v3070_v42 = vrot.slane %v3068_v15, 7 }
 0x479   : > { %3199 = vst [vmem:[#allocation3 + $0x28] sm:$0xf] %v3198_v51  ;;  %v2864_v3 = vmax.f32 %v7744_v62, 0.0  ;;  %v7747_v9 = vrot.slane %v2983_v10, 5  ;;  %v7749_v20 = vrot.slane %v2980_v58, 4  ;;  %v2982_v1 = vrot.slane %v2980_v58, 7 }
 0x47a   : > { %9744 = vst [vmem:[#allocation31_spill] sm:$0xff] %v7744_v62  ;;  %v3221_v51 = vld [vmem:[#allocation3 + $0x58] sm:$0xf]  ;;  %v7751_v49 = vpop.f32.mrf.mxu0  ;;  %v3484_v46 = vor.u32 %v3483_v2, %v3482_v45  ;;  %v7753_v7 = vor.u32 %v3071_v28, %v3070_v42 }
 0x47b   : > { %9745 = vst [vmem:[#allocation39_spill] sm:$0xff] %v7751_v49  ;;  %v7755_v47 = vpack.c.bf16 %v2864_v3, %v2864_v3  ;;  %v2853_v38 = vmax.f32 %v7751_v49, 0.0  ;;  %v2985_v62 = vor.u32 %v2983_v10, %v2982_v1  ;;  %v7763_v58 = vsel %vm6169_vm0, %v3431_v23, %v7747_v9 }
 0x47c   : > { %9746 = vst [vmem:[#allocation34_spill] sm:$0xff] %v7753_v7  ;;  %v3222_v41 = vsel %vm7524_vm5, %v7753_v7, %v3221_v51  ;;  %v3485_v3 = vrot.slane %v3484_v46, 4 }
 0x47d   : > { %9747 = vst [vmem:[#allocation37_spill] sm:$0xff] %v7755_v47  ;;  %v7768_v55 = vpack.c.bf16 %v2853_v38, %v2853_v38  ;;  %v7772_v28 = vsel %vm6149_vm15, %v2978_v35, %v2985_v62  ;;  %v3076_v45 = vshrl.u32 %v7755_v47, 16  ;;  %v3079_v1 = vshll.u32 %v7755_v47, 16 }
 0x47e   : > { %9749 = vst [vmem:[#allocation46_spill] sm:$0xff] %v7772_v28 }
 0x47f   : > { %9748 = vst [vmem:[#allocation47_spill] sm:$0xff] %v7768_v55  ;;  %3291 = vrot.lane.b32.xlu1 %v7768_v55, %s5435_s23  ;;  %v2988_v23 = vshrl.u32 %v7768_v55, 16  ;;  %v2991_v38 = vshll.u32 %v7768_v55, 16  ;;  %v7782_v10 = vrot.slane %v3076_v45, 4  ;;  %v3078_v2 = vrot.slane %v3076_v45, 7 }
 0x480   : > { %3223 = vst [vmem:[#allocation3 + $0x58] sm:$0xf] %v3222_v41  ;;  %v7784_v35 = vpop.f32.mrf.mxu3  ;;  %v7786_v62 = vrot.slane %v3079_v1, 5  ;;  %v3074_v45 = vrot.slane %v3070_v42, 4 }
 0x481   : > { %3200 = vst.msk [vmem:[#allocation3 + $0x2c] sm:$0xf] %vm3178_vm4, %v7772_v28  ;;  %v2865_v51 = vmax.f32 %v7784_v35, 0.0  ;;  %v2990_v41 = vrot.slane %v2988_v23, 7  ;;  %v3437_v15 = vrot.slane %v2988_v23, 4  ;;  %v3438_v49 = vrot.slane %v2991_v38, 5 }
 0x482   : > { %9750 = vst [vmem:[#allocation41_spill] sm:$0xff] %v7784_v35  ;;  %v7789_v34 = vpop.f32.mrf.mxu0  ;;  %v7796_v17 = vsel %vm6169_vm0, %v3485_v3, %v7786_v62  ;;  %v3081_v55 = vor.u32 %v3079_v1, %v3078_v2 }
 0x483   : > { %9751 = vst [vmem:[#allocation49_spill] sm:$0xff] %v7789_v34  ;;  %v7798_v18 = vpack.c.bf16 %v2865_v51, %v2865_v51  ;;  %v2854_v46 = vmax.f32 %v7789_v34, 0.0  ;;  %v3439_v35 = vor.u32 %v3438_v49, %v3437_v15  ;;  %v7801_v23 = vor.u32 %v2991_v38, %v2990_v41 }
 0x484   : > { %9752 = vst [vmem:[#allocation50_spill] sm:$0xff] %v7796_v17  ;;  %v7805_v53 = vsel %vm6149_vm15, %v3074_v45, %v3081_v55  ;;  %v2994_v48 = vrot.slane %v2990_v41, 4 }
 0x485   : > { %9753 = vst [vmem:[#allocation45_spill] sm:$0xff] %v7801_v23  ;;  %v7807_v32 = vpack.c.bf16 %v2854_v46, %v2854_v46  ;;  %v3084_v31 = vshrl.u32 %v7798_v18, 16  ;;  %v3087_v3 = vshll.u32 %v7798_v18, 16  ;;  %v3202_v42 = vsel %vm7524_vm5, %v7801_v23, %v3201_v33 }
 0x486   : > { %9754 = vst [vmem:[#allocation53_spill] sm:$0xff] %v7805_v53  ;;  %v3440_v2 = vrot.slane %v3439_v35, 4 }
 0x487   : > { %9755 = vst [vmem:[#allocation52_spill] sm:$0xff] %v7807_v32  ;;  %3293 = vrot.lane.b32.xlu2 %v7807_v32, %s5435_s23  ;;  %v2996_v49 = vshrl.u32 %v7807_v32, 16  ;;  %v2999_v15 = vshll.u32 %v7807_v32, 16  ;;  %v3491_v55 = vrot.slane %v3084_v31, 4  ;;  %v3492_v1 = vrot.slane %v3087_v3, 5 }
 0x488   : > { %3224 = vst.msk [vmem:[#allocation3 + $0x5c] sm:$0xf] %vm3178_vm4, %v7805_v53  ;;  %v7820_v38 = vpop.f32.mrf.mxu3  ;;  %v3086_v51 = vrot.slane %v3084_v31, 7  ;;  %v3205_v53 = vld [vmem:[#allocation3 + $0x38] sm:$0xf] }
 0x489   : > { %3203 = vst [vmem:[#allocation3 + $0x30] sm:$0xf] %v3202_v42  ;;  %v2866_v45 = vmax.f32 %v7820_v38, 0.0  ;;  %v2998_v33 = vrot.slane %v2996_v49, 7  ;;  %v7823_v46 = vrot.slane %v2999_v15, 5  ;;  %v7825_v34 = vrot.slane %v2996_v49, 4 }
 0x48a   : > { %9756 = vst [vmem:[#allocation48_spill] sm:$0xff] %v7820_v38  ;;  %v7827_v0 = vpop.f32.mrf.mxu0  ;;  %v3493_v7 = vor.u32 %v3492_v1, %v3491_v55  ;;  %v7829_v32 = vor.u32 %v3087_v3, %v3086_v51 }
 0x48b   : > { %9757 = vst [vmem:[#allocation54_spill] sm:$0xff] %v7827_v0  ;;  %v7831_v42 = vpack.c.bf16 %v2866_v45, %v2866_v45  ;;  %v2855_v22 = vmax.f32 %v7827_v0, 0.0  ;;  %v3001_v35 = vor.u32 %v2999_v15, %v2998_v33  ;;  %v7837_v31 = vsel %vm6169_vm0, %v3440_v2, %v7823_v46 }
 0x48c   : > { %9758 = vst [vmem:[#allocation56_spill] sm:$0xff] %v7829_v32  ;;  %v3226_v41 = vsel %vm7524_vm5, %v7829_v32, %v3225_v57  ;;  %v3494_v33 = vrot.slane %v3493_v7, 4 }
 0x48d   : > { %v7844_v55 = vpack.c.bf16 %v2855_v22, %v2855_v22  ;;  %v7848_v3 = vsel %vm6149_vm15, %v2994_v48, %v3001_v35  ;;  %v3095_v15 = vshll.u32 %v7831_v42, 16  ;;  %v3092_v1 = vshrl.u32 %v7831_v42, 16  ;;  %3227 = vst [vmem:[#allocation3 + $0x60] sm:$0xf] %v3226_v41 }
 0x48e   : > { %9760 = vst [vmem:[#allocation27_spill] sm:$0xff] %v7848_v3 }
 0x48f   : > { %9759 = vst [vmem:[#allocation51_spill] sm:$0xff] %v7844_v55  ;;  %3295 = vrot.lane.b32.xlu0 %v7844_v55, %s5435_s23  ;;  %v3004_v2 = vshrl.u32 %v7844_v55, 16  ;;  %v3007_v57 = vshll.u32 %v7844_v55, 16  ;;  %v7858_v22 = vrot.slane %v3095_v15, 5  ;;  %v7860_v45 = vrot.slane %v3092_v1, 4 }
 0x490   : > { %3204 = vst.msk [vmem:[#allocation3 + $0x34] sm:$0xf] %vm3178_vm4, %v7848_v3  ;;  %v7862_v48 = vpop.f32.mrf.mxu3  ;;  %v3094_v35 = vrot.slane %v3092_v1, 7  ;;  %v3090_v3 = vrot.slane %v3086_v51, 4 }
 0x491   : > { %9761 = vst [vmem:[#allocation57_spill] sm:$0xff] %v7858_v22  ;;  %v2867_v41 = vmax.f32 %v7862_v48, 0.0  ;;  %v3446_v49 = vrot.slane %v3004_v2, 4  ;;  %v3447_v38 = vrot.slane %v3007_v57, 5  ;;  %v3006_v0 = vrot.slane %v3004_v2, 7 }
 0x492   : > { %9762 = vst [vmem:[#allocation58_spill] sm:$0xff] %v7860_v45  ;;  %v7865_v32 = vpop.f32.mrf.mxu0  ;;  %v7870_v55 = vsel %vm6169_vm0, %v3494_v33, %v7858_v22  ;;  %v3097_v8 = vor.u32 %v3095_v15, %v3094_v35 }
 0x493   : > { %9763 = vst [vmem:[#allocation59_spill] sm:$0xff] %v7862_v48  ;;  %v7874_v7 = vpack.c.bf16 %v2867_v41, %v2867_v41  ;;  %v2856_v1 = vmax.f32 %v7865_v32, 0.0  ;;  %v3448_v48 = vor.u32 %v3447_v38, %v3446_v49  ;;  %v7877_v23 = vor.u32 %v3007_v57, %v3006_v0 }
 0x494   : > { %9764 = vst [vmem:[#allocation60_spill] sm:$0xff] %v7865_v32  ;;  %v7881_v2 = vsel %vm6149_vm15, %v3090_v3, %v3097_v8  ;;  %v3010_v28 = vrot.slane %v3006_v0, 4 }
 0x495   : > { %9765 = vst [vmem:[#allocation61_spill] sm:$0xff] %v7870_v55  ;;  %v7883_v13 = vpack.c.bf16 %v2856_v1, %v2856_v1  ;;  %v3206_v33 = vsel %vm7524_vm5, %v7877_v23, %v3205_v53  ;;  %v3100_v51 = vshrl.u32 %v7874_v7, 16  ;;  %v3103_v38 = vshll.u32 %v7874_v7, 16 }
 0x496   : > { %9766 = vst [vmem:[#allocation62_spill] sm:$0xff] %v7877_v23  ;;  %v3449_v53 = vrot.slane %v3448_v48, 4 }
 0x497   : > { %9767 = vst [vmem:[#allocation63_spill] sm:$0xff] %v7881_v2  ;;  %3297 = vrot.lane.b32.xlu1 %v7883_v13, %s5435_s23  ;;  %v3015_v8 = vshll.u32 %v7883_v13, 16  ;;  %v3012_v49 = vshrl.u32 %v7883_v13, 16  ;;  %v3500_v3 = vrot.slane %v3100_v51, 4  ;;  %v3102_v15 = vrot.slane %v3100_v51, 7 }
 0x498   : > { %9768 = vst [vmem:[#allocation64_spill] sm:$0xff] %v7883_v13  ;;  %v7896_v57 = vpop.f32.mrf.mxu3  ;;  %v3501_v35 = vrot.slane %v3103_v38, 5 }
 0x499   : > { %3228 = vst.msk [vmem:[#allocation3 + $0x64] sm:$0xf] %vm3178_vm4, %v7881_v2  ;;  %v2868_v41 = vmax.f32 %v7896_v57, 0.0  ;;  %v3276_v1 = vpop.permute.xlu2 %3275  ;;  %v7899_v6 = vrot.slane %v3015_v8, 5  ;;  %v3014_v32 = vrot.slane %v3012_v49, 7  ;;  %v7906_v61 = vor.u32 %v3103_v38, %v3102_v15 }
 0x49a   : > { %3207 = vst [vmem:[#allocation3 + $0x38] sm:$0xf] %v3206_v33  ;;  %v7901_v33 = vrot.slane %v3012_v49, 4  ;;  %v3229_v2 = vld [vmem:[#allocation3 + $0x68] sm:$0xf]  ;;  %v7904_v23 = vpop.f32.mrf.mxu0  ;;  %v3502_v13 = vor.u32 %v3501_v35, %v3500_v3 }
 0x49b   : > { %9769 = vst [vmem:[#allocation65_spill] sm:$0xff] %v7896_v57  ;;  %v7908_v51 = vpack.c.bf16 %v2868_v41, %v2868_v41  ;;  %v2857_v48 = vmax.f32 %v7904_v23, 0.0  ;;  %v7914_v57 = vsel %vm6169_vm0, %v3449_v53, %v7899_v6  ;;  %v3017_v44 = vor.u32 %v3015_v8, %v3014_v32 }
 0x49c   : > { %3364 = vst.msk [vmem:[#allocation3 + $0x10] sm:$0xf] %vm3361_vm6, %v3276_v1  ;;  %v3230_v3 = vsel %vm7524_vm5, %v7906_v61, %v3229_v2 }
 0x49d   : > { %9770 = vst [vmem:[#allocation66_spill] sm:$0xff] %v7904_v23  ;;  %v7921_v38 = vpack.c.bf16 %v2857_v48, %v2857_v48  ;;  %v3111_v35 = vshll.u32 %v7908_v51, 16  ;;  %v3108_v41 = vshrl.u32 %v7908_v51, 16  ;;  %v7927_v53 = vsel %vm6149_vm15, %v3010_v28, %v3017_v44 }
 0x49e   : > { %9771 = vst [vmem:[#allocation67_spill] sm:$0xff] %v7906_v61  ;;  %v3503_v48 = vrot.slane %v3502_v13, 4 }
 0x49f   : > { %9772 = vst [vmem:[#allocation68_spill] sm:$0xff] %v7921_v38  ;;  %v3020_v1 = vshrl.u32 %v7921_v38, 16  ;;  %v3023_v0 = vshll.u32 %v7921_v38, 16  ;;  %3299 = vrot.lane.b32.xlu2 %v7921_v38, %s5435_s23  ;;  %v7935_v32 = vrot.slane %v3111_v35, 5  ;;  %v7937_v2 = vrot.slane %v3108_v41, 4 }
 0x4a0   : > { %3231 = vst [vmem:[#allocation3 + $0x68] sm:$0xf] %v3230_v3  ;;  %v7939_v8 = vpop.f32.mrf.mxu3  ;;  %v3110_v3 = vrot.slane %v3108_v41, 7  ;;  %v3106_v41 = vrot.slane %v3102_v15, 4 }
 0x4a1   : > { %9773 = vst [vmem:[#allocation69_spill] sm:$0xff] %v7927_v53  ;;  %v2869_v44 = vmax.f32 %v7939_v8, 0.0  ;;  %v3272_v28 = vpop.permute.xlu0 %3271  ;;  %v3022_v49 = vrot.slane %v3020_v1, 7  ;;  %v3455_v23 = vrot.slane %v3020_v1, 4  ;;  %v3456_v61 = vrot.slane %v3023_v0, 5 }
 0x4a2   : > { %3208 = vst.msk [vmem:[#allocation3 + $0x3c] sm:$0xf] %vm3178_vm4, %v7927_v53  ;;  %v7943_v38 = vpop.f32.mrf.mxu0  ;;  %v7948_v53 = vsel %vm6169_vm0, %v3503_v48, %v7935_v32  ;;  %v3113_v63 = vor.u32 %v3111_v35, %v3110_v3 }
 0x4a3   : > { %9774 = vst [vmem:[#allocation70_spill] sm:$0xff] %v7935_v32  ;;  %v2858_v1 = vmax.f32 %v7943_v38, 0.0  ;;  %v7955_v27 = vor.u32 %v3023_v0, %v3022_v49 }
 0x4a4   : > { %9775 = vst [vmem:[#allocation71_spill] sm:$0xff] %v7937_v2  ;;  %v7959_v11 = vsel %vm6149_vm15, %v3106_v41, %v3113_v63 }
 0x4a5   : > { %9776 = vst [vmem:[#allocation72_spill] sm:$0xff] %v7939_v8  ;;  %v7952_v8 = vpack.c.bf16 %v2869_v44, %v2869_v44  ;;  %v7961_v39 = vpack.c.bf16 %v2858_v1, %v2858_v1  ;;  %v3210_v48 = vsel %vm7524_vm5, %v7955_v27, %v3209_v4 }
 0x4a6   : > { %3362 = vst.msk [vmem:[#allocation3 + $0x8] sm:$0xf] %vm3361_vm6, %v3272_v28  ;;  %v3457_v28 = vor.u32 %v3456_v61, %v3455_v23 }
 0x4a7   : > { %9777 = vst [vmem:[#allocation73_spill] sm:$0xff] %v7943_v38  ;;  %v3116_v15 = vshrl.u32 %v7952_v8, 16  ;;  %v3119_v35 = vshll.u32 %v7952_v8, 16  ;;  %3301 = vrot.lane.b32.xlu0 %v7961_v39, %s5435_s23  ;;  %v3028_v63 = vshrl.u32 %v7961_v39, 16  ;;  %v3031_v61 = vshll.u32 %v7961_v39, 16 }
 0x4a8   : > { %9778 = vst [vmem:[#allocation74_spill] sm:$0xff] %v7955_v27  ;;  %v7974_v3 = vpop.f32.mrf.mxu3  ;;  %v3458_v4 = vrot.slane %v3457_v28, 4 }
 0x4a9   : > { %9779 = vst [vmem:[#allocation75_spill] sm:$0xff] %v7959_v11  ;;  %v3509_v23 = vrot.slane %v3116_v15, 4  ;;  %v3118_v0 = vrot.slane %v3116_v15, 7  ;;  %v3510_v44 = vrot.slane %v3119_v35, 5  ;;  %v2870_v41 = vmax.f32 %v7974_v3, 0.0  ;;  %v3274_v1 = vpop.permute.xlu1 %3273 }
 0x4aa   : > { %9780 = vst [vmem:[#allocation76_spill] sm:$0xff] %v7961_v39  ;;  %v7977_v13 = vrot.slane %v3031_v61, 5  ;;  %v3030_v38 = vrot.slane %v3028_v63, 7  ;;  %v7982_v27 = vpop.f32.mrf.mxu0 }
 0x4ab   : > { %3232 = vst.msk [vmem:[#allocation3 + $0x6c] sm:$0xf] %vm3178_vm4, %v7959_v11  ;;  %v3233_v11 = vld [vmem:[#allocation3 + $0x70] sm:$0xf]  ;;  %v3511_v39 = vor.u32 %v3510_v44, %v3509_v23  ;;  %v7984_v22 = vor.u32 %v3119_v35, %v3118_v0  ;;  %v7986_v15 = vpack.c.bf16 %v2870_v41, %v2870_v41  ;;  %v2859_v28 = vmax.f32 %v7982_v27, 0.0 }
 0x4ac   : > { %3211 = vst [vmem:[#allocation3 + $0x40] sm:$0xf] %v3210_v48  ;;  %v7979_v48 = vrot.slane %v3028_v63, 4  ;;  %v7994_v45 = vsel %vm6169_vm0, %v3458_v4, %v7977_v13  ;;  %v3026_v63 = vrot.slane %v3022_v49, 4  ;;  %v3033_v32 = vor.u32 %v3031_v61, %v3030_v38 }
 0x4ad   : > { %9781 = vst [vmem:[#allocation77_spill] sm:$0xff] %v7974_v3  ;;  %v3234_v23 = vsel %vm7524_vm5, %v7984_v22, %v3233_v11  ;;  %v7999_v35 = vpack.c.bf16 %v2859_v28, %v2859_v28  ;;  %v3124_v44 = vshrl.u32 %v7986_v15, 16  ;;  %v3127_v41 = vshll.u32 %v7986_v15, 16 }
 0x4ae   : > { %3363 = vst.msk [vmem:[#allocation3 + $0xc] sm:$0xf] %vm3361_vm6, %v3274_v1  ;;  %v8005_v1 = vsel %vm6149_vm15, %v3026_v63, %v3033_v32  ;;  %v3512_v32 = vrot.slane %v3511_v39, 4  ;;  %v3122_v39 = vrot.slane %v3118_v0, 4 }
 0x4af   : > { %9782 = vst [vmem:[#allocation78_spill] sm:$0xff] %v7982_v27  ;;  %3307 = vrot.lane.b32.xlu0 %v7652_v60, %s5435_s23  ;;  %3303 = vrot.lane.b32.xlu1 %v7999_v35, %s5435_s23  ;;  %v3036_v49 = vshrl.u32 %v7999_v35, 16  ;;  %v3039_v11 = vshll.u32 %v7999_v35, 16  ;;  %v8013_v38 = vrot.slane %v3127_v41, 5  ;;  %v8015_v61 = vrot.slane %v3124_v44, 4 }
 0x4b0   : > { %9783 = vst [vmem:[#allocation79_spill] sm:$0xff] %v7984_v22  ;;  %v8019_v4 = vpop.f32.mrf.mxu3  ;;  %v3126_v28 = vrot.slane %v3124_v44, 7 }
 0x4b1   : > { %9784 = vst [vmem:[#allocation80_spill] sm:$0xff] %v7999_v35  ;;  %v2871_v63 = vmax.f32 %v8019_v4, 0.0  ;;  %v3464_v3 = vrot.slane %v3036_v49, 4  ;;  %v3465_v27 = vrot.slane %v3039_v11, 5  ;;  %v3038_v60 = vrot.slane %v3036_v49, 7 }
 0x4b2   : > { %3235 = vst [vmem:[#allocation3 + $0x70] sm:$0xf] %v3234_v23  ;;  %v3282_v23 = vpop.permute.xlu2 %3281  ;;  %v8023_v35 = vpop.f32.mrf.mxu0  ;;  %v3129_v44 = vor.u32 %v3127_v41, %v3126_v28  ;;  %v3213_v49 = vld [vmem:[#allocation3 + $0x48] sm:$0xf] }
 0x4b3   : > { %9785 = vst [vmem:[#allocation81_spill] sm:$0xff] %v8005_v1  ;;  %v8032_v2 = vpack.c.bf16 %v2871_v63, %v2871_v63  ;;  %v3466_v17 = vor.u32 %v3465_v27, %v3464_v3  ;;  %v8035_v55 = vor.u32 %v3039_v11, %v3038_v60 }
 0x4b4   : > { %9786 = vst [vmem:[#allocation82_spill] sm:$0xff] %v8015_v61 }
 0x4b5   : > { %3212 = vst.msk [vmem:[#allocation3 + $0x44] sm:$0xf] %vm3178_vm4, %v8005_v1  ;;  %v8030_v1 = vsel %vm6169_vm0, %v3512_v32, %v8013_v38  ;;  %v3132_v61 = vshrl.u32 %v8032_v2, 16  ;;  %v3135_v32 = vshll.u32 %v8032_v2, 16  ;;  %v3214_v27 = vsel %vm7524_vm5, %v8035_v55, %v3213_v49 }
 0x4b6   : > { %9787 = vst [vmem:[#allocation83_spill] sm:$0xff] %v8019_v4  ;;  %v2860_v4 = vmax.f32 %v8023_v35, 0.0  ;;  %v3467_v28 = vrot.slane %v3466_v17, 4 }
 0x4b7   : > { %3367 = vst.msk [vmem:[#allocation3 + $0x1c] sm:$0xf] %vm3361_vm6, %v3282_v23  ;;  %v8039_v23 = vsel %vm6149_vm15, %v3122_v39, %v3129_v44  ;;  %3313 = vrot.lane.b32.xlu0 %v7755_v47, %s5435_s23  ;;  %3309 = vrot.lane.b32.xlu1 %v7679_v43, %s5435_s23  ;;  %v3518_v41 = vrot.slane %v3132_v61, 4  ;;  %v3519_v11 = vrot.slane %v3135_v32, 5  ;;  %v3134_v63 = vrot.slane %v3132_v61, 7 }
 0x4b8   : > { %9788 = vst [vmem:[#allocation84_spill] sm:$0xff] %v8023_v35  ;;  %v8041_v22 = vpack.c.bf16 %v2860_v4, %v2860_v4  ;;  %v8058_v4 = vpop.f32.mrf.mxu3  ;;  %v3237_v43 = vld [vmem:[#allocation3 + $0x78] sm:$0xf] }
 0x4b9   : > { %9789 = vst [vmem:[#allocation85_spill] sm:$0xff] %v8035_v55  ;;  %v2872_v39 = vmax.f32 %v8058_v4, 0.0  ;;  %v3278_v44 = vpop.permute.xlu0 %3277  ;;  %v8066_v55 = vor.u32 %v3135_v32, %v3134_v63 }
 0x4ba   : > { %9790 = vst [vmem:[#allocation86_spill] sm:$0xff] %v8039_v23  ;;  %v3047_v0 = vshll.u32 %v8041_v22, 16  ;;  %v3044_v3 = vshrl.u32 %v8041_v22, 16  ;;  %3305 = vrot.lane.b32.xlu2 %v8041_v22, %s5435_s23 }
 0x4bb   : > { %9791 = vst [vmem:[#allocation87_spill] sm:$0xff] %v8041_v22  ;;  %v8068_v22 = vpack.c.bf16 %v2872_v39, %v2872_v39 }
 0x4bc   : > { %3236 = vst.msk [vmem:[#allocation3 + $0x74] sm:$0xf] %vm3178_vm4, %v8039_v23  ;;  %v8061_v49 = vrot.slane %v3047_v0, 5  ;;  %v8063_v35 = vrot.slane %v3044_v3, 4  ;;  %v3046_v47 = vrot.slane %v3044_v3, 7  ;;  %v3042_v23 = vrot.slane %v3038_v60, 4 }
 0x4bd   : > { %3215 = vst [vmem:[#allocation3 + $0x48] sm:$0xf] %v3214_v27  ;;  %v3520_v27 = vor.u32 %v3519_v11, %v3518_v41  ;;  %v3238_v3 = vsel %vm7524_vm5, %v8066_v55, %v3237_v43  ;;  %v3143_v32 = vshll.u32 %v8068_v22, 16  ;;  %v3140_v41 = vshrl.u32 %v8068_v22, 16 }
 0x4be   : > { %9792 = vst [vmem:[#allocation88_spill] sm:$0xff] %v8058_v4  ;;  %v8073_v17 = vsel %vm6169_vm0, %v3467_v28, %v8061_v49  ;;  %v3049_v4 = vor.u32 %v3047_v0, %v3046_v47  ;;  %v3138_v11 = vrot.slane %v3134_v63, 4  ;;  %vm5071_vm5 = vcmask 64512  }
 0x4bf   : > { %3365 = vst.msk [vmem:[#allocation3 + $0x14] sm:$0xf] %vm3361_vm6, %v3278_v44  ;;  %3319 = vrot.lane.b32.xlu0 %v7874_v7, %s5435_s23  ;;  %3315 = vrot.lane.b32.xlu1 %v7798_v18, %s5435_s23  ;;  %v3521_v47 = vrot.slane %v3520_v27, 4  ;;  %v8092_v59 = vrot.slane %v3143_v32, 5  ;;  %v8094_v43 = vrot.slane %v3140_v41, 4 }
 0x4c0   : > { %9793 = vst [vmem:[#allocation89_spill] sm:$0xff] %v8066_v55  ;;  %v8082_v60 = vsel %vm6149_vm15, %v3042_v23, %v3049_v4  ;;  %v3142_v23 = vrot.slane %v3140_v41, 7  ;;  %v8098_v0 = vpop.f32.mrf.mxu3 }
 0x4c1   : > { %9794 = vst [vmem:[#allocation90_spill] sm:$0xff] %v8082_v60  ;;  %v2873_v4 = vmax.f32 %v8098_v0, 0.0  ;;  %v3280_v28 = vpop.permute.xlu1 %3279  ;;  %v8104_v39 = vsel %vm6169_vm0, %v3521_v47, %v8092_v59 }
 0x4c2   : > { %3239 = vst [vmem:[#allocation3 + $0x78] sm:$0xf] %v3238_v3  ;;  %3311 = vrot.lane.b32.xlu2 %v7722_v26, %s5435_s23  ;;  %v3145_v27 = vor.u32 %v3143_v32, %v3142_v23 }
 0x4c3   : > { %3216 = vst.msk [vmem:[#allocation3 + $0x4c] sm:$0xf] %vm3178_vm4, %v8082_v60  ;;  %v8109_v3 = vpack.c.bf16 %v2873_v4, %v2873_v4 }
 0x4c4   : > { %9795 = vst [vmem:[#allocation91_spill] sm:$0xff] %v8098_v0  ;;  %v8113_v41 = vsel %vm6149_vm15, %v3138_v11, %v3145_v27 }
 0x4c5   : > { %3366 = vst.msk [vmem:[#allocation3 + $0x18] sm:$0xf] %vm3361_vm6, %v3280_v28  ;;  %v9467_v63 = vshrl.u32 %v8109_v3, 16  ;;  %v9468_v47 = vshll.u32 %v8109_v3, 16 }
 0x4c6   : > { %9796 = vst [vmem:[#allocation92_spill] sm:$0xff] %v8113_v41 }
 0x4c7   : > { %3240 = vst.msk [vmem:[#allocation3 + $0x7c] sm:$0xf] %vm3178_vm4, %v8113_v41  ;;  %3325 = vrot.lane.b32.xlu0 %v7986_v15, %s5435_s23  ;;  %3321 = vrot.lane.b32.xlu1 %v7908_v51, %s5435_s23  ;;  %v3990_v32 = vrot.slane %v9467_v63, 4  ;;  %v3991_v23 = vrot.slane %v9468_v47, 5  ;;  %vm8905_vm4 = vmand %vm4526_vm3, %vm1369_vm13 }
 0x4c8   : > { %v8129_v11 = vpop.f32.mrf.mxu3 }
 0x4c9   : > { %9797 = vst [vmem:[#allocation93_spill] sm:$0xff] %v8129_v11  ;;  %v2874_v4 = vmax.f32 %v8129_v11, 0.0  ;;  %v3288_v28 = vpop.permute.xlu2 %3287  ;;  %v3992_v27 = vor.u32 %v3991_v23, %v3990_v32 }
 0x4ca   : > { %3317 = vrot.lane.b32.xlu2 %v7831_v42, %s5435_s23  ;;  %3370 = vst.msk [vmem:[#allocation3 + $0x28] sm:$0xf] %vm3361_vm6, %v3288_v28 }
 0x4cb   : > { %v8133_v44 = vpack.c.bf16 %v2874_v4, %v2874_v4  ;;  %v3993_v47 = vrot.slane %v3992_v27, 4  ;;  %v9798_v27 = vor.u32 %v7583_v54, %v7581_v50  ;;  %v9801_v54 = vor.u32 %v7673_v52, %v7671_v21 }
 0x4cc   : > { %v9804_v52 = vor.u32 %v7901_v33, %v7899_v6  ;;  %v9806_v6 = vor.u32 %v7782_v10, %v7786_v62  ;;  %v9807_v33 = vor.u32 %v7708_v5, %v7706_v29  ;;  %v9809_v29 = vld [vmem:[#allocation61_spill] sm:$0xff]  ;;  %v9810_v5 = vld [vmem:[#allocation50_spill] sm:$0xff] }
 0x4cd   : > { %v9471_v61 = vshrl.u32 %v8133_v44, 16  ;;  %v9470_v63 = vshll.u32 %v8133_v44, 16 }
 0x4cf   : > { %3527 = vrot.lane.b32.xlu0 %v7550_v36, %s5437_s25  ;;  %3327 = vrot.lane.b32.xlu1 %v8032_v2, %s5435_s23  ;;  %v8143_v11 = vrot.slane %v9470_v63, 5  ;;  %v8147_v32 = vrot.slane %v9471_v61, 4  ;;  %v8162_v63 = vrot.slane %v9798_v27, 4  ;;  %v9799_v61 = vor.u32 %v7542_v37, %v7540_v16 }
 0x4d0   : > { %v9800_v37 = vor.u32 %v7749_v20, %v7747_v9  ;;  %v8220_v20 = vrot.slane %v9804_v52, 4  ;;  %v9805_v27 = vor.u32 %v7825_v34, %v7823_v46  ;;  %v8244_v46 = vrot.slane %v9806_v6, 4  ;;  %v9816_v52 = vld [vmem:[#allocation58_spill] sm:$0xff] }
 0x4d1   : > { %v3284_v23 = vpop.permute.xlu0 %3283  ;;  %v8154_v4 = vsel %vm6169_vm0, %v3993_v47, %v8143_v11  ;;  %v8167_v0 = vrot.slane %v9799_v61, 4  ;;  %v8191_v61 = vrot.slane %v9801_v54, 4  ;;  %v9802_v47 = vor.u32 %v7623_v19, %v7621_v56 }
 0x4d2   : > { %3323 = vrot.lane.b32.xlu2 %v7952_v8, %s5435_s23  ;;  %3368 = vst.msk [vmem:[#allocation3 + $0x20] sm:$0xf] %vm3361_vm6, %v3284_v23  ;;  %v8186_v50 = vrot.slane %v9800_v37, 4  ;;  %v9803_v19 = vor.u32 %v7979_v48, %v7977_v13  ;;  %v8249_v48 = vrot.slane %v9807_v33, 4  ;;  %v9819_v33 = vld [vmem:[#allocation9_spill] sm:$0xff]  ;;  %vm3617_vm0 = vcmask 191616  }
 0x4d3   : > { %v8196_v23 = vrot.slane %v9802_v47, 4  ;;  %v9813_v47 = vld [vmem:[#allocation71_spill] sm:$0xff]  ;;  %vm8342_vm7 = vmand %vm3617_vm0, %vm1369_vm13  ;;  %vm4737_vm13 = vcmask 588800  }
 0x4d4   : > { %v8215_v21 = vrot.slane %v9803_v19, 4 }
 0x4d7   : > { %3533 = vrot.lane.b32.xlu0 %v8162_v63, %s5437_s25  ;;  %3529 = vrot.lane.b32.xlu1 %v8167_v0, %s5437_s25 }
 0x4d9   : > { %v3286_v25 = vpop.permute.xlu1 %3285 }
 0x4da   : > { %3329 = vrot.lane.b32.xlu2 %v8068_v22, %s5435_s23  ;;  %3369 = vst.msk [vmem:[#allocation3 + $0x24] sm:$0xf] %vm3361_vm6, %v3286_v25  ;;  %v8225_v25 = vrot.slane %v9805_v27, 4  ;;  %v9817_v27 = vld [vmem:[#allocation57_spill] sm:$0xff] }
 0x4df   : > { %3539 = vrot.lane.b32.xlu0 %v7685_v40, %s5437_s25  ;;  %3535 = vrot.lane.b32.xlu1 %v7631_v24, %s5437_s25 }
 0x4e1   : > { %v3294_v16 = vpop.permute.xlu2 %3293 }
 0x4e2   : > { %3531 = vrot.lane.b32.xlu2 %v7593_v14, %s5437_s25  ;;  %3373 = vst.msk [vmem:[#allocation3 + $0x34] sm:$0xf] %vm3361_vm6, %v3294_v16  ;;  %v9808_v16 = vor.u32 %v8063_v35, %v8061_v49  ;;  %v9811_v35 = vld [vmem:[#allocation82_spill] sm:$0xff] }
 0x4e3   : > { %v9812_v49 = vor.u32 %v9811_v35, %v8013_v38  ;;  %v9820_v35 = vor.u32 %v8094_v43, %v8092_v59  ;;  %v9823_v59 = vld [vmem:[#allocation19_spill] sm:$0xff]  ;;  %v9824_v43 = vld [vmem:[#allocation4_spill] sm:$0xff] }
 0x4e4   : > { %v8254_v37 = vrot.slane %v9808_v16, 4 }
 0x4e5   : > { %v8273_v54 = vrot.slane %v9812_v49, 4  ;;  %v8305_v49 = vrot.slane %v9820_v35, 4 }
 0x4e7   : > { %3545 = vrot.lane.b32.xlu0 %v8186_v50, %s5437_s25  ;;  %3541 = vrot.lane.b32.xlu1 %v8191_v61, %s5437_s25 }
 0x4e9   : > { %v3290_v9 = vpop.permute.xlu0 %3289 }
 0x4ea   : > { %3537 = vrot.lane.b32.xlu2 %v8196_v23, %s5437_s25  ;;  %3371 = vst.msk [vmem:[#allocation3 + $0x2c] sm:$0xf] %vm3361_vm6, %v3290_v9  ;;  %v9814_v9 = vld [vmem:[#allocation70_spill] sm:$0xff] }
 0x4ef   : > { %3551 = vrot.lane.b32.xlu0 %v7914_v57, %s5437_s25  ;;  %3547 = vrot.lane.b32.xlu1 %v7837_v31, %s5437_s25 }
 0x4f1   : > { %v3292_v56 = vpop.permute.xlu1 %3291 }
 0x4f2   : > { %3543 = vrot.lane.b32.xlu2 %v7763_v58, %s5437_s25  ;;  %3372 = vst.msk [vmem:[#allocation3 + $0x30] sm:$0xf] %vm3361_vm6, %v3292_v56  ;;  %v9815_v56 = vor.u32 %v9813_v47, %v9814_v9  ;;  %v9821_v47 = vld [vmem:[#allocation44_spill] sm:$0xff]  ;;  %v9822_v9 = vld [vmem:[#allocation21_spill] sm:$0xff] }
 0x4f4   : > { %v8278_v19 = vrot.slane %v9815_v56, 4 }
 0x4f7   : > { %3557 = vrot.lane.b32.xlu0 %v8215_v21, %s5437_s25  ;;  %3553 = vrot.lane.b32.xlu1 %v8220_v20, %s5437_s25 }
 0x4f9   : > { %v3300_v13 = vpop.permute.xlu2 %3299 }
 0x4fa   : > { %3549 = vrot.lane.b32.xlu2 %v8225_v25, %s5437_s25  ;;  %3376 = vst.msk [vmem:[#allocation3 + $0x40] sm:$0xf] %vm3361_vm6, %v3300_v13  ;;  %v9818_v13 = vor.u32 %v9816_v52, %v9817_v27 }
 0x4ff   : > { %3563 = vrot.lane.b32.xlu0 %v7718_v12, %s5437_s25  ;;  %3559 = vrot.lane.b32.xlu1 %v8073_v17, %s5437_s25 }
 0x501   : > { %v3296_v34 = vpop.permute.xlu0 %3295 }
 0x502   : > { %3555 = vrot.lane.b32.xlu2 %v7994_v45, %s5437_s25  ;;  %3374 = vst.msk [vmem:[#allocation3 + $0x38] sm:$0xf] %vm3361_vm6, %v3296_v34  ;;  %v8283_v34 = vrot.slane %v9818_v13, 4  ;;  %v9825_v13 = vld [vmem:[#allocation29_spill] sm:$0xff] }
 0x507   : > { %3569 = vrot.lane.b32.xlu0 %v8244_v46, %s5437_s25  ;;  %3565 = vrot.lane.b32.xlu1 %v8249_v48, %s5437_s25 }
 0x509   : > { %v3298_v10 = vpop.permute.xlu1 %3297 }
 0x50a   : > { %3561 = vrot.lane.b32.xlu2 %v8254_v37, %s5437_s25  ;;  %3375 = vst.msk [vmem:[#allocation3 + $0x3c] sm:$0xf] %vm3361_vm6, %v3298_v10 }
 0x50f   : > { %3575 = vrot.lane.b32.xlu0 %v7948_v53, %s5437_s25  ;;  %3571 = vrot.lane.b32.xlu1 %v9809_v29, %s5437_s25 }
 0x512   : > { %3567 = vrot.lane.b32.xlu2 %v9810_v5, %s5437_s25 }
 0x514   : > { %v3306_v62 = vpop.permute.xlu2 %3305 }
 0x515   : > { %3379 = vst.msk [vmem:[#allocation3 + $0x4c] sm:$0xf] %vm3361_vm6, %v3306_v62 }
 0x517   : > { %3581 = vrot.lane.b32.xlu0 %v8273_v54, %s5437_s25  ;;  %3577 = vrot.lane.b32.xlu1 %v8278_v19, %s5437_s25 }
 0x519   : > { %v3302_v38 = vpop.permute.xlu0 %3301 }
 0x51a   : > { %3573 = vrot.lane.b32.xlu2 %v8283_v34, %s5437_s25  ;;  %3377 = vst.msk [vmem:[#allocation3 + $0x44] sm:$0xf] %vm3361_vm6, %v3302_v38 }
 0x51c   : > { %v3312_v6 = vpop.permute.xlu2 %3311 }
 0x51d   : > { %3382 = vst.msk [vmem:[#allocation3 + $0x58] sm:$0xf] %vm3361_vm6, %v3312_v6 }
 0x51f   : > { %3696 = vrot.lane.b32.xlu0 %v9819_v33, %s5439_s27  ;;  %3583 = vrot.lane.b32.xlu1 %v8104_v39, %s5437_s25 }
 0x521   : > { %v3308_v16 = vpop.permute.xlu0 %3307  ;;  %v3304_v10 = vpop.permute.xlu1 %3303 }
 0x522   : > { %3579 = vrot.lane.b32.xlu2 %v8030_v1, %s5437_s25  ;;  %3380 = vst.msk [vmem:[#allocation3 + $0x50] sm:$0xf] %vm3361_vm6, %v3308_v16  ;;  %v9826_v16 = vld [vmem:[#allocation46_spill] sm:$0xff] }
 0x523   : > { %3378 = vst.msk [vmem:[#allocation3 + $0x48] sm:$0xf] %vm3361_vm6, %v3304_v10  ;;  %v9827_v10 = vld [vmem:[#allocation25_spill] sm:$0xff] }
 0x524   : > { %v3318_v62 = vpop.permute.xlu2 %3317 }
 0x525   : > { %3385 = vst.msk [vmem:[#allocation3 + $0x64] sm:$0xf] %vm3361_vm6, %v3318_v62  ;;  %v9828_v62 = vld [vmem:[#allocation7_spill] sm:$0xff] }
 0x527   : > { %3702 = vrot.lane.b32.xlu0 %v9821_v47, %s5439_s27  ;;  %3698 = vrot.lane.b32.xlu1 %v9822_v9, %s5439_s27 }
 0x529   : > { %v3314_v56 = vpop.permute.xlu0 %3313  ;;  %v3310_v52 = vpop.permute.xlu1 %3309 }
 0x52a   : > { %3585 = vrot.lane.b32.xlu2 %v8305_v49, %s5437_s25  ;;  %3383 = vst.msk [vmem:[#allocation3 + $0x5c] sm:$0xf] %vm3361_vm6, %v3314_v56  ;;  %s5446_s25 = smov 120  }
 0x52b   : > { %3381 = vst.msk [vmem:[#allocation3 + $0x54] sm:$0xf] %vm3361_vm6, %v3310_v52  ;;  %v9829_v52 = vld [vmem:[#allocation62_spill] sm:$0xff] }
 0x52c   : > { %v3324_v27 = vpop.permute.xlu2 %3323 }
 0x52d   : > { %3388 = vst.msk [vmem:[#allocation3 + $0x70] sm:$0xf] %vm3361_vm6, %v3324_v27  ;;  %v9830_v27 = vld [vmem:[#allocation45_spill] sm:$0xff] }
 0x52f   : > { %3708 = vrot.lane.b32.xlu0 %v9823_v59, %s5439_s27  ;;  %3704 = vrot.lane.b32.xlu1 %v9824_v43, %s5439_s27 }
 0x531   : > { %v3320_v38 = vpop.permute.xlu0 %3319  ;;  %v3316_v6 = vpop.permute.xlu1 %3315 }
 0x532   : > { %3700 = vrot.lane.b32.xlu2 %v9825_v13, %s5439_s27  ;;  %3386 = vst.msk [vmem:[#allocation3 + $0x68] sm:$0xf] %vm3361_vm6, %v3320_v38  ;;  %v9831_v38 = vld [vmem:[#allocation28_spill] sm:$0xff] }
 0x533   : > { %3384 = vst.msk [vmem:[#allocation3 + $0x60] sm:$0xf] %vm3361_vm6, %v3316_v6 }
 0x534   : > { %v3330_v33 = vpop.permute.xlu2 %3329 }
 0x535   : > { %3391 = vst.msk [vmem:[#allocation3 + $0x7c] sm:$0xf] %vm3361_vm6, %v3330_v33 }
 0x537   : > { %3714 = vrot.lane.b32.xlu0 %v9826_v16, %s5439_s27  ;;  %3710 = vrot.lane.b32.xlu1 %v9827_v10, %s5439_s27  ;;  %v9836_v10 = vld [vmem:[#allocation27_spill] sm:$0xff]  ;;  %v3625_v16 = vld [vmem:[#allocation3 + $0x14] sm:$0xf] }
 0x539   : > { %v3326_v35 = vpop.permute.xlu0 %3325  ;;  %v3322_v9 = vpop.permute.xlu1 %3321 }
 0x53a   : > { %3706 = vrot.lane.b32.xlu2 %v9828_v62, %s5439_s27  ;;  %3389 = vst.msk [vmem:[#allocation3 + $0x74] sm:$0xf] %vm3361_vm6, %v3326_v35 }
 0x53b   : > { %3387 = vst.msk [vmem:[#allocation3 + $0x6c] sm:$0xf] %vm3361_vm6, %v3322_v9  ;;  %v3629_v9 = vld [vmem:[#allocation3 + $0x1c] sm:$0xf] }
 0x53c   : > { %v3532_v56 = vpop.permute.xlu2 %3531 }
 0x53d   : > { %3624 = vst.msk [vmem:[#allocation3 + $0x10] sm:$0xf] %vm3617_vm0, %v3532_v56 }
 0x53f   : > { %3720 = vrot.lane.b32.xlu0 %v9829_v52, %s5439_s27  ;;  %3716 = vrot.lane.b32.xlu1 %v9830_v27, %s5439_s27  ;;  %v9834_v27 = vld [vmem:[#allocation81_spill] sm:$0xff] }
 0x540   : > { %v9835_v52 = vld [vmem:[#allocation69_spill] sm:$0xff] }
 0x541   : > { %v3528_v33 = vpop.permute.xlu0 %3527  ;;  %v3328_v35 = vpop.permute.xlu1 %3327 }
 0x542   : > { %3712 = vrot.lane.b32.xlu2 %v9831_v38, %s5439_s27  ;;  %3618 = vst.msk [vmem:[#allocation3 + $0x8] sm:$0xf] %vm3617_vm0, %v3528_v33  ;;  %v3621_v33 = vld [vmem:[#allocation3 + $0xc] sm:$0xf] }
 0x543   : > { %3390 = vst.msk [vmem:[#allocation3 + $0x78] sm:$0xf] %vm3361_vm6, %v3328_v35 }
 0x544   : > { %v3538_v56 = vpop.permute.xlu2 %3537 }
 0x545   : > { %v3630_v28 = vsel %vm8342_vm7, %v3538_v56, %v3629_v9  ;;  %v9837_v56 = vld [vmem:[#allocation20_spill] sm:$0xff] }
 0x546   : > { %3631 = vst [vmem:[#allocation3 + $0x1c] sm:$0xf] %v3630_v28 }
 0x547   : > { %3726 = vrot.lane.b32.xlu0 %v9834_v27, %s5439_s27  ;;  %3722 = vrot.lane.b32.xlu1 %v9835_v52, %s5439_s27  ;;  %v9838_v52 = vld [vmem:[#allocation85_spill] sm:$0xff]  ;;  %v9839_v27 = vld [vmem:[#allocation74_spill] sm:$0xff] }
 0x549   : > { %v3534_v43 = vpop.permute.xlu0 %3533  ;;  %v3530_v38 = vpop.permute.xlu1 %3529 }
 0x54a   : > { %3718 = vrot.lane.b32.xlu2 %v9836_v10, %s5439_s27  ;;  %v3626_v35 = vsel %vm8342_vm7, %v3534_v43, %v3625_v16  ;;  %v3622_v9 = vsel %vm8342_vm7, %v3530_v38, %v3621_v33  ;;  %v3641_v43 = vld [vmem:[#allocation3 + $0x34] sm:$0xf]  ;;  %v9840_v33 = vld [vmem:[#allocation53_spill] sm:$0xff] }
 0x54b   : > { %3627 = vst [vmem:[#allocation3 + $0x14] sm:$0xf] %v3626_v35  ;;  %v9841_v35 = vld [vmem:[#allocation35_spill] sm:$0xff] }
 0x54c   : > { %v3544_v28 = vpop.permute.xlu2 %3543  ;;  %3623 = vst [vmem:[#allocation3 + $0xc] sm:$0xf] %v3622_v9  ;;  %v3637_v9 = vld [vmem:[#allocation3 + $0x2c] sm:$0xf] }
 0x54d   : > { %3636 = vst.msk [vmem:[#allocation3 + $0x28] sm:$0xf] %vm3617_vm0, %v3544_v28 }
 0x54f   : > { %3732 = vrot.lane.b32.xlu0 %v9837_v56, %s5439_s27  ;;  %3728 = vrot.lane.b32.xlu1 %v9838_v52, %s5439_s27 }
 0x551   : > { %v3540_v10 = vpop.permute.xlu0 %3539  ;;  %v3536_v59 = vpop.permute.xlu1 %3535 }
 0x552   : > { %3724 = vrot.lane.b32.xlu2 %v9839_v27, %s5439_s27  ;;  %3632 = vst.msk [vmem:[#allocation3 + $0x20] sm:$0xf] %vm3617_vm0, %v3540_v10  ;;  %v3633_v10 = vld [vmem:[#allocation3 + $0x24] sm:$0xf] }
 0x553   : > { %3628 = vst.msk [vmem:[#allocation3 + $0x18] sm:$0xf] %vm3617_vm0, %v3536_v59 }
 0x554   : > { %v3550_v16 = vpop.permute.xlu2 %3549 }
 0x555   : > { %v3642_v38 = vsel %vm8342_vm7, %v3550_v16, %v3641_v43 }
 0x556   : > { %3643 = vst [vmem:[#allocation3 + $0x34] sm:$0xf] %v3642_v38  ;;  %v9842_v38 = vld [vmem:[#allocation67_spill] sm:$0xff] }
 0x557   : > { %3738 = vrot.lane.b32.xlu0 %v9840_v33, %s5439_s27  ;;  %3734 = vrot.lane.b32.xlu1 %v9841_v35, %s5439_s27  ;;  %v9843_v33 = vld [vmem:[#allocation56_spill] sm:$0xff]  ;;  %v9844_v35 = vld [vmem:[#allocation34_spill] sm:$0xff] }
 0x559   : > { %v3546_v28 = vpop.permute.xlu0 %3545  ;;  %v3542_v52 = vpop.permute.xlu1 %3541 }
 0x55a   : > { %3730 = vrot.lane.b32.xlu2 %v8082_v60, %s5439_s27  ;;  %v3638_v59 = vsel %vm8342_vm7, %v3546_v28, %v3637_v9  ;;  %v3634_v43 = vsel %vm8342_vm7, %v3542_v52, %v3633_v10  ;;  %v3653_v52 = vld [vmem:[#allocation3 + $0x4c] sm:$0xf]  ;;  %v9845_v10 = vld [vmem:[#allocation86_spill] sm:$0xff] }
 0x55b   : > { %3639 = vst [vmem:[#allocation3 + $0x2c] sm:$0xf] %v3638_v59  ;;  %v9846_v59 = vld [vmem:[#allocation75_spill] sm:$0xff] }
 0x55c   : > { %v3556_v16 = vpop.permute.xlu2 %3555  ;;  %3635 = vst [vmem:[#allocation3 + $0x24] sm:$0xf] %v3634_v43  ;;  %v9847_v43 = vld [vmem:[#allocation63_spill] sm:$0xff] }
 0x55d   : > { %3648 = vst.msk [vmem:[#allocation3 + $0x40] sm:$0xf] %vm3617_vm0, %v3556_v16 }
 0x55f   : > { %3744 = vrot.lane.b32.xlu0 %v9842_v38, %s5439_s27  ;;  %3740 = vrot.lane.b32.xlu1 %v9843_v33, %s5439_s27  ;;  %v3649_v38 = vld [vmem:[#allocation3 + $0x44] sm:$0xf] }
 0x561   : > { %v3552_v56 = vpop.permute.xlu0 %3551  ;;  %v3548_v60 = vpop.permute.xlu1 %3547 }
 0x562   : > { %3736 = vrot.lane.b32.xlu2 %v9844_v35, %s5439_s27  ;;  %3644 = vst.msk [vmem:[#allocation3 + $0x38] sm:$0xf] %vm3617_vm0, %v3552_v56  ;;  %v3645_v56 = vld [vmem:[#allocation3 + $0x3c] sm:$0xf]  ;;  %v9848_v35 = vshrl.u32 %v8109_v3, 16 }
 0x563   : > { %3640 = vst.msk [vmem:[#allocation3 + $0x30] sm:$0xf] %vm3617_vm0, %v3548_v60 }
 0x564   : > { %v3562_v9 = vpop.permute.xlu2 %3561  ;;  %v3683_v60 = vrot.slane %v9848_v35, 7 }
 0x565   : > { %v3654_v28 = vsel %vm8342_vm7, %v3562_v9, %v3653_v52 }
 0x566   : > { %3655 = vst [vmem:[#allocation3 + $0x4c] sm:$0xf] %v3654_v28 }
 0x567   : > { %3750 = vrot.lane.b32.xlu0 %v9845_v10, %s5439_s27  ;;  %3746 = vrot.lane.b32.xlu1 %v9846_v59, %s5439_s27  ;;  %v9849_v10 = vshll.u32 %v8109_v3, 16 }
 0x569   : > { %v3558_v16 = vpop.permute.xlu0 %3557  ;;  %v3554_v33 = vpop.permute.xlu1 %3553  ;;  %v8407_v59 = vor.u32 %v9849_v10, %v3683_v60  ;;  %v9853_v10 = vshll.u32 %v8133_v44, 16 }
 0x56a   : > { %3742 = vrot.lane.b32.xlu2 %v9847_v43, %s5439_s27  ;;  %v3650_v9 = vsel %vm8342_vm7, %v3558_v16, %v3649_v38  ;;  %v3646_v52 = vsel %vm8342_vm7, %v3554_v33, %v3645_v56  ;;  %v9851_v43 = vshrl.u32 %v8133_v44, 16  ;;  %v9852_v33 = vld [vmem:[#allocation79_spill] sm:$0xff]  ;;  %v3665_v16 = vld [vmem:[#allocation3 + $0x64] sm:$0xf] }
 0x56b   : > { %3651 = vst [vmem:[#allocation3 + $0x44] sm:$0xf] %v3650_v9 }
 0x56c   : > { %v3568_v28 = vpop.permute.xlu2 %3567  ;;  %3647 = vst [vmem:[#allocation3 + $0x3c] sm:$0xf] %v3646_v52  ;;  %v3691_v27 = vrot.slane %v9851_v43, 7  ;;  %v3687_v52 = vrot.slane %v3683_v60, 4 }
 0x56d   : > { %3660 = vst.msk [vmem:[#allocation3 + $0x58] sm:$0xf] %vm3617_vm0, %v3568_v28 }
 0x56e   : > { %9850 = vst [vmem:[#allocation61_spill] sm:$0xff] %v8407_v59  ;;  %v3694_v9 = vor.u32 %v9853_v10, %v3691_v27  ;;  %v3661_v27 = vld [vmem:[#allocation3 + $0x5c] sm:$0xf] }
 0x56f   : > { %3756 = vrot.lane.b32.xlu0 %v8407_v59, %s5439_s27  ;;  %3752 = vrot.lane.b32.xlu1 %v8066_v55, %s5439_s27  ;;  %v9855_v59 = vld [vmem:[#allocation11_spill] sm:$0xff] }
 0x570   : > { %v8425_v28 = vsel %vm6149_vm15, %v3687_v52, %v3694_v9  ;;  %v9858_v9 = vld [vmem:[#allocation43_spill] sm:$0xff]  ;;  %vm3792_vm15 = vcmask 257216  }
 0x571   : > { %v3564_v35 = vpop.permute.xlu0 %3563  ;;  %v3560_v38 = vpop.permute.xlu1 %3559  ;;  %9854 = vst [vmem:[#allocation50_spill] sm:$0xff] %v8425_v28  ;;  %vm8456_vm9 = vmand %vm3792_vm15, %vm1155_vm8  ;;  %vm4786_vm8 = vcmask 1043456  }
 0x572   : > { %3748 = vrot.lane.b32.xlu2 %v9852_v33, %s5439_s27  ;;  %3656 = vst.msk [vmem:[#allocation3 + $0x50] sm:$0xf] %vm3617_vm0, %v3564_v35  ;;  %v9864_v33 = vld [vmem:[#allocation47_spill] sm:$0xff] }
 0x573   : > { %3652 = vst.msk [vmem:[#allocation3 + $0x48] sm:$0xf] %vm3617_vm0, %v3560_v38  ;;  %v3657_v38 = vld [vmem:[#allocation3 + $0x54] sm:$0xf] }
 0x574   : > { %v3574_v56 = vpop.permute.xlu2 %3573 }
 0x575   : > { %v3666_v43 = vsel %vm8342_vm7, %v3574_v56, %v3665_v16  ;;  %v9857_v56 = vld [vmem:[#allocation18_spill] sm:$0xff] }
 0x576   : > { %3667 = vst [vmem:[#allocation3 + $0x64] sm:$0xf] %v3666_v43 }
 0x577   : > { %3863 = vrot.lane.b32.xlu0 %v9855_v59, %s5441_s29  ;;  %3758 = vrot.lane.b32.xlu1 %v8425_v28, %s5439_s27  ;;  %v9856_v59 = vld [vmem:[#allocation42_spill] sm:$0xff]  ;;  %v3799_v28 = vld [vmem:[#allocation3 + $0x8] sm:$0xf] }
 0x579   : > { %v3570_v35 = vpop.permute.xlu0 %3569  ;;  %v3566_v10 = vpop.permute.xlu1 %3565 }
 0x57a   : > { %3754 = vrot.lane.b32.xlu2 %v8113_v41, %s5439_s27  ;;  %v3662_v60 = vsel %vm8342_vm7, %v3570_v35, %v3661_v27  ;;  %v3658_v30 = vsel %vm8342_vm7, %v3566_v10, %v3657_v38  ;;  %v3677_v27 = vld [vmem:[#allocation3 + $0x7c] sm:$0xf]  ;;  %v9859_v10 = vld [vmem:[#allocation16_spill] sm:$0xff] }
 0x57b   : > { %3663 = vst [vmem:[#allocation3 + $0x5c] sm:$0xf] %v3662_v60  ;;  %v9860_v60 = vld [vmem:[#allocation8_spill] sm:$0xff] }
 0x57c   : > { %v3580_v16 = vpop.permute.xlu2 %3579  ;;  %3659 = vst [vmem:[#allocation3 + $0x54] sm:$0xf] %v3658_v30  ;;  %v9861_v30 = vld [vmem:[#allocation30_spill] sm:$0xff] }
 0x57d   : > { %3672 = vst.msk [vmem:[#allocation3 + $0x70] sm:$0xf] %vm3617_vm0, %v3580_v16 }
 0x57f   : > { %3869 = vrot.lane.b32.xlu0 %v9856_v59, %s5441_s29  ;;  %3865 = vrot.lane.b32.xlu1 %v9857_v56, %s5441_s29 }
 0x581   : > { %v3576_v43 = vpop.permute.xlu0 %3575  ;;  %v3572_v52 = vpop.permute.xlu1 %3571 }
 0x582   : > { %3861 = vrot.lane.b32.xlu2 %v9858_v9, %s5441_s29  ;;  %3668 = vst.msk [vmem:[#allocation3 + $0x68] sm:$0xf] %vm3617_vm0, %v3576_v43  ;;  %v3673_v9 = vld [vmem:[#allocation3 + $0x74] sm:$0xf] }
 0x583   : > { %3664 = vst.msk [vmem:[#allocation3 + $0x60] sm:$0xf] %vm3617_vm0, %v3572_v52  ;;  %v3669_v52 = vld [vmem:[#allocation3 + $0x6c] sm:$0xf] }
 0x584   : > { %v3586_v35 = vpop.permute.xlu2 %3585 }
 0x585   : > { %v3678_v38 = vsel %vm8342_vm7, %v3586_v35, %v3677_v27 }
 0x586   : > { %3679 = vst [vmem:[#allocation3 + $0x7c] sm:$0xf] %v3678_v38 }
 0x587   : > { %3875 = vrot.lane.b32.xlu0 %v9859_v10, %s5441_s29  ;;  %3871 = vrot.lane.b32.xlu1 %v9860_v60, %s5441_s29  ;;  %v9865_v10 = vld [vmem:[#allocation24_spill] sm:$0xff] }
 0x588   : > { %v3794_v60 = vld [vmem:[#allocation3] sm:$0xf] }
 0x589   : > { %v3582_v43 = vpop.permute.xlu0 %3581  ;;  %v3578_v27 = vpop.permute.xlu1 %3577 }
 0x58a   : > { %3867 = vrot.lane.b32.xlu2 %v9861_v30, %s5441_s29  ;;  %v3674_v35 = vsel %vm8342_vm7, %v3582_v43, %v3673_v9  ;;  %v3670_v38 = vsel %vm8342_vm7, %v3578_v27, %v3669_v52  ;;  %v9866_v9 = vld [vmem:[#allocation12_spill] sm:$0xff] }
 0x58b   : > { %3675 = vst [vmem:[#allocation3 + $0x74] sm:$0xf] %v3674_v35  ;;  %v9869_v27 = vld [vmem:[#allocation36_spill] sm:$0xff] }
 0x58c   : > { %v3701_v55 = vpop.permute.xlu2 %3700  ;;  %3671 = vst [vmem:[#allocation3 + $0x6c] sm:$0xf] %v3670_v38 }
 0x58d   : > { %v3800_v41 = vsel %vm8456_vm9, %v3701_v55, %v3799_v28  ;;  %v9868_v28 = vld [vmem:[#allocation52_spill] sm:$0xff] }
 0x58e   : > { %3801 = vst [vmem:[#allocation3 + $0x8] sm:$0xf] %v3800_v41  ;;  %v9867_v41 = vld [vmem:[#allocation64_spill] sm:$0xff] }
 0x58f   : > { %3881 = vrot.lane.b32.xlu0 %v9864_v33, %s5441_s29  ;;  %3877 = vrot.lane.b32.xlu1 %v9865_v10, %s5441_s29  ;;  %v3807_v33 = vld [vmem:[#allocation3 + $0x18] sm:$0xf] }
 0x591   : > { %v3697_v6 = vpop.permute.xlu0 %3696  ;;  %v3584_v43 = vpop.permute.xlu1 %3583 }
 0x592   : > { %3873 = vrot.lane.b32.xlu2 %v9866_v9, %s5441_s29  ;;  %v3795_v52 = vsel %vm8456_vm9, %v3697_v6, %v3794_v60  ;;  %3676 = vst.msk [vmem:[#allocation3 + $0x78] sm:$0xf] %vm3617_vm0, %v3584_v43  ;;  %v3811_v60 = vld [vmem:[#allocation3 + $0x20] sm:$0xf] }
 0x593   : > { %3796 = vst [vmem:[#allocation3] sm:$0xf] %v3795_v52  ;;  %v9870_v52 = vld [vmem:[#allocation80_spill] sm:$0xff] }
 0x594   : > { %v3707_v55 = vpop.permute.xlu2 %3706 }
 0x595   : > { %3806 = vst.msk [vmem:[#allocation3 + $0x14] sm:$0xf] %vm3792_vm15, %v3707_v55  ;;  %v9871_v55 = vld [vmem:[#allocation68_spill] sm:$0xff] }
 0x597   : > { %3887 = vrot.lane.b32.xlu0 %v9867_v41, %s5441_s29  ;;  %3883 = vrot.lane.b32.xlu1 %v9868_v28, %s5441_s29  ;;  %v9872_v41 = vld [vmem:[#allocation51_spill] sm:$0xff] }
 0x599   : > { %v3703_v35 = vpop.permute.xlu0 %3702  ;;  %v3699_v38 = vpop.permute.xlu1 %3698 }
 0x59a   : > { %3879 = vrot.lane.b32.xlu2 %v9869_v27, %s5441_s29  ;;  %3802 = vst.msk [vmem:[#allocation3 + $0xc] sm:$0xf] %vm3792_vm15, %v3703_v35  ;;  %v3803_v35 = vld [vmem:[#allocation3 + $0x10] sm:$0xf] }
 0x59b   : > { %3798 = vst.msk [vmem:[#allocation3 + $0x4] sm:$0xf] %vm3792_vm15, %v3699_v38 }
 0x59c   : > { %v3713_v6 = vpop.permute.xlu2 %3712 }
 0x59d   : > { %v3812_v43 = vsel %vm8456_vm9, %v3713_v6, %v3811_v60 }
 0x59e   : > { %3813 = vst [vmem:[#allocation3 + $0x20] sm:$0xf] %v3812_v43  ;;  %v9873_v43 = vld [vmem:[#allocation26_spill] sm:$0xff] }
 0x59f   : > { %3893 = vrot.lane.b32.xlu0 %v9870_v52, %s5441_s29  ;;  %3889 = vrot.lane.b32.xlu1 %v9871_v55, %s5441_s29  ;;  %v9874_v55 = vld [vmem:[#allocation87_spill] sm:$0xff]  ;;  %v9875_v52 = vld [vmem:[#allocation76_spill] sm:$0xff] }
 0x5a1   : > { %v3709_v28 = vpop.permute.xlu0 %3708  ;;  %v3705_v10 = vpop.permute.xlu1 %3704 }
 0x5a2   : > { %3885 = vrot.lane.b32.xlu2 %v9872_v41, %s5441_s29  ;;  %v3808_v38 = vsel %vm8456_vm9, %v3709_v28, %v3807_v33  ;;  %v3804_v60 = vsel %vm8456_vm9, %v3705_v10, %v3803_v35  ;;  %v3823_v33 = vld [vmem:[#allocation3 + $0x38] sm:$0xf]  ;;  %v9876_v35 = vld [vmem:[#allocation13_spill] sm:$0xff] }
 0x5a3   : > { %3809 = vst [vmem:[#allocation3 + $0x18] sm:$0xf] %v3808_v38 }
 0x5a4   : > { %v3719_v6 = vpop.permute.xlu2 %3718  ;;  %3805 = vst [vmem:[#allocation3 + $0x10] sm:$0xf] %v3804_v60  ;;  %v3819_v60 = vld [vmem:[#allocation3 + $0x30] sm:$0xf] }
 0x5a5   : > { %3818 = vst.msk [vmem:[#allocation3 + $0x2c] sm:$0xf] %vm3792_vm15, %v3719_v6 }
 0x5a7   : > { %3899 = vrot.lane.b32.xlu0 %v9873_v43, %s5441_s29  ;;  %3895 = vrot.lane.b32.xlu1 %v9874_v55, %s5441_s29 }
 0x5a9   : > { %v3715_v41 = vpop.permute.xlu0 %3714  ;;  %v3711_v27 = vpop.permute.xlu1 %3710 }
 0x5aa   : > { %3891 = vrot.lane.b32.xlu2 %v9875_v52, %s5441_s29  ;;  %3814 = vst.msk [vmem:[#allocation3 + $0x24] sm:$0xf] %vm3792_vm15, %v3715_v41  ;;  %v3815_v41 = vld [vmem:[#allocation3 + $0x28] sm:$0xf] }
 0x5ab   : > { %3810 = vst.msk [vmem:[#allocation3 + $0x1c] sm:$0xf] %vm3792_vm15, %v3711_v27 }
 0x5ac   : > { %v3725_v10 = vpop.permute.xlu2 %3724 }
 0x5ad   : > { %v3824_v28 = vsel %vm8456_vm9, %v3725_v10, %v3823_v33 }
 0x5ae   : > { %3825 = vst [vmem:[#allocation3 + $0x38] sm:$0xf] %v3824_v28  ;;  %v9877_v28 = vld [vmem:[#allocation37_spill] sm:$0xff] }
 0x5af   : > { %3905 = vrot.lane.b32.xlu0 %v7798_v18, %s5441_s29  ;;  %3901 = vrot.lane.b32.xlu1 %v7722_v26, %s5441_s29 }
 0x5b1   : > { %v3721_v38 = vpop.permute.xlu0 %3720  ;;  %v3717_v6 = vpop.permute.xlu1 %3716 }
 0x5b2   : > { %3897 = vrot.lane.b32.xlu2 %v9876_v35, %s5441_s29  ;;  %v3820_v27 = vsel %vm8456_vm9, %v3721_v38, %v3819_v60  ;;  %v3816_v33 = vsel %vm8456_vm9, %v3717_v6, %v3815_v41  ;;  %v3835_v38 = vld [vmem:[#allocation3 + $0x50] sm:$0xf] }
 0x5b3   : > { %3821 = vst [vmem:[#allocation3 + $0x30] sm:$0xf] %v3820_v27  ;;  %v3831_v27 = vld [vmem:[#allocation3 + $0x48] sm:$0xf] }
 0x5b4   : > { %v3731_v10 = vpop.permute.xlu2 %3730  ;;  %3817 = vst [vmem:[#allocation3 + $0x28] sm:$0xf] %v3816_v33 }
 0x5b5   : > { %3830 = vst.msk [vmem:[#allocation3 + $0x44] sm:$0xf] %vm3792_vm15, %v3731_v10 }
 0x5b7   : > { %3911 = vrot.lane.b32.xlu0 %v7908_v51, %s5441_s29  ;;  %3907 = vrot.lane.b32.xlu1 %v7831_v42, %s5441_s29 }
 0x5b9   : > { %v3727_v55 = vpop.permute.xlu0 %3726  ;;  %v3723_v52 = vpop.permute.xlu1 %3722 }
 0x5ba   : > { %3903 = vrot.lane.b32.xlu2 %v9877_v28, %s5441_s29  ;;  %3826 = vst.msk [vmem:[#allocation3 + $0x3c] sm:$0xf] %vm3792_vm15, %v3727_v55  ;;  %v3827_v55 = vld [vmem:[#allocation3 + $0x40] sm:$0xf] }
 0x5bb   : > { %3822 = vst.msk [vmem:[#allocation3 + $0x34] sm:$0xf] %vm3792_vm15, %v3723_v52 }
 0x5bc   : > { %v3737_v60 = vpop.permute.xlu2 %3736 }
 0x5bd   : > { %v3836_v41 = vsel %vm8456_vm9, %v3737_v60, %v3835_v38 }
 0x5be   : > { %3837 = vst [vmem:[#allocation3 + $0x50] sm:$0xf] %v3836_v41 }
 0x5bf   : > { %3917 = vrot.lane.b32.xlu0 %v8032_v2, %s5441_s29  ;;  %3913 = vrot.lane.b32.xlu1 %v7952_v8, %s5441_s29 }
 0x5c1   : > { %v3733_v6 = vpop.permute.xlu0 %3732  ;;  %v3729_v33 = vpop.permute.xlu1 %3728 }
 0x5c2   : > { %3909 = vrot.lane.b32.xlu2 %v7874_v7, %s5441_s29  ;;  %v3832_v52 = vsel %vm8456_vm9, %v3733_v6, %v3831_v27  ;;  %v3828_v10 = vsel %vm8456_vm9, %v3729_v33, %v3827_v55  ;;  %v3847_v6 = vld [vmem:[#allocation3 + $0x68] sm:$0xf] }
 0x5c3   : > { %3833 = vst [vmem:[#allocation3 + $0x48] sm:$0xf] %v3832_v52  ;;  %v3843_v52 = vld [vmem:[#allocation3 + $0x60] sm:$0xf] }
 0x5c4   : > { %v3743_v38 = vpop.permute.xlu2 %3742  ;;  %3829 = vst [vmem:[#allocation3 + $0x40] sm:$0xf] %v3828_v10 }
 0x5c5   : > { %3842 = vst.msk [vmem:[#allocation3 + $0x5c] sm:$0xf] %vm3792_vm15, %v3743_v38  ;;  %v3839_v38 = vld [vmem:[#allocation3 + $0x58] sm:$0xf] }
 0x5c7   : > { %3923 = vrot.lane.b32.xlu0 %v8133_v44, %s5441_s29  ;;  %3919 = vrot.lane.b32.xlu1 %v8068_v22, %s5441_s29 }
 0x5c9   : > { %v3739_v60 = vpop.permute.xlu0 %3738  ;;  %v3735_v41 = vpop.permute.xlu1 %3734 }
 0x5ca   : > { %3915 = vrot.lane.b32.xlu2 %v7986_v15, %s5441_s29  ;;  %3838 = vst.msk [vmem:[#allocation3 + $0x54] sm:$0xf] %vm3792_vm15, %v3739_v60 }
 0x5cb   : > { %3834 = vst.msk [vmem:[#allocation3 + $0x4c] sm:$0xf] %vm3792_vm15, %v3735_v41 }
 0x5cc   : > { %v3749_v27 = vpop.permute.xlu2 %3748 }
 0x5cd   : > { %v3848_v55 = vsel %vm8456_vm9, %v3749_v27, %v3847_v6 }
 0x5ce   : > { %3849 = vst [vmem:[#allocation3 + $0x68] sm:$0xf] %v3848_v55 }
 0x5cf   : > { %4003 = vrot.lane.b32.xlu0 %v7593_v14, %s5442_s9  ;;  %3999 = vrot.lane.b32.xlu1 %v7550_v36, %s5442_s9 }
 0x5d1   : > { %v3745_v33 = vpop.permute.xlu0 %3744  ;;  %v3741_v10 = vpop.permute.xlu1 %3740 }
 0x5d2   : > { %3921 = vrot.lane.b32.xlu2 %v8109_v3, %s5441_s29  ;;  %v3844_v60 = vsel %vm8456_vm9, %v3745_v33, %v3843_v52  ;;  %v3840_v41 = vsel %vm8456_vm9, %v3741_v10, %v3839_v38  ;;  %v3855_v33 = vld [vmem:[#allocation3 + $0x78] sm:$0xf]  ;;  %v3851_v10 = vld [vmem:[#allocation3 + $0x70] sm:$0xf] }
 0x5d3   : > { %3845 = vst [vmem:[#allocation3 + $0x60] sm:$0xf] %v3844_v60 }
 0x5d4   : > { %v3755_v6 = vpop.permute.xlu2 %3754  ;;  %3841 = vst [vmem:[#allocation3 + $0x58] sm:$0xf] %v3840_v41 }
 0x5d5   : > { %3854 = vst.msk [vmem:[#allocation3 + $0x74] sm:$0xf] %vm3792_vm15, %v3755_v6 }
 0x5d7   : > { %4009 = vrot.lane.b32.xlu0 %v8196_v23, %s5442_s9  ;;  %4005 = vrot.lane.b32.xlu1 %v8162_v63, %s5442_s9 }
 0x5d9   : > { %v3751_v36 = vpop.permute.xlu0 %3750  ;;  %v3747_v27 = vpop.permute.xlu1 %3746 }
 0x5da   : > { %4001 = vrot.lane.b32.xlu2 %v8167_v0, %s5442_s9  ;;  %3850 = vst.msk [vmem:[#allocation3 + $0x6c] sm:$0xf] %vm3792_vm15, %v3751_v36 }
 0x5db   : > { %3846 = vst.msk [vmem:[#allocation3 + $0x64] sm:$0xf] %vm3792_vm15, %v3747_v27 }
 0x5dc   : > { %v3862_v55 = vpop.permute.xlu2 %3861 }
 0x5dd   : > { %3958 = vst.msk [vmem:[#allocation3] sm:$0xf] %vm3957_vm10, %v3862_v55 }
 0x5df   : > { %4015 = vrot.lane.b32.xlu0 %v7763_v58, %s5442_s9  ;;  %4011 = vrot.lane.b32.xlu1 %v7685_v40, %s5442_s9 }
 0x5e1   : > { %v3757_v0 = vpop.permute.xlu0 %3756  ;;  %v3753_v52 = vpop.permute.xlu1 %3752 }
 0x5e2   : > { %4007 = vrot.lane.b32.xlu2 %v7631_v24, %s5442_s9  ;;  %v3856_v38 = vsel %vm8456_vm9, %v3757_v0, %v3855_v33  ;;  %v3852_v60 = vsel %vm8456_vm9, %v3753_v52, %v3851_v10 }
 0x5e3   : > { %3857 = vst [vmem:[#allocation3 + $0x78] sm:$0xf] %v3856_v38 }
 0x5e4   : > { %v3868_v41 = vpop.permute.xlu2 %3867  ;;  %3853 = vst [vmem:[#allocation3 + $0x70] sm:$0xf] %v3852_v60 }
 0x5e5   : > { %3961 = vst.msk [vmem:[#allocation3 + $0xc] sm:$0xf] %vm3957_vm10, %v3868_v41 }
 0x5e7   : > { %4021 = vrot.lane.b32.xlu0 %v8225_v25, %s5442_s9  ;;  %4017 = vrot.lane.b32.xlu1 %v8186_v50, %s5442_s9 }
 0x5e9   : > { %v3864_v6 = vpop.permute.xlu0 %3863  ;;  %v3759_v36 = vpop.permute.xlu1 %3758 }
 0x5ea   : > { %4013 = vrot.lane.b32.xlu2 %v8191_v61, %s5442_s9  ;;  %3959 = vst.msk [vmem:[#allocation3 + $0x4] sm:$0xf] %vm3957_vm10, %v3864_v6 }
 0x5eb   : > { %3858 = vst.msk [vmem:[#allocation3 + $0x7c] sm:$0xf] %vm3792_vm15, %v3759_v36 }
 0x5ec   : > { %v3874_v16 = vpop.permute.xlu2 %3873 }
 0x5ed   : > { %3964 = vst.msk [vmem:[#allocation3 + $0x18] sm:$0xf] %vm3957_vm10, %v3874_v16 }
 0x5ef   : > { %4027 = vrot.lane.b32.xlu0 %v7994_v45, %s5442_s9  ;;  %4023 = vrot.lane.b32.xlu1 %v7914_v57, %s5442_s9 }
 0x5f1   : > { %v3870_v27 = vpop.permute.xlu0 %3869  ;;  %v3866_v55 = vpop.permute.xlu1 %3865 }
 0x5f2   : > { %4019 = vrot.lane.b32.xlu2 %v7837_v31, %s5442_s9  ;;  %3962 = vst.msk [vmem:[#allocation3 + $0x10] sm:$0xf] %vm3957_vm10, %v3870_v27 }
 0x5f3   : > { %3960 = vst.msk [vmem:[#allocation3 + $0x8] sm:$0xf] %vm3957_vm10, %v3866_v55 }
 0x5f4   : > { %v3880_v0 = vpop.permute.xlu2 %3879 }
 0x5f5   : > { %3967 = vst.msk [vmem:[#allocation3 + $0x24] sm:$0xf] %vm3957_vm10, %v3880_v0 }
 0x5f7   : > { %4029 = vrot.lane.b32.xlu1 %v8215_v21, %s5442_s9  ;;  %4033 = vrot.lane.b32.xlu0 %v8254_v37, %s5442_s9 }
 0x5f9   : > { %v3876_v33 = vpop.permute.xlu0 %3875  ;;  %v3872_v52 = vpop.permute.xlu1 %3871 }
 0x5fa   : > { %4025 = vrot.lane.b32.xlu2 %v8220_v20, %s5442_s9  ;;  %3965 = vst.msk [vmem:[#allocation3 + $0x1c] sm:$0xf] %vm3957_vm10, %v3876_v33 }
 0x5fb   : > { %3963 = vst.msk [vmem:[#allocation3 + $0x14] sm:$0xf] %vm3957_vm10, %v3872_v52 }
 0x5fc   : > { %v3886_v10 = vpop.permute.xlu2 %3885 }
 0x5fd   : > { %3970 = vst.msk [vmem:[#allocation3 + $0x30] sm:$0xf] %vm3957_vm10, %v3886_v10 }
 0x5ff   : > { %4035 = vrot.lane.b32.xlu1 %v7718_v12, %s5442_s9  ;;  %4039 = vrot.lane.b32.xlu0 %v9810_v5, %s5442_s9 }
 0x601   : > { %v3882_v38 = vpop.permute.xlu0 %3881  ;;  %v3878_v60 = vpop.permute.xlu1 %3877 }
 0x602   : > { %4031 = vrot.lane.b32.xlu2 %v8073_v17, %s5442_s9  ;;  %3968 = vst.msk [vmem:[#allocation3 + $0x28] sm:$0xf] %vm3957_vm10, %v3882_v38 }
 0x603   : > { %3966 = vst.msk [vmem:[#allocation3 + $0x20] sm:$0xf] %vm3957_vm10, %v3878_v60 }
 0x604   : > { %v3892_v41 = vpop.permute.xlu2 %3891 }
 0x605   : > { %3973 = vst.msk [vmem:[#allocation3 + $0x3c] sm:$0xf] %vm3957_vm10, %v3892_v41 }
 0x607   : > { %4041 = vrot.lane.b32.xlu1 %v8244_v46, %s5442_s9  ;;  %4045 = vrot.lane.b32.xlu0 %v8283_v34, %s5442_s9 }
 0x609   : > { %v3888_v6 = vpop.permute.xlu0 %3887  ;;  %v3884_v36 = vpop.permute.xlu1 %3883 }
 0x60a   : > { %4037 = vrot.lane.b32.xlu2 %v8249_v48, %s5442_s9  ;;  %3971 = vst.msk [vmem:[#allocation3 + $0x34] sm:$0xf] %vm3957_vm10, %v3888_v6  ;;  %v9878_v6 = vor.u32 %v8147_v32, %v8143_v11  ;;  %v9879_v11 = vld [vmem:[#allocation19_spill] sm:$0xff]  ;;  %v9880_v32 = vld [vmem:[#allocation28_spill] sm:$0xff] }
 0x60b   : > { %3969 = vst.msk [vmem:[#allocation3 + $0x2c] sm:$0xf] %vm3957_vm10, %v3884_v36 }
 0x60c   : > { %v3898_v16 = vpop.permute.xlu2 %3897  ;;  %v8655_v36 = vrot.slane %v9878_v6, 4 }
 0x60d   : > { %3976 = vst.msk [vmem:[#allocation3 + $0x48] sm:$0xf] %vm3957_vm10, %v3898_v16 }
 0x60f   : > { %4047 = vrot.lane.b32.xlu1 %v7948_v53, %s5442_s9  ;;  %4051 = vrot.lane.b32.xlu0 %v8030_v1, %s5442_s9 }
 0x611   : > { %v3894_v27 = vpop.permute.xlu0 %3893  ;;  %v3890_v55 = vpop.permute.xlu1 %3889 }
 0x612   : > { %4043 = vrot.lane.b32.xlu2 %v9809_v29, %s5442_s9  ;;  %3974 = vst.msk [vmem:[#allocation3 + $0x40] sm:$0xf] %vm3957_vm10, %v3894_v27 }
 0x613   : > { %3972 = vst.msk [vmem:[#allocation3 + $0x38] sm:$0xf] %vm3957_vm10, %v3890_v55 }
 0x614   : > { %v3904_v0 = vpop.permute.xlu2 %3903 }
 0x615   : > { %3979 = vst.msk [vmem:[#allocation3 + $0x54] sm:$0xf] %vm3957_vm10, %v3904_v0 }
 0x617   : > { %4053 = vrot.lane.b32.xlu1 %v8273_v54, %s5442_s9  ;;  %4057 = vrot.lane.b32.xlu0 %v8305_v49, %s5442_s9 }
 0x619   : > { %v3900_v33 = vpop.permute.xlu0 %3899  ;;  %v3896_v52 = vpop.permute.xlu1 %3895 }
 0x61a   : > { %4049 = vrot.lane.b32.xlu2 %v8278_v19, %s5442_s9  ;;  %3977 = vst.msk [vmem:[#allocation3 + $0x4c] sm:$0xf] %vm3957_vm10, %v3900_v33  ;;  %v4099_v33 = vld [vmem:[#allocation3 + $0x4] sm:$0xf] }
 0x61b   : > { %3975 = vst.msk [vmem:[#allocation3 + $0x44] sm:$0xf] %vm3957_vm10, %v3896_v52 }
 0x61c   : > { %v3910_v10 = vpop.permute.xlu2 %3909 }
 0x61d   : > { %3982 = vst.msk [vmem:[#allocation3 + $0x60] sm:$0xf] %vm3957_vm10, %v3910_v10 }
 0x61f   : > { %4059 = vrot.lane.b32.xlu1 %v8154_v4, %s5442_s9  ;;  %4162 = vrot.lane.b32.xlu0 %v9825_v13, %s5443_s10 }
 0x621   : > { %v3906_v38 = vpop.permute.xlu0 %3905  ;;  %v3902_v60 = vpop.permute.xlu1 %3901 }
 0x622   : > { %4055 = vrot.lane.b32.xlu2 %v8104_v39, %s5442_s9  ;;  %3980 = vst.msk [vmem:[#allocation3 + $0x58] sm:$0xf] %vm3957_vm10, %v3906_v38  ;;  %v9884_v38 = vld [vmem:[#allocation46_spill] sm:$0xff] }
 0x623   : > { %3978 = vst.msk [vmem:[#allocation3 + $0x50] sm:$0xf] %vm3957_vm10, %v3902_v60  ;;  %v9885_v60 = vld [vmem:[#allocation27_spill] sm:$0xff] }
 0x624   : > { %v3916_v41 = vpop.permute.xlu2 %3915 }
 0x625   : > { %3985 = vst.msk [vmem:[#allocation3 + $0x6c] sm:$0xf] %vm3957_vm10, %v3916_v41  ;;  %v9886_v41 = vld [vmem:[#allocation25_spill] sm:$0xff] }
 0x627   : > { %4164 = vrot.lane.b32.xlu1 %v9821_v47, %s5443_s10  ;;  %4168 = vrot.lane.b32.xlu0 %v9828_v62, %s5443_s10  ;;  %v9881_v47 = vld [vmem:[#allocation4_spill] sm:$0xff] }
 0x629   : > { %v3912_v13 = vpop.permute.xlu0 %3911  ;;  %v3908_v16 = vpop.permute.xlu1 %3907 }
 0x62a   : > { %4061 = vrot.lane.b32.xlu2 %v8655_v36, %s5442_s9  ;;  %3983 = vst.msk [vmem:[#allocation3 + $0x64] sm:$0xf] %vm3957_vm10, %v3912_v13 }
 0x62b   : > { %3981 = vst.msk [vmem:[#allocation3 + $0x5c] sm:$0xf] %vm3957_vm10, %v3908_v16 }
 0x62c   : > { %v3922_v27 = vpop.permute.xlu2 %3921 }
 0x62d   : > { %3988 = vst.msk [vmem:[#allocation3 + $0x78] sm:$0xf] %vm3957_vm10, %v3922_v27  ;;  %v9887_v27 = vld [vmem:[#allocation62_spill] sm:$0xff] }
 0x62f   : > { %4170 = vrot.lane.b32.xlu1 %v9879_v11, %s5443_s10  ;;  %4174 = vrot.lane.b32.xlu0 %v9880_v32, %s5443_s10  ;;  %v9888_v11 = vld [vmem:[#allocation74_spill] sm:$0xff]  ;;  %v9889_v32 = vld [vmem:[#allocation45_spill] sm:$0xff] }
 0x631   : > { %v3918_v55 = vpop.permute.xlu0 %3917  ;;  %v3914_v0 = vpop.permute.xlu1 %3913 }
 0x632   : > { %4166 = vrot.lane.b32.xlu2 %v9881_v47, %s5443_s10  ;;  %3986 = vst.msk [vmem:[#allocation3 + $0x70] sm:$0xf] %vm3957_vm10, %v3918_v55 }
 0x633   : > { %3984 = vst.msk [vmem:[#allocation3 + $0x68] sm:$0xf] %vm3957_vm10, %v3914_v0  ;;  %v4111_v0 = vld [vmem:[#allocation3 + $0x1c] sm:$0xf] }
 0x634   : > { %v4002_v52 = vpop.permute.xlu2 %4001 }
 0x635   : > { %v4100_v10 = vsel %vm8674_vm12, %v4002_v52, %v4099_v33 }
 0x636   : > { %4101 = vst [vmem:[#allocation3 + $0x4] sm:$0xf] %v4100_v10  ;;  %v9890_v10 = vld [vmem:[#allocation81_spill] sm:$0xff] }
 0x637   : > { %4176 = vrot.lane.b32.xlu1 %v9884_v38, %s5443_s10  ;;  %4180 = vrot.lane.b32.xlu0 %v9885_v60, %s5443_s10  ;;  %v9891_v38 = vld [vmem:[#allocation90_spill] sm:$0xff]  ;;  %v9892_v60 = vld [vmem:[#allocation69_spill] sm:$0xff] }
 0x639   : > { %v3924_v6 = vpop.permute.xlu0 %3923  ;;  %v3920_v13 = vpop.permute.xlu1 %3919 }
 0x63a   : > { %4172 = vrot.lane.b32.xlu2 %v9886_v41, %s5443_s10  ;;  %3989 = vst.msk [vmem:[#allocation3 + $0x7c] sm:$0xf] %vm3957_vm10, %v3924_v6  ;;  %v4107_v6 = vld [vmem:[#allocation3 + $0x14] sm:$0xf] }
 0x63b   : > { %3987 = vst.msk [vmem:[#allocation3 + $0x74] sm:$0xf] %vm3957_vm10, %v3920_v13 }
 0x63c   : > { %v4008_v16 = vpop.permute.xlu2 %4007 }
 0x63d   : > { %4106 = vst.msk [vmem:[#allocation3 + $0x10] sm:$0xf] %vm4095_vm11, %v4008_v16  ;;  %v4103_v16 = vld [vmem:[#allocation3 + $0xc] sm:$0xf] }
 0x63f   : > { %4182 = vrot.lane.b32.xlu1 %v9887_v27, %s5443_s10  ;;  %4186 = vrot.lane.b32.xlu0 %v9888_v11, %s5443_s10 }
 0x641   : > { %v4004_v47 = vpop.permute.xlu0 %4003  ;;  %v4000_v55 = vpop.permute.xlu1 %3999 }
 0x642   : > { %4178 = vrot.lane.b32.xlu2 %v9889_v32, %s5443_s10  ;;  %4102 = vst.msk [vmem:[#allocation3 + $0x8] sm:$0xf] %vm4095_vm11, %v4004_v47  ;;  %v9893_v47 = vld [vmem:[#allocation20_spill] sm:$0xff] }
 0x643   : > { %4096 = vst.msk [vmem:[#allocation3] sm:$0xf] %vm4095_vm11, %v4000_v55  ;;  %v9894_v55 = vld [vmem:[#allocation85_spill] sm:$0xff] }
 0x644   : > { %v4014_v33 = vpop.permute.xlu2 %4013 }
 0x645   : > { %v4112_v52 = vsel %vm8674_vm12, %v4014_v33, %v4111_v0 }
 0x646   : > { %4113 = vst [vmem:[#allocation3 + $0x1c] sm:$0xf] %v4112_v52  ;;  %v4123_v52 = vld [vmem:[#allocation3 + $0x34] sm:$0xf] }
 0x647   : > { %4188 = vrot.lane.b32.xlu1 %v9890_v10, %s5443_s10  ;;  %4192 = vrot.lane.b32.xlu0 %v9891_v38, %s5443_s10 }
 0x649   : > { %v4010_v41 = vpop.permute.xlu0 %4009  ;;  %v4006_v13 = vpop.permute.xlu1 %4005 }
 0x64a   : > { %4184 = vrot.lane.b32.xlu2 %v9892_v60, %s5443_s10  ;;  %v4108_v27 = vsel %vm8674_vm12, %v4010_v41, %v4107_v6  ;;  %v4104_v11 = vsel %vm8674_vm12, %v4006_v13, %v4103_v16  ;;  %v9895_v60 = vld [vmem:[#allocation34_spill] sm:$0xff]  ;;  %v4119_v6 = vld [vmem:[#allocation3 + $0x2c] sm:$0xf]  ;;  %v4115_v16 = vld [vmem:[#allocation3 + $0x24] sm:$0xf] }
 0x64b   : > { %4109 = vst [vmem:[#allocation3 + $0x14] sm:$0xf] %v4108_v27 }
 0x64c   : > { %v4020_v32 = vpop.permute.xlu2 %4019  ;;  %4105 = vst [vmem:[#allocation3 + $0xc] sm:$0xf] %v4104_v11 }
 0x64d   : > { %4118 = vst.msk [vmem:[#allocation3 + $0x28] sm:$0xf] %vm4095_vm11, %v4020_v32 }
 0x64f   : > { %4194 = vrot.lane.b32.xlu1 %v9893_v47, %s5443_s10  ;;  %4349 = vrot.lane.b32.xlu0 %v9873_v43, %s5444_s11  ;;  %v9896_v43 = vld [vmem:[#allocation35_spill] sm:$0xff] }
 0x651   : > { %v4016_v0 = vpop.permute.xlu0 %4015  ;;  %v4012_v33 = vpop.permute.xlu1 %4011 }
 0x652   : > { %4190 = vrot.lane.b32.xlu2 %v9894_v55, %s5443_s10  ;;  %4114 = vst.msk [vmem:[#allocation3 + $0x20] sm:$0xf] %vm4095_vm11, %v4016_v0  ;;  %v4135_v0 = vld [vmem:[#allocation3 + $0x4c] sm:$0xf] }
 0x653   : > { %4110 = vst.msk [vmem:[#allocation3 + $0x18] sm:$0xf] %vm4095_vm11, %v4012_v33 }
 0x654   : > { %v4026_v10 = vpop.permute.xlu2 %4025 }
 0x655   : > { %v4124_v38 = vsel %vm8674_vm12, %v4026_v10, %v4123_v52  ;;  %v4131_v52 = vld [vmem:[#allocation3 + $0x44] sm:$0xf] }
 0x656   : > { %4125 = vst [vmem:[#allocation3 + $0x34] sm:$0xf] %v4124_v38 }
 0x657   : > { %4198 = vrot.lane.b32.xlu1 %v9895_v60, %s5443_s10  ;;  %4347 = vrot.lane.b32.xlu0 %v9876_v35, %s5444_s11 }
 0x659   : > { %v4022_v41 = vpop.permute.xlu0 %4021  ;;  %v4018_v13 = vpop.permute.xlu1 %4017 }
 0x65a   : > { %4196 = vrot.lane.b32.xlu2 %v9896_v43, %s5443_s10  ;;  %v4120_v27 = vsel %vm8674_vm12, %v4022_v41, %v4119_v6  ;;  %v4116_v11 = vsel %vm8674_vm12, %v4018_v13, %v4115_v16  ;;  %v4147_v43 = vld [vmem:[#allocation3 + $0x64] sm:$0xf]  ;;  %v4139_v13 = vld [vmem:[#allocation3 + $0x54] sm:$0xf] }
 0x65b   : > { %4121 = vst [vmem:[#allocation3 + $0x2c] sm:$0xf] %v4120_v27  ;;  %v4143_v27 = vld [vmem:[#allocation3 + $0x5c] sm:$0xf] }
 0x65c   : > { %v4032_v32 = vpop.permute.xlu2 %4031  ;;  %4117 = vst [vmem:[#allocation3 + $0x24] sm:$0xf] %v4116_v11 }
 0x65d   : > { %4130 = vst.msk [vmem:[#allocation3 + $0x40] sm:$0xf] %vm4095_vm11, %v4032_v32 }
 0x65f   : > { %4470 = vrot.lane.b32.xlu1 %v8249_v48, %s5445_s13  ;;  %4315 = vrot.lane.b32.xlu0 %v9857_v56, %s5444_s11  ;;  %v4127_v56 = vld [vmem:[#allocation3 + $0x3c] sm:$0xf] }
 0x661   : > { %v4028_v35 = vpop.permute.xlu0 %4027  ;;  %v4024_v47 = vpop.permute.xlu1 %4023 }
 0x662   : > { %4317 = vrot.lane.b32.xlu2 %v9861_v30, %s5444_s11  ;;  %4126 = vst.msk [vmem:[#allocation3 + $0x38] sm:$0xf] %vm4095_vm11, %v4028_v35 }
 0x663   : > { %4122 = vst.msk [vmem:[#allocation3 + $0x30] sm:$0xf] %vm4095_vm11, %v4024_v47  ;;  %v4159_v47 = vld [vmem:[#allocation3 + $0x7c] sm:$0xf] }
 0x664   : > { %v4038_v55 = vpop.permute.xlu2 %4037 }
 0x665   : > { %v4136_v33 = vsel %vm8674_vm12, %v4038_v55, %v4135_v0 }
 0x666   : > { %4137 = vst [vmem:[#allocation3 + $0x4c] sm:$0xf] %v4136_v33 }
 0x667   : > { %4438 = vrot.lane.b32.xlu1 %v8162_v63, %s5445_s13  ;;  %4436 = vrot.lane.b32.xlu0 %v7593_v14, %s5445_s13 }
 0x669   : > { %v4030_v48 = vpop.permute.xlu1 %4029  ;;  %v4034_v30 = vpop.permute.xlu0 %4033 }
 0x66a   : > { %4468 = vrot.lane.b32.xlu2 %v7718_v12, %s5445_s13  ;;  %v4128_v10 = vsel %vm8674_vm12, %v4030_v48, %v4127_v56  ;;  %v4132_v38 = vsel %vm8674_vm12, %v4034_v30, %v4131_v52  ;;  %v9897_v12 = vld [vmem:[#allocation53_spill] sm:$0xff]  ;;  %v4155_v30 = vld [vmem:[#allocation3 + $0x74] sm:$0xf] }
 0x66b   : > { %4129 = vst [vmem:[#allocation3 + $0x3c] sm:$0xf] %v4128_v10  ;;  %v4151_v48 = vld [vmem:[#allocation3 + $0x6c] sm:$0xf]  ;;  %v4259_v10 = vld [vmem:[#allocation3 + $0x8] sm:$0xf] }
 0x66c   : > { %v4044_v60 = vpop.permute.xlu2 %4043  ;;  %4133 = vst [vmem:[#allocation3 + $0x44] sm:$0xf] %v4132_v38 }
 0x66d   : > { %4142 = vst.msk [vmem:[#allocation3 + $0x58] sm:$0xf] %vm4095_vm11, %v4044_v60 }
 0x66f   : > { %4353 = vrot.lane.b32.xlu1 %v9877_v28, %s5444_s11  ;;  %4351 = vrot.lane.b32.xlu0 %v7722_v26, %s5444_s11  ;;  %v9898_v26 = vld [vmem:[#allocation8_spill] sm:$0xff] }
 0x671   : > { %v4036_v14 = vpop.permute.xlu1 %4035  ;;  %v4040_v63 = vpop.permute.xlu0 %4039 }
 0x672   : > { %4200 = vrot.lane.b32.xlu2 %v9897_v12, %s5443_s10  ;;  %4134 = vst.msk [vmem:[#allocation3 + $0x48] sm:$0xf] %vm4095_vm11, %v4036_v14  ;;  %v9903_v12 = vld [vmem:[#allocation56_spill] sm:$0xff] }
 0x673   : > { %4138 = vst.msk [vmem:[#allocation3 + $0x50] sm:$0xf] %vm4095_vm11, %v4040_v63  ;;  %v4254_v63 = vld [vmem:[#allocation3] sm:$0xf] }
 0x674   : > { %v4050_v41 = vpop.permute.xlu2 %4049 }
 0x675   : > { %v4148_v6 = vsel %vm8674_vm12, %v4050_v41, %v4147_v43 }
 0x676   : > { %4149 = vst [vmem:[#allocation3 + $0x64] sm:$0xf] %v4148_v6 }
 0x677   : > { %4474 = vrot.lane.b32.xlu1 %v8244_v46, %s5445_s13  ;;  %4319 = vrot.lane.b32.xlu0 %v9856_v59, %s5444_s11 }
 0x679   : > { %v4042_v28 = vpop.permute.xlu1 %4041  ;;  %v4046_v16 = vpop.permute.xlu0 %4045 }
 0x67a   : > { %4321 = vrot.lane.b32.xlu2 %v9898_v26, %s5444_s11  ;;  %v4140_v11 = vsel %vm8674_vm12, %v4042_v28, %v4139_v13  ;;  %v4144_v32 = vsel %vm8674_vm12, %v4046_v16, %v4143_v27  ;;  %v4271_v26 = vld [vmem:[#allocation3 + $0x20] sm:$0xf]  ;;  %v4263_v16 = vld [vmem:[#allocation3 + $0x10] sm:$0xf] }
 0x67b   : > { %4141 = vst [vmem:[#allocation3 + $0x54] sm:$0xf] %v4140_v11  ;;  %v4267_v11 = vld [vmem:[#allocation3 + $0x18] sm:$0xf] }
 0x67c   : > { %v4056_v35 = vpop.permute.xlu2 %4055  ;;  %4145 = vst [vmem:[#allocation3 + $0x5c] sm:$0xf] %v4144_v32 }
 0x67d   : > { %4154 = vst.msk [vmem:[#allocation3 + $0x70] sm:$0xf] %vm4095_vm11, %v4056_v35 }
 0x67f   : > { %4442 = vrot.lane.b32.xlu1 %v8196_v23, %s5445_s13  ;;  %4440 = vrot.lane.b32.xlu0 %v7631_v24, %s5445_s13  ;;  %v9899_v24 = vld [vmem:[#allocation16_spill] sm:$0xff]  ;;  %v9900_v23 = vld [vmem:[#allocation63_spill] sm:$0xff] }
 0x681   : > { %v4048_v46 = vpop.permute.xlu1 %4047  ;;  %v4052_v59 = vpop.permute.xlu0 %4051 }
 0x682   : > { %4472 = vrot.lane.b32.xlu2 %v9810_v5, %s5445_s13  ;;  %4146 = vst.msk [vmem:[#allocation3 + $0x60] sm:$0xf] %vm4095_vm11, %v4048_v46 }
 0x683   : > { %4150 = vst.msk [vmem:[#allocation3 + $0x68] sm:$0xf] %vm4095_vm11, %v4052_v59 }
 0x684   : > { %v4062_v55 = vpop.permute.xlu2 %4061 }
 0x685   : > { %v4160_v0 = vsel %vm8674_vm12, %v4062_v55, %v4159_v47 }
 0x686   : > { %4161 = vst [vmem:[#allocation3 + $0x7c] sm:$0xf] %v4160_v0 }
 0x687   : > { %4357 = vrot.lane.b32.xlu1 %v7831_v42, %s5444_s11  ;;  %4325 = vrot.lane.b32.xlu0 %v9899_v24, %s5444_s11  ;;  %v4283_v24 = vld [vmem:[#allocation3 + $0x38] sm:$0xf] }
 0x689   : > { %v4054_v33 = vpop.permute.xlu1 %4053  ;;  %v4058_v56 = vpop.permute.xlu0 %4057 }
 0x68a   : > { %4204 = vrot.lane.b32.xlu2 %v9900_v23, %s5443_s10  ;;  %v4152_v52 = vsel %vm8674_vm12, %v4054_v33, %v4151_v48  ;;  %v4156_v42 = vsel %vm8674_vm12, %v4058_v56, %v4155_v30  ;;  %v4275_v56 = vld [vmem:[#allocation3 + $0x28] sm:$0xf] }
 0x68b   : > { %4153 = vst [vmem:[#allocation3 + $0x6c] sm:$0xf] %v4152_v52  ;;  %v4279_v52 = vld [vmem:[#allocation3 + $0x30] sm:$0xf] }
 0x68c   : > { %v4167_v38 = vpop.permute.xlu2 %4166  ;;  %4157 = vst [vmem:[#allocation3 + $0x74] sm:$0xf] %v4156_v42 }
 0x68d   : > { %v4260_v60 = vsel %vm8793_vm1, %v4167_v38, %v4259_v10 }
 0x68e   : > { %4261 = vst [vmem:[#allocation3 + $0x8] sm:$0xf] %v4260_v60  ;;  %v9908_v60 = vld [vmem:[#allocation24_spill] sm:$0xff] }
 0x68f   : > { %4355 = vrot.lane.b32.xlu1 %v7798_v18, %s5444_s11  ;;  %4476 = vrot.lane.b32.xlu0 %v9809_v29, %s5445_s13  ;;  %v9904_v18 = vld [vmem:[#allocation75_spill] sm:$0xff] }
 0x691   : > { %v4060_v14 = vpop.permute.xlu1 %4059  ;;  %v4163_v62 = vpop.permute.xlu0 %4162 }
 0x692   : > { %4202 = vrot.lane.b32.xlu2 %v9903_v12, %s5443_s10  ;;  %4158 = vst.msk [vmem:[#allocation3 + $0x78] sm:$0xf] %vm4095_vm11, %v4060_v14  ;;  %v4255_v43 = vsel %vm8793_vm1, %v4163_v62, %v4254_v63  ;;  %v5391_v63 = vld [vmem:[%s9221_s2] sm:$0xff] }
 0x693   : > { %4256 = vst [vmem:[#allocation3] sm:$0xf] %v4255_v43 }
 0x694   : > { %v4173_v41 = vpop.permute.xlu2 %4172 }
 0x695   : > { %4266 = vst.msk [vmem:[#allocation3 + $0x14] sm:$0xf] %vm4252_vm14, %v4173_v41  ;;  %v4287_v41 = vld [vmem:[#allocation3 + $0x40] sm:$0xf] }
 0x697   : > { %4323 = vrot.lane.b32.xlu1 %v9866_v9, %s5444_s11  ;;  %4208 = vrot.lane.b32.xlu0 %v9904_v18, %s5443_s10  ;;  %v9905_v9 = vld [vmem:[#allocation67_spill] sm:$0xff] }
 0x699   : > { %v4165_v29 = vpop.permute.xlu1 %4164  ;;  %v4169_v6 = vpop.permute.xlu0 %4168 }
 0x69a   : > { %4478 = vrot.lane.b32.xlu2 %v8283_v34, %s5445_s13  ;;  %4258 = vst.msk [vmem:[#allocation3 + $0x4] sm:$0xf] %vm4252_vm14, %v4165_v29 }
 0x69b   : > { %4262 = vst.msk [vmem:[#allocation3 + $0xc] sm:$0xf] %vm4252_vm14, %v4169_v6 }
 0x69c   : > { %v4179_v28 = vpop.permute.xlu2 %4178 }
 0x69d   : > { %v4272_v13 = vsel %vm8793_vm1, %v4179_v28, %v4271_v26  ;;  %v9910_v26 = vld [vmem:[#allocation47_spill] sm:$0xff]  ;;  %v4291_v28 = vld [vmem:[#allocation3 + $0x48] sm:$0xf] }
 0x69e   : > { %4273 = vst [vmem:[#allocation3 + $0x20] sm:$0xf] %v4272_v13 }
 0x69f   : > { %4444 = vrot.lane.b32.xlu1 %v7685_v40, %s5445_s13  ;;  %4206 = vrot.lane.b32.xlu0 %v9905_v9, %s5443_s10  ;;  %v4629_v40 = vld [vmem:[%s9221_s2 + $0x20] sm:$0xf] }
 0x6a0   : > { %v4727_v59 = vunpack.c.l.b16 %v4629_v40 }
 0x6a1   : > { %v4171_v34 = vpop.permute.xlu1 %4170  ;;  %v4175_v27 = vpop.permute.xlu0 %4174 }
 0x6a2   : > { %4446 = vrot.lane.b32.xlu2 %v8191_v61, %s5445_s13  ;;  %v4264_v32 = vsel %vm8793_vm1, %v4171_v34, %v4263_v16  ;;  %v4268_v35 = vsel %vm8793_vm1, %v4175_v27, %v4267_v11  ;;  %v9906_v61 = vld [vmem:[#allocation36_spill] sm:$0xff]  ;;  %v4732_v0 = vpack.c.b16 %v4727_v59, %v4727_v59 }
 0x6a3   : > { %4265 = vst [vmem:[#allocation3 + $0x10] sm:$0xf] %v4264_v32 }
 0x6a4   : > { %v4185_v46 = vpop.permute.xlu2 %4184  ;;  %4269 = vst [vmem:[#allocation3 + $0x18] sm:$0xf] %v4268_v35  ;;  %v4788_v48 = vsel %vm4786_vm8, %v4732_v0, 0 }
 0x6a5   : > { %4278 = vst.msk [vmem:[#allocation3 + $0x2c] sm:$0xf] %vm4252_vm14, %v4185_v46  ;;  %5398 = vmatpush.bf16.msra.mxu2 %v4788_v48  ;;  %4793 = vmatpush.bf16.msra.mxu1 %v4788_v48 }
 0x6a7   : > { %4329 = vrot.lane.b32.xlu1 %v9906_v61, %s5444_s11  ;;  %4482 = vrot.lane.b32.xlu0 %v8278_v19, %s5445_s13 }
 0x6a9   : > { %v4177_v47 = vpop.permute.xlu1 %4176  ;;  %v4181_v55 = vpop.permute.xlu0 %4180 }
 0x6aa   : > { %4361 = vrot.lane.b32.xlu2 %v7908_v51, %s5444_s11  ;;  %4270 = vst.msk [vmem:[#allocation3 + $0x1c] sm:$0xf] %vm4252_vm14, %v4177_v47  ;;  %v5394_v51 = vld [vmem:[%s9221_s2 + $0x18] sm:$0xff] }
 0x6ab   : > { %4274 = vst.msk [vmem:[#allocation3 + $0x24] sm:$0xf] %vm4252_vm14, %v4181_v55  ;;  %5399 = vmatpush.bf16.msra.mxu2 %v5394_v51  ;;  %4794 = vmatpush.bf16.msra.mxu1 %v5394_v51 }
 0x6ac   : > { %v4191_v23 = vpop.permute.xlu2 %4190 }
 0x6ad   : > { %v4284_v33 = vsel %vm8793_vm1, %v4191_v23, %v4283_v24 }
 0x6ae   : > { %4285 = vst [vmem:[#allocation3 + $0x38] sm:$0xf] %v4284_v33 }
 0x6af   : > { %4480 = vrot.lane.b32.xlu1 %v7948_v53, %s5445_s13  ;;  %4450 = vrot.lane.b32.xlu0 %v8186_v50, %s5445_s13  ;;  %v5393_v53 = vld [vmem:[%s9221_s2 + $0x10] sm:$0xff] }
 0x6b0   : > { %5400 = vmatpush.bf16.msra.mxu2 %v5393_v53  ;;  %4795 = vmatpush.bf16.msra.mxu1 %v5393_v53  ;;  %v9907_v50 = vld [vmem:[#allocation86_spill] sm:$0xff] }
 0x6b1   : > { %v4183_v19 = vpop.permute.xlu1 %4182  ;;  %v4187_v30 = vpop.permute.xlu0 %4186 }
 0x6b2   : > { %4359 = vrot.lane.b32.xlu2 %v7874_v7, %s5444_s11  ;;  %v4276_v42 = vsel %vm8793_vm1, %v4183_v19, %v4275_v56  ;;  %v4280_v10 = vsel %vm8793_vm1, %v4187_v30, %v4279_v52  ;;  %v5392_v7 = vld [vmem:[%s9221_s2 + $0x8] sm:$0xff]  ;;  %v4295_v56 = vld [vmem:[#allocation3 + $0x50] sm:$0xf] }
 0x6b3   : > { %4277 = vst [vmem:[#allocation3 + $0x28] sm:$0xf] %v4276_v42 }
 0x6b4   : > { %v4197_v38 = vpop.permute.xlu2 %4196  ;;  %4281 = vst [vmem:[#allocation3 + $0x30] sm:$0xf] %v4280_v10  ;;  %5401 = vmatpush.bf16.msra.mxu2 %v5392_v7  ;;  %4796 = vmatpush.bf16.msra.mxu1 %v5392_v7 }
 0x6b5   : > { %4290 = vst.msk [vmem:[#allocation3 + $0x44] sm:$0xf] %vm4252_vm14, %v4197_v38 }
 0x6b7   : > { %4212 = vrot.lane.b32.xlu1 %v9907_v50, %s5443_s10  ;;  %4365 = vrot.lane.b32.xlu0 %v7986_v15, %s5444_s11  ;;  %v9909_v15 = vld [vmem:[#allocation79_spill] sm:$0xff] }
 0x6b8   : > { %5402 = vmatpush.bf16.msra.mxu2 %v5391_v63  ;;  %4797 = vmatpush.bf16.msra.mxu1 %v5391_v63 }
 0x6b9   : > { %v4189_v12 = vpop.permute.xlu1 %4188  ;;  %v4193_v14 = vpop.permute.xlu0 %4192 }
 0x6ba   : > { %4327 = vrot.lane.b32.xlu2 %v9908_v60, %s5444_s11  ;;  %4282 = vst.msk [vmem:[#allocation3 + $0x34] sm:$0xf] %vm4252_vm14, %v4189_v12 }
 0x6bb   : > { %4286 = vst.msk [vmem:[#allocation3 + $0x3c] sm:$0xf] %vm4252_vm14, %v4193_v14 }
 0x6bc   : > { %v4318_v62 = vpop.permute.xlu2 %4317 }
 0x6bd   : > { %4407 = vst.msk [vmem:[#allocation3 + $0x4] sm:$0xf] %vm4405_vm2, %v4318_v62 }
 0x6bf   : > { %4210 = vrot.lane.b32.xlu1 %v9909_v15, %s5443_s10  ;;  %4363 = vrot.lane.b32.xlu0 %v7952_v8, %s5444_s11  ;;  %v9911_v8 = vld [vmem:[#allocation52_spill] sm:$0xff] }
 0x6c1   : > { %v4195_v43 = vpop.permute.xlu1 %4194  ;;  %v4350_v18 = vpop.permute.xlu0 %4349 }
 0x6c2   : > { %4448 = vrot.lane.b32.xlu2 %v7763_v58, %s5445_s13  ;;  %v4288_v29 = vsel %vm8793_vm1, %v4195_v43, %v4287_v41  ;;  %4423 = vst.msk [vmem:[#allocation3 + $0x44] sm:$0xf] %vm4405_vm2, %v4350_v18 }
 0x6c3   : > { %4289 = vst [vmem:[#allocation3 + $0x40] sm:$0xf] %v4288_v29 }
 0x6c4   : > { %v4469_v6 = vpop.permute.xlu2 %4468  ;;  %v4530_v46 = vld [vmem:[#allocation3 + $0x4] sm:$0xf] }
 0x6c7   : > { %4486 = vrot.lane.b32.xlu1 %v8273_v54, %s5445_s13  ;;  %4331 = vrot.lane.b32.xlu0 %v9910_v26, %s5444_s11  ;;  %v9924_v26 = vld [vmem:[#allocation87_spill] sm:$0xff] }
 0x6c9   : > { %v4199_v58 = vpop.permute.xlu1 %4198  ;;  %v4348_v13 = vpop.permute.xlu0 %4347  ;;  %v4562_v27 = vld [vmem:[#allocation3 + $0x44] sm:$0xf] }
 0x6ca   : > { %4333 = vrot.lane.b32.xlu2 %v9911_v8, %s5444_s11  ;;  %v4292_v9 = vsel %vm8793_vm1, %v4199_v58, %v4291_v28  ;;  %4422 = vst.msk [vmem:[#allocation3 + $0x40] sm:$0xf] %vm4405_vm2, %v4348_v13  ;;  %v4299_v28 = vld [vmem:[#allocation3 + $0x58] sm:$0xf] }
 0x6cb   : > { %4293 = vst [vmem:[#allocation3 + $0x48] sm:$0xf] %v4292_v9 }
 0x6cc   : > { %v4201_v34 = vpop.permute.xlu2 %4200  ;;  %4561 = vst.msk [vmem:[#allocation3 + $0x40] sm:$0xf] %vm4526_vm3, %v4469_v6 }
 0x6cd   : > { %4294 = vst.msk [vmem:[#allocation3 + $0x4c] sm:$0xf] %vm4252_vm14, %v4201_v34  ;;  %v9926_v34 = vld [vmem:[#allocation22_spill] sm:$0xff] }
 0x6cf   : > { %4454 = vrot.lane.b32.xlu1 %v8225_v25, %s5445_s13  ;;  %4452 = vrot.lane.b32.xlu0 %v7837_v31, %s5445_s13  ;;  %v9914_v31 = vld [vmem:[#allocation64_spill] sm:$0xff] }
 0x6d1   : > { %v4471_v16 = vpop.permute.xlu1 %4470  ;;  %v4316_v11 = vpop.permute.xlu0 %4315 }
 0x6d2   : > { %4484 = vrot.lane.b32.xlu2 %v8030_v1, %s5445_s13  ;;  %v4563_v32 = vsel %vm8905_vm4, %v4471_v16, %v4562_v27  ;;  %4406 = vst.msk [vmem:[#allocation3] sm:$0xf] %vm4405_vm2, %v4316_v11  ;;  %v9915_v1 = vld [vmem:[#allocation92_spill] sm:$0xff] }
 0x6d3   : > { %4564 = vst [vmem:[#allocation3 + $0x44] sm:$0xf] %v4563_v32 }
 0x6d4   : > { %v4322_v25 = vpop.permute.xlu2 %4321 }
 0x6d5   : > { %4409 = vst.msk [vmem:[#allocation3 + $0xc] sm:$0xf] %vm4405_vm2, %v4322_v25 }
 0x6d7   : > { %4369 = vrot.lane.b32.xlu1 %v8068_v22, %s5444_s11  ;;  %4337 = vrot.lane.b32.xlu0 %v9914_v31, %s5444_s11  ;;  %v9916_v22 = vld [vmem:[#allocation89_spill] sm:$0xff] }
 0x6d9   : > { %v4439_v35 = vpop.permute.xlu1 %4438  ;;  %v4437_v40 = vpop.permute.xlu0 %4436 }
 0x6da   : > { %4216 = vrot.lane.b32.xlu2 %v9915_v1, %s5443_s10  ;;  %v4531_v61 = vsel %vm8905_vm4, %v4439_v35, %v4530_v46  ;;  %4527 = vst.msk [vmem:[#allocation3] sm:$0xf] %vm4526_vm3, %v4437_v40  ;;  %v5383_v47 = vld [vmem:[#allocation3 + $0x40] sm:$0xff]  ;;  %v9927_v1 = vld [vmem:[#allocation38_spill] sm:$0xff] }
 0x6db   : > { %4532 = vst [vmem:[#allocation3 + $0x4] sm:$0xf] %v4531_v61  ;;  %5345 = vmatmul.msk.bf16.vlgmr.msra.gmra.mxu2 %vm4737_vm13, %v5383_v47  ;;  %v9929_v35 = vld [vmem:[#allocation14_spill] sm:$0xff] }
 0x6dc   : > { %v4473_v59 = vpop.permute.xlu2 %4472  ;;  %v4534_v10 = vld [vmem:[#allocation3 + $0xc] sm:$0xf] }
 0x6df   : > { %4367 = vrot.lane.b32.xlu1 %v8032_v2, %s5444_s11  ;;  %4488 = vrot.lane.b32.xlu0 %v8104_v39, %s5445_s13  ;;  %v9917_v2 = vld [vmem:[#allocation51_spill] sm:$0xff]  ;;  %v9918_v39 = vld [vmem:[#allocation50_spill] sm:$0xff] }
 0x6e1   : > { %v4354_v55 = vpop.permute.xlu1 %4353  ;;  %v4352_v0 = vpop.permute.xlu0 %4351 }
 0x6e2   : > { %4214 = vrot.lane.b32.xlu2 %v9916_v22, %s5443_s10  ;;  %4425 = vst.msk [vmem:[#allocation3 + $0x4c] sm:$0xf] %vm4405_vm2, %v4354_v55  ;;  %v5375_v23 = vld [vmem:[#allocation3] sm:$0xff]  ;;  %v9930_v22 = vld [vmem:[#allocation10_spill] sm:$0xff]  ;;  %v9931_v55 = vld [vmem:[#allocation33_spill] sm:$0xff] }
 0x6e3   : > { %4424 = vst.msk [vmem:[#allocation3 + $0x48] sm:$0xf] %vm4405_vm2, %v4352_v0  ;;  %5337 = vmatmul.msk.bf16.vlgmr.msra.gmra.mxu1 %vm4737_vm13, %v5375_v23  ;;  %v9932_v0 = vld [vmem:[#allocation55_spill] sm:$0xff] }
 0x6e4   : > { %v4205_v24 = vpop.permute.xlu2 %4204  ;;  %4565 = vst.msk [vmem:[#allocation3 + $0x48] sm:$0xf] %vm4526_vm3, %v4473_v59 }
 0x6e5   : > { %4298 = vst.msk [vmem:[#allocation3 + $0x54] sm:$0xf] %vm4252_vm14, %v4205_v24 }
 0x6e7   : > { %4335 = vrot.lane.b32.xlu1 %v9917_v2, %s5444_s11  ;;  %4220 = vrot.lane.b32.xlu0 %v9918_v39, %s5443_s10 }
 0x6e9   : > { %v4475_v33 = vpop.permute.xlu1 %4474  ;;  %v4566_v48 = vld [vmem:[#allocation3 + $0x4c] sm:$0xf]  ;;  %v4320_v51 = vpop.permute.xlu0 %4319 }
 0x6ea   : > { %4490 = vrot.lane.b32.xlu2 %v8305_v49, %s5445_s13  ;;  %v4567_v19 = vsel %vm8905_vm4, %v4475_v33, %v4566_v48  ;;  %4408 = vst.msk [vmem:[#allocation3 + $0x8] sm:$0xf] %vm4405_vm2, %v4320_v51  ;;  %v9919_v49 = vld [vmem:[#allocation61_spill] sm:$0xff]  ;;  %v9933_v48 = vld [vmem:[#allocation39_spill] sm:$0xff]  ;;  %v9934_v51 = vld [vmem:[#allocation54_spill] sm:$0xff] }
 0x6eb   : > { %4568 = vst [vmem:[#allocation3 + $0x4c] sm:$0xf] %v4567_v19  ;;  %v9935_v19 = vld [vmem:[#allocation23_spill] sm:$0xff] }
 0x6ec   : > { %v4203_v30 = vpop.permute.xlu2 %4202 }
 0x6ed   : > { %v4296_v52 = vsel %vm8793_vm1, %v4203_v30, %v4295_v56  ;;  %v4303_v30 = vld [vmem:[#allocation3 + $0x60] sm:$0xf] }
 0x6ee   : > { %4297 = vst [vmem:[#allocation3 + $0x50] sm:$0xf] %v4296_v52 }
 0x6ef   : > { %4456 = vrot.lane.b32.xlu1 %v7914_v57, %s5445_s13  ;;  %4218 = vrot.lane.b32.xlu0 %v9919_v49, %s5443_s10  ;;  %v9920_v57 = vld [vmem:[#allocation76_spill] sm:$0xff] }
 0x6f1   : > { %v4443_v42 = vpop.permute.xlu1 %4442  ;;  %v4441_v38 = vpop.permute.xlu0 %4440 }
 0x6f2   : > { %4458 = vrot.lane.b32.xlu2 %v8220_v20, %s5445_s13  ;;  %v4535_v53 = vsel %vm8905_vm4, %v4443_v42, %v4534_v10  ;;  %4533 = vst.msk [vmem:[#allocation3 + $0x8] sm:$0xf] %vm4526_vm3, %v4441_v38  ;;  %v5384_v50 = vld [vmem:[#allocation3 + $0x48] sm:$0xff]  ;;  %v9936_v10 = vld [vmem:[#allocation60_spill] sm:$0xff] }
 0x6f3   : > { %4536 = vst [vmem:[#allocation3 + $0xc] sm:$0xf] %v4535_v53  ;;  %5346 = vmatmul.msk.bf16.gmra.mxu2 %vm4737_vm13, %v5384_v50  ;;  %v9937_v38 = vld [vmem:[#allocation73_spill] sm:$0xff] }
 0x6f4   : > { %v4479_v7 = vpop.permute.xlu2 %4478  ;;  %v9938_v53 = vld [vmem:[#allocation49_spill] sm:$0xff] }
 0x6f7   : > { %4341 = vrot.lane.b32.xlu1 %v9920_v57, %s5444_s11  ;;  %4494 = vrot.lane.b32.xlu0 %v8655_v36, %s5445_s13 }
 0x6f9   : > { %v4358_v20 = vpop.permute.xlu1 %4357  ;;  %v4326_v60 = vpop.permute.xlu0 %4325 }
 0x6fa   : > { %4373 = vrot.lane.b32.xlu2 %v8133_v44, %s5444_s11  ;;  %4427 = vst.msk [vmem:[#allocation3 + $0x54] sm:$0xf] %vm4405_vm2, %v4358_v20  ;;  %v5376_v14 = vld [vmem:[#allocation3 + $0x8] sm:$0xff] }
 0x6fb   : > { %4411 = vst.msk [vmem:[#allocation3 + $0x14] sm:$0xf] %vm4405_vm2, %v4326_v60  ;;  %5338 = vmatmul.msk.bf16.gmra.mxu1 %vm4737_vm13, %v5376_v14  ;;  %v4307_v60 = vld [vmem:[#allocation3 + $0x68] sm:$0xf] }
 0x6fc   : > { %v4447_v12 = vpop.permute.xlu2 %4446 }
 0x6ff   : > { %4492 = vrot.lane.b32.xlu1 %v8154_v4, %s5445_s13  ;;  %4462 = vrot.lane.b32.xlu0 %v8215_v21, %s5445_s13  ;;  %v9922_v21 = vld [vmem:[#allocation68_spill] sm:$0xff] }
 0x701   : > { %v4570_v44 = vld [vmem:[#allocation3 + $0x54] sm:$0xf]  ;;  %v4356_v36 = vpop.permute.xlu1 %4355  ;;  %v4477_v62 = vpop.permute.xlu0 %4476 }
 0x702   : > { %4371 = vrot.lane.b32.xlu2 %v8109_v3, %s5444_s11  ;;  %v4571_v63 = vsel %vm8905_vm4, %v4479_v7, %v4570_v44  ;;  %v4538_v15 = vld [vmem:[#allocation3 + $0x14] sm:$0xf]  ;;  %4426 = vst.msk [vmem:[#allocation3 + $0x50] sm:$0xf] %vm4405_vm2, %v4356_v36  ;;  %v9921_v3 = vld [vmem:[#allocation80_spill] sm:$0xff]  ;;  %v9940_v36 = vld [vmem:[#allocation15_spill] sm:$0xff] }
 0x703   : > { %4572 = vst [vmem:[#allocation3 + $0x54] sm:$0xf] %v4571_v63  ;;  %v4539_v4 = vsel %vm8905_vm4, %v4447_v12, %v4538_v15  ;;  %v9939_v44 = vld [vmem:[#allocation78_spill] sm:$0xff] }
 0x704   : > { %v4362_v43 = vpop.permute.xlu2 %4361  ;;  %4540 = vst [vmem:[#allocation3 + $0x14] sm:$0xf] %v4539_v4 }
 0x705   : > { %4569 = vst.msk [vmem:[#allocation3 + $0x50] sm:$0xf] %vm4526_vm3, %v4477_v62  ;;  %v9941_v62 = vld [vmem:[#allocation66_spill] sm:$0xff] }
 0x707   : > { %4460 = vrot.lane.b32.xlu1 %v7994_v45, %s5445_s13  ;;  %4343 = vrot.lane.b32.xlu0 %v9921_v3, %s5444_s11  ;;  %v9923_v45 = vld [vmem:[#allocation40_spill] sm:$0xff] }
 0x709   : > { %v4324_v41 = vpop.permute.xlu1 %4323  ;;  %v4209_v18 = vpop.permute.xlu0 %4208 }
 0x70a   : > { %4339 = vrot.lane.b32.xlu2 %v9922_v21, %s5444_s11  ;;  %4410 = vst.msk [vmem:[#allocation3 + $0x10] sm:$0xf] %vm4405_vm2, %v4324_v41  ;;  %v9942_v41 = vld [vmem:[#allocation17_spill] sm:$0xff] }
 0x70b   : > { %4302 = vst.msk [vmem:[#allocation3 + $0x5c] sm:$0xf] %vm4252_vm14, %v4209_v18  ;;  %v9943_v18 = vld [vmem:[#allocation31_spill] sm:$0xff] }
 0x70c   : > { %v4360_v29 = vpop.permute.xlu2 %4359  ;;  %4429 = vst.msk [vmem:[#allocation3 + $0x5c] sm:$0xf] %vm4405_vm2, %v4362_v43  ;;  %v5385_v6 = vld [vmem:[#allocation3 + $0x50] sm:$0xff] }
 0x70d   : > { %5347 = vmatmul.msk.bf16.gmra.mxu2 %vm4737_vm13, %v5385_v6 }
 0x70f   : > { %4466 = vrot.lane.b32.xlu1 %v8254_v37, %s5445_s13  ;;  %4943 = vrot.lane.b32.xlu0 %v9923_v45, %s5446_s25  ;;  %v9925_v37 = vld [vmem:[#allocation6_spill] sm:$0xff] }
 0x711   : > { %v4445_v8 = vpop.permute.xlu1 %4444  ;;  %v4207_v58 = vpop.permute.xlu0 %4206 }
 0x712   : > { %4345 = vrot.lane.b32.xlu2 %v9924_v26, %s5444_s11  ;;  %4537 = vst.msk [vmem:[#allocation3 + $0x10] sm:$0xf] %vm4526_vm3, %v4445_v8  ;;  %v4300_v13 = vsel %vm8793_vm1, %v4207_v58, %v4299_v28  ;;  %v9945_v58 = vld [vmem:[#allocation41_spill] sm:$0xff]  ;;  %v9946_v28 = vld [vmem:[#allocation59_spill] sm:$0xff] }
 0x713   : > { %4301 = vst [vmem:[#allocation3 + $0x58] sm:$0xf] %v4300_v13  ;;  %v4574_v11 = vld [vmem:[#allocation3 + $0x5c] sm:$0xf]  ;;  %v9947_v13 = vld [vmem:[#allocation32_spill] sm:$0xff] }
 0x714   : > { %v4328_v9 = vpop.permute.xlu2 %4327  ;;  %4428 = vst.msk [vmem:[#allocation3 + $0x58] sm:$0xf] %vm4405_vm2, %v4360_v29  ;;  %v9944_v29 = vld [vmem:[#allocation84_spill] sm:$0xff] }
 0x715   : > { %4412 = vst.msk [vmem:[#allocation3 + $0x18] sm:$0xf] %vm4405_vm2, %v4328_v9 }
 0x717   : > { %4945 = vrot.lane.b32.xlu1 %v9925_v37, %s5446_s25  ;;  %4949 = vrot.lane.b32.xlu0 %v9926_v34, %s5446_s25 }
 0x719   : > { %v4330_v16 = vpop.permute.xlu1 %4329  ;;  %v4483_v27 = vpop.permute.xlu0 %4482  ;;  %v5377_v32 = vld [vmem:[#allocation3 + $0x10] sm:$0xff] }
 0x71a   : > { %4464 = vrot.lane.b32.xlu2 %v8073_v17, %s5445_s13  ;;  %4413 = vst.msk [vmem:[#allocation3 + $0x1c] sm:$0xf] %vm4405_vm2, %v4330_v16  ;;  %v4575_v25 = vsel %vm8905_vm4, %v4483_v27, %v4574_v11  ;;  %5339 = vmatmul.msk.bf16.gmra.mxu1 %vm4737_vm13, %v5377_v32  ;;  %v9928_v17 = vld [vmem:[#allocation5_spill] sm:$0xff] }
 0x71b   : > { %4576 = vst [vmem:[#allocation3 + $0x5c] sm:$0xf] %v4575_v25  ;;  %v9948_v25 = vld [vmem:[#allocation65_spill] sm:$0xff] }
 0x71c   : > { %v4449_v31 = vpop.permute.xlu2 %4448 }
 0x71d   : > { %4541 = vst.msk [vmem:[#allocation3 + $0x18] sm:$0xf] %vm4526_vm3, %v4449_v31  ;;  %v9949_v31 = vld [vmem:[#allocation77_spill] sm:$0xff] }
 0x71f   : > { %4951 = vrot.lane.b32.xlu1 %v9927_v1, %s5446_s25  ;;  %4955 = vrot.lane.b32.xlu0 %v9928_v17, %s5446_s25  ;;  %v9950_v1 = vld [vmem:[#allocation48_spill] sm:$0xff] }
 0x721   : > { %v4481_v46 = vpop.permute.xlu1 %4480  ;;  %v4451_v40 = vpop.permute.xlu0 %4450  ;;  %v4542_v61 = vld [vmem:[#allocation3 + $0x1c] sm:$0xf] }
 0x722   : > { %4947 = vrot.lane.b32.xlu2 %v9929_v35, %s5446_s25  ;;  %4573 = vst.msk [vmem:[#allocation3 + $0x58] sm:$0xf] %vm4526_vm3, %v4481_v46  ;;  %v4543_v59 = vsel %vm8905_vm4, %v4451_v40, %v4542_v61  ;;  %v9951_v61 = vld [vmem:[#allocation83_spill] sm:$0xff] }
 0x723   : > { %4544 = vst [vmem:[#allocation3 + $0x1c] sm:$0xf] %v4543_v59  ;;  %v9952_v59 = vld [vmem:[#allocation91_spill] sm:$0xff] }
 0x724   : > { %v4334_v47 = vpop.permute.xlu2 %4333 }
 0x725   : > { %4415 = vst.msk [vmem:[#allocation3 + $0x24] sm:$0xf] %vm4405_vm2, %v4334_v47  ;;  %v9953_v47 = vld [vmem:[#allocation72_spill] sm:$0xff] }
 0x727   : > { %4957 = vrot.lane.b32.xlu1 %v9930_v22, %s5446_s25  ;;  %4961 = vrot.lane.b32.xlu0 %v9931_v55, %s5446_s25 }
 0x729   : > { %v4213_v24 = vpop.permute.xlu1 %4212  ;;  %v4366_v23 = vpop.permute.xlu0 %4365  ;;  %v5386_v2 = vld [vmem:[#allocation3 + $0x58] sm:$0xff] }
 0x72a   : > { %4953 = vrot.lane.b32.xlu2 %v9932_v0, %s5446_s25  ;;  %4306 = vst.msk [vmem:[#allocation3 + $0x64] sm:$0xf] %vm4252_vm14, %v4213_v24  ;;  %v5378_v33 = vld [vmem:[#allocation3 + $0x18] sm:$0xff]  ;;  %5348 = vmatmul.msk.bf16.gmra.mxu2 %vm4737_vm13, %v5386_v2  ;;  %v4311_v0 = vld [vmem:[#allocation3 + $0x70] sm:$0xf]  ;;  %v9954_v2 = vld [vmem:[#allocation93_spill] sm:$0xff] }
 0x72b   : > { %4431 = vst.msk [vmem:[#allocation3 + $0x64] sm:$0xf] %vm4405_vm2, %v4366_v23  ;;  %5340 = vmatmul.msk.bf16.gmra.mxu1 %vm4737_vm13, %v5378_v33  ;;  %v9955_v33 = vld [vmem:[#allocation88_spill] sm:$0xff] }
 0x72c   : > { %v4485_v39 = vpop.permute.xlu2 %4484  ;;  %v4546_v15 = vld [vmem:[#allocation3 + $0x24] sm:$0xf] }
 0x72f   : > { %4963 = vrot.lane.b32.xlu1 %v9933_v48, %s5446_s25  ;;  %4967 = vrot.lane.b32.xlu0 %v9934_v51, %s5446_s25 }
 0x731   : > { %v4211_v56 = vpop.permute.xlu1 %4210  ;;  %v4364_v52 = vpop.permute.xlu0 %4363 }
 0x732   : > { %4959 = vrot.lane.b32.xlu2 %v9935_v19, %s5446_s25  ;;  %v4304_v49 = vsel %vm8793_vm1, %v4211_v56, %v4303_v30  ;;  %v4578_v50 = vld [vmem:[#allocation3 + $0x64] sm:$0xf] }
 0x733   : > { %4305 = vst [vmem:[#allocation3 + $0x60] sm:$0xf] %v4304_v49 }
 0x734   : > { %v4217_v42 = vpop.permute.xlu2 %4216  ;;  %4430 = vst.msk [vmem:[#allocation3 + $0x60] sm:$0xf] %vm4405_vm2, %v4364_v52 }
 0x735   : > { %4577 = vst.msk [vmem:[#allocation3 + $0x60] sm:$0xf] %vm4526_vm3, %v4485_v39 }
 0x736   : > { %4310 = vst.msk [vmem:[#allocation3 + $0x6c] sm:$0xf] %vm4252_vm14, %v4217_v42 }
 0x737   : > { %4969 = vrot.lane.b32.xlu1 %v9936_v10, %s5446_s25  ;;  %4973 = vrot.lane.b32.xlu0 %v9937_v38, %s5446_s25 }
 0x739   : > { %v4487_v7 = vpop.permute.xlu1 %4486  ;;  %v4332_v57 = vpop.permute.xlu0 %4331 }
 0x73a   : > { %4965 = vrot.lane.b32.xlu2 %v9938_v53, %s5446_s25  ;;  %v4579_v20 = vsel %vm8905_vm4, %v4487_v7, %v4578_v50  ;;  %4414 = vst.msk [vmem:[#allocation3 + $0x20] sm:$0xf] %vm4405_vm2, %v4332_v57 }
 0x73b   : > { %4580 = vst [vmem:[#allocation3 + $0x64] sm:$0xf] %v4579_v20 }
 0x73c   : > { %v4215_v12 = vpop.permute.xlu2 %4214 }
 0x73d   : > { %v4308_v14 = vsel %vm8793_vm1, %v4215_v12, %v4307_v60 }
 0x73e   : > { %4309 = vst [vmem:[#allocation3 + $0x68] sm:$0xf] %v4308_v14 }
 0x73f   : > { %4975 = vrot.lane.b32.xlu1 %v9939_v44, %s5446_s25  ;;  %4979 = vrot.lane.b32.xlu0 %v9940_v36, %s5446_s25 }
 0x741   : > { %v4455_v63 = vpop.permute.xlu1 %4454  ;;  %v4453_v43 = vpop.permute.xlu0 %4452 }
 0x742   : > { %4971 = vrot.lane.b32.xlu2 %v9941_v62, %s5446_s25  ;;  %v4547_v4 = vsel %vm8905_vm4, %v4455_v63, %v4546_v15  ;;  %4545 = vst.msk [vmem:[#allocation3 + $0x20] sm:$0xf] %vm4526_vm3, %v4453_v43  ;;  %v5387_v21 = vld [vmem:[#allocation3 + $0x60] sm:$0xff] }
 0x743   : > { %4548 = vst [vmem:[#allocation3 + $0x24] sm:$0xf] %v4547_v4  ;;  %5349 = vmatmul.msk.bf16.gmra.mxu2 %vm4737_vm13, %v5387_v21 }
 0x744   : > { %v4491_v3 = vpop.permute.xlu2 %4490 }
 0x747   : > { %4981 = vrot.lane.b32.xlu1 %v9942_v41, %s5446_s25  ;;  %4985 = vrot.lane.b32.xlu0 %v9943_v18, %s5446_s25 }
 0x749   : > { %v4370_v6 = vpop.permute.xlu1 %4369  ;;  %v4338_v45 = vpop.permute.xlu0 %4337 }
 0x74a   : > { %4977 = vrot.lane.b32.xlu2 %v9944_v29, %s5446_s25  ;;  %4433 = vst.msk [vmem:[#allocation3 + $0x6c] sm:$0xf] %vm4405_vm2, %v4370_v6  ;;  %v5379_v8 = vld [vmem:[#allocation3 + $0x20] sm:$0xff] }
 0x74b   : > { %4417 = vst.msk [vmem:[#allocation3 + $0x2c] sm:$0xf] %vm4405_vm2, %v4338_v45  ;;  %5341 = vmatmul.msk.bf16.gmra.mxu1 %vm4737_vm13, %v5379_v8  ;;  %v5390_v8 = vld [vmem:[#allocation3 + $0x78] sm:$0xff] }
 0x74c   : > { %v4459_v26 = vpop.permute.xlu2 %4458 }
 0x74f   : > { %4987 = vrot.lane.b32.xlu1 %v9945_v58, %s5446_s25  ;;  %4991 = vrot.lane.b32.xlu0 %v9946_v28, %s5446_s25 }
 0x751   : > { %v4582_v9 = vld [vmem:[#allocation3 + $0x6c] sm:$0xf]  ;;  %v4368_v37 = vpop.permute.xlu1 %4367  ;;  %v4489_v34 = vpop.permute.xlu0 %4488 }
 0x752   : > { %4983 = vrot.lane.b32.xlu2 %v9947_v13, %s5446_s25  ;;  %v4583_v16 = vsel %vm8905_vm4, %v4491_v3, %v4582_v9  ;;  %v4550_v27 = vld [vmem:[#allocation3 + $0x2c] sm:$0xf]  ;;  %4432 = vst.msk [vmem:[#allocation3 + $0x68] sm:$0xf] %vm4405_vm2, %v4368_v37 }
 0x753   : > { %4584 = vst [vmem:[#allocation3 + $0x6c] sm:$0xf] %v4583_v16  ;;  %v4551_v32 = vsel %vm8905_vm4, %v4459_v26, %v4550_v27 }
 0x754   : > { %v4374_v11 = vpop.permute.xlu2 %4373  ;;  %4552 = vst [vmem:[#allocation3 + $0x2c] sm:$0xf] %v4551_v32 }
 0x755   : > { %4581 = vst.msk [vmem:[#allocation3 + $0x68] sm:$0xf] %vm4526_vm3, %v4489_v34 }
 0x757   : > { %4993 = vrot.lane.b32.xlu1 %v9948_v25, %s5446_s25  ;;  %4997 = vrot.lane.b32.xlu0 %v9949_v31, %s5446_s25 }
 0x759   : > { %v4336_v17 = vpop.permute.xlu1 %4335  ;;  %v4221_v35 = vpop.permute.xlu0 %4220 }
 0x75a   : > { %4989 = vrot.lane.b32.xlu2 %v9950_v1, %s5446_s25  ;;  %4416 = vst.msk [vmem:[#allocation3 + $0x28] sm:$0xf] %vm4405_vm2, %v4336_v17 }
 0x75b   : > { %4314 = vst.msk [vmem:[#allocation3 + $0x74] sm:$0xf] %vm4252_vm14, %v4221_v35 }
 0x75c   : > { %v4372_v46 = vpop.permute.xlu2 %4371  ;;  %4435 = vst.msk [vmem:[#allocation3 + $0x74] sm:$0xf] %vm4405_vm2, %v4374_v11  ;;  %v5388_v40 = vld [vmem:[#allocation3 + $0x68] sm:$0xff] }
 0x75d   : > { %5350 = vmatmul.msk.bf16.gmra.mxu2 %vm4737_vm13, %v5388_v40 }
 0x75e   : > { %v9116_v7 = vpop.f32.mrf.mxu2 }
 0x75f   : > { %4999 = vrot.lane.b32.xlu1 %v9951_v61, %s5446_s25  ;;  %5003 = vrot.lane.b32.xlu0 %v9952_v59, %s5446_s25 }
 0x760   : > { %v4799_v39 = vpop.f32.mrf.mxu1 }
 0x761   : > { %v4457_v22 = vpop.permute.xlu1 %4456  ;;  %v4219_v55 = vpop.permute.xlu0 %4218  ;;  %v4879_v36 = vmax.f32 %v4799_v39, 0.0 }
 0x762   : > { %4995 = vrot.lane.b32.xlu2 %v9953_v47, %s5446_s25  ;;  %4549 = vst.msk [vmem:[#allocation3 + $0x28] sm:$0xf] %vm4526_vm3, %v4457_v22  ;;  %v4312_v24 = vsel %vm8793_vm1, %v4219_v55, %v4311_v0 }
 0x763   : > { %4313 = vst [vmem:[#allocation3 + $0x70] sm:$0xf] %v4312_v24  ;;  %v4586_v19 = vld [vmem:[#allocation3 + $0x74] sm:$0xf] }
 0x764   : > { %v4340_v23 = vpop.permute.xlu2 %4339  ;;  %4434 = vst.msk [vmem:[#allocation3 + $0x70] sm:$0xf] %vm4405_vm2, %v4372_v46 }
 0x765   : > { %4418 = vst.msk [vmem:[#allocation3 + $0x30] sm:$0xf] %vm4405_vm2, %v4340_v23 }
 0x766   : > { %v4841_v4 = vpop.f32.mrf.mxu2 }
 0x767   : > { %5005 = vrot.lane.b32.xlu1 %v9954_v2, %s5446_s25  ;;  %v4896_v40 = vmax.f32 %v4841_v4, 0.0 }
 0x768   : > { %v4801_v10 = vpop.f32.mrf.mxu1 }
 0x769   : > { %v4342_v48 = vpop.permute.xlu1 %4341  ;;  %v4495_v51 = vpop.permute.xlu0 %4494  ;;  %v5380_v56 = vld [vmem:[#allocation3 + $0x28] sm:$0xff]  ;;  %v4880_v29 = vmax.f32 %v4801_v10, 0.0 }
 0x76a   : > { %5001 = vrot.lane.b32.xlu2 %v9955_v33, %s5446_s25  ;;  %4419 = vst.msk [vmem:[#allocation3 + $0x34] sm:$0xf] %vm4405_vm2, %v4342_v48  ;;  %v4587_v5 = vsel %vm8905_vm4, %v4495_v51, %v4586_v19  ;;  %5342 = vmatmul.msk.bf16.gmra.mxu1 %vm4737_vm13, %v5380_v56 }
 0x76b   : > { %4588 = vst [vmem:[#allocation3 + $0x74] sm:$0xf] %v4587_v5 }
 0x76c   : > { %v4346_v30 = vpop.permute.xlu2 %4345 }
 0x76d   : > { %4421 = vst.msk [vmem:[#allocation3 + $0x3c] sm:$0xf] %vm4405_vm2, %v4346_v30  ;;  %v4895_v30 = vmax.f32 %v9116_v7, 0.0 }
 0x771   : > { %v4493_v52 = vpop.permute.xlu1 %4492  ;;  %v4463_v49 = vpop.permute.xlu0 %4462  ;;  %v4554_v42 = vld [vmem:[#allocation3 + $0x34] sm:$0xf] }
 0x772   : > { %4585 = vst.msk [vmem:[#allocation3 + $0x70] sm:$0xf] %vm4526_vm3, %v4493_v52  ;;  %v4555_v38 = vsel %vm8905_vm4, %v4463_v49, %v4554_v42 }
 0x773   : > { %4556 = vst [vmem:[#allocation3 + $0x34] sm:$0xf] %v4555_v38 }
 0x774   : > { %v4465_v53 = vpop.permute.xlu2 %4464  ;;  %v4558_v63 = vld [vmem:[#allocation3 + $0x3c] sm:$0xf] }
 0x776   : > { %v4844_v58 = vpop.f32.mrf.mxu2 }
 0x777   : > { %v4897_v52 = vmax.f32 %v4844_v58, 0.0 }
 0x778   : > { %v4804_v12 = vpop.f32.mrf.mxu1 }
 0x779   : > { %v4461_v50 = vpop.permute.xlu1 %4460  ;;  %v4344_v57 = vpop.permute.xlu0 %4343  ;;  %v5389_v20 = vld [vmem:[#allocation3 + $0x70] sm:$0xff]  ;;  %v4881_v14 = vmax.f32 %v4804_v12, 0.0 }
 0x77a   : > { %4553 = vst.msk [vmem:[#allocation3 + $0x30] sm:$0xf] %vm4526_vm3, %v4461_v50  ;;  %5351 = vmatmul.msk.bf16.gmra.mxu2 %vm4737_vm13, %v5389_v20 }
 0x77b   : > { %4420 = vst.msk [vmem:[#allocation3 + $0x38] sm:$0xf] %vm4405_vm2, %v4344_v57 }
 0x77c   : > { %v4948_v60 = vpop.permute.xlu2 %4947  ;;  %4557 = vst.msk [vmem:[#allocation3 + $0x38] sm:$0xf] %vm4526_vm3, %v4465_v53 }
 0x77d   : > { %v5041_v44 = vadd.f32 %v4948_v60, %v4881_v14 }
 0x77e   : > { %v4846_v27 = vpop.f32.mrf.mxu2 }
 0x77f   : > { %5074 = vst.msk [vmem:[%s5483_s21 + $0x10] sm:$0xff] %vm5071_vm5, %v5041_v44  ;;  %v4898_v60 = vmax.f32 %v4846_v27, 0.0 }
 0x780   : > { %v4806_v18 = vpop.f32.mrf.mxu1 }
 0x781   : > { %v4467_v62 = vpop.permute.xlu1 %4466  ;;  %v4944_v15 = vpop.permute.xlu0 %4943  ;;  %v5381_v43 = vld [vmem:[#allocation3 + $0x30] sm:$0xff]  ;;  %v4882_v6 = vmax.f32 %v4806_v18, 0.0 }
 0x782   : > { %v4559_v3 = vsel %vm8905_vm4, %v4467_v62, %v4558_v63  ;;  %v5039_v21 = vadd.f32 %v4944_v15, %v4879_v36  ;;  %5343 = vmatmul.msk.bf16.gmra.mxu1 %vm4737_vm13, %v5381_v43 }
 0x783   : > { %4560 = vst [vmem:[#allocation3 + $0x3c] sm:$0xf] %v4559_v3 }
 0x784   : > { %v4954_v41 = vpop.permute.xlu2 %4953  ;;  %5072 = vst.msk [vmem:[%s5483_s21] sm:$0xff] %vm5071_vm5, %v5039_v21 }
 0x789   : > { %v4946_v45 = vpop.permute.xlu1 %4945  ;;  %v4950_v26 = vpop.permute.xlu0 %4949 }
 0x78a   : > { %v5040_v28 = vadd.f32 %v4946_v45, %v4880_v29  ;;  %v5042_v13 = vadd.f32 %v4950_v26, %v4882_v6  ;;  %5352 = vmatmul.msk.bf16.gmra.mxu2 %vm4737_vm13, %v5390_v8  ;;  %v5382_v37 = vld [vmem:[#allocation3 + $0x38] sm:$0xff] }
 0x78c   : > { %v9129_v54 = vpop.permute.xlu2 %4959  ;;  %5073 = vst.msk [vmem:[%s5483_s21 + $0x8] sm:$0xff] %vm5071_vm5, %v5040_v28 }
 0x78d   : > { %5075 = vst.msk [vmem:[%s5483_s21 + $0x18] sm:$0xff] %vm5071_vm5, %v5042_v13 }
 0x790   : > { %v4849_v35 = vpop.f32.mrf.mxu2 }
 0x791   : > { %v4952_v9 = vpop.permute.xlu1 %4951  ;;  %v4956_v34 = vpop.permute.xlu0 %4955  ;;  %v4899_v23 = vmax.f32 %v4849_v35, 0.0 }
 0x792   : > { %5344 = vmatmul.msk.bf16.gmra.mxu1 %vm4737_vm13, %v5382_v37 }
 0x794   : > { %v9136_v16 = vpop.permute.xlu2 %4965 }
 0x797   : > { %v4809_v11 = vpop.f32.mrf.mxu1 }
 0x798   : > { %v4883_v25 = vmax.f32 %v4809_v11, 0.0  ;;  %v4851_v24 = vpop.f32.mrf.mxu2 }
 0x799   : > { %v4958_v32 = vpop.permute.xlu1 %4957  ;;  %v9139_v31 = vpop.permute.xlu0 %4961  ;;  %v4900_v14 = vmax.f32 %v4851_v24, 0.0 }
 0x79a   : > { %v5043_v17 = vadd.f32 %v4952_v9, %v4883_v25 }
 0x79c   : > { %v9141_v1 = vpop.permute.xlu2 %4971  ;;  %5076 = vst.msk [vmem:[%s5483_s21 + $0x20] sm:$0xff] %vm5071_vm5, %v5043_v17 }
 0x79f   : > { %v4811_v46 = vpop.f32.mrf.mxu1 }
 0x7a0   : > { %v4884_v59 = vmax.f32 %v4811_v46, 0.0 }
 0x7a1   : > { %v9145_v61 = vpop.permute.xlu1 %4963  ;;  %v9147_v47 = vpop.permute.xlu0 %4967 }
 0x7a2   : > { %v5044_v55 = vadd.f32 %v4954_v41, %v4884_v59 }
 0x7a4   : > { %v4978_v22 = vpop.permute.xlu2 %4977  ;;  %5077 = vst.msk [vmem:[%s5483_s21 + $0x28] sm:$0xff] %vm5071_vm5, %v5044_v55 }
 0x7a5   : > { %v5056_v0 = vadd.f32 %v4978_v22, %v4896_v40 }
 0x7a7   : > { %5089 = vst.msk [vmem:[%s5483_s21 + $0x88] sm:$0xff] %vm5071_vm5, %v5056_v0 }
 0x7a8   : > { %v4814_v39 = vpop.f32.mrf.mxu1 }
 0x7a9   : > { %v9153_v2 = vpop.permute.xlu1 %4969  ;;  %v9155_v33 = vpop.permute.xlu0 %4973  ;;  %v4885_v51 = vmax.f32 %v4814_v39, 0.0 }
 0x7ab   : > { %v5045_v56 = vadd.f32 %v4956_v34, %v4885_v51 }
 0x7ac   : > { %v4984_v48 = vpop.permute.xlu2 %4983 }
 0x7ad   : > { %v5059_v19 = vadd.f32 %v4984_v48, %v4899_v23  ;;  %5078 = vst.msk [vmem:[%s5483_s21 + $0x30] sm:$0xff] %vm5071_vm5, %v5045_v56  ;;  %v4854_v5 = vpop.f32.mrf.mxu2 }
 0x7ae   : > { %v4901_v43 = vmax.f32 %v4854_v5, 0.0 }
 0x7af   : > { %5092 = vst.msk [vmem:[%s5483_s21 + $0xa0] sm:$0xff] %vm5071_vm5, %v5059_v19 }
 0x7b0   : > { %v4816_v42 = vpop.f32.mrf.mxu1 }
 0x7b1   : > { %v4976_v49 = vpop.permute.xlu1 %4975  ;;  %v4980_v38 = vpop.permute.xlu0 %4979  ;;  %v4886_v53 = vmax.f32 %v4816_v42, 0.0 }
 0x7b2   : > { %v5055_v10 = vadd.f32 %v4976_v49, %v4895_v30  ;;  %v5057_v50 = vadd.f32 %v4980_v38, %v4897_v52 }
 0x7b3   : > { %v5046_v57 = vadd.f32 %v4958_v32, %v4886_v53 }
 0x7b4   : > { %5088 = vst.msk [vmem:[%s5483_s21 + $0x80] sm:$0xff] %vm5071_vm5, %v5055_v10  ;;  %v4990_v12 = vpop.permute.xlu2 %4989 }
 0x7b5   : > { %5090 = vst.msk [vmem:[%s5483_s21 + $0x90] sm:$0xff] %vm5071_vm5, %v5057_v50  ;;  %v4856_v20 = vpop.f32.mrf.mxu2 }
 0x7b6   : > { %5079 = vst.msk [vmem:[%s5483_s21 + $0x38] sm:$0xff] %vm5071_vm5, %v5046_v57  ;;  %v4902_v7 = vmax.f32 %v4856_v20, 0.0 }
 0x7b8   : > { %v5062_v44 = vadd.f32 %v4990_v12, %v4902_v7 }
 0x7b9   : > { %v4982_v36 = vpop.permute.xlu1 %4981  ;;  %v4986_v63 = vpop.permute.xlu0 %4985 }
 0x7ba   : > { %v5058_v62 = vadd.f32 %v4982_v36, %v4898_v60  ;;  %5095 = vst.msk [vmem:[%s5483_s21 + $0xb8] sm:$0xff] %vm5071_vm5, %v5062_v44  ;;  %v5060_v15 = vadd.f32 %v4986_v63, %v4900_v14 }
 0x7bc   : > { %5091 = vst.msk [vmem:[%s5483_s21 + $0x98] sm:$0xff] %vm5071_vm5, %v5058_v62 }
 0x7bd   : > { %5093 = vst.msk [vmem:[%s5483_s21 + $0xa8] sm:$0xff] %vm5071_vm5, %v5060_v15 }
 0x7c1   : > { %v4988_v4 = vpop.permute.xlu1 %4987  ;;  %v4992_v18 = vpop.permute.xlu0 %4991 }
 0x7c2   : > { %v5061_v3 = vadd.f32 %v4988_v4, %v4901_v43 }
 0x7c4   : > { %5094 = vst.msk [vmem:[%s5483_s21 + $0xb0] sm:$0xff] %vm5071_vm5, %v5061_v3 }
 0x7c6   : > { %v4859_v21 = vpop.f32.mrf.mxu2 }
 0x7c7   : > { %v4903_v41 = vmax.f32 %v4859_v21, 0.0 }
 0x7c8   : > { %v4819_v29 = vpop.f32.mrf.mxu1 }
 0x7c9   : > { %v5063_v6 = vadd.f32 %v4992_v18, %v4903_v41  ;;  %v4887_v45 = vmax.f32 %v4819_v29, 0.0  ;;  %v4994_v28 = vpop.permute.xlu1 %4993  ;;  %v4998_v40 = vpop.permute.xlu0 %4997 }
 0x7cb   : > { %5096 = vst.msk [vmem:[%s5483_s21 + $0xc0] sm:$0xff] %vm5071_vm5, %v5063_v6  ;;  %v5047_v26 = vadd.f32 %v9129_v54, %v4887_v45  ;;  %v4996_v54 = vpop.permute.xlu2 %4995 }
 0x7cd   : > { %5080 = vst.msk [vmem:[%s5483_s21 + $0x40] sm:$0xff] %vm5071_vm5, %v5047_v26 }
 0x7ce   : > { %v4861_v8 = vpop.f32.mrf.mxu2 }
 0x7cf   : > { %v4904_v58 = vmax.f32 %v4861_v8, 0.0 }
 0x7d0   : > { %v4821_v13 = vpop.f32.mrf.mxu1 }
 0x7d1   : > { %v5064_v9 = vadd.f32 %v4994_v28, %v4904_v58  ;;  %v4888_v37 = vmax.f32 %v4821_v13, 0.0  ;;  %v5000_v39 = vpop.permute.xlu1 %4999 }
 0x7d3   : > { %5097 = vst.msk [vmem:[%s5483_s21 + $0xc8] sm:$0xff] %vm5071_vm5, %v5064_v9  ;;  %v5048_v34 = vadd.f32 %v9139_v31, %v4888_v37 }
 0x7d5   : > { %5081 = vst.msk [vmem:[%s5483_s21 + $0x48] sm:$0xff] %vm5071_vm5, %v5048_v34 }
 0x7d9   : > { %v5006_v12 = vpop.permute.xlu1 %5005 }
 0x7e0   : > { %v4864_v27 = vpop.f32.mrf.mxu2 }
 0x7e1   : > { %v4905_v11 = vmax.f32 %v4864_v27, 0.0 }
 0x7e3   : > { %v5065_v32 = vadd.f32 %v4996_v54, %v4905_v11 }
 0x7e5   : > { %5098 = vst.msk [vmem:[%s5483_s21 + $0xd0] sm:$0xff] %vm5071_vm5, %v5065_v32 }
 0x7e7   : > { %v4824_v25 = vpop.f32.mrf.mxu1 }
 0x7e8   : > { %v4866_v17 = vpop.f32.mrf.mxu2  ;;  %v4889_v35 = vmax.f32 %v4824_v25, 0.0 }
 0x7e9   : > { %v4906_v46 = vmax.f32 %v4866_v17, 0.0 }
 0x7ea   : > { %v5049_v59 = vadd.f32 %v9145_v61, %v4889_v35 }
 0x7eb   : > { %v5066_v22 = vadd.f32 %v4998_v40, %v4906_v46 }
 0x7ec   : > { %5082 = vst.msk [vmem:[%s5483_s21 + $0x50] sm:$0xff] %vm5071_vm5, %v5049_v59 }
 0x7ed   : > { %5099 = vst.msk [vmem:[%s5483_s21 + $0xd8] sm:$0xff] %vm5071_vm5, %v5066_v22 }
 0x7ef   : > { %v4826_v31 = vpop.f32.mrf.mxu1 }
 0x7f0   : > { %v4890_v55 = vmax.f32 %v4826_v31, 0.0 }
 0x7f2   : > { %v5050_v0 = vadd.f32 %v9136_v16, %v4890_v55  ;;  %v5002_v16 = vpop.permute.xlu2 %5001 }
 0x7f4   : > { %5083 = vst.msk [vmem:[%s5483_s21 + $0x58] sm:$0xff] %vm5071_vm5, %v5050_v0 }
 0x7fd   : > { %v4869_v24 = vpop.f32.mrf.mxu2 }
 0x7fe   : > { %v4907_v23 = vmax.f32 %v4869_v24, 0.0 }
 0x7ff   : > { %v4829_v48 = vpop.f32.mrf.mxu1 }
 0x800   : > { %v5067_v51 = vadd.f32 %v5000_v39, %v4907_v23  ;;  %v4891_v61 = vmax.f32 %v4829_v48, 0.0 }
 0x802   : > { %5100 = vst.msk [vmem:[%s5483_s21 + $0xe0] sm:$0xff] %vm5071_vm5, %v5067_v51  ;;  %v5051_v19 = vadd.f32 %v9147_v47, %v4891_v61  ;;  %v5004_v47 = vpop.permute.xlu0 %5003 }
 0x804   : > { %5084 = vst.msk [vmem:[%s5483_s21 + $0x60] sm:$0xff] %vm5071_vm5, %v5051_v19 }
 0x805   : > { %v4871_v56 = vpop.f32.mrf.mxu2 }
 0x806   : > { %v4908_v5 = vmax.f32 %v4871_v56, 0.0 }
 0x807   : > { %v4831_v30 = vpop.f32.mrf.mxu1 }
 0x808   : > { %v5068_v52 = vadd.f32 %v5002_v16, %v4908_v5  ;;  %v4892_v49 = vmax.f32 %v4831_v30, 0.0 }
 0x80a   : > { %5101 = vst.msk [vmem:[%s5483_s21 + $0xe8] sm:$0xff] %vm5071_vm5, %v5068_v52  ;;  %v5052_v42 = vadd.f32 %v9153_v2, %v4892_v49 }
 0x80c   : > { %5085 = vst.msk [vmem:[%s5483_s21 + $0x68] sm:$0xff] %vm5071_vm5, %v5052_v42 }
 0x80d   : > { %v4874_v10 = vpop.f32.mrf.mxu2 }
 0x80e   : > { %v4909_v38 = vmax.f32 %v4874_v10, 0.0 }
 0x80f   : > { %v4834_v53 = vpop.f32.mrf.mxu1 }
 0x810   : > { %v5069_v50 = vadd.f32 %v5004_v47, %v4909_v38  ;;  %v4893_v57 = vmax.f32 %v4834_v53, 0.0 }
 0x812   : > { %5102 = vst.msk [vmem:[%s5483_s21 + $0xf0] sm:$0xff] %vm5071_vm5, %v5069_v50  ;;  %v5053_v20 = vadd.f32 %v9141_v1, %v4893_v57 }
 0x814   : > { %5086 = vst.msk [vmem:[%s5483_s21 + $0x70] sm:$0xff] %vm5071_vm5, %v5053_v20 }
 0x815   : > { %v4876_v7 = vpop.f32.mrf.mxu2 }
 0x816   : > { %v4910_v60 = vmax.f32 %v4876_v7, 0.0 }
 0x817   : > { %v4836_v2 = vpop.f32.mrf.mxu1 }
 0x818   : > { %v5070_v14 = vadd.f32 %v5006_v12, %v4910_v60  ;;  %v4894_v44 = vmax.f32 %v4836_v2, 0.0 }
 0x81a   : > { %5103 = vst.msk [vmem:[%s5483_s21 + $0xf8] sm:$0xff] %vm5071_vm5, %v5070_v14  ;;  %v5054_v36 = vadd.f32 %v9155_v33, %v4894_v44 }
 0x81c   : > { %5087 = vst.msk [vmem:[%s5483_s21 + $0x78] sm:$0xff] %vm5071_vm5, %v5054_v36 }
 0x81d PF: > { %s13_s12 = sadd.s32 1, %s5431_s12  }
 0x81e   : > { %p10_p5 = scmp.ge.s32.totalorder %s13_s12, 4  }
 0x820   :  { %12 = sbr.rel (!%p10_p5) target bundleno = 1 (0x1), region = 70 }

</bundles_post_ra>
